<compile_context>
chip_gen: v7x
topology: tpu7x:2x2x1
jax: 0.10.0
libtpu: 0.0.40
codegen_flags: <defaults>
</compile_context>

<pallas_src>
import functools

import numpy as np
import jax
import jax.numpy as jnp
from jax import lax
from jax.experimental import pallas as pl
from jax.experimental.pallas import tpu as pltpu


# ----------------------------------------------------------------------------
# Fused whole-forward Pallas kernel
# ----------------------------------------------------------------------------
def make_transformer_kernel(n_layers, d_k, d_v):
    """Builds the fused transformer-forward kernel (weights arrive pre-transposed)."""
    assert d_k == d_v, "reference attention math requires d_k == d_v"
    scale = np.float32(1.0 / np.sqrt(d_k))

    def proj_t(w_ref, b_ref, xT):
        # (n_out, d_model) @ (d_model, S) + (n_out, 1)   -- plain NN contraction.
        return jnp.dot(w_ref[...], xT, preferred_element_type=jnp.float32) + b_ref[...]

    def attention_t(qT, kT, vT, wo_ref, bo_ref):
        # qT, kT: (d_k, S_qk); vT: (d_v, S_v)  (all in transposed layout).
        # scores = q^T k / sqrt(d_k)  -> contract over the sequence axis (NT).
        s = lax.dot_general(qT, kT, (((1,), (1,)), ((), ())),
                            preferred_element_type=jnp.float32) * scale
        m = jnp.max(s, axis=-1, keepdims=True)
        e = jnp.exp(s - m)
        # EUP approximate reciprocal instead of a VALU divide.
        a = e * pl.reciprocal(jnp.sum(e, axis=-1, keepdims=True), approx=True)
        # head^T = A @ v^T                       -> (d_k, S_v)
        headT = jnp.dot(a, vT, preferred_element_type=jnp.float32)
        # out^T = Wo^T @ head^T + bo             -> (d_model, S_v)
        return jnp.dot(wo_ref[...], headT, preferred_element_type=jnp.float32) + bo_ref[...]

    def self_attn_t(xT, wqkv_ref, bqkv_ref, wo_ref, bo_ref):
        p = proj_t(wqkv_ref, bqkv_ref, xT)          # (2*d_k + d_v, S), fused q|k|v
        return attention_t(p[:d_k], p[d_k:2 * d_k], p[2 * d_k:], wo_ref, bo_ref)

    def cross_attn_t(y_decT, x_encT, wqk_ref, bqk_ref, wv_ref, bv_ref, wo_ref, bo_ref):
        # Reference `from_encoder` attention: q, k from the encoder output,
        # v from the decoder stream.
        p = proj_t(wqk_ref, bqk_ref, x_encT)        # (2*d_k, S_enc)
        vT = proj_t(wv_ref, bv_ref, y_decT)         # (d_v, S_dec)
        return attention_t(p[:d_k], p[d_k:2 * d_k], vT, wo_ref, bo_ref)

    def ffn_t(xT, w1_ref, b1_ref, w2_ref, b2_ref):
        h = jnp.maximum(proj_t(w1_ref, b1_ref, xT), 0.0)
        return proj_t(w2_ref, b2_ref, h)

    def add_ln_t(xT, rT, g_ref, b_ref):
        # LayerNorm(x + r) over the d_model axis (axis 0 in transposed layout),
        # eps = 1e-5, biased variance -- matches torch.nn.LayerNorm.
        z = xT + rT
        mu = jnp.mean(z, axis=0, keepdims=True)
        var = jnp.mean((z - mu) ** 2, axis=0, keepdims=True)
        return (z - mu) * lax.rsqrt(var + 1e-5) * g_ref[...] + b_ref[...]

    def kernel(x_ref, y_ref, pex_ref, pey_ref,
               # encoder layer
               e_qkv, e_bqkv, e_wo, e_bo, e_g1, e_b1,
               e_w1, e_fb1, e_w2, e_fb2, e_g2, e_b2,
               # decoder self ("masked") attention + LN1
               ds_qkv, ds_bqkv, ds_wo, ds_bo, d_g1, d_b1,
               # decoder cross attention + LN2
               dx_qk, dx_bqk, dx_wv, dx_bv, dx_wo, dx_bo, d_g2, d_b2,
               # decoder feed-forward + LN3
               d_w1, d_fb1, d_w2, d_fb2, d_g3, d_b3,
               # final vocab projection (columns zero-padded to a 128 multiple)
               fc_w, fc_b,
               o_ref):
        # Positional encoding, then switch to the transposed (d_model, seq) layout.
        xT = (x_ref[...] + pex_ref[...]).T          # (d_model, S_enc)
        yT = (y_ref[...] + pey_ref[...]).T          # (d_model, S_dec)

        # n_layers iterations of the SAME shared encoder/decoder layer weights,
        # unrolled at trace time (exactly like the reference module).
        for _ in range(n_layers):
            # ---- encoder layer ----
            a = self_attn_t(xT, e_qkv, e_bqkv, e_wo, e_bo)
            xT = add_ln_t(xT, a, e_g1, e_b1)
            f = ffn_t(xT, e_w1, e_fb1, e_w2, e_fb2)
            xT = add_ln_t(xT, f, e_g2, e_b2)
            # ---- decoder layer ----
            a = self_attn_t(yT, ds_qkv, ds_bqkv, ds_wo, ds_bo)  # mask is a no-op in the reference
            yT = add_ln_t(yT, a, d_g1, d_b1)
            a = cross_attn_t(yT, xT, dx_qk, dx_bqk, dx_wv, dx_bv, dx_wo, dx_bo)
            yT = add_ln_t(yT, a, d_g2, d_b2)
            f = ffn_t(yT, d_w1, d_fb1, d_w2, d_fb2)
            yT = add_ln_t(yT, f, d_g3, d_b3)

        # Final vocabulary projection; stored lane-dense (S_dec, vocab_pad).
        logitsT = jnp.dot(fc_w[...], yT, preferred_element_type=jnp.float32) + fc_b[...]
        o_ref[...] = logitsT.T

    return kernel


# ----------------------------------------------------------------------------
# Parameter packing (canonical params -> transposed / fused kernel operands)
# ----------------------------------------------------------------------------
def _pack_kernel_inputs(x, y, params, vocab_pad):
    """Flattens the canonical parameter dict into the kernel operand order.

    Weights are pre-transposed (constant-folded under jit) so every in-kernel
    matmul is a plain NN/NT contraction; q|k|v are fused column-wise; the vocab
    projection is zero-padded to a lane-dense width.
    """
    pe = params["pe"]
    enc, dec = params["enc"], params["dec"]

    def self_attn(p):
        w = jnp.concatenate([p["wq"], p["wk"], p["wv"]], axis=1)   # (D, 2dk+dv)
        b = jnp.concatenate([p["bq"], p["bk"], p["bv"]], axis=1)   # (1, 2dk+dv)
        return (w.T, b.T, p["wh"].T, p["bh"].T)

    def cross_attn(p):
        w = jnp.concatenate([p["wq"], p["wk"]], axis=1)            # (D, 2dk)
        b = jnp.concatenate([p["bq"], p["bk"]], axis=1)            # (1, 2dk)
        return (w.T, b.T, p["wv"].T, p["bv"].T, p["wh"].T, p["bh"].T)

    def ffn(p):
        return (p["w1"].T, p["b1"].T, p["w2"].T, p["b2"].T)

    def ln(g, b):
        return (g.T, b.T)

    pad = vocab_pad - params["fc_w"].shape[1]
    fc_w = jnp.pad(params["fc_w"], ((0, 0), (0, pad)))
    fc_b = jnp.pad(params["fc_b"], ((0, 0), (0, pad)))

    return (
        (x, y, pe[: x.shape[0]], pe[: y.shape[0]])
        + self_attn(enc["attn"]) + ln(enc["ln1_g"], enc["ln1_b"])
        + ffn(enc["ff"]) + ln(enc["ln2_g"], enc["ln2_b"])
        + self_attn(dec["masked_attn"]) + ln(dec["ln1_g"], dec["ln1_b"])
        + cross_attn(dec["attn"]) + ln(dec["ln2_g"], dec["ln2_b"])
        + ffn(dec["ff"]) + ln(dec["ln3_g"], dec["ln3_b"])
        + (fc_w.T, fc_b.T)
    )


def transformer_forward(x, y, params, n_layers):
    d_k = params["enc"]["attn"]["wq"].shape[1]
    d_v = params["enc"]["attn"]["wv"].shape[1]
    vocab = params["fc_w"].shape[1]
    vocab_pad = ((vocab + 127) // 128) * 128        # lane-dense output store

    inputs = _pack_kernel_inputs(x, y, params, vocab_pad)
    vmem = pl.BlockSpec(memory_space=pltpu.MemorySpace.VMEM)  # whole array in VMEM, no grid

    out = pl.pallas_call(
        make_transformer_kernel(n_layers, d_k, d_v),
        out_shape=jax.ShapeDtypeStruct((y.shape[0], vocab_pad), jnp.float32),
        in_specs=[vmem] * len(inputs),
        out_specs=vmem,
    )(*inputs)
    return out[:, :vocab]


# ----------------------------------------------------------------------------
# Deterministic parameter construction (mimics nn.Linear / nn.LayerNorm init)
# ----------------------------------------------------------------------------
def _linear_params(key, fan_in, fan_out):
    kw, kb = jax.random.split(key)
    bound = 1.0 / np.sqrt(fan_in)
    w = jax.random.uniform(kw, (fan_in, fan_out), jnp.float32, -bound, bound)
    b = jax.random.uniform(kb, (1, fan_out), jnp.float32, -bound, bound)
    return w, b


def _mha_params(key, d_model, d_k, d_v):
    ks = jax.random.split(key, 4)
    wq, bq = _linear_params(ks[0], d_model, d_k)
    wk, bk = _linear_params(ks[1], d_model, d_k)
    wv, bv = _linear_params(ks[2], d_model, d_v)
    wh, bh = _linear_params(ks[3], d_v, d_model)
    return dict(wq=wq, bq=bq, wk=wk, bk=bk, wv=wv, bv=bv, wh=wh, bh=bh)


def _ln_params(d_model):
    return jnp.ones((1, d_model), jnp.float32), jnp.zeros((1, d_model), jnp.float32)


def _ff_params(key, d_model, d_ff):
    k1, k2 = jax.random.split(key)
    w1, b1 = _linear_params(k1, d_model, d_ff)
    w2, b2 = _linear_params(k2, d_ff, d_model)
    return dict(w1=w1, b1=b1, w2=w2, b2=b2)


def _position_encoding(max_len, d_model):
    pos = np.arange(max_len, dtype=np.float32)[:, None]
    denom = np.exp(np.arange(0, d_model, 2, dtype=np.float32) * (np.log(10000.0) / d_model))
    pe = np.zeros((max_len, d_model), dtype=np.float32)
    pe[:, 0::2] = np.sin(pos / denom)
    pe[:, 1::2] = np.cos(pos / denom)
    return jnp.asarray(pe)


def init_params(key, vocab_size, d_model, d_k, d_v, d_ff, max_len):
    keys = jax.random.split(key, 8)
    enc = dict(attn=_mha_params(keys[0], d_model, d_k, d_v),
               ff=_ff_params(keys[1], d_model, d_ff))
    enc["ln1_g"], enc["ln1_b"] = _ln_params(d_model)
    enc["ln2_g"], enc["ln2_b"] = _ln_params(d_model)
    dec = dict(masked_attn=_mha_params(keys[2], d_model, d_k, d_v),
               attn=_mha_params(keys[3], d_model, d_k, d_v),
               ff=_ff_params(keys[4], d_model, d_ff))
    dec["ln1_g"], dec["ln1_b"] = _ln_params(d_model)
    dec["ln2_g"], dec["ln2_b"] = _ln_params(d_model)
    dec["ln3_g"], dec["ln3_b"] = _ln_params(d_model)
    fc_w, fc_b = _linear_params(keys[5], d_model, vocab_size)
    return dict(enc=enc, dec=dec, fc_w=fc_w, fc_b=fc_b,
                pe=_position_encoding(max_len, d_model))


# ----------------------------------------------------------------------------
# Pure-JAX reference (numerical sanity check of the fused Pallas kernel)
# ----------------------------------------------------------------------------
def _ref_linear(x, w, b):
    return jnp.dot(x, w, precision=lax.Precision.HIGHEST) + b


def _ref_mha(xqk, xv, p):
    q = _ref_linear(xqk, p["wq"], p["bq"])
    k = _ref_linear(xqk, p["wk"], p["bk"])
    v = _ref_linear(xv, p["wv"], p["bv"])
    s = jnp.dot(q.T, k, precision=lax.Precision.HIGHEST) / np.sqrt(k.shape[-1])
    a = jax.nn.softmax(s, axis=-1)
    head = jnp.dot(a, v.T, precision=lax.Precision.HIGHEST).T
    return _ref_linear(head, p["wh"], p["bh"])


def _ref_ln(z, g, b):
    mu = jnp.mean(z, -1, keepdims=True)
    var = jnp.mean((z - mu) ** 2, -1, keepdims=True)
    return (z - mu) / jnp.sqrt(var + 1e-5) * g + b


def _ref_ffn(x, p):
    return _ref_linear(jax.nn.relu(_ref_linear(x, p["w1"], p["b1"])), p["w2"], p["b2"])


def reference_forward(x, y, params, n_layers):
    pe = params["pe"]
    x = x + pe[: x.shape[0]]
    y = y + pe[: y.shape[0]]
    for _ in range(n_layers):
        p = params["enc"]
        x = _ref_ln(x + _ref_mha(x, x, p["attn"]), p["ln1_g"], p["ln1_b"])
        x = _ref_ln(x + _ref_ffn(x, p["ff"]), p["ln2_g"], p["ln2_b"])
        p = params["dec"]
        y = _ref_ln(y + _ref_mha(y, y, p["masked_attn"]), p["ln1_g"], p["ln1_b"])
        y = _ref_ln(y + _ref_mha(x, y, p["attn"]), p["ln2_g"], p["ln2_b"])
        y = _ref_ln(y + _ref_ffn(y, p["ff"]), p["ln3_g"], p["ln3_b"])
    return _ref_linear(y, params["fc_w"], params["fc_b"])


# ----------------------------------------------------------------------------
if __name__ == "__main__":
    D_MODEL, D_K, D_V, D_FF = 64, 16, 16, 128
    VOCAB, N_LAYERS, MAX_LEN = 32, 2, 128
    S_ENC, S_DEC = 8, 16

    root = jax.random.PRNGKey(0)
    kp, kx, ky = jax.random.split(root, 3)
    params = init_params(kp, VOCAB, D_MODEL, D_K, D_V, D_FF, MAX_LEN)

    x = jax.random.normal(kx, (S_ENC, D_MODEL), jnp.float32)  # encoder input (seq, d_model)
    y = jax.random.normal(ky, (S_DEC, D_MODEL), jnp.float32)  # decoder input (seq, d_model)

    fwd = jax.jit(functools.partial(transformer_forward, params=params, n_layers=N_LAYERS))
    out = fwd(x, y)
    jax.block_until_ready(out)

    ref = reference_forward(x, y, params, N_LAYERS)
    np.testing.assert_allclose(np.asarray(out), np.asarray(ref), rtol=2e-2, atol=2e-2)
    assert out.shape == (S_DEC, VOCAB) and out.dtype == jnp.float32

    print("KERNEL_OK")
</pallas_src>

<mosaic_0001>
module attributes {stable_mosaic.version = 11 : i64} {
  func.func @kernel(%arg0: memref<8x64xf32, #tpu.memory_space<vmem>>, %arg1: memref<16x64xf32, #tpu.memory_space<vmem>>, %arg2: memref<8x64xf32, #tpu.memory_space<vmem>>, %arg3: memref<16x64xf32, #tpu.memory_space<vmem>>, %arg4: memref<48x64xf32, #tpu.memory_space<vmem>>, %arg5: memref<48x1xf32, #tpu.memory_space<vmem>>, %arg6: memref<64x16xf32, #tpu.memory_space<vmem>>, %arg7: memref<64x1xf32, #tpu.memory_space<vmem>>, %arg8: memref<64x1xf32, #tpu.memory_space<vmem>>, %arg9: memref<64x1xf32, #tpu.memory_space<vmem>>, %arg10: memref<128x64xf32, #tpu.memory_space<vmem>>, %arg11: memref<128x1xf32, #tpu.memory_space<vmem>>, %arg12: memref<64x128xf32, #tpu.memory_space<vmem>>, %arg13: memref<64x1xf32, #tpu.memory_space<vmem>>, %arg14: memref<64x1xf32, #tpu.memory_space<vmem>>, %arg15: memref<64x1xf32, #tpu.memory_space<vmem>>, %arg16: memref<48x64xf32, #tpu.memory_space<vmem>>, %arg17: memref<48x1xf32, #tpu.memory_space<vmem>>, %arg18: memref<64x16xf32, #tpu.memory_space<vmem>>, %arg19: memref<64x1xf32, #tpu.memory_space<vmem>>, %arg20: memref<64x1xf32, #tpu.memory_space<vmem>>, %arg21: memref<64x1xf32, #tpu.memory_space<vmem>>, %arg22: memref<32x64xf32, #tpu.memory_space<vmem>>, %arg23: memref<32x1xf32, #tpu.memory_space<vmem>>, %arg24: memref<16x64xf32, #tpu.memory_space<vmem>>, %arg25: memref<16x1xf32, #tpu.memory_space<vmem>>, %arg26: memref<64x16xf32, #tpu.memory_space<vmem>>, %arg27: memref<64x1xf32, #tpu.memory_space<vmem>>, %arg28: memref<64x1xf32, #tpu.memory_space<vmem>>, %arg29: memref<64x1xf32, #tpu.memory_space<vmem>>, %arg30: memref<128x64xf32, #tpu.memory_space<vmem>>, %arg31: memref<128x1xf32, #tpu.memory_space<vmem>>, %arg32: memref<64x128xf32, #tpu.memory_space<vmem>>, %arg33: memref<64x1xf32, #tpu.memory_space<vmem>>, %arg34: memref<64x1xf32, #tpu.memory_space<vmem>>, %arg35: memref<64x1xf32, #tpu.memory_space<vmem>>, %arg36: memref<128x64xf32, #tpu.memory_space<vmem>>, %arg37: memref<128x1xf32, #tpu.memory_space<vmem>>, %arg38: memref<16x128xf32, #tpu.memory_space<vmem>>) attributes {dimension_semantics = [], scalar_prefetch = 0 : i64, scratch_operands = 0 : i64, tpu.core_type = #tpu.core_type<tc>} {
    %c0 = arith.constant 0 : index
    %c0_0 = arith.constant 0 : index
    %0 = vector.load %arg0[%c0, %c0_0] : memref<8x64xf32, #tpu.memory_space<vmem>>, vector<8x64xf32>
    %c0_1 = arith.constant 0 : index
    %c0_2 = arith.constant 0 : index
    %1 = vector.load %arg2[%c0_1, %c0_2] : memref<8x64xf32, #tpu.memory_space<vmem>>, vector<8x64xf32>
    %2 = arith.addf %0, %1 : vector<8x64xf32>
    %3 = tpu.transpose %2, [1, 0] : vector<8x64xf32> -> vector<64x8xf32>
    %c0_3 = arith.constant 0 : index
    %c0_4 = arith.constant 0 : index
    %4 = vector.load %arg1[%c0_3, %c0_4] : memref<16x64xf32, #tpu.memory_space<vmem>>, vector<16x64xf32>
    %c0_5 = arith.constant 0 : index
    %c0_6 = arith.constant 0 : index
    %5 = vector.load %arg3[%c0_5, %c0_6] : memref<16x64xf32, #tpu.memory_space<vmem>>, vector<16x64xf32>
    %6 = arith.addf %4, %5 : vector<16x64xf32>
    %7 = tpu.transpose %6, [1, 0] : vector<16x64xf32> -> vector<64x16xf32>
    %c0_7 = arith.constant 0 : index
    %c0_8 = arith.constant 0 : index
    %8 = vector.load %arg4[%c0_7, %c0_8] : memref<48x64xf32, #tpu.memory_space<vmem>>, vector<48x64xf32>
    %cst = arith.constant dense<0.000000e+00> : vector<48x8xf32>
    %9 = tpu.matmul %8, %3, %cst {dimension_numbers = #tpu.dot_dimension_numbers<[1], [0], [0], [1], [0, 0, 1, 1], [], []>} : vector<48x64xf32>, vector<64x8xf32>, vector<48x8xf32> -> vector<48x8xf32>
    %c0_9 = arith.constant 0 : index
    %c0_10 = arith.constant 0 : index
    %10 = vector.load %arg5[%c0_9, %c0_10] : memref<48x1xf32, #tpu.memory_space<vmem>>, vector<48x1xf32>
    %11 = vector.broadcast %10 : vector<48x1xf32> to vector<48x8xf32>
    %12 = arith.addf %9, %11 : vector<48x8xf32>
    %13 = vector.extract_strided_slice %12 {offsets = [0, 0], sizes = [16, 8], strides = [1, 1]} : vector<48x8xf32> to vector<16x8xf32>
    %14 = vector.extract_strided_slice %12 {offsets = [16, 0], sizes = [16, 8], strides = [1, 1]} : vector<48x8xf32> to vector<16x8xf32>
    %15 = vector.extract_strided_slice %12 {offsets = [32, 0], sizes = [16, 8], strides = [1, 1]} : vector<48x8xf32> to vector<16x8xf32>
    %cst_11 = arith.constant dense<0.000000e+00> : vector<16x16xf32>
    %16 = tpu.matmul %13, %14, %cst_11 {dimension_numbers = #tpu.dot_dimension_numbers<[1], [1], [0], [0], [0, 0, 1, 0], [], []>} : vector<16x8xf32>, vector<16x8xf32>, vector<16x16xf32> -> vector<16x16xf32>
    %cst_12 = arith.constant 2.500000e-01 : f32
    %17 = vector.broadcast %cst_12 : f32 to vector<16x16xf32>
    %18 = arith.mulf %16, %17 : vector<16x16xf32>
    %cst_13 = arith.constant dense<0xFF800000> : vector<16xf32>
    %19 = vector.multi_reduction <maximumf>, %18, %cst_13 [1] : vector<16x16xf32> to vector<16xf32>
    %20 = vector.shape_cast %19 : vector<16xf32> to vector<16x1xf32>
    %21 = vector.broadcast %20 : vector<16x1xf32> to vector<16x16xf32>
    %22 = arith.subf %18, %21 : vector<16x16xf32>
    %23 = math.exp %22 : vector<16x16xf32>
    %cst_14 = arith.constant dense<0.000000e+00> : vector<16xf32>
    %24 = vector.multi_reduction <add>, %23, %cst_14 [1] : vector<16x16xf32> to vector<16xf32>
    %25 = vector.shape_cast %24 : vector<16xf32> to vector<16x1xf32>
    %26 = tpu.reciprocal %25 {approx = true} : vector<16x1xf32> -> vector<16x1xf32>
    %27 = vector.broadcast %26 : vector<16x1xf32> to vector<16x16xf32>
    %28 = arith.mulf %23, %27 : vector<16x16xf32>
    %cst_15 = arith.constant dense<0.000000e+00> : vector<16x8xf32>
    %29 = tpu.matmul %28, %15, %cst_15 {dimension_numbers = #tpu.dot_dimension_numbers<[1], [0], [0], [1], [0, 0, 1, 1], [], []>} : vector<16x16xf32>, vector<16x8xf32>, vector<16x8xf32> -> vector<16x8xf32>
    %c0_16 = arith.constant 0 : index
    %c0_17 = arith.constant 0 : index
    %30 = vector.load %arg6[%c0_16, %c0_17] : memref<64x16xf32, #tpu.memory_space<vmem>>, vector<64x16xf32>
    %cst_18 = arith.constant dense<0.000000e+00> : vector<64x8xf32>
    %31 = tpu.matmul %30, %29, %cst_18 {dimension_numbers = #tpu.dot_dimension_numbers<[1], [0], [0], [1], [0, 0, 1, 1], [], []>} : vector<64x16xf32>, vector<16x8xf32>, vector<64x8xf32> -> vector<64x8xf32>
    %c0_19 = arith.constant 0 : index
    %c0_20 = arith.constant 0 : index
    %32 = vector.load %arg7[%c0_19, %c0_20] : memref<64x1xf32, #tpu.memory_space<vmem>>, vector<64x1xf32>
    %33 = vector.broadcast %32 : vector<64x1xf32> to vector<64x8xf32>
    %34 = arith.addf %31, %33 : vector<64x8xf32>
    %35 = arith.addf %3, %34 : vector<64x8xf32>
    %cst_21 = arith.constant dense<0.000000e+00> : vector<8xf32>
    %36 = vector.multi_reduction <add>, %35, %cst_21 [0] : vector<64x8xf32> to vector<8xf32>
    %37 = vector.shape_cast %36 : vector<8xf32> to vector<1x8xf32>
    %cst_22 = arith.constant 6.400000e+01 : f32
    %38 = vector.broadcast %cst_22 : f32 to vector<1x8xf32>
    %39 = arith.divf %37, %38 : vector<1x8xf32>
    %40 = vector.broadcast %39 : vector<1x8xf32> to vector<64x8xf32>
    %41 = arith.subf %35, %40 : vector<64x8xf32>
    %42 = arith.mulf %41, %41 : vector<64x8xf32>
    %cst_23 = arith.constant dense<0.000000e+00> : vector<8xf32>
    %43 = vector.multi_reduction <add>, %42, %cst_23 [0] : vector<64x8xf32> to vector<8xf32>
    %44 = vector.shape_cast %43 : vector<8xf32> to vector<1x8xf32>
    %cst_24 = arith.constant 6.400000e+01 : f32
    %45 = vector.broadcast %cst_24 : f32 to vector<1x8xf32>
    %46 = arith.divf %44, %45 : vector<1x8xf32>
    %47 = vector.broadcast %39 : vector<1x8xf32> to vector<64x8xf32>
    %48 = arith.subf %35, %47 : vector<64x8xf32>
    %cst_25 = arith.constant 9.99999974E-6 : f32
    %49 = vector.broadcast %cst_25 : f32 to vector<1x8xf32>
    %50 = arith.addf %46, %49 : vector<1x8xf32>
    %51 = math.rsqrt %50 : vector<1x8xf32>
    %52 = vector.broadcast %51 : vector<1x8xf32> to vector<64x8xf32>
    %53 = arith.mulf %48, %52 : vector<64x8xf32>
    %c0_26 = arith.constant 0 : index
    %c0_27 = arith.constant 0 : index
    %54 = vector.load %arg8[%c0_26, %c0_27] : memref<64x1xf32, #tpu.memory_space<vmem>>, vector<64x1xf32>
    %55 = vector.broadcast %54 : vector<64x1xf32> to vector<64x8xf32>
    %56 = arith.mulf %53, %55 : vector<64x8xf32>
    %c0_28 = arith.constant 0 : index
    %c0_29 = arith.constant 0 : index
    %57 = vector.load %arg9[%c0_28, %c0_29] : memref<64x1xf32, #tpu.memory_space<vmem>>, vector<64x1xf32>
    %58 = vector.broadcast %57 : vector<64x1xf32> to vector<64x8xf32>
    %59 = arith.addf %56, %58 : vector<64x8xf32>
    %c0_30 = arith.constant 0 : index
    %c0_31 = arith.constant 0 : index
    %60 = vector.load %arg10[%c0_30, %c0_31] : memref<128x64xf32, #tpu.memory_space<vmem>>, vector<128x64xf32>
    %cst_32 = arith.constant dense<0.000000e+00> : vector<128x8xf32>
    %61 = tpu.matmul %60, %59, %cst_32 {dimension_numbers = #tpu.dot_dimension_numbers<[1], [0], [0], [1], [0, 0, 1, 1], [], []>} : vector<128x64xf32>, vector<64x8xf32>, vector<128x8xf32> -> vector<128x8xf32>
    %c0_33 = arith.constant 0 : index
    %c0_34 = arith.constant 0 : index
    %62 = vector.load %arg11[%c0_33, %c0_34] : memref<128x1xf32, #tpu.memory_space<vmem>>, vector<128x1xf32>
    %63 = vector.broadcast %62 : vector<128x1xf32> to vector<128x8xf32>
    %64 = arith.addf %61, %63 : vector<128x8xf32>
    %cst_35 = arith.constant 0.000000e+00 : f32
    %65 = vector.broadcast %cst_35 : f32 to vector<128x8xf32>
    %66 = arith.maximumf %64, %65 : vector<128x8xf32>
    %c0_36 = arith.constant 0 : index
    %c0_37 = arith.constant 0 : index
    %67 = vector.load %arg12[%c0_36, %c0_37] : memref<64x128xf32, #tpu.memory_space<vmem>>, vector<64x128xf32>
    %cst_38 = arith.constant dense<0.000000e+00> : vector<64x8xf32>
    %68 = tpu.matmul %67, %66, %cst_38 {dimension_numbers = #tpu.dot_dimension_numbers<[1], [0], [0], [1], [0, 0, 1, 1], [], []>} : vector<64x128xf32>, vector<128x8xf32>, vector<64x8xf32> -> vector<64x8xf32>
    %c0_39 = arith.constant 0 : index
    %c0_40 = arith.constant 0 : index
    %69 = vector.load %arg13[%c0_39, %c0_40] : memref<64x1xf32, #tpu.memory_space<vmem>>, vector<64x1xf32>
    %70 = vector.broadcast %69 : vector<64x1xf32> to vector<64x8xf32>
    %71 = arith.addf %68, %70 : vector<64x8xf32>
    %72 = arith.addf %59, %71 : vector<64x8xf32>
    %cst_41 = arith.constant dense<0.000000e+00> : vector<8xf32>
    %73 = vector.multi_reduction <add>, %72, %cst_41 [0] : vector<64x8xf32> to vector<8xf32>
    %74 = vector.shape_cast %73 : vector<8xf32> to vector<1x8xf32>
    %cst_42 = arith.constant 6.400000e+01 : f32
    %75 = vector.broadcast %cst_42 : f32 to vector<1x8xf32>
    %76 = arith.divf %74, %75 : vector<1x8xf32>
    %77 = vector.broadcast %76 : vector<1x8xf32> to vector<64x8xf32>
    %78 = arith.subf %72, %77 : vector<64x8xf32>
    %79 = arith.mulf %78, %78 : vector<64x8xf32>
    %cst_43 = arith.constant dense<0.000000e+00> : vector<8xf32>
    %80 = vector.multi_reduction <add>, %79, %cst_43 [0] : vector<64x8xf32> to vector<8xf32>
    %81 = vector.shape_cast %80 : vector<8xf32> to vector<1x8xf32>
    %cst_44 = arith.constant 6.400000e+01 : f32
    %82 = vector.broadcast %cst_44 : f32 to vector<1x8xf32>
    %83 = arith.divf %81, %82 : vector<1x8xf32>
    %84 = vector.broadcast %76 : vector<1x8xf32> to vector<64x8xf32>
    %85 = arith.subf %72, %84 : vector<64x8xf32>
    %cst_45 = arith.constant 9.99999974E-6 : f32
    %86 = vector.broadcast %cst_45 : f32 to vector<1x8xf32>
    %87 = arith.addf %83, %86 : vector<1x8xf32>
    %88 = math.rsqrt %87 : vector<1x8xf32>
    %89 = vector.broadcast %88 : vector<1x8xf32> to vector<64x8xf32>
    %90 = arith.mulf %85, %89 : vector<64x8xf32>
    %c0_46 = arith.constant 0 : index
    %c0_47 = arith.constant 0 : index
    %91 = vector.load %arg14[%c0_46, %c0_47] : memref<64x1xf32, #tpu.memory_space<vmem>>, vector<64x1xf32>
    %92 = vector.broadcast %91 : vector<64x1xf32> to vector<64x8xf32>
    %93 = arith.mulf %90, %92 : vector<64x8xf32>
    %c0_48 = arith.constant 0 : index
    %c0_49 = arith.constant 0 : index
    %94 = vector.load %arg15[%c0_48, %c0_49] : memref<64x1xf32, #tpu.memory_space<vmem>>, vector<64x1xf32>
    %95 = vector.broadcast %94 : vector<64x1xf32> to vector<64x8xf32>
    %96 = arith.addf %93, %95 : vector<64x8xf32>
    %c0_50 = arith.constant 0 : index
    %c0_51 = arith.constant 0 : index
    %97 = vector.load %arg16[%c0_50, %c0_51] : memref<48x64xf32, #tpu.memory_space<vmem>>, vector<48x64xf32>
    %cst_52 = arith.constant dense<0.000000e+00> : vector<48x16xf32>
    %98 = tpu.matmul %97, %7, %cst_52 {dimension_numbers = #tpu.dot_dimension_numbers<[1], [0], [0], [1], [0, 0, 1, 1], [], []>} : vector<48x64xf32>, vector<64x16xf32>, vector<48x16xf32> -> vector<48x16xf32>
    %c0_53 = arith.constant 0 : index
    %c0_54 = arith.constant 0 : index
    %99 = vector.load %arg17[%c0_53, %c0_54] : memref<48x1xf32, #tpu.memory_space<vmem>>, vector<48x1xf32>
    %100 = vector.broadcast %99 : vector<48x1xf32> to vector<48x16xf32>
    %101 = arith.addf %98, %100 : vector<48x16xf32>
    %102 = vector.extract_strided_slice %101 {offsets = [0, 0], sizes = [16, 16], strides = [1, 1]} : vector<48x16xf32> to vector<16x16xf32>
    %103 = vector.extract_strided_slice %101 {offsets = [16, 0], sizes = [16, 16], strides = [1, 1]} : vector<48x16xf32> to vector<16x16xf32>
    %104 = vector.extract_strided_slice %101 {offsets = [32, 0], sizes = [16, 16], strides = [1, 1]} : vector<48x16xf32> to vector<16x16xf32>
    %cst_55 = arith.constant dense<0.000000e+00> : vector<16x16xf32>
    %105 = tpu.matmul %102, %103, %cst_55 {dimension_numbers = #tpu.dot_dimension_numbers<[1], [1], [0], [0], [0, 0, 1, 0], [], []>} : vector<16x16xf32>, vector<16x16xf32>, vector<16x16xf32> -> vector<16x16xf32>
    %cst_56 = arith.constant 2.500000e-01 : f32
    %106 = vector.broadcast %cst_56 : f32 to vector<16x16xf32>
    %107 = arith.mulf %105, %106 : vector<16x16xf32>
    %cst_57 = arith.constant dense<0xFF800000> : vector<16xf32>
    %108 = vector.multi_reduction <maximumf>, %107, %cst_57 [1] : vector<16x16xf32> to vector<16xf32>
    %109 = vector.shape_cast %108 : vector<16xf32> to vector<16x1xf32>
    %110 = vector.broadcast %109 : vector<16x1xf32> to vector<16x16xf32>
    %111 = arith.subf %107, %110 : vector<16x16xf32>
    %112 = math.exp %111 : vector<16x16xf32>
    %cst_58 = arith.constant dense<0.000000e+00> : vector<16xf32>
    %113 = vector.multi_reduction <add>, %112, %cst_58 [1] : vector<16x16xf32> to vector<16xf32>
    %114 = vector.shape_cast %113 : vector<16xf32> to vector<16x1xf32>
    %115 = tpu.reciprocal %114 {approx = true} : vector<16x1xf32> -> vector<16x1xf32>
    %116 = vector.broadcast %115 : vector<16x1xf32> to vector<16x16xf32>
    %117 = arith.mulf %112, %116 : vector<16x16xf32>
    %cst_59 = arith.constant dense<0.000000e+00> : vector<16x16xf32>
    %118 = tpu.matmul %117, %104, %cst_59 {dimension_numbers = #tpu.dot_dimension_numbers<[1], [0], [0], [1], [0, 0, 1, 1], [], []>} : vector<16x16xf32>, vector<16x16xf32>, vector<16x16xf32> -> vector<16x16xf32>
    %c0_60 = arith.constant 0 : index
    %c0_61 = arith.constant 0 : index
    %119 = vector.load %arg18[%c0_60, %c0_61] : memref<64x16xf32, #tpu.memory_space<vmem>>, vector<64x16xf32>
    %cst_62 = arith.constant dense<0.000000e+00> : vector<64x16xf32>
    %120 = tpu.matmul %119, %118, %cst_62 {dimension_numbers = #tpu.dot_dimension_numbers<[1], [0], [0], [1], [0, 0, 1, 1], [], []>} : vector<64x16xf32>, vector<16x16xf32>, vector<64x16xf32> -> vector<64x16xf32>
    %c0_63 = arith.constant 0 : index
    %c0_64 = arith.constant 0 : index
    %121 = vector.load %arg19[%c0_63, %c0_64] : memref<64x1xf32, #tpu.memory_space<vmem>>, vector<64x1xf32>
    %122 = vector.broadcast %121 : vector<64x1xf32> to vector<64x16xf32>
    %123 = arith.addf %120, %122 : vector<64x16xf32>
    %124 = arith.addf %7, %123 : vector<64x16xf32>
    %cst_65 = arith.constant dense<0.000000e+00> : vector<16xf32>
    %125 = vector.multi_reduction <add>, %124, %cst_65 [0] : vector<64x16xf32> to vector<16xf32>
    %126 = vector.shape_cast %125 : vector<16xf32> to vector<1x16xf32>
    %cst_66 = arith.constant 6.400000e+01 : f32
    %127 = vector.broadcast %cst_66 : f32 to vector<1x16xf32>
    %128 = arith.divf %126, %127 : vector<1x16xf32>
    %129 = vector.broadcast %128 : vector<1x16xf32> to vector<64x16xf32>
    %130 = arith.subf %124, %129 : vector<64x16xf32>
    %131 = arith.mulf %130, %130 : vector<64x16xf32>
    %cst_67 = arith.constant dense<0.000000e+00> : vector<16xf32>
    %132 = vector.multi_reduction <add>, %131, %cst_67 [0] : vector<64x16xf32> to vector<16xf32>
    %133 = vector.shape_cast %132 : vector<16xf32> to vector<1x16xf32>
    %cst_68 = arith.constant 6.400000e+01 : f32
    %134 = vector.broadcast %cst_68 : f32 to vector<1x16xf32>
    %135 = arith.divf %133, %134 : vector<1x16xf32>
    %136 = vector.broadcast %128 : vector<1x16xf32> to vector<64x16xf32>
    %137 = arith.subf %124, %136 : vector<64x16xf32>
    %cst_69 = arith.constant 9.99999974E-6 : f32
    %138 = vector.broadcast %cst_69 : f32 to vector<1x16xf32>
    %139 = arith.addf %135, %138 : vector<1x16xf32>
    %140 = math.rsqrt %139 : vector<1x16xf32>
    %141 = vector.broadcast %140 : vector<1x16xf32> to vector<64x16xf32>
    %142 = arith.mulf %137, %141 : vector<64x16xf32>
    %c0_70 = arith.constant 0 : index
    %c0_71 = arith.constant 0 : index
    %143 = vector.load %arg20[%c0_70, %c0_71] : memref<64x1xf32, #tpu.memory_space<vmem>>, vector<64x1xf32>
    %144 = vector.broadcast %143 : vector<64x1xf32> to vector<64x16xf32>
    %145 = arith.mulf %142, %144 : vector<64x16xf32>
    %c0_72 = arith.constant 0 : index
    %c0_73 = arith.constant 0 : index
    %146 = vector.load %arg21[%c0_72, %c0_73] : memref<64x1xf32, #tpu.memory_space<vmem>>, vector<64x1xf32>
    %147 = vector.broadcast %146 : vector<64x1xf32> to vector<64x16xf32>
    %148 = arith.addf %145, %147 : vector<64x16xf32>
    %c0_74 = arith.constant 0 : index
    %c0_75 = arith.constant 0 : index
    %149 = vector.load %arg22[%c0_74, %c0_75] : memref<32x64xf32, #tpu.memory_space<vmem>>, vector<32x64xf32>
    %cst_76 = arith.constant dense<0.000000e+00> : vector<32x8xf32>
    %150 = tpu.matmul %149, %96, %cst_76 {dimension_numbers = #tpu.dot_dimension_numbers<[1], [0], [0], [1], [0, 0, 1, 1], [], []>} : vector<32x64xf32>, vector<64x8xf32>, vector<32x8xf32> -> vector<32x8xf32>
    %c0_77 = arith.constant 0 : index
    %c0_78 = arith.constant 0 : index
    %151 = vector.load %arg23[%c0_77, %c0_78] : memref<32x1xf32, #tpu.memory_space<vmem>>, vector<32x1xf32>
    %152 = vector.broadcast %151 : vector<32x1xf32> to vector<32x8xf32>
    %153 = arith.addf %150, %152 : vector<32x8xf32>
    %c0_79 = arith.constant 0 : index
    %c0_80 = arith.constant 0 : index
    %154 = vector.load %arg24[%c0_79, %c0_80] : memref<16x64xf32, #tpu.memory_space<vmem>>, vector<16x64xf32>
    %cst_81 = arith.constant dense<0.000000e+00> : vector<16x16xf32>
    %155 = tpu.matmul %154, %148, %cst_81 {dimension_numbers = #tpu.dot_dimension_numbers<[1], [0], [0], [1], [0, 0, 1, 1], [], []>} : vector<16x64xf32>, vector<64x16xf32>, vector<16x16xf32> -> vector<16x16xf32>
    %c0_82 = arith.constant 0 : index
    %c0_83 = arith.constant 0 : index
    %156 = vector.load %arg25[%c0_82, %c0_83] : memref<16x1xf32, #tpu.memory_space<vmem>>, vector<16x1xf32>
    %157 = vector.broadcast %156 : vector<16x1xf32> to vector<16x16xf32>
    %158 = arith.addf %155, %157 : vector<16x16xf32>
    %159 = vector.extract_strided_slice %153 {offsets = [0, 0], sizes = [16, 8], strides = [1, 1]} : vector<32x8xf32> to vector<16x8xf32>
    %160 = vector.extract_strided_slice %153 {offsets = [16, 0], sizes = [16, 8], strides = [1, 1]} : vector<32x8xf32> to vector<16x8xf32>
    %cst_84 = arith.constant dense<0.000000e+00> : vector<16x16xf32>
    %161 = tpu.matmul %159, %160, %cst_84 {dimension_numbers = #tpu.dot_dimension_numbers<[1], [1], [0], [0], [0, 0, 1, 0], [], []>} : vector<16x8xf32>, vector<16x8xf32>, vector<16x16xf32> -> vector<16x16xf32>
    %cst_85 = arith.constant 2.500000e-01 : f32
    %162 = vector.broadcast %cst_85 : f32 to vector<16x16xf32>
    %163 = arith.mulf %161, %162 : vector<16x16xf32>
    %cst_86 = arith.constant dense<0xFF800000> : vector<16xf32>
    %164 = vector.multi_reduction <maximumf>, %163, %cst_86 [1] : vector<16x16xf32> to vector<16xf32>
    %165 = vector.shape_cast %164 : vector<16xf32> to vector<16x1xf32>
    %166 = vector.broadcast %165 : vector<16x1xf32> to vector<16x16xf32>
    %167 = arith.subf %163, %166 : vector<16x16xf32>
    %168 = math.exp %167 : vector<16x16xf32>
    %cst_87 = arith.constant dense<0.000000e+00> : vector<16xf32>
    %169 = vector.multi_reduction <add>, %168, %cst_87 [1] : vector<16x16xf32> to vector<16xf32>
    %170 = vector.shape_cast %169 : vector<16xf32> to vector<16x1xf32>
    %171 = tpu.reciprocal %170 {approx = true} : vector<16x1xf32> -> vector<16x1xf32>
    %172 = vector.broadcast %171 : vector<16x1xf32> to vector<16x16xf32>
    %173 = arith.mulf %168, %172 : vector<16x16xf32>
    %cst_88 = arith.constant dense<0.000000e+00> : vector<16x16xf32>
    %174 = tpu.matmul %173, %158, %cst_88 {dimension_numbers = #tpu.dot_dimension_numbers<[1], [0], [0], [1], [0, 0, 1, 1], [], []>} : vector<16x16xf32>, vector<16x16xf32>, vector<16x16xf32> -> vector<16x16xf32>
    %c0_89 = arith.constant 0 : index
    %c0_90 = arith.constant 0 : index
    %175 = vector.load %arg26[%c0_89, %c0_90] : memref<64x16xf32, #tpu.memory_space<vmem>>, vector<64x16xf32>
    %cst_91 = arith.constant dense<0.000000e+00> : vector<64x16xf32>
    %176 = tpu.matmul %175, %174, %cst_91 {dimension_numbers = #tpu.dot_dimension_numbers<[1], [0], [0], [1], [0, 0, 1, 1], [], []>} : vector<64x16xf32>, vector<16x16xf32>, vector<64x16xf32> -> vector<64x16xf32>
    %c0_92 = arith.constant 0 : index
    %c0_93 = arith.constant 0 : index
    %177 = vector.load %arg27[%c0_92, %c0_93] : memref<64x1xf32, #tpu.memory_space<vmem>>, vector<64x1xf32>
    %178 = vector.broadcast %177 : vector<64x1xf32> to vector<64x16xf32>
    %179 = arith.addf %176, %178 : vector<64x16xf32>
    %180 = arith.addf %148, %179 : vector<64x16xf32>
    %cst_94 = arith.constant dense<0.000000e+00> : vector<16xf32>
    %181 = vector.multi_reduction <add>, %180, %cst_94 [0] : vector<64x16xf32> to vector<16xf32>
    %182 = vector.shape_cast %181 : vector<16xf32> to vector<1x16xf32>
    %cst_95 = arith.constant 6.400000e+01 : f32
    %183 = vector.broadcast %cst_95 : f32 to vector<1x16xf32>
    %184 = arith.divf %182, %183 : vector<1x16xf32>
    %185 = vector.broadcast %184 : vector<1x16xf32> to vector<64x16xf32>
    %186 = arith.subf %180, %185 : vector<64x16xf32>
    %187 = arith.mulf %186, %186 : vector<64x16xf32>
    %cst_96 = arith.constant dense<0.000000e+00> : vector<16xf32>
    %188 = vector.multi_reduction <add>, %187, %cst_96 [0] : vector<64x16xf32> to vector<16xf32>
    %189 = vector.shape_cast %188 : vector<16xf32> to vector<1x16xf32>
    %cst_97 = arith.constant 6.400000e+01 : f32
    %190 = vector.broadcast %cst_97 : f32 to vector<1x16xf32>
    %191 = arith.divf %189, %190 : vector<1x16xf32>
    %192 = vector.broadcast %184 : vector<1x16xf32> to vector<64x16xf32>
    %193 = arith.subf %180, %192 : vector<64x16xf32>
    %cst_98 = arith.constant 9.99999974E-6 : f32
    %194 = vector.broadcast %cst_98 : f32 to vector<1x16xf32>
    %195 = arith.addf %191, %194 : vector<1x16xf32>
    %196 = math.rsqrt %195 : vector<1x16xf32>
    %197 = vector.broadcast %196 : vector<1x16xf32> to vector<64x16xf32>
    %198 = arith.mulf %193, %197 : vector<64x16xf32>
    %c0_99 = arith.constant 0 : index
    %c0_100 = arith.constant 0 : index
    %199 = vector.load %arg28[%c0_99, %c0_100] : memref<64x1xf32, #tpu.memory_space<vmem>>, vector<64x1xf32>
    %200 = vector.broadcast %199 : vector<64x1xf32> to vector<64x16xf32>
    %201 = arith.mulf %198, %200 : vector<64x16xf32>
    %c0_101 = arith.constant 0 : index
    %c0_102 = arith.constant 0 : index
    %202 = vector.load %arg29[%c0_101, %c0_102] : memref<64x1xf32, #tpu.memory_space<vmem>>, vector<64x1xf32>
    %203 = vector.broadcast %202 : vector<64x1xf32> to vector<64x16xf32>
    %204 = arith.addf %201, %203 : vector<64x16xf32>
    %c0_103 = arith.constant 0 : index
    %c0_104 = arith.constant 0 : index
    %205 = vector.load %arg30[%c0_103, %c0_104] : memref<128x64xf32, #tpu.memory_space<vmem>>, vector<128x64xf32>
    %cst_105 = arith.constant dense<0.000000e+00> : vector<128x16xf32>
    %206 = tpu.matmul %205, %204, %cst_105 {dimension_numbers = #tpu.dot_dimension_numbers<[1], [0], [0], [1], [0, 0, 1, 1], [], []>} : vector<128x64xf32>, vector<64x16xf32>, vector<128x16xf32> -> vector<128x16xf32>
    %c0_106 = arith.constant 0 : index
    %c0_107 = arith.constant 0 : index
    %207 = vector.load %arg31[%c0_106, %c0_107] : memref<128x1xf32, #tpu.memory_space<vmem>>, vector<128x1xf32>
    %208 = vector.broadcast %207 : vector<128x1xf32> to vector<128x16xf32>
    %209 = arith.addf %206, %208 : vector<128x16xf32>
    %cst_108 = arith.constant 0.000000e+00 : f32
    %210 = vector.broadcast %cst_108 : f32 to vector<128x16xf32>
    %211 = arith.maximumf %209, %210 : vector<128x16xf32>
    %c0_109 = arith.constant 0 : index
    %c0_110 = arith.constant 0 : index
    %212 = vector.load %arg32[%c0_109, %c0_110] : memref<64x128xf32, #tpu.memory_space<vmem>>, vector<64x128xf32>
    %cst_111 = arith.constant dense<0.000000e+00> : vector<64x16xf32>
    %213 = tpu.matmul %212, %211, %cst_111 {dimension_numbers = #tpu.dot_dimension_numbers<[1], [0], [0], [1], [0, 0, 1, 1], [], []>} : vector<64x128xf32>, vector<128x16xf32>, vector<64x16xf32> -> vector<64x16xf32>
    %c0_112 = arith.constant 0 : index
    %c0_113 = arith.constant 0 : index
    %214 = vector.load %arg33[%c0_112, %c0_113] : memref<64x1xf32, #tpu.memory_space<vmem>>, vector<64x1xf32>
    %215 = vector.broadcast %214 : vector<64x1xf32> to vector<64x16xf32>
    %216 = arith.addf %213, %215 : vector<64x16xf32>
    %217 = arith.addf %204, %216 : vector<64x16xf32>
    %cst_114 = arith.constant dense<0.000000e+00> : vector<16xf32>
    %218 = vector.multi_reduction <add>, %217, %cst_114 [0] : vector<64x16xf32> to vector<16xf32>
    %219 = vector.shape_cast %218 : vector<16xf32> to vector<1x16xf32>
    %cst_115 = arith.constant 6.400000e+01 : f32
    %220 = vector.broadcast %cst_115 : f32 to vector<1x16xf32>
    %221 = arith.divf %219, %220 : vector<1x16xf32>
    %222 = vector.broadcast %221 : vector<1x16xf32> to vector<64x16xf32>
    %223 = arith.subf %217, %222 : vector<64x16xf32>
    %224 = arith.mulf %223, %223 : vector<64x16xf32>
    %cst_116 = arith.constant dense<0.000000e+00> : vector<16xf32>
    %225 = vector.multi_reduction <add>, %224, %cst_116 [0] : vector<64x16xf32> to vector<16xf32>
    %226 = vector.shape_cast %225 : vector<16xf32> to vector<1x16xf32>
    %cst_117 = arith.constant 6.400000e+01 : f32
    %227 = vector.broadcast %cst_117 : f32 to vector<1x16xf32>
    %228 = arith.divf %226, %227 : vector<1x16xf32>
    %229 = vector.broadcast %221 : vector<1x16xf32> to vector<64x16xf32>
    %230 = arith.subf %217, %229 : vector<64x16xf32>
    %cst_118 = arith.constant 9.99999974E-6 : f32
    %231 = vector.broadcast %cst_118 : f32 to vector<1x16xf32>
    %232 = arith.addf %228, %231 : vector<1x16xf32>
    %233 = math.rsqrt %232 : vector<1x16xf32>
    %234 = vector.broadcast %233 : vector<1x16xf32> to vector<64x16xf32>
    %235 = arith.mulf %230, %234 : vector<64x16xf32>
    %c0_119 = arith.constant 0 : index
    %c0_120 = arith.constant 0 : index
    %236 = vector.load %arg34[%c0_119, %c0_120] : memref<64x1xf32, #tpu.memory_space<vmem>>, vector<64x1xf32>
    %237 = vector.broadcast %236 : vector<64x1xf32> to vector<64x16xf32>
    %238 = arith.mulf %235, %237 : vector<64x16xf32>
    %c0_121 = arith.constant 0 : index
    %c0_122 = arith.constant 0 : index
    %239 = vector.load %arg35[%c0_121, %c0_122] : memref<64x1xf32, #tpu.memory_space<vmem>>, vector<64x1xf32>
    %240 = vector.broadcast %239 : vector<64x1xf32> to vector<64x16xf32>
    %241 = arith.addf %238, %240 : vector<64x16xf32>
    %c0_123 = arith.constant 0 : index
    %c0_124 = arith.constant 0 : index
    %242 = vector.load %arg4[%c0_123, %c0_124] : memref<48x64xf32, #tpu.memory_space<vmem>>, vector<48x64xf32>
    %cst_125 = arith.constant dense<0.000000e+00> : vector<48x8xf32>
    %243 = tpu.matmul %242, %96, %cst_125 {dimension_numbers = #tpu.dot_dimension_numbers<[1], [0], [0], [1], [0, 0, 1, 1], [], []>} : vector<48x64xf32>, vector<64x8xf32>, vector<48x8xf32> -> vector<48x8xf32>
    %c0_126 = arith.constant 0 : index
    %c0_127 = arith.constant 0 : index
    %244 = vector.load %arg5[%c0_126, %c0_127] : memref<48x1xf32, #tpu.memory_space<vmem>>, vector<48x1xf32>
    %245 = vector.broadcast %244 : vector<48x1xf32> to vector<48x8xf32>
    %246 = arith.addf %243, %245 : vector<48x8xf32>
    %247 = vector.extract_strided_slice %246 {offsets = [0, 0], sizes = [16, 8], strides = [1, 1]} : vector<48x8xf32> to vector<16x8xf32>
    %248 = vector.extract_strided_slice %246 {offsets = [16, 0], sizes = [16, 8], strides = [1, 1]} : vector<48x8xf32> to vector<16x8xf32>
    %249 = vector.extract_strided_slice %246 {offsets = [32, 0], sizes = [16, 8], strides = [1, 1]} : vector<48x8xf32> to vector<16x8xf32>
    %cst_128 = arith.constant dense<0.000000e+00> : vector<16x16xf32>
    %250 = tpu.matmul %247, %248, %cst_128 {dimension_numbers = #tpu.dot_dimension_numbers<[1], [1], [0], [0], [0, 0, 1, 0], [], []>} : vector<16x8xf32>, vector<16x8xf32>, vector<16x16xf32> -> vector<16x16xf32>
    %cst_129 = arith.constant 2.500000e-01 : f32
    %251 = vector.broadcast %cst_129 : f32 to vector<16x16xf32>
    %252 = arith.mulf %250, %251 : vector<16x16xf32>
    %cst_130 = arith.constant dense<0xFF800000> : vector<16xf32>
    %253 = vector.multi_reduction <maximumf>, %252, %cst_130 [1] : vector<16x16xf32> to vector<16xf32>
    %254 = vector.shape_cast %253 : vector<16xf32> to vector<16x1xf32>
    %255 = vector.broadcast %254 : vector<16x1xf32> to vector<16x16xf32>
    %256 = arith.subf %252, %255 : vector<16x16xf32>
    %257 = math.exp %256 : vector<16x16xf32>
    %cst_131 = arith.constant dense<0.000000e+00> : vector<16xf32>
    %258 = vector.multi_reduction <add>, %257, %cst_131 [1] : vector<16x16xf32> to vector<16xf32>
    %259 = vector.shape_cast %258 : vector<16xf32> to vector<16x1xf32>
    %260 = tpu.reciprocal %259 {approx = true} : vector<16x1xf32> -> vector<16x1xf32>
    %261 = vector.broadcast %260 : vector<16x1xf32> to vector<16x16xf32>
    %262 = arith.mulf %257, %261 : vector<16x16xf32>
    %cst_132 = arith.constant dense<0.000000e+00> : vector<16x8xf32>
    %263 = tpu.matmul %262, %249, %cst_132 {dimension_numbers = #tpu.dot_dimension_numbers<[1], [0], [0], [1], [0, 0, 1, 1], [], []>} : vector<16x16xf32>, vector<16x8xf32>, vector<16x8xf32> -> vector<16x8xf32>
    %c0_133 = arith.constant 0 : index
    %c0_134 = arith.constant 0 : index
    %264 = vector.load %arg6[%c0_133, %c0_134] : memref<64x16xf32, #tpu.memory_space<vmem>>, vector<64x16xf32>
    %cst_135 = arith.constant dense<0.000000e+00> : vector<64x8xf32>
    %265 = tpu.matmul %264, %263, %cst_135 {dimension_numbers = #tpu.dot_dimension_numbers<[1], [0], [0], [1], [0, 0, 1, 1], [], []>} : vector<64x16xf32>, vector<16x8xf32>, vector<64x8xf32> -> vector<64x8xf32>
    %c0_136 = arith.constant 0 : index
    %c0_137 = arith.constant 0 : index
    %266 = vector.load %arg7[%c0_136, %c0_137] : memref<64x1xf32, #tpu.memory_space<vmem>>, vector<64x1xf32>
    %267 = vector.broadcast %266 : vector<64x1xf32> to vector<64x8xf32>
    %268 = arith.addf %265, %267 : vector<64x8xf32>
    %269 = arith.addf %96, %268 : vector<64x8xf32>
    %cst_138 = arith.constant dense<0.000000e+00> : vector<8xf32>
    %270 = vector.multi_reduction <add>, %269, %cst_138 [0] : vector<64x8xf32> to vector<8xf32>
    %271 = vector.shape_cast %270 : vector<8xf32> to vector<1x8xf32>
    %cst_139 = arith.constant 6.400000e+01 : f32
    %272 = vector.broadcast %cst_139 : f32 to vector<1x8xf32>
    %273 = arith.divf %271, %272 : vector<1x8xf32>
    %274 = vector.broadcast %273 : vector<1x8xf32> to vector<64x8xf32>
    %275 = arith.subf %269, %274 : vector<64x8xf32>
    %276 = arith.mulf %275, %275 : vector<64x8xf32>
    %cst_140 = arith.constant dense<0.000000e+00> : vector<8xf32>
    %277 = vector.multi_reduction <add>, %276, %cst_140 [0] : vector<64x8xf32> to vector<8xf32>
    %278 = vector.shape_cast %277 : vector<8xf32> to vector<1x8xf32>
    %cst_141 = arith.constant 6.400000e+01 : f32
    %279 = vector.broadcast %cst_141 : f32 to vector<1x8xf32>
    %280 = arith.divf %278, %279 : vector<1x8xf32>
    %281 = vector.broadcast %273 : vector<1x8xf32> to vector<64x8xf32>
    %282 = arith.subf %269, %281 : vector<64x8xf32>
    %cst_142 = arith.constant 9.99999974E-6 : f32
    %283 = vector.broadcast %cst_142 : f32 to vector<1x8xf32>
    %284 = arith.addf %280, %283 : vector<1x8xf32>
    %285 = math.rsqrt %284 : vector<1x8xf32>
    %286 = vector.broadcast %285 : vector<1x8xf32> to vector<64x8xf32>
    %287 = arith.mulf %282, %286 : vector<64x8xf32>
    %c0_143 = arith.constant 0 : index
    %c0_144 = arith.constant 0 : index
    %288 = vector.load %arg8[%c0_143, %c0_144] : memref<64x1xf32, #tpu.memory_space<vmem>>, vector<64x1xf32>
    %289 = vector.broadcast %288 : vector<64x1xf32> to vector<64x8xf32>
    %290 = arith.mulf %287, %289 : vector<64x8xf32>
    %c0_145 = arith.constant 0 : index
    %c0_146 = arith.constant 0 : index
    %291 = vector.load %arg9[%c0_145, %c0_146] : memref<64x1xf32, #tpu.memory_space<vmem>>, vector<64x1xf32>
    %292 = vector.broadcast %291 : vector<64x1xf32> to vector<64x8xf32>
    %293 = arith.addf %290, %292 : vector<64x8xf32>
    %c0_147 = arith.constant 0 : index
    %c0_148 = arith.constant 0 : index
    %294 = vector.load %arg10[%c0_147, %c0_148] : memref<128x64xf32, #tpu.memory_space<vmem>>, vector<128x64xf32>
    %cst_149 = arith.constant dense<0.000000e+00> : vector<128x8xf32>
    %295 = tpu.matmul %294, %293, %cst_149 {dimension_numbers = #tpu.dot_dimension_numbers<[1], [0], [0], [1], [0, 0, 1, 1], [], []>} : vector<128x64xf32>, vector<64x8xf32>, vector<128x8xf32> -> vector<128x8xf32>
    %c0_150 = arith.constant 0 : index
    %c0_151 = arith.constant 0 : index
    %296 = vector.load %arg11[%c0_150, %c0_151] : memref<128x1xf32, #tpu.memory_space<vmem>>, vector<128x1xf32>
    %297 = vector.broadcast %296 : vector<128x1xf32> to vector<128x8xf32>
    %298 = arith.addf %295, %297 : vector<128x8xf32>
    %cst_152 = arith.constant 0.000000e+00 : f32
    %299 = vector.broadcast %cst_152 : f32 to vector<128x8xf32>
    %300 = arith.maximumf %298, %299 : vector<128x8xf32>
    %c0_153 = arith.constant 0 : index
    %c0_154 = arith.constant 0 : index
    %301 = vector.load %arg12[%c0_153, %c0_154] : memref<64x128xf32, #tpu.memory_space<vmem>>, vector<64x128xf32>
    %cst_155 = arith.constant dense<0.000000e+00> : vector<64x8xf32>
    %302 = tpu.matmul %301, %300, %cst_155 {dimension_numbers = #tpu.dot_dimension_numbers<[1], [0], [0], [1], [0, 0, 1, 1], [], []>} : vector<64x128xf32>, vector<128x8xf32>, vector<64x8xf32> -> vector<64x8xf32>
    %c0_156 = arith.constant 0 : index
    %c0_157 = arith.constant 0 : index
    %303 = vector.load %arg13[%c0_156, %c0_157] : memref<64x1xf32, #tpu.memory_space<vmem>>, vector<64x1xf32>
    %304 = vector.broadcast %303 : vector<64x1xf32> to vector<64x8xf32>
    %305 = arith.addf %302, %304 : vector<64x8xf32>
    %306 = arith.addf %293, %305 : vector<64x8xf32>
    %cst_158 = arith.constant dense<0.000000e+00> : vector<8xf32>
    %307 = vector.multi_reduction <add>, %306, %cst_158 [0] : vector<64x8xf32> to vector<8xf32>
    %308 = vector.shape_cast %307 : vector<8xf32> to vector<1x8xf32>
    %cst_159 = arith.constant 6.400000e+01 : f32
    %309 = vector.broadcast %cst_159 : f32 to vector<1x8xf32>
    %310 = arith.divf %308, %309 : vector<1x8xf32>
    %311 = vector.broadcast %310 : vector<1x8xf32> to vector<64x8xf32>
    %312 = arith.subf %306, %311 : vector<64x8xf32>
    %313 = arith.mulf %312, %312 : vector<64x8xf32>
    %cst_160 = arith.constant dense<0.000000e+00> : vector<8xf32>
    %314 = vector.multi_reduction <add>, %313, %cst_160 [0] : vector<64x8xf32> to vector<8xf32>
    %315 = vector.shape_cast %314 : vector<8xf32> to vector<1x8xf32>
    %cst_161 = arith.constant 6.400000e+01 : f32
    %316 = vector.broadcast %cst_161 : f32 to vector<1x8xf32>
    %317 = arith.divf %315, %316 : vector<1x8xf32>
    %318 = vector.broadcast %310 : vector<1x8xf32> to vector<64x8xf32>
    %319 = arith.subf %306, %318 : vector<64x8xf32>
    %cst_162 = arith.constant 9.99999974E-6 : f32
    %320 = vector.broadcast %cst_162 : f32 to vector<1x8xf32>
    %321 = arith.addf %317, %320 : vector<1x8xf32>
    %322 = math.rsqrt %321 : vector<1x8xf32>
    %323 = vector.broadcast %322 : vector<1x8xf32> to vector<64x8xf32>
    %324 = arith.mulf %319, %323 : vector<64x8xf32>
    %c0_163 = arith.constant 0 : index
    %c0_164 = arith.constant 0 : index
    %325 = vector.load %arg14[%c0_163, %c0_164] : memref<64x1xf32, #tpu.memory_space<vmem>>, vector<64x1xf32>
    %326 = vector.broadcast %325 : vector<64x1xf32> to vector<64x8xf32>
    %327 = arith.mulf %324, %326 : vector<64x8xf32>
    %c0_165 = arith.constant 0 : index
    %c0_166 = arith.constant 0 : index
    %328 = vector.load %arg15[%c0_165, %c0_166] : memref<64x1xf32, #tpu.memory_space<vmem>>, vector<64x1xf32>
    %329 = vector.broadcast %328 : vector<64x1xf32> to vector<64x8xf32>
    %330 = arith.addf %327, %329 : vector<64x8xf32>
    %c0_167 = arith.constant 0 : index
    %c0_168 = arith.constant 0 : index
    %331 = vector.load %arg16[%c0_167, %c0_168] : memref<48x64xf32, #tpu.memory_space<vmem>>, vector<48x64xf32>
    %cst_169 = arith.constant dense<0.000000e+00> : vector<48x16xf32>
    %332 = tpu.matmul %331, %241, %cst_169 {dimension_numbers = #tpu.dot_dimension_numbers<[1], [0], [0], [1], [0, 0, 1, 1], [], []>} : vector<48x64xf32>, vector<64x16xf32>, vector<48x16xf32> -> vector<48x16xf32>
    %c0_170 = arith.constant 0 : index
    %c0_171 = arith.constant 0 : index
    %333 = vector.load %arg17[%c0_170, %c0_171] : memref<48x1xf32, #tpu.memory_space<vmem>>, vector<48x1xf32>
    %334 = vector.broadcast %333 : vector<48x1xf32> to vector<48x16xf32>
    %335 = arith.addf %332, %334 : vector<48x16xf32>
    %336 = vector.extract_strided_slice %335 {offsets = [0, 0], sizes = [16, 16], strides = [1, 1]} : vector<48x16xf32> to vector<16x16xf32>
    %337 = vector.extract_strided_slice %335 {offsets = [16, 0], sizes = [16, 16], strides = [1, 1]} : vector<48x16xf32> to vector<16x16xf32>
    %338 = vector.extract_strided_slice %335 {offsets = [32, 0], sizes = [16, 16], strides = [1, 1]} : vector<48x16xf32> to vector<16x16xf32>
    %cst_172 = arith.constant dense<0.000000e+00> : vector<16x16xf32>
    %339 = tpu.matmul %336, %337, %cst_172 {dimension_numbers = #tpu.dot_dimension_numbers<[1], [1], [0], [0], [0, 0, 1, 0], [], []>} : vector<16x16xf32>, vector<16x16xf32>, vector<16x16xf32> -> vector<16x16xf32>
    %cst_173 = arith.constant 2.500000e-01 : f32
    %340 = vector.broadcast %cst_173 : f32 to vector<16x16xf32>
    %341 = arith.mulf %339, %340 : vector<16x16xf32>
    %cst_174 = arith.constant dense<0xFF800000> : vector<16xf32>
    %342 = vector.multi_reduction <maximumf>, %341, %cst_174 [1] : vector<16x16xf32> to vector<16xf32>
    %343 = vector.shape_cast %342 : vector<16xf32> to vector<16x1xf32>
    %344 = vector.broadcast %343 : vector<16x1xf32> to vector<16x16xf32>
    %345 = arith.subf %341, %344 : vector<16x16xf32>
    %346 = math.exp %345 : vector<16x16xf32>
    %cst_175 = arith.constant dense<0.000000e+00> : vector<16xf32>
    %347 = vector.multi_reduction <add>, %346, %cst_175 [1] : vector<16x16xf32> to vector<16xf32>
    %348 = vector.shape_cast %347 : vector<16xf32> to vector<16x1xf32>
    %349 = tpu.reciprocal %348 {approx = true} : vector<16x1xf32> -> vector<16x1xf32>
    %350 = vector.broadcast %349 : vector<16x1xf32> to vector<16x16xf32>
    %351 = arith.mulf %346, %350 : vector<16x16xf32>
    %cst_176 = arith.constant dense<0.000000e+00> : vector<16x16xf32>
    %352 = tpu.matmul %351, %338, %cst_176 {dimension_numbers = #tpu.dot_dimension_numbers<[1], [0], [0], [1], [0, 0, 1, 1], [], []>} : vector<16x16xf32>, vector<16x16xf32>, vector<16x16xf32> -> vector<16x16xf32>
    %c0_177 = arith.constant 0 : index
    %c0_178 = arith.constant 0 : index
    %353 = vector.load %arg18[%c0_177, %c0_178] : memref<64x16xf32, #tpu.memory_space<vmem>>, vector<64x16xf32>
    %cst_179 = arith.constant dense<0.000000e+00> : vector<64x16xf32>
    %354 = tpu.matmul %353, %352, %cst_179 {dimension_numbers = #tpu.dot_dimension_numbers<[1], [0], [0], [1], [0, 0, 1, 1], [], []>} : vector<64x16xf32>, vector<16x16xf32>, vector<64x16xf32> -> vector<64x16xf32>
    %c0_180 = arith.constant 0 : index
    %c0_181 = arith.constant 0 : index
    %355 = vector.load %arg19[%c0_180, %c0_181] : memref<64x1xf32, #tpu.memory_space<vmem>>, vector<64x1xf32>
    %356 = vector.broadcast %355 : vector<64x1xf32> to vector<64x16xf32>
    %357 = arith.addf %354, %356 : vector<64x16xf32>
    %358 = arith.addf %241, %357 : vector<64x16xf32>
    %cst_182 = arith.constant dense<0.000000e+00> : vector<16xf32>
    %359 = vector.multi_reduction <add>, %358, %cst_182 [0] : vector<64x16xf32> to vector<16xf32>
    %360 = vector.shape_cast %359 : vector<16xf32> to vector<1x16xf32>
    %cst_183 = arith.constant 6.400000e+01 : f32
    %361 = vector.broadcast %cst_183 : f32 to vector<1x16xf32>
    %362 = arith.divf %360, %361 : vector<1x16xf32>
    %363 = vector.broadcast %362 : vector<1x16xf32> to vector<64x16xf32>
    %364 = arith.subf %358, %363 : vector<64x16xf32>
    %365 = arith.mulf %364, %364 : vector<64x16xf32>
    %cst_184 = arith.constant dense<0.000000e+00> : vector<16xf32>
    %366 = vector.multi_reduction <add>, %365, %cst_184 [0] : vector<64x16xf32> to vector<16xf32>
    %367 = vector.shape_cast %366 : vector<16xf32> to vector<1x16xf32>
    %cst_185 = arith.constant 6.400000e+01 : f32
    %368 = vector.broadcast %cst_185 : f32 to vector<1x16xf32>
    %369 = arith.divf %367, %368 : vector<1x16xf32>
    %370 = vector.broadcast %362 : vector<1x16xf32> to vector<64x16xf32>
    %371 = arith.subf %358, %370 : vector<64x16xf32>
    %cst_186 = arith.constant 9.99999974E-6 : f32
    %372 = vector.broadcast %cst_186 : f32 to vector<1x16xf32>
    %373 = arith.addf %369, %372 : vector<1x16xf32>
    %374 = math.rsqrt %373 : vector<1x16xf32>
    %375 = vector.broadcast %374 : vector<1x16xf32> to vector<64x16xf32>
    %376 = arith.mulf %371, %375 : vector<64x16xf32>
    %c0_187 = arith.constant 0 : index
    %c0_188 = arith.constant 0 : index
    %377 = vector.load %arg20[%c0_187, %c0_188] : memref<64x1xf32, #tpu.memory_space<vmem>>, vector<64x1xf32>
    %378 = vector.broadcast %377 : vector<64x1xf32> to vector<64x16xf32>
    %379 = arith.mulf %376, %378 : vector<64x16xf32>
    %c0_189 = arith.constant 0 : index
    %c0_190 = arith.constant 0 : index
    %380 = vector.load %arg21[%c0_189, %c0_190] : memref<64x1xf32, #tpu.memory_space<vmem>>, vector<64x1xf32>
    %381 = vector.broadcast %380 : vector<64x1xf32> to vector<64x16xf32>
    %382 = arith.addf %379, %381 : vector<64x16xf32>
    %c0_191 = arith.constant 0 : index
    %c0_192 = arith.constant 0 : index
    %383 = vector.load %arg22[%c0_191, %c0_192] : memref<32x64xf32, #tpu.memory_space<vmem>>, vector<32x64xf32>
    %cst_193 = arith.constant dense<0.000000e+00> : vector<32x8xf32>
    %384 = tpu.matmul %383, %330, %cst_193 {dimension_numbers = #tpu.dot_dimension_numbers<[1], [0], [0], [1], [0, 0, 1, 1], [], []>} : vector<32x64xf32>, vector<64x8xf32>, vector<32x8xf32> -> vector<32x8xf32>
    %c0_194 = arith.constant 0 : index
    %c0_195 = arith.constant 0 : index
    %385 = vector.load %arg23[%c0_194, %c0_195] : memref<32x1xf32, #tpu.memory_space<vmem>>, vector<32x1xf32>
    %386 = vector.broadcast %385 : vector<32x1xf32> to vector<32x8xf32>
    %387 = arith.addf %384, %386 : vector<32x8xf32>
    %c0_196 = arith.constant 0 : index
    %c0_197 = arith.constant 0 : index
    %388 = vector.load %arg24[%c0_196, %c0_197] : memref<16x64xf32, #tpu.memory_space<vmem>>, vector<16x64xf32>
    %cst_198 = arith.constant dense<0.000000e+00> : vector<16x16xf32>
    %389 = tpu.matmul %388, %382, %cst_198 {dimension_numbers = #tpu.dot_dimension_numbers<[1], [0], [0], [1], [0, 0, 1, 1], [], []>} : vector<16x64xf32>, vector<64x16xf32>, vector<16x16xf32> -> vector<16x16xf32>
    %c0_199 = arith.constant 0 : index
    %c0_200 = arith.constant 0 : index
    %390 = vector.load %arg25[%c0_199, %c0_200] : memref<16x1xf32, #tpu.memory_space<vmem>>, vector<16x1xf32>
    %391 = vector.broadcast %390 : vector<16x1xf32> to vector<16x16xf32>
    %392 = arith.addf %389, %391 : vector<16x16xf32>
    %393 = vector.extract_strided_slice %387 {offsets = [0, 0], sizes = [16, 8], strides = [1, 1]} : vector<32x8xf32> to vector<16x8xf32>
    %394 = vector.extract_strided_slice %387 {offsets = [16, 0], sizes = [16, 8], strides = [1, 1]} : vector<32x8xf32> to vector<16x8xf32>
    %cst_201 = arith.constant dense<0.000000e+00> : vector<16x16xf32>
    %395 = tpu.matmul %393, %394, %cst_201 {dimension_numbers = #tpu.dot_dimension_numbers<[1], [1], [0], [0], [0, 0, 1, 0], [], []>} : vector<16x8xf32>, vector<16x8xf32>, vector<16x16xf32> -> vector<16x16xf32>
    %cst_202 = arith.constant 2.500000e-01 : f32
    %396 = vector.broadcast %cst_202 : f32 to vector<16x16xf32>
    %397 = arith.mulf %395, %396 : vector<16x16xf32>
    %cst_203 = arith.constant dense<0xFF800000> : vector<16xf32>
    %398 = vector.multi_reduction <maximumf>, %397, %cst_203 [1] : vector<16x16xf32> to vector<16xf32>
    %399 = vector.shape_cast %398 : vector<16xf32> to vector<16x1xf32>
    %400 = vector.broadcast %399 : vector<16x1xf32> to vector<16x16xf32>
    %401 = arith.subf %397, %400 : vector<16x16xf32>
    %402 = math.exp %401 : vector<16x16xf32>
    %cst_204 = arith.constant dense<0.000000e+00> : vector<16xf32>
    %403 = vector.multi_reduction <add>, %402, %cst_204 [1] : vector<16x16xf32> to vector<16xf32>
    %404 = vector.shape_cast %403 : vector<16xf32> to vector<16x1xf32>
    %405 = tpu.reciprocal %404 {approx = true} : vector<16x1xf32> -> vector<16x1xf32>
    %406 = vector.broadcast %405 : vector<16x1xf32> to vector<16x16xf32>
    %407 = arith.mulf %402, %406 : vector<16x16xf32>
    %cst_205 = arith.constant dense<0.000000e+00> : vector<16x16xf32>
    %408 = tpu.matmul %407, %392, %cst_205 {dimension_numbers = #tpu.dot_dimension_numbers<[1], [0], [0], [1], [0, 0, 1, 1], [], []>} : vector<16x16xf32>, vector<16x16xf32>, vector<16x16xf32> -> vector<16x16xf32>
    %c0_206 = arith.constant 0 : index
    %c0_207 = arith.constant 0 : index
    %409 = vector.load %arg26[%c0_206, %c0_207] : memref<64x16xf32, #tpu.memory_space<vmem>>, vector<64x16xf32>
    %cst_208 = arith.constant dense<0.000000e+00> : vector<64x16xf32>
    %410 = tpu.matmul %409, %408, %cst_208 {dimension_numbers = #tpu.dot_dimension_numbers<[1], [0], [0], [1], [0, 0, 1, 1], [], []>} : vector<64x16xf32>, vector<16x16xf32>, vector<64x16xf32> -> vector<64x16xf32>
    %c0_209 = arith.constant 0 : index
    %c0_210 = arith.constant 0 : index
    %411 = vector.load %arg27[%c0_209, %c0_210] : memref<64x1xf32, #tpu.memory_space<vmem>>, vector<64x1xf32>
    %412 = vector.broadcast %411 : vector<64x1xf32> to vector<64x16xf32>
    %413 = arith.addf %410, %412 : vector<64x16xf32>
    %414 = arith.addf %382, %413 : vector<64x16xf32>
    %cst_211 = arith.constant dense<0.000000e+00> : vector<16xf32>
    %415 = vector.multi_reduction <add>, %414, %cst_211 [0] : vector<64x16xf32> to vector<16xf32>
    %416 = vector.shape_cast %415 : vector<16xf32> to vector<1x16xf32>
    %cst_212 = arith.constant 6.400000e+01 : f32
    %417 = vector.broadcast %cst_212 : f32 to vector<1x16xf32>
    %418 = arith.divf %416, %417 : vector<1x16xf32>
    %419 = vector.broadcast %418 : vector<1x16xf32> to vector<64x16xf32>
    %420 = arith.subf %414, %419 : vector<64x16xf32>
    %421 = arith.mulf %420, %420 : vector<64x16xf32>
    %cst_213 = arith.constant dense<0.000000e+00> : vector<16xf32>
    %422 = vector.multi_reduction <add>, %421, %cst_213 [0] : vector<64x16xf32> to vector<16xf32>
    %423 = vector.shape_cast %422 : vector<16xf32> to vector<1x16xf32>
    %cst_214 = arith.constant 6.400000e+01 : f32
    %424 = vector.broadcast %cst_214 : f32 to vector<1x16xf32>
    %425 = arith.divf %423, %424 : vector<1x16xf32>
    %426 = vector.broadcast %418 : vector<1x16xf32> to vector<64x16xf32>
    %427 = arith.subf %414, %426 : vector<64x16xf32>
    %cst_215 = arith.constant 9.99999974E-6 : f32
    %428 = vector.broadcast %cst_215 : f32 to vector<1x16xf32>
    %429 = arith.addf %425, %428 : vector<1x16xf32>
    %430 = math.rsqrt %429 : vector<1x16xf32>
    %431 = vector.broadcast %430 : vector<1x16xf32> to vector<64x16xf32>
    %432 = arith.mulf %427, %431 : vector<64x16xf32>
    %c0_216 = arith.constant 0 : index
    %c0_217 = arith.constant 0 : index
    %433 = vector.load %arg28[%c0_216, %c0_217] : memref<64x1xf32, #tpu.memory_space<vmem>>, vector<64x1xf32>
    %434 = vector.broadcast %433 : vector<64x1xf32> to vector<64x16xf32>
    %435 = arith.mulf %432, %434 : vector<64x16xf32>
    %c0_218 = arith.constant 0 : index
    %c0_219 = arith.constant 0 : index
    %436 = vector.load %arg29[%c0_218, %c0_219] : memref<64x1xf32, #tpu.memory_space<vmem>>, vector<64x1xf32>
    %437 = vector.broadcast %436 : vector<64x1xf32> to vector<64x16xf32>
    %438 = arith.addf %435, %437 : vector<64x16xf32>
    %c0_220 = arith.constant 0 : index
    %c0_221 = arith.constant 0 : index
    %439 = vector.load %arg30[%c0_220, %c0_221] : memref<128x64xf32, #tpu.memory_space<vmem>>, vector<128x64xf32>
    %cst_222 = arith.constant dense<0.000000e+00> : vector<128x16xf32>
    %440 = tpu.matmul %439, %438, %cst_222 {dimension_numbers = #tpu.dot_dimension_numbers<[1], [0], [0], [1], [0, 0, 1, 1], [], []>} : vector<128x64xf32>, vector<64x16xf32>, vector<128x16xf32> -> vector<128x16xf32>
    %c0_223 = arith.constant 0 : index
    %c0_224 = arith.constant 0 : index
    %441 = vector.load %arg31[%c0_223, %c0_224] : memref<128x1xf32, #tpu.memory_space<vmem>>, vector<128x1xf32>
    %442 = vector.broadcast %441 : vector<128x1xf32> to vector<128x16xf32>
    %443 = arith.addf %440, %442 : vector<128x16xf32>
    %cst_225 = arith.constant 0.000000e+00 : f32
    %444 = vector.broadcast %cst_225 : f32 to vector<128x16xf32>
    %445 = arith.maximumf %443, %444 : vector<128x16xf32>
    %c0_226 = arith.constant 0 : index
    %c0_227 = arith.constant 0 : index
    %446 = vector.load %arg32[%c0_226, %c0_227] : memref<64x128xf32, #tpu.memory_space<vmem>>, vector<64x128xf32>
    %cst_228 = arith.constant dense<0.000000e+00> : vector<64x16xf32>
    %447 = tpu.matmul %446, %445, %cst_228 {dimension_numbers = #tpu.dot_dimension_numbers<[1], [0], [0], [1], [0, 0, 1, 1], [], []>} : vector<64x128xf32>, vector<128x16xf32>, vector<64x16xf32> -> vector<64x16xf32>
    %c0_229 = arith.constant 0 : index
    %c0_230 = arith.constant 0 : index
    %448 = vector.load %arg33[%c0_229, %c0_230] : memref<64x1xf32, #tpu.memory_space<vmem>>, vector<64x1xf32>
    %449 = vector.broadcast %448 : vector<64x1xf32> to vector<64x16xf32>
    %450 = arith.addf %447, %449 : vector<64x16xf32>
    %451 = arith.addf %438, %450 : vector<64x16xf32>
    %cst_231 = arith.constant dense<0.000000e+00> : vector<16xf32>
    %452 = vector.multi_reduction <add>, %451, %cst_231 [0] : vector<64x16xf32> to vector<16xf32>
    %453 = vector.shape_cast %452 : vector<16xf32> to vector<1x16xf32>
    %cst_232 = arith.constant 6.400000e+01 : f32
    %454 = vector.broadcast %cst_232 : f32 to vector<1x16xf32>
    %455 = arith.divf %453, %454 : vector<1x16xf32>
    %456 = vector.broadcast %455 : vector<1x16xf32> to vector<64x16xf32>
    %457 = arith.subf %451, %456 : vector<64x16xf32>
    %458 = arith.mulf %457, %457 : vector<64x16xf32>
    %cst_233 = arith.constant dense<0.000000e+00> : vector<16xf32>
    %459 = vector.multi_reduction <add>, %458, %cst_233 [0] : vector<64x16xf32> to vector<16xf32>
    %460 = vector.shape_cast %459 : vector<16xf32> to vector<1x16xf32>
    %cst_234 = arith.constant 6.400000e+01 : f32
    %461 = vector.broadcast %cst_234 : f32 to vector<1x16xf32>
    %462 = arith.divf %460, %461 : vector<1x16xf32>
    %463 = vector.broadcast %455 : vector<1x16xf32> to vector<64x16xf32>
    %464 = arith.subf %451, %463 : vector<64x16xf32>
    %cst_235 = arith.constant 9.99999974E-6 : f32
    %465 = vector.broadcast %cst_235 : f32 to vector<1x16xf32>
    %466 = arith.addf %462, %465 : vector<1x16xf32>
    %467 = math.rsqrt %466 : vector<1x16xf32>
    %468 = vector.broadcast %467 : vector<1x16xf32> to vector<64x16xf32>
    %469 = arith.mulf %464, %468 : vector<64x16xf32>
    %c0_236 = arith.constant 0 : index
    %c0_237 = arith.constant 0 : index
    %470 = vector.load %arg34[%c0_236, %c0_237] : memref<64x1xf32, #tpu.memory_space<vmem>>, vector<64x1xf32>
    %471 = vector.broadcast %470 : vector<64x1xf32> to vector<64x16xf32>
    %472 = arith.mulf %469, %471 : vector<64x16xf32>
    %c0_238 = arith.constant 0 : index
    %c0_239 = arith.constant 0 : index
    %473 = vector.load %arg35[%c0_238, %c0_239] : memref<64x1xf32, #tpu.memory_space<vmem>>, vector<64x1xf32>
    %474 = vector.broadcast %473 : vector<64x1xf32> to vector<64x16xf32>
    %475 = arith.addf %472, %474 : vector<64x16xf32>
    %c0_240 = arith.constant 0 : index
    %c0_241 = arith.constant 0 : index
    %476 = vector.load %arg36[%c0_240, %c0_241] : memref<128x64xf32, #tpu.memory_space<vmem>>, vector<128x64xf32>
    %cst_242 = arith.constant dense<0.000000e+00> : vector<128x16xf32>
    %477 = tpu.matmul %476, %475, %cst_242 {dimension_numbers = #tpu.dot_dimension_numbers<[1], [0], [0], [1], [0, 0, 1, 1], [], []>} : vector<128x64xf32>, vector<64x16xf32>, vector<128x16xf32> -> vector<128x16xf32>
    %c0_243 = arith.constant 0 : index
    %c0_244 = arith.constant 0 : index
    %478 = vector.load %arg37[%c0_243, %c0_244] : memref<128x1xf32, #tpu.memory_space<vmem>>, vector<128x1xf32>
    %479 = vector.broadcast %478 : vector<128x1xf32> to vector<128x16xf32>
    %480 = arith.addf %477, %479 : vector<128x16xf32>
    %481 = tpu.transpose %480, [1, 0] : vector<128x16xf32> -> vector<16x128xf32>
    %c0_245 = arith.constant 0 : index
    %c0_246 = arith.constant 0 : index
    %482 = vector.load %arg38[%c0_245, %c0_246] : memref<16x128xf32, #tpu.memory_space<vmem>>, vector<16x128xf32>
    tpu.vector_store %arg38[%c0_245, %c0_246], %481 {strides = array<i32>} : memref<16x128xf32, #tpu.memory_space<vmem>>, vector<16x128xf32>,
    return
  }
}

</mosaic_0001>

<bundles_post_ra>
// kernel: transformer_forward.1
= control target key start
LH: loop header
LB: loop body
LE: loop exit
PB: predicated region body
PF: predicated region fallthrough
CT: control target
= control target key end

     0   :  { %s9370_s6 = smov 1   ;;  %s9371_s10 = smov 2   ;;  %s11491_s0 = inlined_call_operand.smem [shape: u32[39], index: -1, kind: input, shape index: {}] }
   0x1   :  { %s9444_s5 = sld [smem:[%s11491_s0]]   ;;  %s9372_s14 = smov 3  }
   0x2   :  { %s9449_s9 = sld [smem:[%s11491_s0 + %s9370_s6]]   ;;  %s9373_s18 = smov 4  }
   0x3   :  { %s9454_s13 = sld [smem:[%s11491_s0 + %s9371_s10]]   ;;  %s9374_s22 = smov 5  }
   0x4   :  { %s9459_s17 = sld [smem:[%s11491_s0 + %s9372_s14]]   ;;  %s9375_s26 = smov 6  }
   0x5   :  { %s9464_s21 = sld [smem:[%s11491_s0 + %s9373_s18]]   ;;  %s9376_s30 = smov 7  }
   0x6   :  { %s9469_s25 = sld [smem:[%s11491_s0 + %s9374_s22]]   ;;  %s9377_s4 = smov 8  }
   0x7   :  { %11655 = sst [smem:[#allocation55_spill]] %s9444_s5  ;;  %s9378_s10 = smov 9  }
   0x8   :  { %s9474_s29 = sld [smem:[%s11491_s0 + %s9375_s26]]   ;;  %s9379_s15 = smov 10  }
   0x9   :  { %s9479_s3 = sld [smem:[%s11491_s0 + %s9376_s30]]   ;;  %s9380_s20 = smov 11  }
   0xa   :  { %s9484_s8 = sld [smem:[%s11491_s0 + %s9377_s4]]   ;;  %s9381_s26 = smov 12  }
   0xb   :  { %s9489_s14 = sld [smem:[%s11491_s0 + %s9378_s10]]   ;;  %s9382_s1 = smov 13  }
   0xc   :  { %s9494_s19 = sld [smem:[%s11491_s0 + %s9379_s15]]   ;;  %s9383_s7 = smov 14  }
   0xd   :  { %s9499_s24 = sld [smem:[%s11491_s0 + %s9380_s20]]   ;;  %s9384_s15 = smov 15  }
   0xe   :  { %11656 = sst [smem:[#allocation56_spill]] %s9474_s29  ;;  %s9385_s22 = smov 16  }
   0xf   :  { %s9504_s30 = sld [smem:[%s11491_s0 + %s9381_s26]]   ;;  %s9386_s28 = smov 17  }
  0x10   :  { %11657 = sst [smem:[#allocation57_spill]] %s9484_s8 }
  0x11   :  { %11658 = sst [smem:[#allocation58_spill]] %s9489_s14 }
  0x12   :  { %11659 = sst [smem:[#allocation59_spill]] %s9494_s19 }
  0x13   :  { %s9509_s6 = sld [smem:[%s11491_s0 + %s9382_s1]]  }
  0x14   :  { %s9514_s12 = sld [smem:[%s11491_s0 + %s9383_s7]]   ;;  %s9387_s7 = smov 18  }
  0x15   :  { %11660 = sst [smem:[#allocation60_spill]] %s9504_s30 }
  0x16   :  { %s9519_s20 = sld [smem:[%s11491_s0 + %s9384_s15]]   ;;  %s9388_s15 = smov 19  }
  0x17   :  { %s9524_s27 = sld [smem:[%s11491_s0 + %s9385_s22]]   ;;  %s9389_s22 = smov 20  }
  0x18   :  { %s9529_s4 = sld [smem:[%s11491_s0 + %s9386_s28]]   ;;  %s9390_s28 = smov 21  }
  0x19   :  { %s9544_s29 = sld [smem:[%s11491_s0 + %s9389_s22]]   ;;  %s9393_s22 = smov 24  }
  0x1a   :  { %11661 = sst [smem:[#allocation61_spill]] %s9514_s12 }
  0x1b   :  { %s9534_s12 = sld [smem:[%s11491_s0 + %s9387_s7]]   ;;  %s9391_s7 = smov 22  }
  0x1c   :  { %11662 = sst [smem:[#allocation62_spill]] %s9519_s20 }
  0x1d   :  { %11663 = sst [smem:[#allocation63_spill]] %s9524_s27 }
  0x1e   :  { %s9539_s20 = sld [smem:[%s11491_s0 + %s9388_s15]]   ;;  %s9392_s15 = smov 23  }
  0x1f   :  { %11665 = sst [smem:[#allocation65_spill]] %s9544_s29 }
  0x20   :  { %s9549_s14 = sld [smem:[%s11491_s0 + %s9390_s28]]   ;;  %s9394_s28 = smov 25  }
  0x21   :  { %11664 = sst [smem:[#allocation64_spill]] %s9534_s12 }
  0x22   :  { %s9554_s8 = sld [smem:[%s11491_s0 + %s9391_s7]]   ;;  %s9395_s7 = smov 26  }
  0x23   :  { %s9559_s5 = sld [smem:[%s11491_s0 + %s9392_s15]]   ;;  %s9396_s15 = smov 27  }
  0x24   :  { %s9564_s29 = sld [smem:[%s11491_s0 + %s9393_s22]]   ;;  %s9397_s22 = smov 28  }
  0x25   :  { %s9584_s12 = sld [smem:[%s11491_s0 + %s9397_s22]]   ;;  %s9401_s22 = smov 32  }
  0x26   :  { %11666 = sst [smem:[#allocation66_spill]] %s9549_s14 }
  0x27   :  { %s9569_s14 = sld [smem:[%s11491_s0 + %s9394_s28]]   ;;  %s9398_s28 = smov 29  }
  0x28   :  { %11667 = sst [smem:[#allocation67_spill]] %s9554_s8 }
  0x29   :  { %11668 = sst [smem:[#allocation68_spill]] %s9559_s5 }
  0x2a   :  { %s9574_s8 = sld [smem:[%s11491_s0 + %s9395_s7]]   ;;  %s9399_s7 = smov 30  }
  0x2b   :  { %s9579_s5 = sld [smem:[%s11491_s0 + %s9396_s15]]   ;;  %s9400_s15 = smov 31  }
  0x2c   :  { %11671 = sst [smem:[#allocation71_spill]] %s9584_s12 }
  0x2d   :  { %11669 = sst [smem:[#allocation69_spill]] %s9569_s14 }
  0x2e   :  { %s9589_s14 = sld [smem:[%s11491_s0 + %s9398_s28]]   ;;  %s9402_s28 = smov 33  }
  0x2f   :  { %s9594_s27 = sld [smem:[%s11491_s0 + %s9399_s7]]   ;;  %s9403_s7 = smov 34  }
  0x30   :  { %s9604_s12 = sld [smem:[%s11491_s0 + %s9401_s22]]   ;;  %s9405_s22 = smov 36  }
  0x31   :  { %11670 = sst [smem:[#allocation70_spill]] %s9579_s5 }
  0x32   :  { %s9599_s5 = sld [smem:[%s11491_s0 + %s9400_s15]]   ;;  %s9404_s15 = smov 35  }
  0x33   :  { %s9614_s30 = sld [smem:[%s11491_s0 + %s9403_s7]]   ;;  %s9407_s7 = smov 38  }
  0x34   :  { %11672 = sst [smem:[#allocation72_spill]] %s9589_s14 }
  0x35   :  { %s9609_s14 = sld [smem:[%s11491_s0 + %s9402_s28]]   ;;  %s9406_s28 = smov 37  }
  0x36   :  { %s9624_s19 = sld [smem:[%s11491_s0 + %s9405_s22]]  }
  0x38   :  { %11673 = sst [smem:[#allocation73_spill]] %s9599_s5 }
  0x39   :  { %11675 = sst [smem:[#allocation75_spill]] %s9614_s30 }
  0x3a   :  { %s9619_s5 = sld [smem:[%s11491_s0 + %s9404_s15]]  }
  0x3b   :  { %11674 = sst [smem:[#allocation74_spill]] %s9609_s14 }
  0x3c   :  { %s9629_s14 = sld [smem:[%s11491_s0 + %s9406_s28]]  }
  0x3d   :  { %s9634_s30 = sld [smem:[%s11491_s0 + %s9407_s7]]  }
  0x3e   :  { %82 = vsyncpa [#allocation3], 0 }
  0x3f   :  { %83 = vsyncpa [#allocation6], 0 }
  0x40   :  { %84 = vsyncpa [#allocation9], 0 }
  0x41   :  { %85 = vsyncpa [#allocation12], 0 }
  0x42   :  { %86 = vsyncpa [#allocation15], 0 }
  0x43   :  { %87 = vsyncpa [#allocation18], 0 }
  0x44   :  { %88 = vsyncpa [#allocation21], 0 }
  0x45   :  { %89 = vsyncpa [#allocation24], 0 }
  0x46   :  { %90 = vsyncpa [#allocation27], 0 }
  0x47   :  { %91 = vsyncpa [#allocation30], 0 }
  0x48   :  { %92 = vsyncpa [#allocation33], 0 }
  0x49   :  { %93 = vsyncpa [#allocation36], 0 }
  0x4a   :  { %94 = vsyncpa [#allocation39], 0 }
  0x4b   :  { %95 = vsyncpa [#allocation4], 0  ;;  %s9408_s15 = smov [#allocation5]   ;;  %s8792_s16 = scalar_lea.hbm %s9454_s13, 128 }
  0x4c   :  { %s116_s0 = sshll.u32 %s9408_s15, 4  ;;  %p8793_p0 = scmp.ne.s32.totalorder %s9454_s13, %s8792_s16  ;;  %s117_s0 = int_to_ptr.vmem [resolvable:$true] %s116_s0 }
  0x4d   :  { %p8796_p1 = scmp.lt.u32.totalorder %s8792_s16, %s9454_s13 }
  0x4f   :  { %p8798_p2 = pnand %p8796_p1, %p8793_p0 }
  0x51   :  { %8801 = shalt.err (!%p8798_p2)
}
  0x52   :  { %s8802_s18 = scalar_lea.vmem %s117_s0, 128  ;;  %p8807_p4 = scmp.lt.s32.totalorder %s117_s0, %s117_s0 }
  0x53   :  { %p8803_p3 = scmp.ne.s32.totalorder %s117_s0, %s8802_s18  ;;  %p8808_p5 = scmp.lt.s32.totalorder %s8802_s18, %s8802_s18 }
  0x55   :  { %p8809_p6 = por %p8808_p5, %p8807_p4 }
  0x57   :  { %p8810_p7 = pnand %p8809_p6, %p8803_p3 }
  0x59   :  { %8813 = shalt.err (!%p8810_p7)
}
  0x5a   :  { %119 = dma.hbm_to_vmem [thread:$0]  %s9454_s13, 128, %s117_s0, [#allocation6]  }
  0x5b   :  { %s9409_s22 = smov [#allocation8]   ;;  %s9410_s26 = smov [#allocation11]  }
  0x5c   :  { %s137_s23 = sshll.u32 %s9409_s22, 4  ;;  %s163_s28 = sshll.u32 %s9410_s26, 4  ;;  %s138_s23 = int_to_ptr.vmem [resolvable:$true] %s137_s23  ;;  %s164_s28 = int_to_ptr.vmem [resolvable:$true] %s163_s28 }
  0x5d   :  { %s8814_s1 = scalar_lea.hbm %s9464_s21, 768 }
  0x5e   :  { %p8815_p8 = scmp.ne.s32.totalorder %s9464_s21, %s8814_s1  ;;  %p8818_p9 = scmp.lt.u32.totalorder %s8814_s1, %s9464_s21 }
  0x60   :  { %p8820_p10 = pnand %p8818_p9, %p8815_p8 }
  0x62   :  { %8823 = shalt.err (!%p8820_p10)
}
  0x63   :  { %s8824_s2 = scalar_lea.vmem %s138_s23, 768  ;;  %p8829_p12 = scmp.lt.s32.totalorder %s138_s23, %s138_s23 }
  0x64   :  { %p8825_p11 = scmp.ne.s32.totalorder %s138_s23, %s8824_s2  ;;  %p8830_p13 = scmp.lt.s32.totalorder %s8824_s2, %s8824_s2 }
  0x66   :  { %p8831_p0 = por %p8830_p13, %p8829_p12 }
  0x68   :  { %p8832_p1 = pnand %p8831_p0, %p8825_p11 }
  0x6a   :  { %8835 = shalt.err (!%p8832_p1)
}
  0x6b   :  { %s9411_s7 = smov 128   ;;  %s9412_s13 = smov 8  }
  0x6c   :  { %143 = dma.hbm_to_vmem [thread:$0]  %s9464_s21, 768, %s138_s23, [#allocation9], %s9411_s7, %s9411_s7, %s9412_s13  }
  0x6d   :  { %s8836_s10 = scalar_lea.hbm %s9479_s3, 1024 }
  0x6e   :  { %p8837_p2 = scmp.ne.s32.totalorder %s9479_s3, %s8836_s10  ;;  %p8840_p3 = scmp.lt.u32.totalorder %s8836_s10, %s9479_s3 }
  0x70   :  { %p8842_p4 = pnand %p8840_p3, %p8837_p2 }
  0x72   :  { %8845 = shalt.err (!%p8842_p4)
}
  0x73   :  { %s8846_s11 = scalar_lea.vmem %s164_s28, 1024  ;;  %p8851_p6 = scmp.lt.s32.totalorder %s164_s28, %s164_s28 }
  0x74   :  { %p8847_p5 = scmp.ne.s32.totalorder %s164_s28, %s8846_s11  ;;  %p8852_p7 = scmp.lt.s32.totalorder %s8846_s11, %s8846_s11 }
  0x76   :  { %p8853_p8 = por %p8852_p7, %p8851_p6 }
  0x78   :  { %p8854_p9 = pnand %p8853_p8, %p8847_p5 }
  0x7a   :  { %8857 = shalt.err (!%p8854_p9)
}
  0x7b   :  { %169 = dma.hbm_to_vmem [thread:$0]  %s9479_s3, 1024, %s164_s28, [#allocation12], %s9411_s7, %s9411_s7, %s9412_s13  }
  0x7c   :  { %s9413_s21 = smov [#allocation14]   ;;  %s9414_s0 = smov [#allocation17]  }
  0x7d   :  { %s191_s15 = sshll.u32 %s9413_s21, 4  ;;  %s215_s16 = sshll.u32 %s9414_s0, 4  ;;  %s192_s15 = int_to_ptr.vmem [resolvable:$true] %s191_s15  ;;  %s216_s16 = int_to_ptr.vmem [resolvable:$true] %s215_s16 }
  0x7e   :  { %s8858_s18 = scalar_lea.hbm %s9499_s24, 2048 }
  0x7f   :  { %p8859_p10 = scmp.ne.s32.totalorder %s9499_s24, %s8858_s18  ;;  %p8862_p11 = scmp.lt.u32.totalorder %s8858_s18, %s9499_s24 }
  0x81   :  { %p8864_p12 = pnand %p8862_p11, %p8859_p10 }
  0x83   :  { %8867 = shalt.err (!%p8864_p12)
}
  0x84   :  { %s8868_s22 = scalar_lea.vmem %s192_s15, 2048  ;;  %p8873_p0 = scmp.lt.s32.totalorder %s192_s15, %s192_s15 }
  0x85   :  { %p8869_p13 = scmp.ne.s32.totalorder %s192_s15, %s8868_s22  ;;  %p8874_p1 = scmp.lt.s32.totalorder %s8868_s22, %s8868_s22 }
  0x87   :  { %p8875_p2 = por %p8874_p1, %p8873_p0 }
  0x89   :  { %p8876_p3 = pnand %p8875_p2, %p8869_p13 }
  0x8b   :  { %8879 = shalt.err (!%p8876_p3)
}
  0x8c   :  { %197 = dma.hbm_to_vmem [thread:$0]  %s9499_s24, 2048, %s192_s15, [#allocation15], %s9411_s7, %s9411_s7, %s9412_s13  }
  0x8d   :  { %s8880_s3 = scalar_lea.hbm %s9509_s6, 1024 }
  0x8e   :  { %p8881_p4 = scmp.ne.s32.totalorder %s9509_s6, %s8880_s3  ;;  %p8884_p5 = scmp.lt.u32.totalorder %s8880_s3, %s9509_s6 }
  0x90   :  { %p8886_p6 = pnand %p8884_p5, %p8881_p4 }
  0x92   :  { %8889 = shalt.err (!%p8886_p6)
}
  0x93   :  { %s8890_s23 = scalar_lea.vmem %s216_s16, 1024  ;;  %p8895_p8 = scmp.lt.s32.totalorder %s216_s16, %s216_s16 }
  0x94   :  { %p8891_p7 = scmp.ne.s32.totalorder %s216_s16, %s8890_s23  ;;  %p8896_p9 = scmp.lt.s32.totalorder %s8890_s23, %s8890_s23 }
  0x96   :  { %p8897_p10 = por %p8896_p9, %p8895_p8 }
  0x98   :  { %p8898_p11 = pnand %p8897_p10, %p8891_p7 }
  0x9a   :  { %8901 = shalt.err (!%p8898_p11)
}
  0x9b   :  { %221 = dma.hbm_to_vmem [thread:$0]  %s9509_s6, 1024, %s216_s16, [#allocation18], %s9411_s7, %s9411_s7, %s9412_s13  }
  0x9c   :  { %s9415_s24 = smov [#allocation20]   ;;  %s9416_s28 = smov [#allocation23]  }
  0x9d   :  { %s243_s26 = sshll.u32 %s9415_s24, 4  ;;  %s267_s1 = sshll.u32 %s9416_s28, 4  ;;  %s244_s26 = int_to_ptr.vmem [resolvable:$true] %s243_s26  ;;  %s268_s1 = int_to_ptr.vmem [resolvable:$true] %s267_s1 }
  0x9e   :  { %s8902_s2 = scalar_lea.hbm %s9529_s4, 768 }
  0x9f   :  { %p8903_p12 = scmp.ne.s32.totalorder %s9529_s4, %s8902_s2  ;;  %p8906_p13 = scmp.lt.u32.totalorder %s8902_s2, %s9529_s4 }
  0xa1   :  { %p8908_p0 = pnand %p8906_p13, %p8903_p12 }
  0xa3   :  { %8911 = shalt.err (!%p8908_p0)
}
  0xa4   :  { %s8912_s10 = scalar_lea.vmem %s244_s26, 768  ;;  %p8917_p2 = scmp.lt.s32.totalorder %s244_s26, %s244_s26 }
  0xa5   :  { %p8913_p1 = scmp.ne.s32.totalorder %s244_s26, %s8912_s10  ;;  %p8918_p3 = scmp.lt.s32.totalorder %s8912_s10, %s8912_s10 }
  0xa7   :  { %p8919_p4 = por %p8918_p3, %p8917_p2 }
  0xa9   :  { %p8920_p5 = pnand %p8919_p4, %p8913_p1 }
  0xab   :  { %8923 = shalt.err (!%p8920_p5)
}
  0xac   :  { %249 = dma.hbm_to_vmem [thread:$0]  %s9529_s4, 768, %s244_s26, [#allocation21], %s9411_s7, %s9411_s7, %s9412_s13  }
  0xad   :  { %s8924_s6 = scalar_lea.hbm %s9539_s20, 1024 }
  0xae   :  { %p8925_p6 = scmp.ne.s32.totalorder %s9539_s20, %s8924_s6  ;;  %p8928_p7 = scmp.lt.u32.totalorder %s8924_s6, %s9539_s20 }
  0xb0   :  { %p8930_p8 = pnand %p8928_p7, %p8925_p6 }
  0xb2   :  { %8933 = shalt.err (!%p8930_p8)
}
  0xb3   :  { %s8934_s11 = scalar_lea.vmem %s268_s1, 1024  ;;  %p8939_p10 = scmp.lt.s32.totalorder %s268_s1, %s268_s1 }
  0xb4   :  { %p8935_p9 = scmp.ne.s32.totalorder %s268_s1, %s8934_s11  ;;  %p8940_p11 = scmp.lt.s32.totalorder %s8934_s11, %s8934_s11 }
  0xb6   :  { %p8941_p12 = por %p8940_p11, %p8939_p10 }
  0xb8   :  { %p8942_p13 = pnand %p8941_p12, %p8935_p9 }
  0xba   :  { %8945 = shalt.err (!%p8942_p13)
}
  0xbb   :  { %273 = dma.hbm_to_vmem [thread:$0]  %s9539_s20, 1024, %s268_s1, [#allocation24], %s9411_s7, %s9411_s7, %s9412_s13  }
  0xbc   :  { %s9417_s4 = smov [#allocation26]   ;;  %s9418_s15 = smov [#allocation29]  }
  0xbd   :  { %s297_s21 = sshll.u32 %s9417_s4, 4  ;;  %s321_s0 = sshll.u32 %s9418_s15, 4  ;;  %s298_s21 = int_to_ptr.vmem [resolvable:$true] %s297_s21  ;;  %s322_s0 = int_to_ptr.vmem [resolvable:$true] %s321_s0 }
  0xbe   :  { %s8946_s16 = scalar_lea.hbm %s9564_s29, 256 }
  0xbf   :  { %p8947_p0 = scmp.ne.s32.totalorder %s9564_s29, %s8946_s16  ;;  %p8950_p1 = scmp.lt.u32.totalorder %s8946_s16, %s9564_s29 }
  0xc1   :  { %p8952_p2 = pnand %p8950_p1, %p8947_p0 }
  0xc3   :  { %8955 = shalt.err (!%p8952_p2)
}
  0xc4   :  { %s8956_s18 = scalar_lea.vmem %s298_s21, 256  ;;  %p8961_p4 = scmp.lt.s32.totalorder %s298_s21, %s298_s21 }
  0xc5   :  { %p8957_p3 = scmp.ne.s32.totalorder %s298_s21, %s8956_s18  ;;  %p8962_p5 = scmp.lt.s32.totalorder %s8956_s18, %s8956_s18 }
  0xc7   :  { %p8963_p6 = por %p8962_p5, %p8961_p4 }
  0xc9   :  { %p8964_p7 = pnand %p8963_p6, %p8957_p3 }
  0xcb   :  { %8967 = shalt.err (!%p8964_p7)
}
  0xcc   :  { %303 = dma.hbm_to_vmem [thread:$0]  %s9564_s29, 256, %s298_s21, [#allocation27], %s9411_s7, %s9411_s7, %s9412_s13  }
  0xcd   :  { %s8968_s20 = scalar_lea.hbm %s9574_s8, 1024 }
  0xce   :  { %p8969_p8 = scmp.ne.s32.totalorder %s9574_s8, %s8968_s20  ;;  %p8972_p9 = scmp.lt.u32.totalorder %s8968_s20, %s9574_s8 }
  0xd0   :  { %p8974_p10 = pnand %p8972_p9, %p8969_p8 }
  0xd2   :  { %8977 = shalt.err (!%p8974_p10)
}
  0xd3   :  { %s8978_s22 = scalar_lea.vmem %s322_s0, 1024  ;;  %p8983_p12 = scmp.lt.s32.totalorder %s322_s0, %s322_s0 }
  0xd4   :  { %p8979_p11 = scmp.ne.s32.totalorder %s322_s0, %s8978_s22  ;;  %p8984_p13 = scmp.lt.s32.totalorder %s8978_s22, %s8978_s22 }
  0xd6   :  { %p8985_p0 = por %p8984_p13, %p8983_p12 }
  0xd8   :  { %p8986_p1 = pnand %p8985_p0, %p8979_p11 }
  0xda   :  { %8989 = shalt.err (!%p8986_p1)
}
  0xdb   :  { %327 = dma.hbm_to_vmem [thread:$0]  %s9574_s8, 1024, %s322_s0, [#allocation30], %s9411_s7, %s9411_s7, %s9412_s13  }
  0xdc   :  { %s9419_s29 = smov [#allocation32]   ;;  %s9420_s23 = smov [#allocation35]  }
  0xdd   :  { %s349_s3 = sshll.u32 %s9419_s29, 4  ;;  %s373_s24 = sshll.u32 %s9420_s23, 4  ;;  %s350_s3 = int_to_ptr.vmem [resolvable:$true] %s349_s3  ;;  %s374_s24 = int_to_ptr.vmem [resolvable:$true] %s373_s24 }
  0xde   :  { %s8990_s26 = scalar_lea.hbm %s9594_s27, 2048 }
  0xdf   :  { %p8991_p2 = scmp.ne.s32.totalorder %s9594_s27, %s8990_s26  ;;  %p8994_p3 = scmp.lt.u32.totalorder %s8990_s26, %s9594_s27 }
  0xe1   :  { %p8996_p4 = pnand %p8994_p3, %p8991_p2 }
  0xe3   :  { %8999 = shalt.err (!%p8996_p4)
}
  0xe4   :  { %s9000_s28 = scalar_lea.vmem %s350_s3, 2048  ;;  %p9005_p6 = scmp.lt.s32.totalorder %s350_s3, %s350_s3 }
  0xe5   :  { %p9001_p5 = scmp.ne.s32.totalorder %s350_s3, %s9000_s28  ;;  %p9006_p7 = scmp.lt.s32.totalorder %s9000_s28, %s9000_s28 }
  0xe7   :  { %p9007_p8 = por %p9006_p7, %p9005_p6 }
  0xe9   :  { %p9008_p9 = pnand %p9007_p8, %p9001_p5 }
  0xeb   :  { %9011 = shalt.err (!%p9008_p9)
}
  0xec   :  { %355 = dma.hbm_to_vmem [thread:$0]  %s9594_s27, 2048, %s350_s3, [#allocation33], %s9411_s7, %s9411_s7, %s9412_s13  }
  0xed   :  { %s9012_s8 = scalar_lea.hbm %s9604_s12, 1024 }
  0xee   :  { %p9013_p10 = scmp.ne.s32.totalorder %s9604_s12, %s9012_s8  ;;  %p9016_p11 = scmp.lt.u32.totalorder %s9012_s8, %s9604_s12 }
  0xf0   :  { %p9018_p12 = pnand %p9016_p11, %p9013_p10 }
  0xf2   :  { %9021 = shalt.err (!%p9018_p12)
}
  0xf3   :  { %s9022_s1 = scalar_lea.vmem %s374_s24, 1024  ;;  %p9027_p0 = scmp.lt.s32.totalorder %s374_s24, %s374_s24 }
  0xf4   :  { %p9023_p13 = scmp.ne.s32.totalorder %s374_s24, %s9022_s1  ;;  %p9028_p1 = scmp.lt.s32.totalorder %s9022_s1, %s9022_s1 }
  0xf6   :  { %p9029_p2 = por %p9028_p1, %p9027_p0 }
  0xf8   :  { %p9030_p3 = pnand %p9029_p2, %p9023_p13 }
  0xfa   :  { %9033 = shalt.err (!%p9030_p3)
}
  0xfb   :  { %379 = dma.hbm_to_vmem [thread:$0]  %s9604_s12, 1024, %s374_s24, [#allocation36], %s9411_s7, %s9411_s7, %s9412_s13  }
  0xfc   :  { %s9421_s27 = smov [#allocation2]   ;;  %s9422_s10 = smov [#allocation7]  }
  0xfd   :  { %s103_s2 = sshll.u32 %s9421_s27, 4  ;;  %s125_s6 = sshll.u32 %s9422_s10, 4  ;;  %s104_s2 = int_to_ptr.vmem [resolvable:$true] %s103_s2  ;;  %s126_s6 = int_to_ptr.vmem [resolvable:$true] %s125_s6 }
  0xfe   :  { %s9034_s11 = scalar_lea.hbm %s9449_s9, 256 }
  0xff   :  { %p9035_p4 = scmp.ne.s32.totalorder %s9449_s9, %s9034_s11  ;;  %p9038_p5 = scmp.lt.u32.totalorder %s9034_s11, %s9449_s9 }
 0x101   :  { %p9040_p6 = pnand %p9038_p5, %p9035_p4 }
 0x103   :  { %9043 = shalt.err (!%p9040_p6)
}
 0x104   :  { %s9044_s4 = scalar_lea.vmem %s104_s2, 256  ;;  %p9049_p8 = scmp.lt.s32.totalorder %s104_s2, %s104_s2 }
 0x105   :  { %p9045_p7 = scmp.ne.s32.totalorder %s104_s2, %s9044_s4  ;;  %p9050_p9 = scmp.lt.s32.totalorder %s9044_s4, %s9044_s4 }
 0x107   :  { %p9051_p10 = por %p9050_p9, %p9049_p8 }
 0x109   :  { %p9052_p11 = pnand %p9051_p10, %p9045_p7 }
 0x10b   :  { %9055 = shalt.err (!%p9052_p11)
}
 0x10c   :  { %109 = dma.hbm_to_vmem [thread:$0]  %s9449_s9, 256, %s104_s2, [#allocation3], %s9411_s7, %s9411_s7, %s9412_s13  }
 0x10d   :  { %s9056_s12 = scalar_lea.hbm %s9459_s17, 256 }
 0x10e   :  { %p9057_p12 = scmp.ne.s32.totalorder %s9459_s17, %s9056_s12  ;;  %p9060_p13 = scmp.lt.u32.totalorder %s9056_s12, %s9459_s17 }
 0x110   :  { %p9062_p0 = pnand %p9060_p13, %p9057_p12 }
 0x112   :  { %9065 = shalt.err (!%p9062_p0)
}
 0x113   :  { %s9066_s21 = scalar_lea.vmem %s126_s6, 256  ;;  %p9071_p2 = scmp.lt.s32.totalorder %s126_s6, %s126_s6 }
 0x114   :  { %p9067_p1 = scmp.ne.s32.totalorder %s126_s6, %s9066_s21  ;;  %p9072_p3 = scmp.lt.s32.totalorder %s9066_s21, %s9066_s21 }
 0x116   :  { %p9073_p4 = por %p9072_p3, %p9071_p2 }
 0x118   :  { %p9074_p5 = pnand %p9073_p4, %p9067_p1 }
 0x11a   :  { %9077 = shalt.err (!%p9074_p5)
}
 0x11b   :  { %131 = dma.hbm_to_vmem [thread:$0]  %s9459_s17, 256, %s126_s6, [#allocation6], %s9411_s7, %s9411_s7, %s9412_s13  }
 0x11c   :  { %s9423_s9 = smov [#allocation10]   ;;  %s9424_s0 = smov [#allocation13]  }
 0x11d   :  { %s149_s15 = sshll.u32 %s9423_s9, 4  ;;  %s179_s16 = sshll.u32 %s9424_s0, 4  ;;  %s150_s15 = int_to_ptr.vmem [resolvable:$true] %s149_s15  ;;  %s180_s16 = int_to_ptr.vmem [resolvable:$true] %s179_s16 }
 0x11e   :  { %s9078_s18 = scalar_lea.hbm %s9469_s25, 768 }
 0x11f   :  { %p9079_p6 = scmp.ne.s32.totalorder %s9469_s25, %s9078_s18  ;;  %p9082_p7 = scmp.lt.u32.totalorder %s9078_s18, %s9469_s25 }
 0x121   :  { %p9084_p8 = pnand %p9082_p7, %p9079_p6 }
 0x123   :  { %9087 = shalt.err (!%p9084_p8)
}
 0x124   :  { %s9088_s20 = scalar_lea.vmem %s150_s15, 768  ;;  %p9093_p10 = scmp.lt.s32.totalorder %s150_s15, %s150_s15 }
 0x125   :  { %p9089_p9 = scmp.ne.s32.totalorder %s150_s15, %s9088_s20  ;;  %p9094_p11 = scmp.lt.s32.totalorder %s9088_s20, %s9088_s20 }
 0x127   :  { %p9095_p12 = por %p9094_p11, %p9093_p10 }
 0x129   :  { %p9096_p13 = pnand %p9095_p12, %p9089_p9 }
 0x12b   :  { %9099 = shalt.err (!%p9096_p13)
}
 0x12c   :  { %s11676_s17 = sld [smem:[#allocation59_spill]] }
 0x12d   :  { %155 = dma.hbm_to_vmem [thread:$0]  %s9469_s25, 768, %s150_s15, [#allocation9], %s9411_s7, %s9411_s7, %s9412_s13  }
 0x132   :  { %s9100_s22 = scalar_lea.hbm %s11676_s17, 2048 }
 0x133   :  { %p9101_p0 = scmp.ne.s32.totalorder %s11676_s17, %s9100_s22  ;;  %p9104_p1 = scmp.lt.u32.totalorder %s9100_s22, %s11676_s17 }
 0x135   :  { %p9106_p2 = pnand %p9104_p1, %p9101_p0 }
 0x137   :  { %9109 = shalt.err (!%p9106_p2)
}
 0x138   :  { %s9110_s29 = scalar_lea.vmem %s180_s16, 2048  ;;  %p9115_p4 = scmp.lt.s32.totalorder %s180_s16, %s180_s16 }
 0x139   :  { %p9111_p3 = scmp.ne.s32.totalorder %s180_s16, %s9110_s29  ;;  %p9116_p5 = scmp.lt.s32.totalorder %s9110_s29, %s9110_s29 }
 0x13b   :  { %p9117_p6 = por %p9116_p5, %p9115_p4 }
 0x13d   :  { %p9118_p7 = pnand %p9117_p6, %p9111_p3 }
 0x13f   :  { %9121 = shalt.err (!%p9118_p7)
}
 0x140   :  { %s11677_s3 = sld [smem:[#allocation60_spill]]  ;;  %s9425_s25 = smov [#allocation16]  }
 0x141   :  { %185 = dma.hbm_to_vmem [thread:$0]  %s11676_s17, 2048, %s180_s16, [#allocation12], %s9411_s7, %s9411_s7, %s9412_s13  }
 0x142   :  { %s203_s23 = sshll.u32 %s9425_s25, 4  ;;  %s9426_s24 = smov [#allocation19]   ;;  %s204_s23 = int_to_ptr.vmem [resolvable:$true] %s203_s23 }
 0x143   :  { %s231_s26 = sshll.u32 %s9426_s24, 4  ;;  %s232_s26 = int_to_ptr.vmem [resolvable:$true] %s231_s26 }
 0x146   :  { %s9122_s28 = scalar_lea.hbm %s11677_s3, 1024 }
 0x147   :  { %p9123_p8 = scmp.ne.s32.totalorder %s11677_s3, %s9122_s28  ;;  %p9126_p9 = scmp.lt.u32.totalorder %s9122_s28, %s11677_s3 }
 0x149   :  { %p9128_p10 = pnand %p9126_p9, %p9123_p8 }
 0x14b   :  { %9131 = shalt.err (!%p9128_p10)
}
 0x14c   :  { %s9132_s8 = scalar_lea.vmem %s204_s23, 1024  ;;  %p9137_p12 = scmp.lt.s32.totalorder %s204_s23, %s204_s23 }
 0x14d   :  { %p9133_p11 = scmp.ne.s32.totalorder %s204_s23, %s9132_s8  ;;  %p9138_p13 = scmp.lt.s32.totalorder %s9132_s8, %s9132_s8 }
 0x14f   :  { %p9139_p0 = por %p9138_p13, %p9137_p12 }
 0x151   :  { %p9140_p1 = pnand %p9139_p0, %p9133_p11 }
 0x153   :  { %9143 = shalt.err (!%p9140_p1)
}
 0x154   :  { %s11678_s1 = sld [smem:[#allocation63_spill]] }
 0x155   :  { %209 = dma.hbm_to_vmem [thread:$0]  %s11677_s3, 1024, %s204_s23, [#allocation15], %s9411_s7, %s9411_s7, %s9412_s13  }
 0x15a   :  { %s9144_s27 = scalar_lea.hbm %s11678_s1, 768 }
 0x15b   :  { %p9145_p2 = scmp.ne.s32.totalorder %s11678_s1, %s9144_s27  ;;  %p9148_p3 = scmp.lt.u32.totalorder %s9144_s27, %s11678_s1 }
 0x15d   :  { %p9150_p4 = pnand %p9148_p3, %p9145_p2 }
 0x15f   :  { %9153 = shalt.err (!%p9150_p4)
}
 0x160   :  { %s9154_s2 = scalar_lea.vmem %s232_s26, 768  ;;  %p9159_p6 = scmp.lt.s32.totalorder %s232_s26, %s232_s26 }
 0x161   :  { %p9155_p5 = scmp.ne.s32.totalorder %s232_s26, %s9154_s2  ;;  %p9160_p7 = scmp.lt.s32.totalorder %s9154_s2, %s9154_s2 }
 0x163   :  { %p9161_p8 = por %p9160_p7, %p9159_p6 }
 0x165   :  { %p9162_p9 = pnand %p9161_p8, %p9155_p5 }
 0x167   :  { %9165 = shalt.err (!%p9162_p9)
}
 0x168   :  { %s11679_s10 = sld [smem:[#allocation64_spill]]  ;;  %s9427_s6 = smov [#allocation22]  }
 0x169   :  { %237 = dma.hbm_to_vmem [thread:$0]  %s11678_s1, 768, %s232_s26, [#allocation18], %s9411_s7, %s9411_s7, %s9412_s13  }
 0x16a   :  { %s255_s11 = sshll.u32 %s9427_s6, 4  ;;  %s9428_s4 = smov [#allocation25]   ;;  %s256_s11 = int_to_ptr.vmem [resolvable:$true] %s255_s11 }
 0x16b   :  { %s285_s12 = sshll.u32 %s9428_s4, 4  ;;  %s286_s12 = int_to_ptr.vmem [resolvable:$true] %s285_s12 }
 0x16e   :  { %s9166_s21 = scalar_lea.hbm %s11679_s10, 1024 }
 0x16f   :  { %p9167_p10 = scmp.ne.s32.totalorder %s11679_s10, %s9166_s21  ;;  %p9170_p11 = scmp.lt.u32.totalorder %s9166_s21, %s11679_s10 }
 0x171   :  { %p9172_p12 = pnand %p9170_p11, %p9167_p10 }
 0x173   :  { %9175 = shalt.err (!%p9172_p12)
}
 0x174   :  { %s9176_s9 = scalar_lea.vmem %s256_s11, 1024  ;;  %p9181_p0 = scmp.lt.s32.totalorder %s256_s11, %s256_s11 }
 0x175   :  { %p9177_p13 = scmp.ne.s32.totalorder %s256_s11, %s9176_s9  ;;  %p9182_p1 = scmp.lt.s32.totalorder %s9176_s9, %s9176_s9 }
 0x177   :  { %p9183_p2 = por %p9182_p1, %p9181_p0 }
 0x179   :  { %p9184_p3 = pnand %p9183_p2, %p9177_p13 }
 0x17b   :  { %9187 = shalt.err (!%p9184_p3)
}
 0x17c   :  { %s11680_s15 = sld [smem:[#allocation68_spill]] }
 0x17d   :  { %261 = dma.hbm_to_vmem [thread:$0]  %s11679_s10, 1024, %s256_s11, [#allocation21], %s9411_s7, %s9411_s7, %s9412_s13  }
 0x182   :  { %s9188_s0 = scalar_lea.hbm %s11680_s15, 512 }
 0x183   :  { %p9189_p4 = scmp.ne.s32.totalorder %s11680_s15, %s9188_s0  ;;  %p9192_p5 = scmp.lt.u32.totalorder %s9188_s0, %s11680_s15 }
 0x185   :  { %p9194_p6 = pnand %p9192_p5, %p9189_p4 }
 0x187   :  { %9197 = shalt.err (!%p9194_p6)
}
 0x188   :  { %s9198_s16 = scalar_lea.vmem %s286_s12, 512  ;;  %p9203_p8 = scmp.lt.s32.totalorder %s286_s12, %s286_s12 }
 0x189   :  { %p9199_p7 = scmp.ne.s32.totalorder %s286_s12, %s9198_s16  ;;  %p9204_p9 = scmp.lt.s32.totalorder %s9198_s16, %s9198_s16 }
 0x18b   :  { %p9205_p10 = por %p9204_p9, %p9203_p8 }
 0x18d   :  { %p9206_p11 = pnand %p9205_p10, %p9199_p7 }
 0x18f   :  { %9209 = shalt.err (!%p9206_p11)
}
 0x190   :  { %s11681_s18 = sld [smem:[#allocation69_spill]]  ;;  %s9429_s20 = smov [#allocation28]  }
 0x191   :  { %291 = dma.hbm_to_vmem [thread:$0]  %s11680_s15, 512, %s286_s12, [#allocation24], %s9411_s7, %s9411_s7, %s9412_s13  }
 0x192   :  { %s309_s17 = sshll.u32 %s9429_s20, 4  ;;  %s9430_s22 = smov [#allocation31]   ;;  %s310_s17 = int_to_ptr.vmem [resolvable:$true] %s309_s17 }
 0x193   :  { %s333_s29 = sshll.u32 %s9430_s22, 4  ;;  %s334_s29 = int_to_ptr.vmem [resolvable:$true] %s333_s29 }
 0x196   :  { %s9210_s3 = scalar_lea.hbm %s11681_s18, 256 }
 0x197   :  { %p9211_p12 = scmp.ne.s32.totalorder %s11681_s18, %s9210_s3  ;;  %p9214_p13 = scmp.lt.u32.totalorder %s9210_s3, %s11681_s18 }
 0x199   :  { %p9216_p0 = pnand %p9214_p13, %p9211_p12 }
 0x19b   :  { %9219 = shalt.err (!%p9216_p0)
}
 0x19c   :  { %s9220_s25 = scalar_lea.vmem %s310_s17, 256  ;;  %p9225_p2 = scmp.lt.s32.totalorder %s310_s17, %s310_s17 }
 0x19d   :  { %p9221_p1 = scmp.ne.s32.totalorder %s310_s17, %s9220_s25  ;;  %p9226_p3 = scmp.lt.s32.totalorder %s9220_s25, %s9220_s25 }
 0x19f   :  { %p9227_p4 = por %p9226_p3, %p9225_p2 }
 0x1a1   :  { %p9228_p5 = pnand %p9227_p4, %p9221_p1 }
 0x1a3   :  { %9231 = shalt.err (!%p9228_p5)
}
 0x1a4   :  { %s11682_s23 = sld [smem:[#allocation70_spill]] }
 0x1a5   :  { %315 = dma.hbm_to_vmem [thread:$0]  %s11681_s18, 256, %s310_s17, [#allocation27], %s9411_s7, %s9411_s7, %s9412_s13  }
 0x1aa   :  { %s9232_s24 = scalar_lea.hbm %s11682_s23, 1024 }
 0x1ab   :  { %p9233_p6 = scmp.ne.s32.totalorder %s11682_s23, %s9232_s24  ;;  %p9236_p7 = scmp.lt.u32.totalorder %s9232_s24, %s11682_s23 }
 0x1ad   :  { %p9238_p8 = pnand %p9236_p7, %p9233_p6 }
 0x1af   :  { %9241 = shalt.err (!%p9238_p8)
}
 0x1b0   :  { %s9242_s26 = scalar_lea.vmem %s334_s29, 1024  ;;  %p9247_p10 = scmp.lt.s32.totalorder %s334_s29, %s334_s29 }
 0x1b1   :  { %p9243_p9 = scmp.ne.s32.totalorder %s334_s29, %s9242_s26  ;;  %p9248_p11 = scmp.lt.s32.totalorder %s9242_s26, %s9242_s26 }
 0x1b3   :  { %p9249_p12 = por %p9248_p11, %p9247_p10 }
 0x1b5   :  { %p9250_p13 = pnand %p9249_p12, %p9243_p9 }
 0x1b7   :  { %9253 = shalt.err (!%p9250_p13)
}
 0x1b8   :  { %s11683_s28 = sld [smem:[#allocation73_spill]]  ;;  %s9431_s8 = smov [#allocation34]  }
 0x1b9   :  { %339 = dma.hbm_to_vmem [thread:$0]  %s11682_s23, 1024, %s334_s29, [#allocation30], %s9411_s7, %s9411_s7, %s9412_s13  }
 0x1ba   :  { %s361_s1 = sshll.u32 %s9431_s8, 4  ;;  %s9432_s27 = smov [#allocation37]   ;;  %s362_s1 = int_to_ptr.vmem [resolvable:$true] %s361_s1 }
 0x1bb   :  { %s385_s2 = sshll.u32 %s9432_s27, 4  ;;  %s386_s2 = int_to_ptr.vmem [resolvable:$true] %s385_s2 }
 0x1be   :  { %s9254_s10 = scalar_lea.hbm %s11683_s28, 2048 }
 0x1bf   :  { %p9255_p0 = scmp.ne.s32.totalorder %s11683_s28, %s9254_s10  ;;  %p9258_p1 = scmp.lt.u32.totalorder %s9254_s10, %s11683_s28 }
 0x1c1   :  { %p9260_p2 = pnand %p9258_p1, %p9255_p0 }
 0x1c3   :  { %9263 = shalt.err (!%p9260_p2)
}
 0x1c4   :  { %s9264_s6 = scalar_lea.vmem %s362_s1, 2048  ;;  %p9269_p4 = scmp.lt.s32.totalorder %s362_s1, %s362_s1 }
 0x1c5   :  { %p9265_p3 = scmp.ne.s32.totalorder %s362_s1, %s9264_s6  ;;  %p9270_p5 = scmp.lt.s32.totalorder %s9264_s6, %s9264_s6 }
 0x1c7   :  { %p9271_p6 = por %p9270_p5, %p9269_p4 }
 0x1c9   :  { %p9272_p7 = pnand %p9271_p6, %p9265_p3 }
 0x1cb   :  { %9275 = shalt.err (!%p9272_p7)
}
 0x1cc   :  { %s11684_s11 = sld [smem:[#allocation74_spill]] }
 0x1cd   :  { %367 = dma.hbm_to_vmem [thread:$0]  %s11683_s28, 2048, %s362_s1, [#allocation33], %s9411_s7, %s9411_s7, %s9412_s13  }
 0x1d2   :  { %s9276_s4 = scalar_lea.hbm %s11684_s11, 1024 }
 0x1d3   :  { %p9277_p8 = scmp.ne.s32.totalorder %s11684_s11, %s9276_s4  ;;  %p9280_p9 = scmp.lt.u32.totalorder %s9276_s4, %s11684_s11 }
 0x1d5   :  { %p9282_p10 = pnand %p9280_p9, %p9277_p8 }
 0x1d7   :  { %9285 = shalt.err (!%p9282_p10)
}
 0x1d8   :  { %s9286_s12 = scalar_lea.vmem %s386_s2, 1024  ;;  %p9291_p12 = scmp.lt.s32.totalorder %s386_s2, %s386_s2 }
 0x1d9   :  { %p9287_p11 = scmp.ne.s32.totalorder %s386_s2, %s9286_s12  ;;  %p9292_p13 = scmp.lt.s32.totalorder %s9286_s12, %s9286_s12 }
 0x1db   :  { %p9293_p0 = por %p9292_p13, %p9291_p12 }
 0x1dd   :  { %p9294_p1 = pnand %p9293_p0, %p9287_p11 }
 0x1df   :  { %9297 = shalt.err (!%p9294_p1)
}
 0x1e0   :  { %391 = dma.hbm_to_vmem [thread:$0]  %s11684_s11, 1024, %s386_s2, [#allocation36], %s9411_s7, %s9411_s7, %s9412_s13  }
 0x1e1   :  { %s9433_s21 = smov [#allocation38]   ;;  %s9298_s15 = scalar_lea.hbm %s9624_s19, 2048 }
 0x1e2   :  { %s401_s9 = sshll.u32 %s9433_s21, 4  ;;  %p9299_p2 = scmp.ne.s32.totalorder %s9624_s19, %s9298_s15  ;;  %s402_s9 = int_to_ptr.vmem [resolvable:$true] %s401_s9 }
 0x1e3   :  { %p9302_p3 = scmp.lt.u32.totalorder %s9298_s15, %s9624_s19 }
 0x1e5   :  { %p9304_p4 = pnand %p9302_p3, %p9299_p2 }
 0x1e7   :  { %9307 = shalt.err (!%p9304_p4)
}
 0x1e8   :  { %s9308_s0 = scalar_lea.vmem %s402_s9, 2048  ;;  %p9313_p6 = scmp.lt.s32.totalorder %s402_s9, %s402_s9 }
 0x1e9   :  { %p9309_p5 = scmp.ne.s32.totalorder %s402_s9, %s9308_s0  ;;  %p9314_p7 = scmp.lt.s32.totalorder %s9308_s0, %s9308_s0 }
 0x1eb   :  { %p9315_p8 = por %p9314_p7, %p9313_p6 }
 0x1ed   :  { %p9316_p9 = pnand %p9315_p8, %p9309_p5 }
 0x1ef   :  { %9319 = shalt.err (!%p9316_p9)
}
 0x1f0   :  { %407 = dma.hbm_to_vmem [thread:$0]  %s9624_s19, 2048, %s402_s9, [#allocation39], %s9411_s7, %s9411_s7, %s9412_s13  }
 0x1f1   :  { %9342 = dma.done.wait [#allocation3], 256  }
 0x1f2   :  { %9343 = vsyncadd [#allocation3], 4294967040 }
 0x1f3   :  { %9344 = dma.done.wait [#allocation6], 384  }
 0x1f4   :  { %9345 = vsyncadd [#allocation6], 4294966912 }
 0x1f5   :  { %9346 = dma.done.wait [#allocation9], 1536  }
 0x1f6   :  { %9347 = vsyncadd [#allocation9], 4294965760 }
 0x1f7   :  { %9348 = dma.done.wait [#allocation12], 3072  }
 0x1f8   :  { %9349 = vsyncadd [#allocation12], 4294964224 }
 0x1f9   :  { %9350 = dma.done.wait [#allocation15], 3072  }
 0x1fa   :  { %9351 = vsyncadd [#allocation15], 4294964224 }
 0x1fb   :  { %9352 = dma.done.wait [#allocation18], 1792  }
 0x1fc   :  { %9353 = vsyncadd [#allocation18], 4294965504 }
 0x1fd   :  { %9354 = dma.done.wait [#allocation21], 1792  }
 0x1fe   :  { %9355 = vsyncadd [#allocation21], 4294965504 }
 0x1ff   :  { %9356 = dma.done.wait [#allocation24], 1536  }
 0x200   :  { %9357 = vsyncadd [#allocation24], 4294965760 }
 0x201   :  { %9358 = dma.done.wait [#allocation27], 512  }
 0x202   :  { %9359 = vsyncadd [#allocation27], 4294966784 }
 0x203   :  { %9360 = dma.done.wait [#allocation30], 2048  }
 0x204   :  { %9361 = vsyncadd [#allocation30], 4294965248 }
 0x205   :  { %9362 = dma.done.wait [#allocation33], 4096  }
 0x206   :  { %9363 = vsyncadd [#allocation33], 4294963200 }
 0x207   :  { %9364 = dma.done.wait [#allocation36], 2048  }
 0x208   :  { %9365 = vsyncadd [#allocation36], 4294965248 }
 0x209   :  { %9366 = dma.done.wait [#allocation39], 2048  }
 0x20a   :  { %9367 = vsyncadd [#allocation39], 4294965248  ;;  %s11685_s19 = sld [smem:[#allocation55_spill]]  ;;  %v9434_v0 = vmov 0   ;;  %v483_v2 = vld [vmem:[#allocation5] sm:$0xff]  ;;  %v555_v4 = vld [vmem:[#allocation8] sm:$0xff] }
 0x20b   :  { %8633 = vset.pattern.permute.xlu1 %v9434_v0  ;;  %vm597_vm0 = vcmask 523264   ;;  %v564_v5 = vld [vmem:[#allocation10 + $0x18] sm:$0xff]  ;;  %v561_v6 = vld [vmem:[#allocation10] sm:$0xff]  ;;  %s11686_s16 = sld [smem:[#allocation57_spill]]  ;;  %v562_v7 = vld [vmem:[#allocation10 + $0x8] sm:$0xff]  ;;  %s11687_s18 = sld [smem:[#allocation58_spill]] }
 0x20c   :  { %7423 = vmatprep.mubr.msk.f32.mxu0 %vm597_vm0, %v555_v4  ;;  %584 = vperm.xlu1 %8633, %v564_v5   ;;  %v563_v8 = vld [vmem:[#allocation10 + $0x10] sm:$0xff]  ;;  %v566_v9 = vld [vmem:[#allocation10 + $0x28] sm:$0xff]  ;;  %v915_v11 = vld [vmem:[#allocation11 + $0x10] sm:$0xff]  ;;  %vm711_vm1 = vcmask 64512   ;;  %vm801_vm3 = vcmask 130048   ;;  %s11713_s20 = sld [smem:[#allocation56_spill]] }
 0x20d   :  { %v913_v10 = vld [vmem:[#allocation11] sm:$0xff]  ;;  %v919_v13 = vld [vmem:[#allocation11 + $0x30] sm:$0xff]  ;;  %v517_v29 = vld [vmem:[#allocation2] sm:$0xff]  ;;  %s11737_s17 = sld [smem:[#allocation61_spill]]  ;;  %s11738_s22 = sld [smem:[#allocation62_spill]] }
 0x20e   :  { %v917_v12 = vld [vmem:[#allocation11 + $0x20] sm:$0xff]  ;;  %v519_v30 = vld [vmem:[#allocation7] sm:$0xff]  ;;  %v520_v34 = vld [vmem:[#allocation7 + $0x8] sm:$0xff]  ;;  %s11739_s29 = sld [smem:[#allocation65_spill]]  ;;  %s11740_s3 = sld [smem:[#allocation66_spill]] }
 0x20f   :  { %v521_v31 = vadd.f32 %v519_v30, %v517_v29  ;;  %v518_v33 = vld [vmem:[#allocation2 + $0x8] sm:$0xff]  ;;  %v556_v40 = vld [vmem:[#allocation8 + $0x8] sm:$0xff]  ;;  %v557_v41 = vld [vmem:[#allocation8 + $0x10] sm:$0xff]  ;;  %s11741_s25 = sld [smem:[#allocation67_spill]]  ;;  %s11805_s23 = sld [smem:[#allocation71_spill]] }
 0x210   :  { %v482_v1 = vld [vmem:[%s11685_s19] sm:$0xff]  ;;  %569 = vperm.xlu1 %8633, %v561_v6   ;;  %v522_v36 = vadd.f32 %v520_v34, %v518_v33  ;;  %v559_v43 = vld [vmem:[#allocation8 + $0x20] sm:$0xff]  ;;  %v560_v44 = vld [vmem:[#allocation8 + $0x28] sm:$0xff]  ;;  %s11806_s24 = sld [smem:[#allocation72_spill]]  ;;  %s11847_s26 = sld [smem:[#allocation75_spill]] }
 0x211   :  { %v484_v3 = vadd.f32 %v483_v2, %v482_v1  ;;  %v1169_v14 = vld [vmem:[%s11686_s16] sm:$0xff]  ;;  %v1171_v16 = vld [vmem:[%s11686_s16 + $0x10] sm:$0xff]  ;;  %vm9888_vm2 = vmpackc.low %vm711_vm1, %vm711_vm1 }
 0x212   :  { %v1225_v15 = vld [vmem:[%s11687_s18] sm:$0xff]  ;;  %v1227_v17 = vld [vmem:[%s11687_s18 + $0x10] sm:$0xff]  ;;  %vm10142_vm4 = vmpackc.low %vm801_vm3, %vm801_vm3 }
 0x213   :  { %485 = vxpose.xlu0.b32.start.end [1/1] (short) (narrow) %v484_v3, 64  ;;  %v1173_v18 = vld [vmem:[%s11686_s16 + $0x20] sm:$0xff]  ;;  %v1175_v20 = vld [vmem:[%s11686_s16 + $0x30] sm:$0xff] }
 0x214   :  { %574 = vperm.xlu1 %8633, %v562_v7   ;;  %v1229_v19 = vld [vmem:[%s11687_s18 + $0x20] sm:$0xff]  ;;  %v1231_v21 = vld [vmem:[%s11687_s18 + $0x30] sm:$0xff] }
 0x215   :  { %v558_v42 = vld [vmem:[#allocation8 + $0x18] sm:$0xff]  ;;  %v1306_v45 = vld [vmem:[#allocation14 + $0x48] sm:$0xff] }
 0x23c   :  { %8632 = vset.pattern.permute.xlu0 %v9434_v0 }
 0x258   :  { %579 = vperm.xlu0 %8632, %v563_v8  }
 0x25c   :  { %594 = vperm.xlu0 %8632, %v566_v9  }
 0x260   :  { %923 = vperm.xlu0 %8632, %v913_v10   ;;  %v11701_v10 = vmov 0 }
 0x261   :  { %v11702_v10 = vsel %vm9888_vm2, 4294967295, %v11701_v10 }
 0x262   :  { %11703 = vst [vmem:[#allocation89_spill] sm:$0xff] %v11702_v10 }
 0x264   :  { %933 = vperm.xlu0 %8632, %v915_v11  }
 0x268   :  { %943 = vperm.xlu0 %8632, %v917_v12  }
 0x26c   :  { %953 = vperm.xlu0 %8632, %v919_v13  }
 0x270   :  { %1179 = vperm.xlu0 %8632, %v1169_v14  }
 0x274   :  { %1235 = vperm.xlu0 %8632, %v1225_v15  }
 0x278   :  { %1189 = vperm.xlu0 %8632, %v1171_v16  }
 0x27c   :  { %1245 = vperm.xlu0 %8632, %v1227_v17  }
 0x280   :  { %1199 = vperm.xlu0 %8632, %v1173_v18  }
 0x284   :  { %1255 = vperm.xlu0 %8632, %v1229_v19  }
 0x288   :  { %1209 = vperm.xlu0 %8632, %v1175_v20  }
 0x28b   :  { %v9874_v63 = vpop.permute.xlu1 %584 }
 0x28c   :  { %1265 = vperm.xlu0 %8632, %v1231_v21   ;;  %11697 = vst [vmem:[#allocation85_spill] sm:$0xff] %v9874_v63 }
 0x28f   :  { %v9878_v2 = vpop.permute.xlu1 %569 }
 0x290   :  { %11699 = vst [vmem:[#allocation87_spill] sm:$0xff] %v9878_v2 }
 0x293   :  { %v9811_v22 = vpop.trf.xlu0  ;;  %v9904_v16 = vpop.permute.xlu1 %574 }
 0x294   :  { %11705 = vst [vmem:[#allocation91_spill] sm:$0xff] %v9904_v16 }
 0x297   :  { %v9813_v23 = vpop.trf.xlu0 }
 0x298   :  { %v8145_v24 = vpack.c.bf16 %v9813_v23, %v9811_v22 }
 0x29a   :  { %8146 = vmatprep.subr.bf16.mxu0 %v8145_v24 }
 0x29b   :  { %8148 = vmatpush3.bf16.msra.mxu0 %v8145_v24  ;;  %v9817_v25 = vpop.trf.xlu0 }
 0x29f   :  { %v9819_v26 = vpop.trf.xlu0 }
 0x2a0   :  { %v8149_v27 = vpack.c.bf16 %v9819_v26, %v9817_v25 }
 0x2a2   :  { %8150 = vmatprep.subr.bf16.mxu0 %v8149_v27 }
 0x2a3   :  { %8152 = vmatpush3.bf16.msra.mxu0 %v8149_v27  ;;  %v9823_v28 = vpop.trf.xlu0 }
 0x2a7   :  { %v9825_v32 = vpop.trf.xlu0 }
 0x2a8   :  { %v8153_v35 = vpack.c.bf16 %v9825_v32, %v9823_v28 }
 0x2aa   :  { %8154 = vmatprep.subr.bf16.mxu0 %v8153_v35  ;;  %523 = vxpose.xlu0.b32.start [1/2] (short) (narrow) %v521_v31, 64 }
 0x2ab   :  { %8156 = vmatpush3.bf16.msra.mxu0 %v8153_v35  ;;  %v9829_v37 = vpop.trf.xlu0  ;;  %v1953_v35 = vld [vmem:[#allocation19] sm:$0xff] }
 0x2ae   :  { %524 = vxpose.xlu0.b32.end [2/2] (short) (narrow) %v522_v36, 64  ;;  %v1954_v36 = vld [vmem:[#allocation19 + $0x8] sm:$0xff] }
 0x2af   :  { %v9831_v38 = vpop.trf.xlu0 }
 0x2b0   :  { %v8157_v39 = vpack.c.bf16 %v9831_v38, %v9829_v37 }
 0x2b2   :  { %8158 = vmatprep.subr.bf16.mxu0 %v8157_v39 }
 0x2b3   :  { %8160 = vmatpush3.bf16.msra.mxu0 %v8157_v39  ;;  %v1955_v39 = vld [vmem:[#allocation19 + $0x10] sm:$0xff] }
 0x2b6   :  { %7424 = vmatmul.mubr.msk.f32.vlgmr.msra.gmra.mrb[0].mxu0 %vm597_vm0, %v556_v40  ;;  %v1956_v40 = vld [vmem:[#allocation19 + $0x18] sm:$0xff] }
 0x2b7   :  { %7426 = vmatprep.mubr.msk.f32.mxu0 %vm597_vm0, %v557_v41 }
 0x2ba   :  { %7427 = vmatmul.mubr.msk.f32.gmra.mrb[2].mxu0 %vm597_vm0, %v558_v42 }
 0x2bb   :  { %7429 = vmatprep.mubr.msk.f32.mxu0 %vm597_vm0, %v559_v43 }
 0x2be   :  { %7430 = vmatmul.mubr.msk.f32.gmra.mrb[4].mxu0 %vm597_vm0, %v560_v44 }
 0x2d7   :  { %v9840_v46 = vpop.permute.xlu0 %579 }
 0x2d8   :  { %11688 = vst [vmem:[#allocation76_spill] sm:$0xff] %v9840_v46 }
 0x2db   :  { %v9842_v47 = vpop.permute.xlu0 %594 }
 0x2dc   :  { %11689 = vst [vmem:[#allocation77_spill] sm:$0xff] %v9842_v47 }
 0x2df   :  { %v9844_v48 = vpop.permute.xlu0 %923 }
 0x2e0   :  { %11690 = vst [vmem:[#allocation78_spill] sm:$0xff] %v9844_v48 }
 0x2e3   :  { %v9846_v49 = vpop.permute.xlu0 %933 }
 0x2e4   :  { %11691 = vst [vmem:[#allocation79_spill] sm:$0xff] %v9846_v49 }
 0x2e7   :  { %v9848_v50 = vpop.permute.xlu0 %943 }
 0x2e8   :  { %11692 = vst [vmem:[#allocation80_spill] sm:$0xff] %v9848_v50 }
 0x2eb   :  { %v9850_v51 = vpop.permute.xlu0 %953 }
 0x2ec   :  { %11693 = vst [vmem:[#allocation81_spill] sm:$0xff] %v9850_v51 }
 0x2ef   :  { %1360 = vperm.xlu0 %8632, %v1306_v45   ;;  %v9852_v52 = vpop.permute.xlu0 %1179 }
 0x2f3   :  { %v9854_v53 = vpop.permute.xlu0 %1235 }
 0x2f7   :  { %v9856_v54 = vpop.permute.xlu0 %1189 }
 0x2fb   :  { %v9858_v55 = vpop.permute.xlu0 %1245 }
 0x2ff   :  { %v9860_v56 = vpop.permute.xlu0 %1199 }
 0x303   :  { %v9862_v57 = vpop.permute.xlu0 %1255 }
 0x307   :  { %v9864_v58 = vpop.permute.xlu0 %1209 }
 0x30b   :  { %v9866_v59 = vpop.permute.xlu0 %1265 }
 0x32a   :  { %v9868_v60 = vpop.trf.xlu0 }
 0x32b   :  { %11694 = vst [vmem:[#allocation82_spill] sm:$0xff] %v9868_v60 }
 0x32e   :  { %v9870_v61 = vpop.trf.xlu0 }
 0x32f   :  { %11695 = vst [vmem:[#allocation83_spill] sm:$0xff] %v9870_v61  ;;  %v8223_v11 = vpack.c.bf16 %v9870_v61, %v9868_v60  ;;  %v908_v60 = vld [vmem:[%s11713_s20 + $0x18] sm:$0xff] }
 0x332   :  { %v9872_v62 = vpop.trf.xlu0 }
 0x333   :  { %11696 = vst [vmem:[#allocation84_spill] sm:$0xff] %v9872_v62 }
 0x336   :  { %v9876_v0 = vpop.trf.xlu0 }
 0x337   :  { %11698 = vst [vmem:[#allocation86_spill] sm:$0xff] %v9876_v0  ;;  %v8227_v17 = vpack.c.bf16 %v9876_v0, %v9872_v62  ;;  %v906_v62 = vld [vmem:[%s11713_s20 + $0x8] sm:$0xff]  ;;  %v907_v0 = vld [vmem:[%s11713_s20 + $0x10] sm:$0xff] }
 0x33a   :  { %v9882_v6 = vpop.trf.xlu0 }
 0x33b   :  { %11700 = vst [vmem:[#allocation88_spill] sm:$0xff] %v9882_v6 }
 0x33e   :  { %v9900_v15 = vpop.trf.xlu0 }
 0x33f   :  { %11704 = vst [vmem:[#allocation90_spill] sm:$0xff] %v9900_v15  ;;  %v8231_v20 = vpack.c.bf16 %v9900_v15, %v9882_v6 }
 0x342   :  { %v9909_v19 = vpop.trf.xlu0 }
 0x343   :  { %11706 = vst [vmem:[#allocation92_spill] sm:$0xff] %v9909_v19 }
 0x346   :  { %v9914_v21 = vpop.trf.xlu0 }
 0x347   :  { %11707 = vst [vmem:[#allocation93_spill] sm:$0xff] %v9914_v21  ;;  %v8235_v24 = vpack.c.bf16 %v9914_v21, %v9909_v19 }
 0x389   :  { %v7425_v1 = vpop.f32.mrb[0].mxu0 }
 0x38a   :  { %v682_v3 = vpop.f32.mrb[1].mxu0  ;;  %v688_v18 = vadd.f32 %v7425_v1, %v9904_v16 }
 0x38b   :  { %v683_v4 = vadd.f32 %v682_v3, %v9878_v2 }
 0x38d   :  { %v7428_v5 = vpop.f32.mrb[2].mxu0  ;;  %7436 = vmatprep.mubr.msk.f32.mxu0 %vm711_vm1, %v683_v4 }
 0x38e   :  { %v698_v7 = vadd.f32 %v7428_v5, %v9874_v63  ;;  %v692_v8 = vpop.f32.mrb[3].mxu0 }
 0x38f   :  { %v693_v9 = vadd.f32 %v692_v8, %v9840_v46  ;;  %v565_v8 = vld [vmem:[#allocation10 + $0x20] sm:$0xff] }
 0x391   :  { %v8161_v12 = vpack.c.bf16 %v698_v7, %v693_v9  ;;  %v9894_v13 = vpop.f32.mrb[4].mxu0  ;;  %v914_v9 = vld [vmem:[#allocation11 + $0x8] sm:$0xff] }
 0x392   :  { %v9896_v14 = vpop.f32.mrb[5].mxu0 }
 0x393   :  { %8163 = vmatprep.subr.msk.bf16.mxu0 %vm9888_vm2, %v8161_v12 }
 0x394   :  { %8166 = vmatpush3.bf16.xpose.msk.msra.mxu0 %vm9888_vm2, %v8161_v12  ;;  %v918_v12 = vld [vmem:[#allocation11 + $0x28] sm:$0xff] }
 0x395   :  { %8224 = vmatprep.subr.bf16.mxu0 %v8223_v11 }
 0x39b   :  { %7437 = vmatmul.mubr.msk.f32.vlgmr.msra.gmra.mrb[6].mxu0 %vm711_vm1, %v688_v18  ;;  %v1170_v18 = vld [vmem:[%s11686_s16 + $0x8] sm:$0xff] }
 0x39c   :  { %8226 = vmatpush3.bf16.msra.mxu0 %v8223_v11  ;;  %7562 = vmatprep.mubr.msk.f32.mxu0 %vm597_vm0, %v1953_v35  ;;  %v916_v11 = vld [vmem:[#allocation11 + $0x18] sm:$0xff]  ;;  %v1298_v35 = vld [vmem:[#allocation14 + $0x8] sm:$0xff] }
 0x39d   :  { %8228 = vmatprep.subr.bf16.mxu0 %v8227_v17 }
 0x3a0   :  { %8230 = vmatpush3.bf16.msra.mxu0 %v8227_v17  ;;  %v920_v17 = vld [vmem:[#allocation11 + $0x38] sm:$0xff] }
 0x3a1   :  { %8232 = vmatprep.subr.bf16.mxu0 %v8231_v20 }
 0x3a4   :  { %8234 = vmatpush3.bf16.msra.mxu0 %v8231_v20  ;;  %v1226_v20 = vld [vmem:[%s11687_s18 + $0x8] sm:$0xff] }
 0x3a5   :  { %8236 = vmatprep.subr.bf16.mxu0 %v8235_v24 }
 0x3a8   :  { %8238 = vmatpush3.bf16.msra.mxu0 %v8235_v24  ;;  %v1172_v24 = vld [vmem:[%s11686_s16 + $0x18] sm:$0xff] }
 0x3ab   :  { %7563 = vmatmul.mubr.msk.f32.vlgmr.msra.gmra.mrb[8].mxu0 %vm597_vm0, %v1954_v36  ;;  %v1299_v36 = vld [vmem:[#allocation14 + $0x10] sm:$0xff] }
 0x3ac   :  { %7565 = vmatprep.mubr.msk.f32.mxu0 %vm597_vm0, %v1955_v39  ;;  %v1300_v39 = vld [vmem:[#allocation14 + $0x18] sm:$0xff] }
 0x3af   :  { %7566 = vmatmul.mubr.msk.f32.gmra.mrb[10].mxu0 %vm597_vm0, %v1956_v40  ;;  %v1301_v40 = vld [vmem:[#allocation14 + $0x20] sm:$0xff] }
 0x46e   :  { %v7438_v27 = vpop.f32.mrb[6].mxu0 }
 0x46f   :  { %v790_v29 = vpop.f32.mrb[7].mxu0  ;;  %v800_v31 = vmul.f32 0.25, %v7438_v27  ;;  %v1228_v27 = vld [vmem:[%s11687_s18 + $0x18] sm:$0xff] }
 0x470   :  { %v799_v30 = vmul.f32 0.25, %v790_v29  ;;  %v1174_v29 = vld [vmem:[%s11686_s16 + $0x28] sm:$0xff] }
 0x471   :  { %v805_v34 = vsel %vm801_vm3, %v800_v31, -inf }
 0x472   :  { %v802_v33 = vsel %vm801_vm3, %v799_v30, -inf }
 0x473   :  { %803 = vmax.xlane.f32.xlu1 %v802_v33  ;;  %v1232_v33 = vld [vmem:[%s11687_s18 + $0x38] sm:$0xff] }
 0x477   :  { %806 = vmax.xlane.f32.xlu1 %v805_v34  ;;  %v1297_v34 = vld [vmem:[#allocation14] sm:$0xff] }
 0x500   :  { %v804_v41 = vpop.xlane.xlu1 %803 }
 0x501   :  { %v808_v42 = vsub.f32 %v799_v30, %v804_v41  ;;  %v1230_v30 = vld [vmem:[%s11687_s18 + $0x28] sm:$0xff]  ;;  %v1302_v41 = vld [vmem:[#allocation14 + $0x28] sm:$0xff] }
 0x503   :  { %v810_v45 = vmul.f32 1.442695, %v808_v42  ;;  %v1303_v42 = vld [vmem:[#allocation14 + $0x30] sm:$0xff] }
 0x504   :  { %v807_v43 = vpop.xlane.xlu1 %806 }
 0x505   :  { %v809_v44 = vsub.f32 %v800_v31, %v807_v43  ;;  %v1176_v31 = vld [vmem:[%s11686_s16 + $0x38] sm:$0xff]  ;;  %v1304_v43 = vld [vmem:[#allocation14 + $0x38] sm:$0xff] }
 0x507   :  { %v812_v1 = vmul.f32 1.442695, %v809_v44  ;;  %v1305_v44 = vld [vmem:[#allocation14 + $0x40] sm:$0xff] }
 0x509   :  { %8634 = vpow2.f32 %v812_v1  ;;  %v1308_v1 = vld [vmem:[#allocation14 + $0x58] sm:$0xff] }
 0x50a   :  { %8636 = vpow2.f32 %v810_v45  ;;  %v1307_v45 = vld [vmem:[#allocation14 + $0x50] sm:$0xff] }
 0x513   :  { %v9924_v3 = vpop.eup %8634 }
 0x514   :  { %v817_v4 = vsel %vm801_vm3, %v9924_v3, 0.0  ;;  %v9928_v5 = vpop.eup %8636 }
 0x515   :  { %818 = vadd.xlane.f32.xlu1 %v817_v4  ;;  %v814_v7 = vsel %vm801_vm3, %v9928_v5, 0.0  ;;  %v1309_v4 = vld [vmem:[#allocation14 + $0x60] sm:$0xff] }
 0x519   :  { %815 = vadd.xlane.f32.xlu1 %v814_v7  ;;  %v1310_v7 = vld [vmem:[#allocation14 + $0x68] sm:$0xff] }
 0x52a   :  { %589 = vperm.xlu1 %8633, %v565_v8   ;;  %v1311_v8 = vld [vmem:[#allocation14 + $0x70] sm:$0xff] }
 0x52e   :  { %928 = vperm.xlu1 %8633, %v914_v9   ;;  %v1312_v9 = vld [vmem:[#allocation14 + $0x78] sm:$0xff] }
 0x532   :  { %938 = vperm.xlu1 %8633, %v916_v11   ;;  %v9940_v11 = vpop.f32.mrb[8].mxu0 }
 0x536   :  { %948 = vperm.xlu1 %8633, %v918_v12   ;;  %v1961_v12 = vld [vmem:[#allocation20 + $0x10] sm:$0xff] }
 0x53a   :  { %958 = vperm.xlu1 %8633, %v920_v17   ;;  %v9942_v17 = vpop.f32.mrb[9].mxu0 }
 0x53e   :  { %1184 = vperm.xlu1 %8633, %v1170_v18   ;;  %v7567_v18 = vpop.f32.mrb[10].mxu0 }
 0x542   :  { %1240 = vperm.xlu1 %8633, %v1226_v20   ;;  %v2089_v20 = vpop.f32.mrb[11].mxu0 }
 0x546   :  { %1194 = vperm.xlu1 %8633, %v1172_v24   ;;  %v1962_v24 = vld [vmem:[#allocation20 + $0x18] sm:$0xff] }
 0x54a   :  { %1250 = vperm.xlu1 %8633, %v1228_v27   ;;  %v1959_v27 = vld [vmem:[#allocation20] sm:$0xff] }
 0x54e   :  { %1204 = vperm.xlu1 %8633, %v1174_v29  }
 0x552   :  { %1260 = vperm.xlu1 %8633, %v1230_v30   ;;  %v1960_v30 = vld [vmem:[#allocation20 + $0x8] sm:$0xff] }
 0x556   :  { %1214 = vperm.xlu1 %8633, %v1176_v31  }
 0x55a   :  { %1270 = vperm.xlu1 %8633, %v1232_v33  }
 0x55e   :  { %1315 = vperm.xlu1 %8633, %v1297_v34   ;;  %v708_v34 = vadd.f32 %v9894_v13, %v9842_v47 }
 0x562   :  { %1320 = vperm.xlu1 %8633, %v1298_v35  }
 0x566   :  { %1325 = vperm.xlu1 %8633, %v1299_v36  }
 0x56a   :  { %1330 = vperm.xlu1 %8633, %v1300_v39  }
 0x56e   :  { %1335 = vperm.xlu1 %8633, %v1301_v40  }
 0x572   :  { %1340 = vperm.xlu1 %8633, %v1302_v41  }
 0x576   :  { %1345 = vperm.xlu1 %8633, %v1303_v42  }
 0x57a   :  { %1350 = vperm.xlu1 %8633, %v1304_v43  }
 0x57e   :  { %1355 = vperm.xlu1 %8633, %v1305_v44  }
 0x582   :  { %1365 = vperm.xlu1 %8633, %v1307_v45  }
 0x586   :  { %1370 = vperm.xlu1 %8633, %v1308_v1  }
 0x58a   :  { %1375 = vperm.xlu1 %8633, %v1309_v4  }
 0x58e   :  { %1380 = vperm.xlu1 %8633, %v1310_v7  }
 0x592   :  { %1385 = vperm.xlu1 %8633, %v1311_v8  }
 0x596   :  { %1390 = vperm.xlu1 %8633, %v1312_v9  }
 0x59a   :  { %1977 = vperm.xlu1 %8633, %v1961_v12  }
 0x59e   :  { %1982 = vperm.xlu1 %8633, %v1962_v24  }
 0x5a2   :  { %1967 = vperm.xlu1 %8633, %v1959_v27   ;;  %v819_v29 = vpop.xlane.xlu1 %818 }
 0x5a3   :  { %8638 = vrcp.f32 %v819_v29 }
 0x5a6   :  { %1972 = vperm.xlu1 %8633, %v1960_v30   ;;  %v816_v31 = vpop.xlane.xlu1 %815 }
 0x5a7   :  { %8640 = vrcp.f32 %v816_v31 }
 0x5aa   :  { %v9944_v33 = vpop.permute.xlu1 %589 }
 0x5ab   :  { %11708 = vst [vmem:[#allocation94_spill] sm:$0xff] %v9944_v33  ;;  %v703_v35 = vadd.f32 %v9896_v14, %v9944_v33 }
 0x5ad   :  { %v8167_v36 = vpack.c.bf16 %v708_v34, %v703_v35  ;;  %v8639_v40 = vpop.eup %8638 }
 0x5ae   :  { %v9950_v39 = vpop.permute.xlu1 %928  ;;  %v823_v44 = vmul.f32 %v8639_v40, %v9924_v3 }
 0x5af   :  { %11709 = vst [vmem:[#allocation95_spill] sm:$0xff] %v9950_v39  ;;  %8168 = vmatprep.subr.bf16.mxu1 %v8167_v36 }
 0x5b0   :  { %8170 = vmatpush3.bf16.msra.mxu1 %v8167_v36 }
 0x5b1   :  { %v8641_v41 = vpop.eup %8640 }
 0x5b2   :  { %v9952_v42 = vpop.permute.xlu1 %938  ;;  %v822_v43 = vmul.f32 %v8641_v41, %v9928_v5 }
 0x5b3   :  { %11710 = vst [vmem:[#allocation96_spill] sm:$0xff] %v9952_v42 }
 0x5b4   :  { %7443 = vmatprep.mubr.msk.f32.mxu1 %vm801_vm3, %v822_v43 }
 0x5b5   :  { %7444 = vmatmul.mubr.msk.f32.vlgmr.msra.gmra.mrb[0].mxu1 %vm801_vm3, %v823_v44  ;;  %v905_v44 = vld [vmem:[%s11713_s20] sm:$0xff] }
 0x5b6   :  { %v9958_v13 = vpop.permute.xlu1 %948  ;;  %7450 = vmatprep.mubr.msk.f32.mxu1 %vm801_vm3, %v905_v44 }
 0x5b7   :  { %11711 = vst [vmem:[#allocation97_spill] sm:$0xff] %v9958_v13 }
 0x5ba   :  { %v9960_v14 = vpop.permute.xlu1 %958 }
 0x5bb   :  { %11712 = vst [vmem:[#allocation98_spill] sm:$0xff] %v9960_v14 }
 0x5be   :  { %v9962_v45 = vpop.permute.xlu1 %1184 }
 0x5c2   :  { %v9964_v1 = vpop.permute.xlu1 %1240 }
 0x5c6   :  { %v9966_v4 = vpop.permute.xlu1 %1194 }
 0x5ca   :  { %v9968_v7 = vpop.permute.xlu1 %1250 }
 0x5ce   :  { %v9970_v8 = vpop.permute.xlu1 %1204 }
 0x5d2   :  { %v9972_v3 = vpop.permute.xlu1 %1260 }
 0x5d6   :  { %v9974_v5 = vpop.permute.xlu1 %1214 }
 0x5da   :  { %v9976_v9 = vpop.permute.xlu1 %1270 }
 0x5de   :  { %v9978_v12 = vpop.permute.xlu1 %1315 }
 0x5df   :  { %11714 = vst [vmem:[#allocation99_spill] sm:$0xff] %v9978_v12 }
 0x5e2   :  { %v9980_v24 = vpop.permute.xlu1 %1320 }
 0x5e3   :  { %11715 = vst [vmem:[#allocation100_spill] sm:$0xff] %v9980_v24 }
 0x5e6   :  { %v9982_v27 = vpop.permute.xlu1 %1325 }
 0x5e7   :  { %11716 = vst [vmem:[#allocation101_spill] sm:$0xff] %v9982_v27 }
 0x5ea   :  { %v9984_v29 = vpop.permute.xlu1 %1330 }
 0x5eb   :  { %11717 = vst [vmem:[#allocation102_spill] sm:$0xff] %v9984_v29 }
 0x5ee   :  { %v9986_v30 = vpop.permute.xlu1 %1335 }
 0x5ef   :  { %11718 = vst [vmem:[#allocation103_spill] sm:$0xff] %v9986_v30 }
 0x5f2   :  { %v9988_v31 = vpop.permute.xlu1 %1340 }
 0x5f3   :  { %11719 = vst [vmem:[#allocation104_spill] sm:$0xff] %v9988_v31 }
 0x5f6   :  { %v9990_v34 = vpop.permute.xlu1 %1345 }
 0x5f7   :  { %11720 = vst [vmem:[#allocation105_spill] sm:$0xff] %v9990_v34 }
 0x5fa   :  { %v9992_v35 = vpop.permute.xlu1 %1350 }
 0x5fb   :  { %11721 = vst [vmem:[#allocation106_spill] sm:$0xff] %v9992_v35 }
 0x5fe   :  { %v9994_v36 = vpop.permute.xlu1 %1355 }
 0x5ff   :  { %11722 = vst [vmem:[#allocation107_spill] sm:$0xff] %v9994_v36 }
 0x602   :  { %v9996_v40 = vpop.permute.xlu1 %1365 }
 0x603   :  { %11723 = vst [vmem:[#allocation108_spill] sm:$0xff] %v9996_v40 }
 0x606   :  { %v9998_v41 = vpop.permute.xlu1 %1370 }
 0x607   :  { %11724 = vst [vmem:[#allocation109_spill] sm:$0xff] %v9998_v41 }
 0x60a   :  { %v10000_v43 = vpop.permute.xlu1 %1375 }
 0x60b   :  { %11725 = vst [vmem:[#allocation110_spill] sm:$0xff] %v10000_v43 }
 0x60e   :  { %v10003_v16 = vpop.permute.xlu1 %1380 }
 0x60f   :  { %11726 = vst [vmem:[#allocation111_spill] sm:$0xff] %v10003_v16 }
 0x612   :  { %v10006_v2 = vpop.permute.xlu1 %1385 }
 0x613   :  { %11727 = vst [vmem:[#allocation112_spill] sm:$0xff] %v10006_v2 }
 0x616   :  { %v10008_v33 = vpop.permute.xlu1 %1390 }
 0x617   :  { %11728 = vst [vmem:[#allocation113_spill] sm:$0xff] %v10008_v33 }
 0x61a   :  { %v10010_v47 = vpop.permute.xlu1 %1977 }
 0x61b   :  { %11729 = vst [vmem:[#allocation114_spill] sm:$0xff] %v10010_v47  ;;  %v2090_v63 = vadd.f32 %v2089_v20, %v10010_v47  ;;  %v909_v20 = vld [vmem:[%s11713_s20 + $0x20] sm:$0xff] }
 0x61e   :  { %v10012_v46 = vpop.permute.xlu1 %1982 }
 0x61f   :  { %11730 = vst [vmem:[#allocation115_spill] sm:$0xff] %v10012_v46  ;;  %v2095_v19 = vadd.f32 %v7567_v18, %v10012_v46 }
 0x621   :  { %v10016_v21 = vpack.c.bf16 %v2095_v19, %v2090_v63  ;;  %v910_v63 = vld [vmem:[%s11713_s20 + $0x28] sm:$0xff]  ;;  %v911_v19 = vld [vmem:[%s11713_s20 + $0x30] sm:$0xff] }
 0x688   :  { %v7445_v6 = vpop.f32.mrb[0].mxu1 }
 0x689   :  { %v896_v44 = vpop.f32.mrb[1].mxu1 }
 0x68a   :  { %v8171_v15 = vpack.c.bf16 %v7445_v6, %v896_v44  ;;  %v912_v6 = vld [vmem:[%s11713_s20 + $0x38] sm:$0xff] }
 0x68c   :  { %8172 = vmatprep.subr.bf16.mxu1 %v8171_v15 }
 0x68d   :  { %8174 = vmatpush3.bf16.msra.mxu1 %v8171_v15  ;;  %v1281_v15 = vld [vmem:[#allocation13] sm:$0xff] }
 0x690   :  { %7451 = vmatmul.mubr.msk.f32.vlgmr.msra.gmra.mrb[2].mxu1 %vm801_vm3, %v906_v62 }
 0x691   :  { %7453 = vmatprep.mubr.msk.f32.mxu1 %vm801_vm3, %v907_v0 }
 0x694   :  { %7454 = vmatmul.mubr.msk.f32.gmra.mrb[4].mxu1 %vm801_vm3, %v908_v60 }
 0x695   :  { %7456 = vmatprep.mubr.msk.f32.mxu1 %vm801_vm3, %v909_v20 }
 0x698   :  { %7457 = vmatmul.mubr.msk.f32.gmra.mrb[6].mxu1 %vm801_vm3, %v910_v63 }
 0x699   :  { %7459 = vmatprep.mubr.msk.f32.mxu1 %vm801_vm3, %v911_v19 }
 0x69c   :  { %7460 = vmatmul.mubr.msk.f32.gmra.mrb[8].mxu1 %vm801_vm3, %v912_v6 }
 0x69d   :  { %7478 = vmatprep.mubr.msk.f32.mxu1 %vm597_vm0, %v1281_v15 }
 0x763   :  { %v7452_v62 = vpop.f32.mrb[2].mxu1 }
 0x764   :  { %v1057_v0 = vadd.f32 %v7452_v62, %v9950_v39  ;;  %v1051_v18 = vpop.f32.mrb[3].mxu1 }
 0x765   :  { %v1052_v60 = vadd.f32 %v1051_v18, %v9844_v48 }
 0x766   :  { %v1091_v44 = vadd.f32 %v1057_v0, %v9813_v23 }
 0x767   :  { %v1090_v20 = vadd.f32 %v1052_v60, %v9811_v22  ;;  %v7455_v47 = vpop.f32.mrb[4].mxu1 }
 0x768   :  { %v1099_v63 = vsel %vm711_vm1, %v1091_v44, 0.0  ;;  %v1067_v19 = vadd.f32 %v7455_v47, %v9952_v42  ;;  %v1061_v46 = vpop.f32.mrb[5].mxu1 }
 0x769   :  { %v1098_v6 = vsel %vm711_vm1, %v1090_v20, 0.0  ;;  %v1062_v15 = vadd.f32 %v1061_v46, %v9846_v49 }
 0x76a   :  { %v1100_v61 = vadd.f32 %v1099_v63, %v1098_v6  ;;  %v1093_v62 = vadd.f32 %v1067_v19, %v9819_v26 }
 0x76b   :  { %v1092_v39 = vadd.f32 %v1062_v15, %v9817_v25  ;;  %v7458_v18 = vpop.f32.mrb[6].mxu1 }
 0x76c   :  { %v1077_v23 = vadd.f32 %v7458_v18, %v9958_v13  ;;  %v1071_v0 = vpop.f32.mrb[7].mxu1  ;;  %v1103_v47 = vsel %vm711_vm1, %v1093_v62, 0.0 }
 0x76d   :  { %v1101_v22 = vsel %vm711_vm1, %v1092_v39, 0.0  ;;  %v1072_v60 = vadd.f32 %v1071_v0, %v9848_v50 }
 0x76e   :  { %v1102_v48 = vadd.f32 %v1101_v22, %v1100_v61  ;;  %v1095_v42 = vadd.f32 %v1077_v23, %v9825_v32 }
 0x76f   :  { %v1094_v46 = vadd.f32 %v1072_v60, %v9823_v28  ;;  %v7461_v63 = vpop.f32.mrb[8].mxu1 }
 0x770   :  { %v1104_v6 = vadd.f32 %v1103_v47, %v1102_v48  ;;  %v1087_v26 = vadd.f32 %v7461_v63, %v9960_v14  ;;  %v1081_v25 = vpop.f32.mrb[9].mxu1  ;;  %v1107_v13 = vsel %vm711_vm1, %v1095_v42, 0.0 }
 0x771   :  { %v1105_v19 = vsel %vm711_vm1, %v1094_v46, 0.0  ;;  %v1082_v15 = vadd.f32 %v1081_v25, %v9850_v51 }
 0x772   :  { %v1106_v18 = vadd.f32 %v1105_v19, %v1104_v6  ;;  %v1097_v61 = vadd.f32 %v1087_v26, %v9831_v38 }
 0x773   :  { %v1096_v0 = vadd.f32 %v1082_v15, %v9829_v37 }
 0x774   :  { %v1108_v22 = vadd.f32 %v1107_v13, %v1106_v18  ;;  %v1111_v48 = vsel %vm711_vm1, %v1097_v61, 0.0 }
 0x775   :  { %v1109_v32 = vsel %vm711_vm1, %v1096_v0, 0.0 }
 0x776   :  { %v1110_v28 = vadd.f32 %v1109_v32, %v1108_v22 }
 0x778   :  { %v1112_v23 = vadd.f32 %v1111_v48, %v1110_v28 }
 0x77a   :  { %v1113_v60 = vrot.slane %v1112_v23, 4 }
 0x77c   :  { %v1114_v47 = vadd.f32 %v1113_v60, %v1112_v23 }
 0x77e   :  { %v1115_v63 = vrot.slane %v1114_v47, 2 }
 0x780   :  { %v1116_v14 = vadd.f32 %v1115_v63, %v1114_v47 }
 0x782   :  { %v1117_v50 = vrot.slane %v1116_v14, 1 }
 0x784   :  { %v1118_v25 = vadd.f32 %v1117_v50, %v1116_v14 }
 0x786   :  { %v1120_v6 = vmul.f32 0.015625, %v1118_v25 }
 0x788   :  { %v1121_v19 = vsub.f32 %v1090_v20, %v1120_v6  ;;  %v1122_v51 = vsub.f32 %v1091_v44, %v1120_v6  ;;  %v1123_v49 = vsub.f32 %v1092_v39, %v1120_v6  ;;  %v1124_v38 = vsub.f32 %v1093_v62, %v1120_v6 }
 0x789   :  { %v1125_v26 = vsub.f32 %v1094_v46, %v1120_v6  ;;  %v1126_v37 = vsub.f32 %v1095_v42, %v1120_v6  ;;  %v1127_v13 = vsub.f32 %v1096_v0, %v1120_v6  ;;  %v1128_v15 = vsub.f32 %v1097_v61, %v1120_v6 }
 0x78a   :  { %v1129_v18 = vmul.f32 %v1121_v19, %v1121_v19  ;;  %v1130_v22 = vmul.f32 %v1122_v51, %v1122_v51  ;;  %v1131_v32 = vmul.f32 %v1123_v49, %v1123_v49  ;;  %v1132_v10 = vmul.f32 %v1124_v38, %v1124_v38 }
 0x78b   :  { %v1133_v60 = vmul.f32 %v1125_v26, %v1125_v26  ;;  %v1134_v44 = vmul.f32 %v1126_v37, %v1126_v37  ;;  %v1135_v42 = vmul.f32 %v1127_v13, %v1127_v13  ;;  %v1136_v61 = vmul.f32 %v1128_v15, %v1128_v15 }
 0x78c   :  { %v1137_v28 = vsel %vm711_vm1, %v1129_v18, 0.0  ;;  %v1138_v48 = vsel %vm711_vm1, %v1130_v22, 0.0  ;;  %v1140_v50 = vsel %vm711_vm1, %v1131_v32, 0.0  ;;  %v1142_v39 = vsel %vm711_vm1, %v1132_v10, 0.0 }
 0x78d   :  { %v1139_v23 = vadd.f32 %v1138_v48, %v1137_v28  ;;  %v1144_v62 = vsel %vm711_vm1, %v1133_v60, 0.0  ;;  %v1146_v0 = vsel %vm711_vm1, %v1134_v44, 0.0  ;;  %v1148_v63 = vsel %vm711_vm1, %v1135_v42, 0.0 }
 0x78e   :  { %v1150_v6 = vsel %vm711_vm1, %v1136_v61, 0.0 }
 0x78f   :  { %v1141_v14 = vadd.f32 %v1140_v50, %v1139_v23 }
 0x791   :  { %v1143_v20 = vadd.f32 %v1142_v39, %v1141_v14 }
 0x793   :  { %v1145_v46 = vadd.f32 %v1144_v62, %v1143_v20 }
 0x795   :  { %v1147_v47 = vadd.f32 %v1146_v0, %v1145_v46 }
 0x797   :  { %v1149_v25 = vadd.f32 %v1148_v63, %v1147_v47 }
 0x799   :  { %v1151_v18 = vadd.f32 %v1150_v6, %v1149_v25 }
 0x79b   :  { %v1152_v22 = vrot.slane %v1151_v18, 4 }
 0x79d   :  { %v1153_v32 = vadd.f32 %v1152_v22, %v1151_v18 }
 0x79f   :  { %v1154_v28 = vrot.slane %v1153_v32, 2 }
 0x7a1   :  { %v1155_v48 = vadd.f32 %v1154_v28, %v1153_v32 }
 0x7a3   :  { %v1156_v10 = vrot.slane %v1155_v48, 1 }
 0x7a5   :  { %v1157_v23 = vadd.f32 %v1156_v10, %v1155_v48 }
 0x7a7   :  { %v1158_v50 = vmul.f32 0.015625, %v1157_v23 }
 0x7a9   :  { %v1159_v14 = vadd.f32 1e-05, %v1158_v50 }
 0x7ab   :  { %8642 = vrsqrt.f32 %v1159_v14  ;;  %v1282_v14 = vld [vmem:[#allocation13 + $0x8] sm:$0xff] }
 0x7b5   :  { %v8643_v60 = vpop.eup %8642 }
 0x7b6   :  { %v1167_v39 = vmul.f32 %v8643_v60, %v1127_v13  ;;  %v1161_v20 = vmul.f32 %v8643_v60, %v1121_v19  ;;  %v1162_v44 = vmul.f32 %v8643_v60, %v1122_v51  ;;  %v1163_v62 = vmul.f32 %v8643_v60, %v1123_v49 }
 0x7b7   :  { %v1164_v46 = vmul.f32 %v8643_v60, %v1124_v38  ;;  %v1165_v42 = vmul.f32 %v8643_v60, %v1125_v26  ;;  %v1166_v0 = vmul.f32 %v8643_v60, %v1126_v37  ;;  %v1168_v47 = vmul.f32 %v8643_v60, %v1128_v15  ;;  %v1283_v60 = vld [vmem:[#allocation13 + $0x10] sm:$0xff] }
 0x7b8   :  { %v1217_v61 = vmul.f32 %v9852_v52, %v1161_v20  ;;  %v1218_v63 = vmul.f32 %v9962_v45, %v1162_v44  ;;  %v1219_v25 = vmul.f32 %v9856_v54, %v1163_v62  ;;  %v1223_v37 = vmul.f32 %v9864_v58, %v1167_v39  ;;  %v1284_v39 = vld [vmem:[#allocation13 + $0x18] sm:$0xff]  ;;  %v1285_v20 = vld [vmem:[#allocation13 + $0x20] sm:$0xff]  ;;  %v1286_v44 = vld [vmem:[#allocation13 + $0x28] sm:$0xff] }
 0x7b9   :  { %v1220_v6 = vmul.f32 %v9966_v4, %v1164_v46  ;;  %v1221_v18 = vmul.f32 %v9860_v56, %v1165_v42  ;;  %v1222_v19 = vmul.f32 %v9970_v8, %v1166_v0  ;;  %v1224_v28 = vmul.f32 %v9974_v5, %v1168_v47  ;;  %v1287_v62 = vld [vmem:[#allocation13 + $0x30] sm:$0xff]  ;;  %v1288_v46 = vld [vmem:[#allocation13 + $0x38] sm:$0xff]  ;;  %v1289_v42 = vld [vmem:[#allocation13 + $0x40] sm:$0xff] }
 0x7ba   :  { %v10071_v22 = vadd.f32 %v9854_v53, %v1217_v61  ;;  %v10074_v51 = vadd.f32 %v9964_v1, %v1218_v63  ;;  %v10077_v49 = vadd.f32 %v9858_v55, %v1219_v25  ;;  %v10098_v10 = vadd.f32 %v9866_v59, %v1223_v37  ;;  %v1290_v0 = vld [vmem:[#allocation13 + $0x48] sm:$0xff]  ;;  %v1291_v47 = vld [vmem:[#allocation13 + $0x50] sm:$0xff]  ;;  %v1292_v61 = vld [vmem:[#allocation13 + $0x58] sm:$0xff] }
 0x7bb   :  { %v10081_v38 = vadd.f32 %v9968_v7, %v1220_v6  ;;  %v10089_v15 = vadd.f32 %v9862_v57, %v1221_v18  ;;  %v10092_v32 = vadd.f32 %v9972_v3, %v1222_v19  ;;  %v10101_v23 = vadd.f32 %v9976_v9, %v1224_v28  ;;  %v1293_v63 = vld [vmem:[#allocation13 + $0x60] sm:$0xff]  ;;  %v1294_v25 = vld [vmem:[#allocation13 + $0x68] sm:$0xff]  ;;  %v1295_v6 = vld [vmem:[#allocation13 + $0x70] sm:$0xff] }
 0x7bc   :  { %v8175_v26 = vpack.c.bf16 %v10074_v51, %v10071_v22  ;;  %v1296_v18 = vld [vmem:[#allocation13 + $0x78] sm:$0xff]  ;;  %v1602_v19 = vld [vmem:[#allocation16] sm:$0xff]  ;;  %v1958_v37 = vld [vmem:[#allocation19 + $0x28] sm:$0xff] }
 0x7bd   :  { %v8179_v13 = vpack.c.bf16 %v10081_v38, %v10077_v49  ;;  %v8183_v48 = vpack.c.bf16 %v10092_v32, %v10089_v15  ;;  %v8187_v50 = vpack.c.bf16 %v10101_v23, %v10098_v10 }
 0x7be   :  { %8176 = vmatprep.subr.bf16.mxu1 %v8175_v26 }
 0x7bf   :  { %8178 = vmatpush3.bf16.msra.mxu1 %v8175_v26  ;;  %v1957_v26 = vld [vmem:[#allocation19 + $0x20] sm:$0xff] }
 0x7c0   :  { %8180 = vmatprep.subr.bf16.mxu1 %v8179_v13  ;;  %7568 = vmatprep.mubr.msk.f32.mxu0 %vm597_vm0, %v1957_v26 }
 0x7c1   :  { %7569 = vmatmul.mubr.msk.f32.gmra.mrb[12].mxu0 %vm597_vm0, %v1958_v37 }
 0x7c3   :  { %8182 = vmatpush3.bf16.msra.mxu1 %v8179_v13 }
 0x7c4   :  { %8184 = vmatprep.subr.bf16.mxu1 %v8183_v48 }
 0x7c7   :  { %8186 = vmatpush3.bf16.msra.mxu1 %v8183_v48 }
 0x7c8   :  { %8188 = vmatprep.subr.bf16.mxu1 %v8187_v50 }
 0x7cb   :  { %8190 = vmatpush3.bf16.msra.mxu1 %v8187_v50 }
 0x7ce   :  { %7479 = vmatmul.mubr.msk.f32.vlgmr.msra.gmra.mrb[10].mxu1 %vm597_vm0, %v1282_v14 }
 0x7cf   :  { %7481 = vmatprep.mubr.msk.f32.mxu1 %vm597_vm0, %v1283_v60 }
 0x7d2   :  { %7482 = vmatmul.mubr.msk.f32.gmra.mrb[12].mxu1 %vm597_vm0, %v1284_v39 }
 0x7d3   :  { %7484 = vmatprep.mubr.msk.f32.mxu1 %vm597_vm0, %v1285_v20 }
 0x7d6   :  { %7485 = vmatmul.mubr.msk.f32.gmra.mrb[14].mxu1 %vm597_vm0, %v1286_v44 }
 0x7d7   :  { %7487 = vmatprep.mubr.msk.f32.mxu1 %vm597_vm0, %v1287_v62 }
 0x7da   :  { %7488 = vmatmul.mubr.msk.f32.gmra.mrb[16].mxu1 %vm597_vm0, %v1288_v46 }
 0x7db   :  { %7490 = vmatprep.mubr.msk.f32.mxu1 %vm597_vm0, %v1289_v42 }
 0x7de   :  { %7491 = vmatmul.mubr.msk.f32.gmra.mrb[18].mxu1 %vm597_vm0, %v1290_v0 }
 0x7df   :  { %7493 = vmatprep.mubr.msk.f32.mxu1 %vm597_vm0, %v1291_v47 }
 0x7e2   :  { %7494 = vmatmul.mubr.msk.f32.gmra.mrb[20].mxu1 %vm597_vm0, %v1292_v61 }
 0x7e3   :  { %7496 = vmatprep.mubr.msk.f32.mxu1 %vm597_vm0, %v1293_v63 }
 0x7e6   :  { %7497 = vmatmul.mubr.msk.f32.gmra.mrb[22].mxu1 %vm597_vm0, %v1294_v25 }
 0x7e7   :  { %7499 = vmatprep.mubr.msk.f32.mxu1 %vm597_vm0, %v1295_v6 }
 0x7ea   :  { %7500 = vmatmul.mubr.msk.f32.gmra.mrb[24].mxu1 %vm597_vm0, %v1296_v18 }
 0x7eb   :  { %7534 = vmatprep.mubr.f32.mxu1 %v1602_v19 }
 0x8a1   :  { %v7480_v13 = vpop.f32.mrb[10].mxu1 }
 0x8a2   :  { %v1513_v28 = vadd.f32 %v7480_v13, %v9980_v24  ;;  %v1507_v48 = vpop.f32.mrb[11].mxu1 }
 0x8a3   :  { %v1508_v50 = vadd.f32 %v1507_v48, %v9978_v12 }
 0x8a4   :  { %v1587_v14 = vmax.f32 %v1513_v28, 0.0 }
 0x8a5   :  { %v1586_v60 = vmax.f32 %v1508_v50, 0.0  ;;  %v7483_v39 = vpop.f32.mrb[12].mxu1 }
 0x8a6   :  { %v1523_v20 = vadd.f32 %v7483_v39, %v9984_v29  ;;  %v1517_v44 = vpop.f32.mrb[13].mxu1 }
 0x8a7   :  { %v8191_v62 = vpack.c.bf16 %v1587_v14, %v1586_v60  ;;  %v1518_v46 = vadd.f32 %v1517_v44, %v9982_v27  ;;  %v10130_v14 = vpop.permute.xlu0 %1360 }
 0x8a8   :  { %v1589_v42 = vmax.f32 %v1523_v20, 0.0  ;;  %11731 = vst [vmem:[#allocation116_spill] sm:$0xff] %v10130_v14 }
 0x8a9   :  { %v1588_v0 = vmax.f32 %v1518_v46, 0.0  ;;  %v7486_v47 = vpop.f32.mrb[14].mxu1  ;;  %8192 = vmatprep.subr.bf16.mxu1 %v8191_v62 }
 0x8aa   :  { %v1533_v61 = vadd.f32 %v7486_v47, %v9988_v31  ;;  %v1527_v63 = vpop.f32.mrb[15].mxu1  ;;  %8194 = vmatpush3.bf16.msra.mxu1 %v8191_v62 }
 0x8ab   :  { %v8195_v25 = vpack.c.bf16 %v1589_v42, %v1588_v0  ;;  %v1528_v6 = vadd.f32 %v1527_v63, %v9986_v30 }
 0x8ac   :  { %v1591_v18 = vmax.f32 %v1533_v61, 0.0 }
 0x8ad   :  { %v1590_v19 = vmax.f32 %v1528_v6, 0.0  ;;  %v7489_v26 = vpop.f32.mrb[16].mxu1  ;;  %8196 = vmatprep.subr.bf16.mxu1 %v8195_v25 }
 0x8ae   :  { %v1543_v37 = vadd.f32 %v7489_v26, %v9992_v35  ;;  %v1537_v13 = vpop.f32.mrb[17].mxu1  ;;  %8198 = vmatpush3.bf16.msra.mxu1 %v8195_v25 }
 0x8af   :  { %v8199_v28 = vpack.c.bf16 %v1591_v18, %v1590_v19  ;;  %v1538_v48 = vadd.f32 %v1537_v13, %v9990_v34 }
 0x8b0   :  { %v1593_v50 = vmax.f32 %v1543_v37, 0.0 }
 0x8b1   :  { %v1592_v60 = vmax.f32 %v1538_v48, 0.0  ;;  %v7492_v39 = vpop.f32.mrb[18].mxu1  ;;  %8200 = vmatprep.subr.bf16.mxu1 %v8199_v28 }
 0x8b2   :  { %v1553_v20 = vadd.f32 %v7492_v39, %v10130_v14  ;;  %v1547_v44 = vpop.f32.mrb[19].mxu1  ;;  %8202 = vmatpush3.bf16.msra.mxu1 %v8199_v28 }
 0x8b3   :  { %v8203_v62 = vpack.c.bf16 %v1593_v50, %v1592_v60  ;;  %v1548_v46 = vadd.f32 %v1547_v44, %v9994_v36 }
 0x8b4   :  { %v1595_v42 = vmax.f32 %v1553_v20, 0.0 }
 0x8b5   :  { %v1594_v0 = vmax.f32 %v1548_v46, 0.0  ;;  %v7495_v47 = vpop.f32.mrb[20].mxu1  ;;  %8204 = vmatprep.subr.bf16.mxu1 %v8203_v62 }
 0x8b6   :  { %v1563_v61 = vadd.f32 %v7495_v47, %v9998_v41  ;;  %v1557_v63 = vpop.f32.mrb[21].mxu1  ;;  %8206 = vmatpush3.bf16.msra.mxu1 %v8203_v62  ;;  %v11788_v41 = vld [vmem:[#allocation92_spill] sm:$0xff] }
 0x8b7   :  { %v8207_v25 = vpack.c.bf16 %v1595_v42, %v1594_v0  ;;  %v1558_v6 = vadd.f32 %v1557_v63, %v9996_v40  ;;  %v1603_v63 = vld [vmem:[#allocation16 + $0x8] sm:$0xff] }
 0x8b8   :  { %v1597_v18 = vmax.f32 %v1563_v61, 0.0  ;;  %v11732_v61 = vmov 0 }
 0x8b9   :  { %v1596_v19 = vmax.f32 %v1558_v6, 0.0  ;;  %v7498_v26 = vpop.f32.mrb[22].mxu1  ;;  %8208 = vmatprep.subr.bf16.mxu1 %v8207_v25  ;;  %v11733_v61 = vsel %vm10142_vm4, 4294967295, %v11732_v61  ;;  %v1605_v6 = vld [vmem:[#allocation16 + $0x18] sm:$0xff] }
 0x8ba   :  { %v1573_v37 = vadd.f32 %v7498_v26, %v10003_v16  ;;  %v1567_v13 = vpop.f32.mrb[23].mxu1  ;;  %8210 = vmatpush3.bf16.msra.mxu1 %v8207_v25  ;;  %11734 = vst [vmem:[#allocation117_spill] sm:$0xff] %v11733_v61  ;;  %v1604_v25 = vld [vmem:[#allocation16 + $0x10] sm:$0xff]  ;;  %v1607_v26 = vld [vmem:[#allocation16 + $0x28] sm:$0xff] }
 0x8bb   :  { %v8211_v28 = vpack.c.bf16 %v1597_v18, %v1596_v19  ;;  %v1568_v48 = vadd.f32 %v1567_v13, %v10000_v43  ;;  %v1606_v18 = vld [vmem:[#allocation16 + $0x20] sm:$0xff]  ;;  %v10149_v19 = vpop.permute.xlu1 %1967  ;;  %v1609_v13 = vld [vmem:[#allocation16 + $0x38] sm:$0xff] }
 0x8bc   :  { %v1599_v50 = vmax.f32 %v1573_v37, 0.0  ;;  %11735 = vst [vmem:[#allocation118_spill] sm:$0xff] %v10149_v19  ;;  %v1608_v37 = vld [vmem:[#allocation16 + $0x30] sm:$0xff] }
 0x8bd   :  { %v1598_v60 = vmax.f32 %v1568_v48, 0.0  ;;  %v7501_v39 = vpop.f32.mrb[24].mxu1  ;;  %8212 = vmatprep.subr.bf16.mxu1 %v8211_v28 }
 0x8be   :  { %v1583_v20 = vadd.f32 %v7501_v39, %v10008_v33  ;;  %v1577_v44 = vpop.f32.mrb[25].mxu1  ;;  %8214 = vmatpush3.bf16.msra.mxu1 %v8211_v28  ;;  %v2080_v28 = vadd.f32 %v9942_v17, %v10149_v19 }
 0x8bf   :  { %v8215_v62 = vpack.c.bf16 %v1599_v50, %v1598_v60  ;;  %v1578_v46 = vadd.f32 %v1577_v44, %v10006_v2  ;;  %v10156_v48 = vpop.permute.xlu1 %1972 }
 0x8c0   :  { %v1601_v42 = vmax.f32 %v1583_v20, 0.0  ;;  %11736 = vst [vmem:[#allocation119_spill] sm:$0xff] %v10156_v48  ;;  %v2085_v50 = vadd.f32 %v9940_v11, %v10156_v48 }
 0x8c1   :  { %v1600_v0 = vmax.f32 %v1578_v46, 0.0  ;;  %8216 = vmatprep.subr.bf16.mxu1 %v8215_v62 }
 0x8c2   :  { %8218 = vmatpush3.bf16.msra.mxu1 %v8215_v62 }
 0x8c3   :  { %v8219_v47 = vpack.c.bf16 %v1601_v42, %v1600_v0 }
 0x8c5   :  { %8220 = vmatprep.subr.bf16.mxu1 %v8219_v47 }
 0x8c6   :  { %8222 = vmatpush3.bf16.msra.mxu1 %v8219_v47 }
 0x8c7   :  { %8241 = vmatprep.subr.msk.bf16.mxu1 %vm10142_vm4, %v10016_v21 }
 0x8c9   :  { %7535 = vmatmul.mubr.f32.vlgmr.msra.gmra.mrb[26].mxu1 %v1603_v63 }
 0x8ca   :  { %7537 = vmatprep.mubr.f32.mxu1 %v1604_v25 }
 0x8cd   :  { %7538 = vmatmul.mubr.f32.gmra.mrb[28].mxu1 %v1605_v6  ;;  %v1964_v6 = vld [vmem:[#allocation20 + $0x28] sm:$0xff] }
 0x8ce   :  { %7540 = vmatprep.mubr.f32.mxu1 %v1606_v18  ;;  %v10180_v18 = vpop.f32.mrb[12].mxu0 }
 0x8cf   :  { %8244 = vmatpush3.bf16.xpose.msk.msra.mxu1 %vm10142_vm4, %v10016_v21 }
 0x8d1   :  { %7541 = vmatmul.mubr.f32.gmra.mrb[30].mxu1 %v1607_v26  ;;  %v1614_v26 = vld [vmem:[#allocation17 + $0x20] sm:$0xff] }
 0x8d2   :  { %7543 = vmatprep.mubr.f32.mxu1 %v1608_v37  ;;  %v1616_v37 = vld [vmem:[#allocation17 + $0x30] sm:$0xff] }
 0x8d5   :  { %7544 = vmatmul.mubr.f32.gmra.mrb[32].mxu1 %v1609_v13  ;;  %v1841_v13 = vld [vmem:[%s11737_s17] sm:$0xff] }
 0x8d6   :  { %7575 = vmatprep.mubr.msk.f32.mxu1 %vm801_vm3, %v2080_v28  ;;  %v1897_v28 = vld [vmem:[%s11738_s22] sm:$0xff] }
 0x8d9   :  { %7576 = vmatmul.mubr.msk.f32.vlgmr.msra.gmra.mrb[34].mxu1 %vm801_vm3, %v2085_v50  ;;  %v1843_v50 = vld [vmem:[%s11737_s17 + $0x10] sm:$0xff] }
 0x99c   :  { %v10162_v60 = vpop.f32.mrb[26].mxu1 }
 0x99d   :  { %v10164_v21 = vpop.f32.mrb[27].mxu1 }
 0x9a0   :  { %v10166_v39 = vpop.f32.mrb[28].mxu1 }
 0x9a1   :  { %v10168_v20 = vpop.f32.mrb[29].mxu1 }
 0x9a4   :  { %v10170_v44 = vpop.f32.mrb[30].mxu1 }
 0x9a5   :  { %v10172_v17 = vpop.f32.mrb[31].mxu1 }
 0x9a8   :  { %v10174_v62 = vpop.f32.mrb[32].mxu1 }
 0x9a9   :  { %v10176_v46 = vpop.f32.mrb[33].mxu1 }
 0x9ac   :  { %v7577_v11 = vpop.f32.mrb[34].mxu1 }
 0x9ad   :  { %v2196_v42 = vmul.f32 0.25, %v7577_v11  ;;  %v2186_v0 = vpop.f32.mrb[35].mxu1  ;;  %v1899_v11 = vld [vmem:[%s11738_s22 + $0x10] sm:$0xff] }
 0x9ae   :  { %v2195_v47 = vmul.f32 0.25, %v2186_v0  ;;  %v1845_v0 = vld [vmem:[%s11737_s17 + $0x20] sm:$0xff] }
 0x9af   :  { %v2200_v63 = vsel %vm801_vm3, %v2196_v42, -inf }
 0x9b0   :  { %2201 = vmax.xlane.f32.xlu0 %v2200_v63  ;;  %v2197_v25 = vsel %vm801_vm3, %v2195_v47, -inf  ;;  %v1901_v63 = vld [vmem:[%s11738_s22 + $0x20] sm:$0xff] }
 0x9b1   :  { %2198 = vmax.xlane.f32.xlu1 %v2197_v25  ;;  %v1847_v25 = vld [vmem:[%s11737_s17 + $0x30] sm:$0xff] }
 0x9c6   :  { %1992 = vperm.xlu0 %8632, %v1964_v6   ;;  %v1903_v6 = vld [vmem:[%s11738_s22 + $0x30] sm:$0xff] }
 0x9ca   :  { %1640 = vperm.xlu0 %8632, %v1614_v26   ;;  %v2681_v26 = vld [vmem:[#allocation25 + $0x10] sm:$0xff] }
 0x9ce   :  { %1650 = vperm.xlu0 %8632, %v1616_v37   ;;  %v2679_v37 = vld [vmem:[#allocation25] sm:$0xff] }
 0x9d2   :  { %1851 = vperm.xlu0 %8632, %v1841_v13   ;;  %v2308_v13 = vld [vmem:[#allocation23] sm:$0xff] }
 0x9d6   :  { %1907 = vperm.xlu0 %8632, %v1897_v28   ;;  %v2310_v28 = vld [vmem:[#allocation23 + $0x10] sm:$0xff] }
 0x9da   :  { %1861 = vperm.xlu0 %8632, %v1843_v50   ;;  %v2312_v50 = vld [vmem:[#allocation23 + $0x20] sm:$0xff] }
 0x9de   :  { %1917 = vperm.xlu0 %8632, %v1899_v11   ;;  %v2314_v11 = vld [vmem:[#allocation23 + $0x30] sm:$0xff] }
 0x9e2   :  { %1871 = vperm.xlu0 %8632, %v1845_v0   ;;  %v2563_v0 = vld [vmem:[%s11739_s29] sm:$0xff] }
 0x9e6   :  { %1927 = vperm.xlu0 %8632, %v1901_v63   ;;  %v2619_v63 = vld [vmem:[%s11740_s3] sm:$0xff] }
 0x9ea   :  { %1881 = vperm.xlu0 %8632, %v1847_v25   ;;  %v2565_v25 = vld [vmem:[%s11739_s29 + $0x10] sm:$0xff] }
 0x9ee   :  { %1937 = vperm.xlu0 %8632, %v1903_v6   ;;  %v2621_v6 = vld [vmem:[%s11740_s3 + $0x10] sm:$0xff] }
 0x9f2   :  { %2695 = vperm.xlu0 %8632, %v2681_v26   ;;  %v2567_v26 = vld [vmem:[%s11739_s29 + $0x20] sm:$0xff] }
 0x9f6   :  { %2685 = vperm.xlu0 %8632, %v2679_v37   ;;  %v2623_v37 = vld [vmem:[%s11740_s3 + $0x20] sm:$0xff] }
 0x9fa   :  { %2318 = vperm.xlu0 %8632, %v2308_v13   ;;  %v2569_v13 = vld [vmem:[%s11739_s29 + $0x30] sm:$0xff] }
 0x9fe   :  { %2328 = vperm.xlu0 %8632, %v2310_v28   ;;  %v2625_v28 = vld [vmem:[%s11740_s3 + $0x30] sm:$0xff] }
 0xa02   :  { %2338 = vperm.xlu0 %8632, %v2312_v50  }
 0xa06   :  { %2348 = vperm.xlu0 %8632, %v2314_v11  }
 0xa0a   :  { %2573 = vperm.xlu0 %8632, %v2563_v0  }
 0xa0e   :  { %2629 = vperm.xlu0 %8632, %v2619_v63  }
 0xa12   :  { %2583 = vperm.xlu0 %8632, %v2565_v25  }
 0xa16   :  { %2639 = vperm.xlu0 %8632, %v2621_v6  }
 0xa1a   :  { %2593 = vperm.xlu0 %8632, %v2567_v26  }
 0xa1e   :  { %2649 = vperm.xlu0 %8632, %v2623_v37   ;;  %v10206_v37 = vpop.f32.mrb[13].mxu0 }
 0xa22   :  { %2603 = vperm.xlu0 %8632, %v2569_v13   ;;  %v1615_v13 = vld [vmem:[#allocation17 + $0x28] sm:$0xff] }
 0xa26   :  { %2659 = vperm.xlu0 %8632, %v2625_v28   ;;  %v1617_v28 = vld [vmem:[#allocation17 + $0x38] sm:$0xff] }
 0xa3d   :  { %v2202_v50 = vpop.xlane.xlu0 %2201 }
 0xa3e   :  { %v2204_v48 = vsub.f32 %v2196_v42, %v2202_v50  ;;  %v2199_v19 = vpop.xlane.xlu1 %2198  ;;  %v1963_v42 = vld [vmem:[#allocation20 + $0x20] sm:$0xff]  ;;  %v1842_v50 = vld [vmem:[%s11737_s17 + $0x8] sm:$0xff] }
 0xa3f   :  { %v2203_v11 = vsub.f32 %v2195_v47, %v2199_v19  ;;  %v1611_v19 = vld [vmem:[#allocation17 + $0x8] sm:$0xff]  ;;  %v1613_v47 = vld [vmem:[#allocation17 + $0x18] sm:$0xff] }
 0xa40   :  { %v2207_v61 = vmul.f32 1.442695, %v2204_v48  ;;  %v1612_v48 = vld [vmem:[#allocation17 + $0x10] sm:$0xff] }
 0xa41   :  { %v2205_v0 = vmul.f32 1.442695, %v2203_v11  ;;  %v1898_v11 = vld [vmem:[%s11738_s22 + $0x8] sm:$0xff] }
 0xa42   :  { %8644 = vpow2.f32 %v2207_v61  ;;  %v1610_v61 = vld [vmem:[#allocation17] sm:$0xff] }
 0xa43   :  { %8646 = vpow2.f32 %v2205_v0  ;;  %v1844_v0 = vld [vmem:[%s11737_s17 + $0x18] sm:$0xff] }
 0xa4c   :  { %v10198_v63 = vpop.eup %8644 }
 0xa4d   :  { %v2212_v25 = vsel %vm801_vm3, %v10198_v63, 0.0  ;;  %v10202_v6 = vpop.eup %8646 }
 0xa4e   :  { %2213 = vadd.xlane.f32.xlu1 %v2212_v25  ;;  %v2209_v26 = vsel %vm801_vm3, %v10202_v6, 0.0  ;;  %v1900_v25 = vld [vmem:[%s11738_s22 + $0x18] sm:$0xff] }
 0xa52   :  { %2210 = vadd.xlane.f32.xlu1 %v2209_v26  ;;  %v1846_v26 = vld [vmem:[%s11737_s17 + $0x28] sm:$0xff] }
 0xa63   :  { %1987 = vperm.xlu1 %8633, %v1963_v42   ;;  %v1902_v42 = vld [vmem:[%s11738_s22 + $0x28] sm:$0xff] }
 0xa67   :  { %1620 = vperm.xlu1 %8633, %v1610_v61   ;;  %v1848_v61 = vld [vmem:[%s11737_s17 + $0x38] sm:$0xff] }
 0xa6b   :  { %1625 = vperm.xlu1 %8633, %v1611_v19   ;;  %v1904_v19 = vld [vmem:[%s11738_s22 + $0x38] sm:$0xff] }
 0xa6f   :  { %1630 = vperm.xlu1 %8633, %v1612_v48   ;;  %v2682_v48 = vld [vmem:[#allocation25 + $0x18] sm:$0xff] }
 0xa73   :  { %1635 = vperm.xlu1 %8633, %v1613_v47   ;;  %v2680_v47 = vld [vmem:[#allocation25 + $0x8] sm:$0xff] }
 0xa77   :  { %1645 = vperm.xlu1 %8633, %v1615_v13   ;;  %v2309_v13 = vld [vmem:[#allocation23 + $0x8] sm:$0xff] }
 0xa7b   :  { %1655 = vperm.xlu1 %8633, %v1617_v28   ;;  %v2311_v28 = vld [vmem:[#allocation23 + $0x18] sm:$0xff] }
 0xa7f   :  { %1856 = vperm.xlu1 %8633, %v1842_v50   ;;  %v2313_v50 = vld [vmem:[#allocation23 + $0x28] sm:$0xff] }
 0xa83   :  { %1912 = vperm.xlu1 %8633, %v1898_v11   ;;  %v2315_v11 = vld [vmem:[#allocation23 + $0x38] sm:$0xff] }
 0xa87   :  { %1866 = vperm.xlu1 %8633, %v1844_v0   ;;  %v2564_v0 = vld [vmem:[%s11739_s29 + $0x8] sm:$0xff] }
 0xa8b   :  { %1922 = vperm.xlu1 %8633, %v1900_v25   ;;  %v2620_v25 = vld [vmem:[%s11740_s3 + $0x8] sm:$0xff] }
 0xa8f   :  { %1876 = vperm.xlu1 %8633, %v1846_v26   ;;  %v2566_v26 = vld [vmem:[%s11739_s29 + $0x18] sm:$0xff] }
 0xa93   :  { %1932 = vperm.xlu1 %8633, %v1902_v42   ;;  %v2622_v42 = vld [vmem:[%s11740_s3 + $0x18] sm:$0xff] }
 0xa97   :  { %1886 = vperm.xlu1 %8633, %v1848_v61   ;;  %v2568_v61 = vld [vmem:[%s11739_s29 + $0x28] sm:$0xff] }
 0xa9b   :  { %1942 = vperm.xlu1 %8633, %v1904_v19   ;;  %v2624_v19 = vld [vmem:[%s11740_s3 + $0x28] sm:$0xff] }
 0xa9f   :  { %2700 = vperm.xlu1 %8633, %v2682_v48   ;;  %v2570_v48 = vld [vmem:[%s11739_s29 + $0x38] sm:$0xff] }
 0xaa3   :  { %2690 = vperm.xlu1 %8633, %v2680_v47   ;;  %v2626_v47 = vld [vmem:[%s11740_s3 + $0x38] sm:$0xff] }
 0xaa7   :  { %2323 = vperm.xlu1 %8633, %v2309_v13   ;;  %v2675_v13 = vld [vmem:[%s11741_s25] sm:$0xff] }
 0xaa8   :  { %7617 = vmatprep.mubr.msk.f32.mxu0 %vm597_vm0, %v2675_v13 }
 0xaab   :  { %2333 = vperm.xlu1 %8633, %v2311_v28  }
 0xaaf   :  { %2343 = vperm.xlu1 %8633, %v2313_v50  }
 0xab3   :  { %2353 = vperm.xlu1 %8633, %v2315_v11   ;;  %v10226_v11 = vpop.permute.xlu0 %1992 }
 0xab4   :  { %11742 = vst [vmem:[#allocation120_spill] sm:$0xff] %v10226_v11 }
 0xab7   :  { %2578 = vperm.xlu1 %8633, %v2564_v0  }
 0xabb   :  { %2634 = vperm.xlu1 %8633, %v2620_v25   ;;  %v2105_v25 = vadd.f32 %v10180_v18, %v10226_v11 }
 0xabf   :  { %2588 = vperm.xlu1 %8633, %v2566_v26  }
 0xac3   :  { %2644 = vperm.xlu1 %8633, %v2622_v42  }
 0xac7   :  { %2598 = vperm.xlu1 %8633, %v2568_v61  }
 0xacb   :  { %2654 = vperm.xlu1 %8633, %v2624_v19  }
 0xacf   :  { %2608 = vperm.xlu1 %8633, %v2570_v48  }
 0xad3   :  { %2664 = vperm.xlu1 %8633, %v2626_v47  }
 0xadb   :  { %v2214_v28 = vpop.xlane.xlu1 %2213 }
 0xadc   :  { %8648 = vrcp.f32 %v2214_v28 }
 0xadf   :  { %v2211_v50 = vpop.xlane.xlu1 %2210 }
 0xae0   :  { %8650 = vrcp.f32 %v2211_v50 }
 0xae3   :  { %v10228_v0 = vpop.permute.xlu1 %1987 }
 0xae4   :  { %11743 = vst [vmem:[#allocation121_spill] sm:$0xff] %v10228_v0  ;;  %v2100_v26 = vadd.f32 %v10206_v37, %v10228_v0 }
 0xae6   :  { %v8245_v42 = vpack.c.bf16 %v2105_v25, %v2100_v26  ;;  %v8649_v48 = vpop.eup %8648  ;;  %v10245_v25 = vpop.permute.xlu0 %1640 }
 0xae7   :  { %v10234_v61 = vpop.permute.xlu1 %1620  ;;  %v2218_v37 = vmul.f32 %v8649_v48, %v10198_v63  ;;  %11746 = vst [vmem:[#allocation124_spill] sm:$0xff] %v10245_v25  ;;  %v1745_v63 = vadd.f32 %v10172_v17, %v10245_v25 }
 0xae8   :  { %11744 = vst [vmem:[#allocation122_spill] sm:$0xff] %v10234_v61  ;;  %v1725_v19 = vadd.f32 %v10164_v21, %v10234_v61  ;;  %8246 = vmatprep.subr.bf16.mxu1 %v8245_v42 }
 0xae9   :  { %8248 = vmatpush3.bf16.msra.mxu1 %v8245_v42 }
 0xaea   :  { %v8651_v47 = vpop.eup %8650  ;;  %v1763_v50 = vadd.f32 %v1725_v19, %v10071_v22  ;;  %v10259_v48 = vpop.permute.xlu0 %1650 }
 0xaeb   :  { %v10238_v13 = vpop.permute.xlu1 %1625  ;;  %v2217_v28 = vmul.f32 %v8651_v47, %v10202_v6  ;;  %11748 = vst [vmem:[#allocation126_spill] sm:$0xff] %v10259_v48 }
 0xaec   :  { %11745 = vst [vmem:[#allocation123_spill] sm:$0xff] %v10238_v13  ;;  %v1730_v18 = vadd.f32 %v10162_v60, %v10238_v13  ;;  %v1771_v42 = vsel %vm711_vm1, %v1763_v50, 0.0 }
 0xaed   :  { %7582 = vmatprep.mubr.msk.f32.mxu1 %vm801_vm3, %v2217_v28 }
 0xaee   :  { %v1764_v21 = vadd.f32 %v1730_v18, %v10074_v51  ;;  %7583 = vmatmul.mubr.msk.f32.vlgmr.msra.gmra.mrb[36].mxu1 %vm801_vm3, %v2218_v37  ;;  %v1767_v37 = vadd.f32 %v1745_v63, %v10089_v15 }
 0xaef   :  { %v10250_v26 = vpop.permute.xlu1 %1630 }
 0xaf0   :  { %11747 = vst [vmem:[#allocation125_spill] sm:$0xff] %v10250_v26  ;;  %v1772_v6 = vsel %vm711_vm1, %v1764_v21, 0.0  ;;  %v1735_v22 = vadd.f32 %v10168_v20, %v10250_v26  ;;  %v1755_v20 = vadd.f32 %v10176_v46, %v10259_v48  ;;  %v1778_v25 = vsel %vm711_vm1, %v1767_v37, 0.0 }
 0xaf1   :  { %v1773_v60 = vadd.f32 %v1772_v6, %v1771_v42 }
 0xaf2   :  { %v1765_v19 = vadd.f32 %v1735_v22, %v10077_v49 }
 0xaf3   :  { %v10261_v51 = vpop.permute.xlu1 %1635 }
 0xaf4   :  { %11749 = vst [vmem:[#allocation127_spill] sm:$0xff] %v10261_v51  ;;  %v1774_v47 = vsel %vm711_vm1, %v1765_v19, 0.0  ;;  %v1740_v28 = vadd.f32 %v10166_v39, %v10261_v51  ;;  %v1769_v39 = vadd.f32 %v1755_v20, %v10098_v10 }
 0xaf5   :  { %v1775_v18 = vadd.f32 %v1774_v47, %v1773_v60 }
 0xaf6   :  { %v1766_v42 = vadd.f32 %v1740_v28, %v10081_v38  ;;  %v1782_v28 = vsel %vm711_vm1, %v1769_v39, 0.0 }
 0xaf7   :  { %v10270_v17 = vpop.permute.xlu1 %1645 }
 0xaf8   :  { %11750 = vst [vmem:[#allocation128_spill] sm:$0xff] %v10270_v17  ;;  %v1776_v49 = vsel %vm711_vm1, %v1766_v42, 0.0  ;;  %v1750_v6 = vadd.f32 %v10170_v44, %v10270_v17 }
 0xaf9   :  { %v1777_v22 = vadd.f32 %v1776_v49, %v1775_v18 }
 0xafa   :  { %v1768_v60 = vadd.f32 %v1750_v6, %v10092_v32 }
 0xafb   :  { %v1779_v15 = vadd.f32 %v1778_v25, %v1777_v22  ;;  %v10278_v63 = vpop.permute.xlu1 %1655 }
 0xafc   :  { %11751 = vst [vmem:[#allocation129_spill] sm:$0xff] %v10278_v63  ;;  %v1780_v46 = vsel %vm711_vm1, %v1768_v60, 0.0  ;;  %v1760_v38 = vadd.f32 %v10174_v62, %v10278_v63 }
 0xafd   :  { %v1781_v47 = vadd.f32 %v1780_v46, %v1779_v15 }
 0xafe   :  { %v1770_v44 = vadd.f32 %v1760_v38, %v10101_v23 }
 0xaff   :  { %v1783_v18 = vadd.f32 %v1782_v28, %v1781_v47 }
 0xb00   :  { %v1784_v49 = vsel %vm711_vm1, %v1770_v44, 0.0 }
 0xb01   :  { %v1785_v48 = vadd.f32 %v1784_v49, %v1783_v18 }
 0xb03   :  { %v1786_v10 = vrot.slane %v1785_v48, 4 }
 0xb05   :  { %v1787_v20 = vadd.f32 %v1786_v10, %v1785_v48 }
 0xb07   :  { %v1788_v32 = vrot.slane %v1787_v20, 2 }
 0xb09   :  { %v1789_v25 = vadd.f32 %v1788_v32, %v1787_v20 }
 0xb0b   :  { %v1790_v6 = vrot.slane %v1789_v25, 1 }
 0xb0d   :  { %v1791_v22 = vadd.f32 %v1790_v6, %v1789_v25  ;;  %v10293_v6 = vpop.permute.xlu0 %1851 }
 0xb0e   :  { %11752 = vst [vmem:[#allocation130_spill] sm:$0xff] %v10293_v6 }
 0xb0f   :  { %v1792_v17 = vmul.f32 0.015625, %v1791_v22 }
 0xb11   :  { %v1796_v26 = vsub.f32 %v1766_v42, %v1792_v17  ;;  %v1798_v51 = vsub.f32 %v1768_v60, %v1792_v17  ;;  %v1800_v61 = vsub.f32 %v1770_v44, %v1792_v17  ;;  %v1793_v62 = vsub.f32 %v1763_v50, %v1792_v17 }
 0xb12   :  { %v1794_v15 = vsub.f32 %v1764_v21, %v1792_v17  ;;  %v1795_v46 = vsub.f32 %v1765_v19, %v1792_v17  ;;  %v1797_v63 = vsub.f32 %v1767_v37, %v1792_v17  ;;  %v1799_v13 = vsub.f32 %v1769_v39, %v1792_v17 }
 0xb13   :  { %v1801_v23 = vmul.f32 %v1793_v62, %v1793_v62  ;;  %v1804_v18 = vmul.f32 %v1796_v26, %v1796_v26  ;;  %v1806_v60 = vmul.f32 %v1798_v51, %v1798_v51  ;;  %v1808_v39 = vmul.f32 %v1800_v61, %v1800_v61 }
 0xb14   :  { %v1802_v38 = vmul.f32 %v1794_v15, %v1794_v15  ;;  %v1803_v47 = vmul.f32 %v1795_v46, %v1795_v46  ;;  %v1805_v10 = vmul.f32 %v1797_v63, %v1797_v63  ;;  %v1807_v19 = vmul.f32 %v1799_v13, %v1799_v13 }
 0xb15   :  { %v1809_v28 = vsel %vm711_vm1, %v1801_v23, 0.0  ;;  %v1814_v50 = vsel %vm711_vm1, %v1804_v18, 0.0  ;;  %v1818_v44 = vsel %vm711_vm1, %v1806_v60, 0.0  ;;  %v10295_v23 = vpop.permute.xlu1 %1856  ;;  %v10298_v18 = vpop.permute.xlu0 %1907 }
 0xb16   :  { %v1810_v48 = vsel %vm711_vm1, %v1802_v38, 0.0  ;;  %v1812_v20 = vsel %vm711_vm1, %v1803_v47, 0.0  ;;  %v1816_v37 = vsel %vm711_vm1, %v1805_v10, 0.0  ;;  %v1820_v25 = vsel %vm711_vm1, %v1807_v19, 0.0  ;;  %11753 = vst [vmem:[#allocation131_spill] sm:$0xff] %v10295_v23  ;;  %11754 = vst [vmem:[#allocation132_spill] sm:$0xff] %v10298_v18 }
 0xb17   :  { %v1811_v49 = vadd.f32 %v1810_v48, %v1809_v28  ;;  %v1822_v38 = vsel %vm711_vm1, %v1808_v39, 0.0 }
 0xb19   :  { %v1813_v42 = vadd.f32 %v1812_v20, %v1811_v49  ;;  %v10300_v49 = vpop.permute.xlu1 %1912 }
 0xb1a   :  { %11755 = vst [vmem:[#allocation133_spill] sm:$0xff] %v10300_v49 }
 0xb1b   :  { %v1815_v21 = vadd.f32 %v1814_v50, %v1813_v42  ;;  %v10302_v42 = vpop.permute.xlu0 %1861 }
 0xb1c   :  { %11756 = vst [vmem:[#allocation134_spill] sm:$0xff] %v10302_v42 }
 0xb1d   :  { %v1817_v17 = vadd.f32 %v1816_v37, %v1815_v21  ;;  %v10304_v50 = vpop.permute.xlu1 %1866 }
 0xb1e   :  { %11757 = vst [vmem:[#allocation135_spill] sm:$0xff] %v10304_v50 }
 0xb1f   :  { %v1819_v32 = vadd.f32 %v1818_v44, %v1817_v17  ;;  %v10306_v37 = vpop.permute.xlu0 %1917 }
 0xb20   :  { %11758 = vst [vmem:[#allocation136_spill] sm:$0xff] %v10306_v37 }
 0xb21   :  { %v1821_v22 = vadd.f32 %v1820_v25, %v1819_v32  ;;  %v10308_v39 = vpop.permute.xlu1 %1922 }
 0xb22   :  { %11759 = vst [vmem:[#allocation137_spill] sm:$0xff] %v10308_v39 }
 0xb23   :  { %v1823_v47 = vadd.f32 %v1822_v38, %v1821_v22  ;;  %v10310_v44 = vpop.permute.xlu0 %1871 }
 0xb24   :  { %11760 = vst [vmem:[#allocation138_spill] sm:$0xff] %v10310_v44 }
 0xb25   :  { %v1824_v28 = vrot.slane %v1823_v47, 4  ;;  %v10312_v32 = vpop.permute.xlu1 %1876 }
 0xb26   :  { %11761 = vst [vmem:[#allocation139_spill] sm:$0xff] %v10312_v32 }
 0xb27   :  { %v1825_v48 = vadd.f32 %v1824_v28, %v1823_v47  ;;  %v10314_v22 = vpop.permute.xlu0 %1927 }
 0xb28   :  { %11762 = vst [vmem:[#allocation140_spill] sm:$0xff] %v10314_v22 }
 0xb29   :  { %v1826_v10 = vrot.slane %v1825_v48, 2  ;;  %v10316_v38 = vpop.permute.xlu1 %1932 }
 0xb2a   :  { %11763 = vst [vmem:[#allocation141_spill] sm:$0xff] %v10316_v38 }
 0xb2b   :  { %v1827_v20 = vadd.f32 %v1826_v10, %v1825_v48 }
 0xb2d   :  { %v1828_v60 = vrot.slane %v1827_v20, 1 }
 0xb2f   :  { %v1829_v21 = vadd.f32 %v1828_v60, %v1827_v20 }
 0xb31   :  { %v1830_v19 = vmul.f32 0.015625, %v1829_v21 }
 0xb33   :  { %v1831_v17 = vadd.f32 1e-05, %v1830_v19 }
 0xb35   :  { %8652 = vrsqrt.f32 %v1831_v17 }
 0xb3f   :  { %v8653_v25 = vpop.eup %8652 }
 0xb40   :  { %v1834_v47 = vmul.f32 %v8653_v25, %v1794_v15  ;;  %v1833_v28 = vmul.f32 %v8653_v25, %v1793_v62  ;;  %v1836_v48 = vmul.f32 %v8653_v25, %v1796_v26  ;;  %v1835_v10 = vmul.f32 %v8653_v25, %v1795_v46  ;;  %v2300_v46 = vld [vmem:[#allocation22] sm:$0xff] }
 0xb41   :  { %v1838_v20 = vmul.f32 %v8653_v25, %v1798_v51  ;;  %v1837_v60 = vmul.f32 %v8653_v25, %v1797_v63  ;;  %v1840_v21 = vmul.f32 %v8653_v25, %v1800_v61  ;;  %v1839_v19 = vmul.f32 %v8653_v25, %v1799_v13  ;;  %v10336_v51 = vpop.permute.xlu0 %1881  ;;  %v10338_v63 = vpop.permute.xlu1 %1886  ;;  %7589 = vmatprep.mubr.msk.f32.mxu1 %vm801_vm3, %v2300_v46 }
 0xb42   :  { %v1890_v0 = vmul.f32 %v10295_v23, %v1834_v47  ;;  %v1889_v17 = vmul.f32 %v10293_v6, %v1833_v28  ;;  %v1892_v11 = vmul.f32 %v10304_v50, %v1836_v48  ;;  %v1891_v2 = vmul.f32 %v10302_v42, %v1835_v10  ;;  %11764 = vst [vmem:[#allocation142_spill] sm:$0xff] %v10336_v51 }
 0xb43   :  { %v1894_v33 = vmul.f32 %v10312_v32, %v1838_v20  ;;  %v1893_v43 = vmul.f32 %v10310_v44, %v1837_v60  ;;  %11765 = vst [vmem:[#allocation143_spill] sm:$0xff] %v10338_v63  ;;  %v1896_v25 = vmul.f32 %v10338_v63, %v1840_v21  ;;  %v1895_v47 = vmul.f32 %v10336_v51, %v1839_v19  ;;  %v2676_v60 = vld [vmem:[%s11741_s25 + $0x8] sm:$0xff]  ;;  %v2677_v21 = vld [vmem:[%s11741_s25 + $0x10] sm:$0xff]  ;;  %v2678_v19 = vld [vmem:[%s11741_s25 + $0x18] sm:$0xff] }
 0xb44   :  { %v10325_v62 = vadd.f32 %v10298_v18, %v1889_v17  ;;  %v10328_v26 = vadd.f32 %v10300_v49, %v1890_v0  ;;  %v10331_v61 = vadd.f32 %v10306_v37, %v1891_v2  ;;  %v10334_v13 = vadd.f32 %v10308_v39, %v1892_v11 }
 0xb45   :  { %v10351_v11 = vadd.f32 %v10314_v22, %v1893_v43  ;;  %v10354_v0 = vadd.f32 %v10316_v38, %v1894_v33  ;;  %v10360_v28 = vpop.permute.xlu0 %1937  ;;  %v10362_v48 = vpop.permute.xlu1 %1942  ;;  %v2303_v38 = vld [vmem:[#allocation22 + $0x18] sm:$0xff]  ;;  %v2304_v22 = vld [vmem:[#allocation22 + $0x20] sm:$0xff] }
 0xb46   :  { %v10342_v15 = vpack.c.bf16 %v10328_v26, %v10325_v62  ;;  %v10348_v2 = vpack.c.bf16 %v10334_v13, %v10331_v61  ;;  %11766 = vst [vmem:[#allocation144_spill] sm:$0xff] %v10360_v28  ;;  %11767 = vst [vmem:[#allocation145_spill] sm:$0xff] %v10362_v48  ;;  %v10369_v33 = vadd.f32 %v10360_v28, %v1895_v47  ;;  %v2301_v47 = vld [vmem:[#allocation22 + $0x8] sm:$0xff] }
 0xb47   :  { %v10366_v43 = vpack.c.bf16 %v10354_v0, %v10351_v11  ;;  %v10372_v10 = vadd.f32 %v10362_v48, %v1896_v25  ;;  %v2302_v48 = vld [vmem:[#allocation22 + $0x10] sm:$0xff] }
 0xb48   :  { %8254 = vmatprep.subr.bf16.mxu0 %v10342_v15 }
 0xb49   :  { %8256 = vmatpush3.bf16.msra.mxu0 %v10342_v15  ;;  %v10378_v20 = vpack.c.bf16 %v10372_v10, %v10369_v33 }
 0xb4a   :  { %8258 = vmatprep.subr.bf16.mxu0 %v10348_v2 }
 0xb4d   :  { %8260 = vmatpush3.bf16.msra.mxu0 %v10348_v2 }
 0xb4e   :  { %8262 = vmatprep.subr.bf16.mxu0 %v10366_v43 }
 0xb51   :  { %8264 = vmatpush3.bf16.msra.mxu0 %v10366_v43 }
 0xb52   :  { %8266 = vmatprep.subr.bf16.mxu0 %v10378_v20 }
 0xb55   :  { %8268 = vmatpush3.bf16.msra.mxu0 %v10378_v20 }
 0xb58   :  { %7618 = vmatmul.mubr.msk.f32.vlgmr.msra.gmra.mrb[14].mxu0 %vm597_vm0, %v2676_v60  ;;  %v2305_v60 = vld [vmem:[#allocation22 + $0x28] sm:$0xff] }
 0xb59   :  { %7620 = vmatprep.mubr.msk.f32.mxu0 %vm597_vm0, %v2677_v21  ;;  %v2306_v21 = vld [vmem:[#allocation22 + $0x30] sm:$0xff] }
 0xb5c   :  { %7621 = vmatmul.mubr.msk.f32.gmra.mrb[16].mxu0 %vm597_vm0, %v2678_v19  ;;  %v2307_v19 = vld [vmem:[#allocation22 + $0x38] sm:$0xff] }
 0xbc1   :  { %v7584_v17 = vpop.f32.mrb[36].mxu1 }
 0xbc2   :  { %v2291_v46 = vpop.f32.mrb[37].mxu1 }
 0xbc3   :  { %v8249_v25 = vpack.c.bf16 %v7584_v17, %v2291_v46  ;;  %v10396_v17 = vpop.permute.xlu0 %2695 }
 0xbc4   :  { %11768 = vst [vmem:[#allocation146_spill] sm:$0xff] %v10396_v17 }
 0xbc5   :  { %8250 = vmatprep.subr.bf16.mxu1 %v8249_v25 }
 0xbc6   :  { %8252 = vmatpush3.bf16.msra.mxu1 %v8249_v25 }
 0xbc7   :  { %v10398_v25 = vpop.permute.xlu0 %2685 }
 0xbc8   :  { %11769 = vst [vmem:[#allocation147_spill] sm:$0xff] %v10398_v25 }
 0xbc9   :  { %7590 = vmatmul.mubr.msk.f32.vlgmr.msra.gmra.mrb[38].mxu1 %vm801_vm3, %v2301_v47 }
 0xbca   :  { %7592 = vmatprep.mubr.msk.f32.mxu1 %vm801_vm3, %v2302_v48 }
 0xbcd   :  { %7593 = vmatmul.mubr.msk.f32.gmra.mrb[40].mxu1 %vm801_vm3, %v2303_v38  ;;  %v10401_v38 = vpop.permute.xlu1 %2700 }
 0xbce   :  { %7595 = vmatprep.mubr.msk.f32.mxu1 %vm801_vm3, %v2304_v22  ;;  %11770 = vst [vmem:[#allocation148_spill] sm:$0xff] %v10401_v38 }
 0xbd1   :  { %7596 = vmatmul.mubr.msk.f32.gmra.mrb[42].mxu1 %vm801_vm3, %v2305_v60  ;;  %v10410_v37 = vpop.permute.xlu1 %2690 }
 0xbd2   :  { %7598 = vmatprep.mubr.msk.f32.mxu1 %vm801_vm3, %v2306_v21  ;;  %11772 = vst [vmem:[#allocation89_spill] sm:$0xff] %v10410_v37 }
 0xbd5   :  { %7599 = vmatmul.mubr.msk.f32.gmra.mrb[44].mxu1 %vm801_vm3, %v2307_v19 }
 0xc2b   :  { %v7619_v46 = vpop.f32.mrb[14].mxu0 }
 0xc2c   :  { %v2781_v48 = vpop.f32.mrb[15].mxu0 }
 0xc2d   :  { %v2782_v47 = vadd.f32 %v2781_v48, %v10398_v25  ;;  %v2787_v48 = vadd.f32 %v7619_v46, %v10410_v37  ;;  %v2800_v25 = vld [vmem:[#allocation26] sm:$0xff]  ;;  %v11777_v46 = vld [vmem:[#allocation83_spill] sm:$0xff] }
 0xc2e   :  { %7639 = vmatprep.mubr.msk.f32.mxu1 %vm597_vm0, %v2800_v25 }
 0xc2f   :  { %v7622_v22 = vpop.f32.mrb[16].mxu0  ;;  %7646 = vmatprep.mubr.msk.f32.mxu0 %vm711_vm1, %v2782_v47  ;;  %v10415_v47 = vpop.permute.xlu1 %2323 }
 0xc30   :  { %v2797_v60 = vadd.f32 %v7622_v22, %v10401_v38  ;;  %v2791_v39 = vpop.f32.mrb[17].mxu0  ;;  %11773 = vst [vmem:[#allocation149_spill] sm:$0xff] %v10415_v47  ;;  %v10417_v22 = vpop.permute.xlu0 %2318 }
 0xc31   :  { %v2792_v21 = vadd.f32 %v2791_v39, %v10396_v17  ;;  %11774 = vst [vmem:[#allocation150_spill] sm:$0xff] %v10417_v22 }
 0xc33   :  { %v8285_v28 = vpack.c.bf16 %v2797_v60, %v2792_v21  ;;  %v10419_v39 = vpop.permute.xlu1 %2333 }
 0xc34   :  { %11775 = vst [vmem:[#allocation151_spill] sm:$0xff] %v10419_v39  ;;  %v10421_v21 = vpop.permute.xlu0 %2328 }
 0xc35   :  { %8287 = vmatprep.subr.msk.bf16.mxu0 %vm9888_vm2, %v8285_v28  ;;  %11776 = vst [vmem:[#allocation152_spill] sm:$0xff] %v10421_v21 }
 0xc36   :  { %8290 = vmatpush3.bf16.xpose.msk.msra.mxu0 %vm9888_vm2, %v8285_v28 }
 0xc37   :  { %v10429_v44 = vpop.permute.xlu1 %2343 }
 0xc38   :  { %11779 = vst [vmem:[#allocation83_spill] sm:$0xff] %v10429_v44 }
 0xc3b   :  { %v10440_v6 = vpop.permute.xlu1 %2353 }
 0xc3d   :  { %7647 = vmatmul.mubr.msk.f32.vlgmr.msra.gmra.mrb[18].mxu0 %vm711_vm1, %v2787_v48  ;;  %v11778_v48 = vld [vmem:[#allocation82_spill] sm:$0xff] }
 0xc9c   :  { %v7591_v60 = vpop.f32.mrb[38].mxu1 }
 0xc9d   :  { %v2452_v28 = vadd.f32 %v7591_v60, %v10415_v47  ;;  %v2446_v17 = vpop.f32.mrb[39].mxu1  ;;  %v10433_v60 = vpop.permute.xlu0 %2338 }
 0xc9e   :  { %v2447_v38 = vadd.f32 %v2446_v17, %v10417_v22  ;;  %11780 = vst [vmem:[#allocation82_spill] sm:$0xff] %v10433_v60  ;;  %v11781_v17 = vld [vmem:[#allocation86_spill] sm:$0xff] }
 0xc9f   :  { %v2486_v37 = vadd.f32 %v2452_v28, %v11777_v46  ;;  %v11782_v28 = vld [vmem:[#allocation84_spill] sm:$0xff]  ;;  %11783 = vst [vmem:[#allocation86_spill] sm:$0xff] %v10440_v6 }
 0xca0   :  { %v2485_v49 = vadd.f32 %v2447_v38, %v11778_v48  ;;  %v7594_v18 = vpop.f32.mrb[40].mxu1 }
 0xca1   :  { %v2494_v25 = vsel %vm801_vm3, %v2486_v37, 0.0  ;;  %v2462_v63 = vadd.f32 %v7594_v18, %v10419_v39  ;;  %v2456_v32 = vpop.f32.mrb[41].mxu1 }
 0xca2   :  { %v2493_v50 = vsel %vm801_vm3, %v2485_v49, 0.0  ;;  %v2457_v51 = vadd.f32 %v2456_v32, %v10421_v21  ;;  %v11784_v21 = vld [vmem:[#allocation90_spill] sm:$0xff] }
 0xca3   :  { %v2495_v47 = vadd.f32 %v2494_v25, %v2493_v50  ;;  %v2488_v22 = vadd.f32 %v2462_v63, %v11781_v17  ;;  %v11785_v50 = vld [vmem:[#allocation88_spill] sm:$0xff]  ;;  %v10445_v17 = vpop.permute.xlu0 %2348 }
 0xca4   :  { %v2487_v46 = vadd.f32 %v2457_v51, %v11782_v28  ;;  %v7597_v38 = vpop.f32.mrb[42].mxu1  ;;  %11786 = vst [vmem:[#allocation84_spill] sm:$0xff] %v10445_v17 }
 0xca5   :  { %v2472_v48 = vadd.f32 %v7597_v38, %v10429_v44  ;;  %v2466_v42 = vpop.f32.mrb[43].mxu1  ;;  %v2498_v32 = vsel %vm801_vm3, %v2488_v22, 0.0 }
 0xca6   :  { %v2496_v18 = vsel %vm801_vm3, %v2487_v46, 0.0  ;;  %v2467_v39 = vadd.f32 %v2466_v42, %v10433_v60  ;;  %v11787_v60 = vld [vmem:[#allocation93_spill] sm:$0xff] }
 0xca7   :  { %v2497_v23 = vadd.f32 %v2496_v18, %v2495_v47  ;;  %v2490_v16 = vadd.f32 %v2472_v48, %v11784_v21 }
 0xca8   :  { %v2489_v25 = vadd.f32 %v2467_v39, %v11785_v50  ;;  %v7600_v63 = vpop.f32.mrb[44].mxu1 }
 0xca9   :  { %v2499_v51 = vadd.f32 %v2498_v32, %v2497_v23  ;;  %v2482_v28 = vadd.f32 %v7600_v63, %v10440_v6  ;;  %v2476_v38 = vpop.f32.mrb[45].mxu1  ;;  %v2502_v18 = vsel %vm801_vm3, %v2490_v16, 0.0 }
 0xcaa   :  { %v2500_v44 = vsel %vm801_vm3, %v2489_v25, 0.0  ;;  %v2477_v42 = vadd.f32 %v2476_v38, %v10445_v17 }
 0xcab   :  { %v2501_v47 = vadd.f32 %v2500_v44, %v2499_v51  ;;  %v2492_v40 = vadd.f32 %v2482_v28, %v11787_v60 }
 0xcac   :  { %v2491_v21 = vadd.f32 %v2477_v42, %v11788_v41 }
 0xcad   :  { %v2503_v48 = vadd.f32 %v2502_v18, %v2501_v47  ;;  %v2506_v23 = vsel %vm801_vm3, %v2492_v40, 0.0 }
 0xcae   :  { %v2504_v39 = vsel %vm801_vm3, %v2491_v21, 0.0 }
 0xcaf   :  { %v2505_v50 = vadd.f32 %v2504_v39, %v2503_v48 }
 0xcb1   :  { %v2507_v32 = vadd.f32 %v2506_v23, %v2505_v50 }
 0xcb3   :  { %v2508_v63 = vrot.slane %v2507_v32, 4 }
 0xcb5   :  { %v2509_v6 = vadd.f32 %v2508_v63, %v2507_v32 }
 0xcb7   :  { %v2510_v36 = vrot.slane %v2509_v6, 2 }
 0xcb9   :  { %v2511_v14 = vadd.f32 %v2510_v36, %v2509_v6 }
 0xcbb   :  { %v2512_v34 = vrot.slane %v2511_v14, 1 }
 0xcbd   :  { %v2513_v38 = vadd.f32 %v2512_v34, %v2511_v14 }
 0xcbf   :  { %v2514_v44 = vmul.f32 0.015625, %v2513_v38  ;;  %v10462_v38 = vpop.permute.xlu0 %2573 }
 0xcc0   :  { %11789 = vst [vmem:[#allocation90_spill] sm:$0xff] %v10462_v38 }
 0xcc1   :  { %v2515_v51 = vsub.f32 %v2485_v49, %v2514_v44  ;;  %v2516_v17 = vsub.f32 %v2486_v37, %v2514_v44  ;;  %v2517_v35 = vsub.f32 %v2487_v46, %v2514_v44  ;;  %v2518_v60 = vsub.f32 %v2488_v22, %v2514_v44 }
 0xcc2   :  { %v2519_v28 = vsub.f32 %v2489_v25, %v2514_v44  ;;  %v2520_v41 = vsub.f32 %v2490_v16, %v2514_v44  ;;  %v2521_v42 = vsub.f32 %v2491_v21, %v2514_v44  ;;  %v2522_v47 = vsub.f32 %v2492_v40, %v2514_v44  ;;  %v10464_v44 = vpop.permute.xlu1 %2578 }
 0xcc3   :  { %v2523_v18 = vmul.f32 %v2515_v51, %v2515_v51  ;;  %v2524_v48 = vmul.f32 %v2516_v17, %v2516_v17  ;;  %v2525_v39 = vmul.f32 %v2517_v35, %v2517_v35  ;;  %v2526_v30 = vmul.f32 %v2518_v60, %v2518_v60  ;;  %11790 = vst [vmem:[#allocation88_spill] sm:$0xff] %v10464_v44 }
 0xcc4   :  { %v2527_v6 = vmul.f32 %v2519_v28, %v2519_v28  ;;  %v2528_v49 = vmul.f32 %v2520_v41, %v2520_v41  ;;  %v2529_v16 = vmul.f32 %v2521_v42, %v2521_v42  ;;  %v2530_v25 = vmul.f32 %v2522_v47, %v2522_v47 }
 0xcc5   :  { %v2531_v50 = vsel %vm801_vm3, %v2523_v18, 0.0  ;;  %v2532_v23 = vsel %vm801_vm3, %v2524_v48, 0.0  ;;  %v2534_v34 = vsel %vm801_vm3, %v2525_v39, 0.0  ;;  %v2536_v37 = vsel %vm801_vm3, %v2526_v30, 0.0 }
 0xcc6   :  { %v2533_v36 = vadd.f32 %v2532_v23, %v2531_v50  ;;  %v2538_v40 = vsel %vm801_vm3, %v2527_v6, 0.0  ;;  %v2540_v21 = vsel %vm801_vm3, %v2528_v49, 0.0  ;;  %v2542_v63 = vsel %vm801_vm3, %v2529_v16, 0.0  ;;  %v10467_v50 = vpop.permute.xlu0 %2629  ;;  %v10469_v23 = vpop.permute.xlu1 %2634 }
 0xcc7   :  { %v2544_v48 = vsel %vm801_vm3, %v2530_v25, 0.0  ;;  %11791 = vst [vmem:[#allocation93_spill] sm:$0xff] %v10467_v50  ;;  %11792 = vst [vmem:[#allocation92_spill] sm:$0xff] %v10469_v23 }
 0xcc8   :  { %v2535_v14 = vadd.f32 %v2534_v34, %v2533_v36 }
 0xcca   :  { %v2537_v22 = vadd.f32 %v2536_v37, %v2535_v14  ;;  %v10471_v14 = vpop.permute.xlu0 %2583  ;;  %v10473_v49 = vpop.permute.xlu1 %2588 }
 0xccb   :  { %11793 = vst [vmem:[#allocation153_spill] sm:$0xff] %v10471_v14  ;;  %11794 = vst [vmem:[#allocation154_spill] sm:$0xff] %v10473_v49 }
 0xccc   :  { %v2539_v46 = vadd.f32 %v2538_v40, %v2537_v22 }
 0xcce   :  { %v2541_v32 = vadd.f32 %v2540_v21, %v2539_v46  ;;  %v10475_v40 = vpop.permute.xlu0 %2639  ;;  %v10477_v46 = vpop.permute.xlu1 %2644 }
 0xccf   :  { %11795 = vst [vmem:[#allocation155_spill] sm:$0xff] %v10475_v40  ;;  %11796 = vst [vmem:[#allocation156_spill] sm:$0xff] %v10477_v46 }
 0xcd0   :  { %v2543_v18 = vadd.f32 %v2542_v63, %v2541_v32 }
 0xcd2   :  { %v2545_v39 = vadd.f32 %v2544_v48, %v2543_v18  ;;  %v10479_v21 = vpop.permute.xlu0 %2593  ;;  %v10481_v32 = vpop.permute.xlu1 %2598 }
 0xcd3   :  { %11797 = vst [vmem:[#allocation157_spill] sm:$0xff] %v10479_v21  ;;  %11798 = vst [vmem:[#allocation158_spill] sm:$0xff] %v10481_v32 }
 0xcd4   :  { %v2546_v30 = vrot.slane %v2545_v39, 4 }
 0xcd6   :  { %v2547_v36 = vadd.f32 %v2546_v30, %v2545_v39  ;;  %v10483_v18 = vpop.permute.xlu0 %2649  ;;  %v10485_v48 = vpop.permute.xlu1 %2654 }
 0xcd7   :  { %11799 = vst [vmem:[#allocation159_spill] sm:$0xff] %v10483_v18  ;;  %11800 = vst [vmem:[#allocation160_spill] sm:$0xff] %v10485_v48 }
 0xcd8   :  { %v2548_v6 = vrot.slane %v2547_v36, 2 }
 0xcda   :  { %v2549_v34 = vadd.f32 %v2548_v6, %v2547_v36 }
 0xcdc   :  { %v2550_v37 = vrot.slane %v2549_v34, 1 }
 0xcde   :  { %v2551_v22 = vadd.f32 %v2550_v37, %v2549_v34 }
 0xce0   :  { %v2552_v16 = vmul.f32 0.015625, %v2551_v22 }
 0xce2   :  { %v2553_v25 = vadd.f32 1e-05, %v2552_v16 }
 0xce4   :  { %8654 = vrsqrt.f32 %v2553_v25 }
 0xcee   :  { %v8655_v63 = vpop.eup %8654 }
 0xcef   :  { %v2561_v39 = vmul.f32 %v8655_v63, %v2521_v42  ;;  %v2555_v30 = vmul.f32 %v8655_v63, %v2515_v51  ;;  %v2556_v36 = vmul.f32 %v8655_v63, %v2516_v17  ;;  %v2557_v6 = vmul.f32 %v8655_v63, %v2517_v35 }
 0xcf0   :  { %v2558_v34 = vmul.f32 %v8655_v63, %v2518_v60  ;;  %v2559_v37 = vmul.f32 %v8655_v63, %v2519_v28  ;;  %v2560_v22 = vmul.f32 %v8655_v63, %v2520_v41  ;;  %v2562_v31 = vmul.f32 %v8655_v63, %v2522_v47  ;;  %v10502_v60 = vpop.permute.xlu0 %2603  ;;  %v10504_v28 = vpop.permute.xlu1 %2608 }
 0xcf1   :  { %v2611_v16 = vmul.f32 %v10462_v38, %v2555_v30  ;;  %v2612_v25 = vmul.f32 %v10464_v44, %v2556_v36  ;;  %v2613_v27 = vmul.f32 %v10471_v14, %v2557_v6  ;;  %11801 = vst [vmem:[#allocation161_spill] sm:$0xff] %v10502_v60  ;;  %11802 = vst [vmem:[#allocation162_spill] sm:$0xff] %v10504_v28 }
 0xcf2   :  { %v2614_v29 = vmul.f32 %v10473_v49, %v2558_v34  ;;  %v2615_v12 = vmul.f32 %v10479_v21, %v2559_v37  ;;  %v2616_v51 = vmul.f32 %v10481_v32, %v2560_v22  ;;  %v2617_v47 = vmul.f32 %v10502_v60, %v2561_v39  ;;  %v2801_v37 = vld [vmem:[#allocation26 + $0x8] sm:$0xff] }
 0xcf3   :  { %v10493_v24 = vadd.f32 %v10467_v50, %v2611_v16  ;;  %v10496_v17 = vadd.f32 %v10469_v23, %v2612_v25  ;;  %v10499_v35 = vadd.f32 %v10475_v40, %v2613_v27  ;;  %v2618_v36 = vmul.f32 %v10504_v28, %v2562_v31 }
 0xcf4   :  { %v10507_v41 = vadd.f32 %v10477_v46, %v2614_v29  ;;  %v10515_v27 = vadd.f32 %v10483_v18, %v2615_v12  ;;  %v10518_v30 = vadd.f32 %v10485_v48, %v2616_v51  ;;  %v10521_v29 = vpop.permute.xlu0 %2659  ;;  %v10523_v6 = vpop.permute.xlu1 %2664 }
 0xcf5   :  { %v8269_v42 = vpack.c.bf16 %v10496_v17, %v10493_v24  ;;  %11803 = vst [vmem:[#allocation163_spill] sm:$0xff] %v10521_v29  ;;  %11804 = vst [vmem:[#allocation164_spill] sm:$0xff] %v10523_v6  ;;  %v10528_v34 = vadd.f32 %v10521_v29, %v2617_v47  ;;  %v10531_v12 = vadd.f32 %v10523_v6, %v2618_v36  ;;  %v3095_v36 = vld [vmem:[#allocation31] sm:$0xff]  ;;  %v3357_v6 = vld [vmem:[%s11805_s23 + $0x38] sm:$0xff] }
 0xcf6   :  { %v8273_v63 = vpack.c.bf16 %v10507_v41, %v10499_v35  ;;  %v8277_v39 = vpack.c.bf16 %v10518_v30, %v10515_v27  ;;  %v3481_v29 = vld [vmem:[#allocation34 + $0x18] sm:$0xff] }
 0xcf7   :  { %8270 = vmatprep.subr.bf16.mxu1 %v8269_v42  ;;  %v8281_v31 = vpack.c.bf16 %v10531_v12, %v10528_v34 }
 0xcf8   :  { %8272 = vmatpush3.bf16.msra.mxu1 %v8269_v42 }
 0xcf9   :  { %8274 = vmatprep.subr.bf16.mxu1 %v8273_v63 }
 0xcfc   :  { %8276 = vmatpush3.bf16.msra.mxu1 %v8273_v63  ;;  %v2802_v63 = vld [vmem:[#allocation28] sm:$0xff] }
 0xcfd   :  { %8278 = vmatprep.subr.bf16.mxu1 %v8277_v39 }
 0xd00   :  { %8280 = vmatpush3.bf16.msra.mxu1 %v8277_v39  ;;  %v3096_v39 = vld [vmem:[#allocation31 + $0x8] sm:$0xff] }
 0xd01   :  { %8282 = vmatprep.subr.bf16.mxu1 %v8281_v31 }
 0xd04   :  { %8284 = vmatpush3.bf16.msra.mxu1 %v8281_v31  ;;  %v3098_v31 = vld [vmem:[#allocation31 + $0x18] sm:$0xff] }
 0xd07   :  { %7640 = vmatmul.mubr.msk.f32.vlgmr.msra.gmra.mrb[46].mxu1 %vm597_vm0, %v2801_v37  ;;  %v3100_v37 = vld [vmem:[#allocation31 + $0x28] sm:$0xff] }
 0xd10   :  { %v7648_v22 = vpop.f32.mrb[18].mxu0 }
 0xd11   :  { %v2983_v16 = vmul.f32 0.25, %v7648_v22  ;;  %v2973_v25 = vpop.f32.mrb[19].mxu0  ;;  %v3102_v22 = vld [vmem:[#allocation31 + $0x38] sm:$0xff] }
 0xd12   :  { %v2982_v51 = vmul.f32 0.25, %v2973_v25  ;;  %v3351_v25 = vld [vmem:[%s11805_s23 + $0x8] sm:$0xff] }
 0xd13   :  { %v2987_v42 = vsel %vm801_vm3, %v2983_v16, -inf }
 0xd14   :  { %2988 = vmax.xlane.f32.xlu1 %v2987_v42  ;;  %v2984_v47 = vsel %vm801_vm3, %v2982_v51, -inf  ;;  %v3407_v42 = vld [vmem:[%s11806_s24 + $0x8] sm:$0xff] }
 0xd15   :  { %2985 = vmax.xlane.f32.xlu0 %v2984_v47  ;;  %v3353_v47 = vld [vmem:[%s11805_s23 + $0x18] sm:$0xff] }
 0xd25   :  { %2806 = vperm.xlu1 %8633, %v2802_v63   ;;  %v3409_v63 = vld [vmem:[%s11806_s24 + $0x18] sm:$0xff] }
 0xd29   :  { %3105 = vperm.xlu1 %8633, %v3095_v36   ;;  %v3355_v36 = vld [vmem:[%s11805_s23 + $0x28] sm:$0xff] }
 0xd2d   :  { %3110 = vperm.xlu1 %8633, %v3096_v39   ;;  %v3411_v39 = vld [vmem:[%s11806_s24 + $0x28] sm:$0xff] }
 0xd31   :  { %3120 = vperm.xlu1 %8633, %v3098_v31   ;;  %v3413_v31 = vld [vmem:[%s11806_s24 + $0x38] sm:$0xff] }
 0xd35   :  { %3130 = vperm.xlu1 %8633, %v3100_v37   ;;  %v3479_v37 = vld [vmem:[#allocation34 + $0x8] sm:$0xff] }
 0xd39   :  { %3140 = vperm.xlu1 %8633, %v3102_v22   ;;  %v3483_v22 = vld [vmem:[#allocation34 + $0x28] sm:$0xff] }
 0xd3d   :  { %3365 = vperm.xlu1 %8633, %v3351_v25   ;;  %v3485_v25 = vld [vmem:[#allocation34 + $0x38] sm:$0xff] }
 0xd41   :  { %3421 = vperm.xlu1 %8633, %v3407_v42   ;;  %v3487_v42 = vld [vmem:[#allocation34 + $0x48] sm:$0xff] }
 0xd45   :  { %3375 = vperm.xlu1 %8633, %v3353_v47   ;;  %v3489_v47 = vld [vmem:[#allocation34 + $0x58] sm:$0xff] }
 0xd49   :  { %3431 = vperm.xlu1 %8633, %v3409_v63   ;;  %v3491_v63 = vld [vmem:[#allocation34 + $0x68] sm:$0xff] }
 0xd4d   :  { %3385 = vperm.xlu1 %8633, %v3355_v36   ;;  %v3493_v36 = vld [vmem:[#allocation34 + $0x78] sm:$0xff] }
 0xd51   :  { %3441 = vperm.xlu1 %8633, %v3411_v39  }
 0xd55   :  { %3395 = vperm.xlu1 %8633, %v3357_v6  }
 0xd59   :  { %3451 = vperm.xlu1 %8633, %v3413_v31  }
 0xd5d   :  { %3501 = vperm.xlu1 %8633, %v3479_v37  }
 0xd61   :  { %3511 = vperm.xlu1 %8633, %v3481_v29  }
 0xd65   :  { %3521 = vperm.xlu1 %8633, %v3483_v22  }
 0xd69   :  { %3531 = vperm.xlu1 %8633, %v3485_v25  }
 0xd6d   :  { %3541 = vperm.xlu1 %8633, %v3487_v42  }
 0xd71   :  { %3551 = vperm.xlu1 %8633, %v3489_v47   ;;  %v3350_v47 = vld [vmem:[%s11805_s23] sm:$0xff] }
 0xd75   :  { %3561 = vperm.xlu1 %8633, %v3491_v63  }
 0xd79   :  { %3571 = vperm.xlu1 %8633, %v3493_v36  }
 0xda1   :  { %v2989_v39 = vpop.xlane.xlu1 %2988 }
 0xda2   :  { %v2991_v6 = vsub.f32 %v2983_v16, %v2989_v39  ;;  %v2986_v28 = vpop.xlane.xlu0 %2985  ;;  %v2803_v16 = vld [vmem:[#allocation28 + $0x8] sm:$0xff] }
 0xda3   :  { %v2990_v31 = vsub.f32 %v2982_v51, %v2986_v28  ;;  %v3097_v28 = vld [vmem:[#allocation31 + $0x10] sm:$0xff]  ;;  %v3406_v39 = vld [vmem:[%s11806_s24] sm:$0xff] }
 0xda4   :  { %v2994_v48 = vmul.f32 1.442695, %v2991_v6  ;;  %v3101_v51 = vld [vmem:[#allocation31 + $0x30] sm:$0xff]  ;;  %v3352_v6 = vld [vmem:[%s11805_s23 + $0x10] sm:$0xff] }
 0xda5   :  { %v2992_v37 = vmul.f32 1.442695, %v2990_v31  ;;  %v3408_v31 = vld [vmem:[%s11806_s24 + $0x10] sm:$0xff] }
 0xda6   :  { %8656 = vpow2.f32 %v2994_v48  ;;  %v3099_v48 = vld [vmem:[#allocation31 + $0x20] sm:$0xff] }
 0xda7   :  { %8658 = vpow2.f32 %v2992_v37  ;;  %v3354_v37 = vld [vmem:[%s11805_s23 + $0x20] sm:$0xff] }
 0xdb0   :  { %v10546_v29 = vpop.eup %8656 }
 0xdb1   :  { %v2999_v22 = vsel %vm801_vm3, %v10546_v29, 0.0  ;;  %v8659_v25 = vpop.eup %8658 }
 0xdb2   :  { %3000 = vadd.xlane.f32.xlu0 %v2999_v22  ;;  %v2996_v42 = vsel %vm801_vm3, %v8659_v25, 0.0  ;;  %v3410_v22 = vld [vmem:[%s11806_s24 + $0x20] sm:$0xff] }
 0xdb6   :  { %2997 = vadd.xlane.f32.xlu0 %v2996_v42  ;;  %v3356_v42 = vld [vmem:[%s11805_s23 + $0x30] sm:$0xff] }
 0xdcc   :  { %2811 = vperm.xlu0 %8632, %v2803_v16   ;;  %v3412_v16 = vld [vmem:[%s11806_s24 + $0x30] sm:$0xff] }
 0xdd0   :  { %3115 = vperm.xlu0 %8632, %v3097_v28   ;;  %v3478_v28 = vld [vmem:[#allocation34] sm:$0xff] }
 0xdd4   :  { %3125 = vperm.xlu0 %8632, %v3099_v48   ;;  %v3480_v48 = vld [vmem:[#allocation34 + $0x10] sm:$0xff] }
 0xdd8   :  { %3135 = vperm.xlu0 %8632, %v3101_v51   ;;  %v3482_v51 = vld [vmem:[#allocation34 + $0x20] sm:$0xff] }
 0xdda   :  { %v7641_v63 = vpop.f32.mrb[46].mxu1 }
 0xddb   :  { %v2886_v36 = vpop.f32.mrb[47].mxu1 }
 0xddc   :  { %3360 = vperm.xlu0 %8632, %v3350_v47   ;;  %v3484_v47 = vld [vmem:[#allocation34 + $0x30] sm:$0xff] }
 0xde0   :  { %3416 = vperm.xlu0 %8632, %v3406_v39   ;;  %v3486_v39 = vld [vmem:[#allocation34 + $0x40] sm:$0xff] }
 0xde4   :  { %3370 = vperm.xlu0 %8632, %v3352_v6   ;;  %v3488_v6 = vld [vmem:[#allocation34 + $0x50] sm:$0xff] }
 0xde8   :  { %3426 = vperm.xlu0 %8632, %v3408_v31   ;;  %v3490_v31 = vld [vmem:[#allocation34 + $0x60] sm:$0xff] }
 0xdec   :  { %3380 = vperm.xlu0 %8632, %v3354_v37   ;;  %v3492_v37 = vld [vmem:[#allocation34 + $0x70] sm:$0xff] }
 0xdf0   :  { %3436 = vperm.xlu0 %8632, %v3410_v22  }
 0xdf4   :  { %3390 = vperm.xlu0 %8632, %v3356_v42  }
 0xdf8   :  { %3446 = vperm.xlu0 %8632, %v3412_v16   ;;  %v10559_v16 = vpop.permute.xlu1 %2806 }
 0xdf9   :  { %11807 = vst [vmem:[#allocation165_spill] sm:$0xff] %v10559_v16 }
 0xdfc   :  { %3496 = vperm.xlu0 %8632, %v3478_v28  }
 0xe00   :  { %3506 = vperm.xlu0 %8632, %v3480_v48   ;;  %v2887_v48 = vadd.f32 %v2886_v36, %v10559_v16 }
 0xe04   :  { %3516 = vperm.xlu0 %8632, %v3482_v51  }
 0xe08   :  { %3526 = vperm.xlu0 %8632, %v3484_v47  }
 0xe0c   :  { %3536 = vperm.xlu0 %8632, %v3486_v39  }
 0xe10   :  { %3546 = vperm.xlu0 %8632, %v3488_v6  }
 0xe14   :  { %3556 = vperm.xlu0 %8632, %v3490_v31  }
 0xe18   :  { %3566 = vperm.xlu0 %8632, %v3492_v37   ;;  %v3087_v37 = vld [vmem:[#allocation29] sm:$0xff] }
 0xe19   :  { %7660 = vmatprep.mubr.msk.f32.mxu1 %vm801_vm3, %v3087_v37 }
 0xe3f   :  { %v3001_v22 = vpop.xlane.xlu0 %3000 }
 0xe43   :  { %v2998_v42 = vpop.xlane.xlu0 %2997 }
 0xe44   :  { %8660 = vrcp.f32 %v2998_v42 }
 0xe45   :  { %8662 = vrcp.f32 %v3001_v22 }
 0xe4b   :  { %v10561_v28 = vpop.permute.xlu0 %2811 }
 0xe4c   :  { %11808 = vst [vmem:[#allocation166_spill] sm:$0xff] %v10561_v28  ;;  %v2892_v51 = vadd.f32 %v7641_v63, %v10561_v28  ;;  %v3088_v63 = vld [vmem:[#allocation29 + $0x8] sm:$0xff] }
 0xe4e   :  { %v8661_v47 = vpop.eup %8660  ;;  %v8291_v39 = vpack.c.bf16 %v2892_v51, %v2887_v48  ;;  %v3089_v48 = vld [vmem:[#allocation29 + $0x10] sm:$0xff]  ;;  %v3091_v51 = vld [vmem:[#allocation29 + $0x20] sm:$0xff] }
 0xe4f   :  { %v8663_v18 = vpop.eup %8662  ;;  %v3004_v6 = vmul.f32 %v8661_v47, %v8659_v25  ;;  %v3090_v25 = vld [vmem:[#allocation29 + $0x18] sm:$0xff] }
 0xe50   :  { %8292 = vmatprep.subr.bf16.mxu0 %v8291_v39  ;;  %v3005_v31 = vmul.f32 %v8663_v18, %v10546_v29  ;;  %v3092_v18 = vld [vmem:[#allocation29 + $0x28] sm:$0xff]  ;;  %v3093_v29 = vld [vmem:[#allocation29 + $0x30] sm:$0xff]  ;;  %v3094_v47 = vld [vmem:[#allocation29 + $0x38] sm:$0xff] }
 0xe51   :  { %8294 = vmatpush3.bf16.msra.mxu0 %v8291_v39  ;;  %7653 = vmatprep.mubr.msk.f32.mxu0 %vm801_vm3, %v3004_v6  ;;  %v3462_v39 = vld [vmem:[#allocation32] sm:$0xff]  ;;  %v10577_v6 = vpop.permute.xlu1 %3105 }
 0xe52   :  { %11809 = vst [vmem:[#allocation167_spill] sm:$0xff] %v10577_v6 }
 0xe54   :  { %7654 = vmatmul.mubr.msk.f32.vlgmr.msra.gmra.mrb[20].mxu0 %vm801_vm3, %v3005_v31 }
 0xe55   :  { %7688 = vmatprep.mubr.msk.f32.mxu0 %vm597_vm0, %v3462_v39  ;;  %v10579_v31 = vpop.permute.xlu1 %3110 }
 0xe56   :  { %11810 = vst [vmem:[#allocation168_spill] sm:$0xff] %v10579_v31 }
 0xe59   :  { %v10581_v37 = vpop.permute.xlu1 %3120 }
 0xe5a   :  { %11811 = vst [vmem:[#allocation169_spill] sm:$0xff] %v10581_v37 }
 0xe5d   :  { %v10591_v16 = vpop.permute.xlu1 %3130 }
 0xe5e   :  { %11813 = vst [vmem:[#allocation171_spill] sm:$0xff] %v10591_v16 }
 0xe61   :  { %v10602_v46 = vpop.permute.xlu1 %3140 }
 0xe62   :  { %11815 = vst [vmem:[#allocation173_spill] sm:$0xff] %v10602_v46 }
 0xf27   :  { %v7655_v22 = vpop.f32.mrb[20].mxu0 }
 0xf28   :  { %v3078_v42 = vpop.f32.mrb[21].mxu0 }
 0xf29   :  { %v8295_v36 = vpack.c.bf16 %v7655_v22, %v3078_v42  ;;  %v10583_v42 = vpop.permute.xlu0 %3115 }
 0xf2a   :  { %11812 = vst [vmem:[#allocation170_spill] sm:$0xff] %v10583_v42 }
 0xf2b   :  { %8296 = vmatprep.subr.bf16.mxu1 %v8295_v36 }
 0xf2c   :  { %8298 = vmatpush3.bf16.msra.mxu1 %v8295_v36 }
 0xf2f   :  { %7661 = vmatmul.mubr.msk.f32.vlgmr.msra.gmra.mrb[48].mxu1 %vm801_vm3, %v3088_v63 }
 0xf30   :  { %7663 = vmatprep.mubr.msk.f32.mxu1 %vm801_vm3, %v3089_v48 }
 0xf33   :  { %7664 = vmatmul.mubr.msk.f32.gmra.mrb[50].mxu1 %vm801_vm3, %v3090_v25 }
 0xf34   :  { %7666 = vmatprep.mubr.msk.f32.mxu1 %vm801_vm3, %v3091_v51 }
 0xf37   :  { %7667 = vmatmul.mubr.msk.f32.gmra.mrb[52].mxu1 %vm801_vm3, %v3092_v18 }
 0xf38   :  { %7669 = vmatprep.mubr.msk.f32.mxu1 %vm801_vm3, %v3093_v29 }
 0xf3b   :  { %7670 = vmatmul.mubr.msk.f32.gmra.mrb[54].mxu1 %vm801_vm3, %v3094_v47 }
0x1002   :  { %v7662_v22 = vpop.f32.mrb[48].mxu1 }
0x1003   :  { %v3239_v36 = vadd.f32 %v7662_v22, %v10579_v31  ;;  %v3233_v63 = vpop.f32.mrb[49].mxu1  ;;  %v10595_v22 = vpop.permute.xlu0 %3125 }
0x1004   :  { %v3234_v48 = vadd.f32 %v3233_v63, %v10577_v6  ;;  %11814 = vst [vmem:[#allocation172_spill] sm:$0xff] %v10595_v22 }
0x1005   :  { %v3273_v25 = vadd.f32 %v3239_v36, %v10496_v17 }
0x1006   :  { %v3272_v51 = vadd.f32 %v3234_v48, %v10493_v24  ;;  %v7665_v18 = vpop.f32.mrb[50].mxu1 }
0x1007   :  { %v3281_v29 = vsel %vm801_vm3, %v3273_v25, 0.0  ;;  %v3249_v47 = vadd.f32 %v7665_v18, %v10581_v37  ;;  %v3243_v39 = vpop.f32.mrb[51].mxu1 }
0x1008   :  { %v3280_v28 = vsel %vm801_vm3, %v3272_v51, 0.0  ;;  %v3244_v60 = vadd.f32 %v3243_v39, %v10583_v42 }
0x1009   :  { %v3282_v31 = vadd.f32 %v3281_v29, %v3280_v28  ;;  %v3275_v63 = vadd.f32 %v3249_v47, %v10507_v41  ;;  %v10607_v29 = vpop.permute.xlu0 %3135 }
0x100a   :  { %v3274_v17 = vadd.f32 %v3244_v60, %v10499_v35  ;;  %v7668_v24 = vpop.f32.mrb[52].mxu1  ;;  %11816 = vst [vmem:[#allocation174_spill] sm:$0xff] %v10607_v29 }
0x100b   :  { %v3259_v36 = vadd.f32 %v7668_v24, %v10591_v16  ;;  %v3253_v48 = vpop.f32.mrb[53].mxu1  ;;  %v3285_v39 = vsel %vm801_vm3, %v3275_v63, 0.0 }
0x100c   :  { %v3283_v18 = vsel %vm801_vm3, %v3274_v17, 0.0  ;;  %v3254_v37 = vadd.f32 %v3253_v48, %v10595_v22 }
0x100d   :  { %v3284_v6 = vadd.f32 %v3283_v18, %v3282_v31  ;;  %v3277_v42 = vadd.f32 %v3259_v36, %v10518_v30 }
0x100e   :  { %v3276_v28 = vadd.f32 %v3254_v37, %v10515_v27  ;;  %v7671_v41 = vpop.f32.mrb[54].mxu1 }
0x100f   :  { %v3286_v35 = vadd.f32 %v3285_v39, %v3284_v6  ;;  %v3269_v60 = vadd.f32 %v7671_v41, %v10602_v46  ;;  %v3263_v47 = vpop.f32.mrb[55].mxu1  ;;  %v3289_v18 = vsel %vm801_vm3, %v3277_v42, 0.0 }
0x1010   :  { %v3287_v24 = vsel %vm801_vm3, %v3276_v28, 0.0  ;;  %v3264_v48 = vadd.f32 %v3263_v47, %v10607_v29 }
0x1011   :  { %v3288_v31 = vadd.f32 %v3287_v24, %v3286_v35  ;;  %v3279_v22 = vadd.f32 %v3269_v60, %v10531_v12 }
0x1012   :  { %v3278_v30 = vadd.f32 %v3264_v48, %v10528_v34 }
0x1013   :  { %v3290_v36 = vadd.f32 %v3289_v18, %v3288_v31  ;;  %v3293_v6 = vsel %vm801_vm3, %v3279_v22, 0.0 }
0x1014   :  { %v3291_v27 = vsel %vm801_vm3, %v3278_v30, 0.0 }
0x1015   :  { %v3292_v37 = vadd.f32 %v3291_v27, %v3290_v36 }
0x1017   :  { %v3294_v39 = vadd.f32 %v3293_v6, %v3292_v37 }
0x1019   :  { %v3295_v41 = vrot.slane %v3294_v39, 4 }
0x101b   :  { %v3296_v46 = vadd.f32 %v3295_v41, %v3294_v39 }
0x101d   :  { %v3297_v16 = vrot.slane %v3296_v46, 2 }
0x101f   :  { %v3298_v32 = vadd.f32 %v3297_v16, %v3296_v46 }
0x1021   :  { %v3299_v40 = vrot.slane %v3298_v32, 1 }
0x1023   :  { %v3300_v47 = vadd.f32 %v3299_v40, %v3298_v32 }
0x1025   :  { %v3301_v35 = vmul.f32 0.015625, %v3300_v47  ;;  %v10624_v47 = vpop.permute.xlu1 %3365 }
0x1027   :  { %v3302_v24 = vsub.f32 %v3272_v51, %v3301_v35  ;;  %v3303_v29 = vsub.f32 %v3273_v25, %v3301_v35  ;;  %v3304_v23 = vsub.f32 %v3274_v17, %v3301_v35  ;;  %v3305_v12 = vsub.f32 %v3275_v63, %v3301_v35 }
0x1028   :  { %v3306_v60 = vsub.f32 %v3276_v28, %v3301_v35  ;;  %v3307_v34 = vsub.f32 %v3277_v42, %v3301_v35  ;;  %v3308_v48 = vsub.f32 %v3278_v30, %v3301_v35  ;;  %v3309_v31 = vsub.f32 %v3279_v22, %v3301_v35  ;;  %v10626_v35 = vpop.permute.xlu0 %3360 }
0x1029   :  { %v3310_v18 = vmul.f32 %v3302_v24, %v3302_v24  ;;  %v3311_v36 = vmul.f32 %v3303_v29, %v3303_v29  ;;  %v3312_v27 = vmul.f32 %v3304_v23, %v3304_v23  ;;  %v3313_v50 = vmul.f32 %v3305_v12, %v3305_v12 }
0x102a   :  { %v3314_v16 = vmul.f32 %v3306_v60, %v3306_v60  ;;  %v3315_v25 = vmul.f32 %v3307_v34, %v3307_v34  ;;  %v3316_v42 = vmul.f32 %v3308_v48, %v3308_v48  ;;  %v3317_v28 = vmul.f32 %v3309_v31, %v3309_v31 }
0x102b   :  { %v3318_v37 = vsel %vm801_vm3, %v3310_v18, 0.0  ;;  %v3319_v6 = vsel %vm801_vm3, %v3311_v36, 0.0  ;;  %v3321_v40 = vsel %vm801_vm3, %v3312_v27, 0.0  ;;  %v3323_v51 = vsel %vm801_vm3, %v3313_v50, 0.0 }
0x102c   :  { %v3320_v46 = vadd.f32 %v3319_v6, %v3318_v37  ;;  %v3325_v22 = vsel %vm801_vm3, %v3314_v16, 0.0  ;;  %v3327_v30 = vsel %vm801_vm3, %v3315_v25, 0.0  ;;  %v3329_v41 = vsel %vm801_vm3, %v3316_v42, 0.0  ;;  %v10629_v37 = vpop.permute.xlu1 %3421  ;;  %v10631_v6 = vpop.permute.xlu0 %3416 }
0x102d   :  { %v3331_v36 = vsel %vm801_vm3, %v3317_v28, 0.0 }
0x102e   :  { %v3322_v32 = vadd.f32 %v3321_v40, %v3320_v46 }
0x1030   :  { %v3324_v63 = vadd.f32 %v3323_v51, %v3322_v32  ;;  %v10633_v32 = vpop.permute.xlu1 %3375  ;;  %v10635_v25 = vpop.permute.xlu0 %3370 }
0x1032   :  { %v3326_v17 = vadd.f32 %v3325_v22, %v3324_v63 }
0x1034   :  { %v3328_v39 = vadd.f32 %v3327_v30, %v3326_v17  ;;  %v10637_v22 = vpop.permute.xlu1 %3431  ;;  %v10639_v17 = vpop.permute.xlu0 %3426 }
0x1035   :  { %11817 = vst [vmem:[#allocation175_spill] sm:$0xff] %v10637_v22 }
0x1036   :  { %v3330_v18 = vadd.f32 %v3329_v41, %v3328_v39 }
0x1038   :  { %v3332_v27 = vadd.f32 %v3331_v36, %v3330_v18  ;;  %v10641_v30 = vpop.permute.xlu1 %3385  ;;  %v10643_v39 = vpop.permute.xlu0 %3380 }
0x1039   :  { %11818 = vst [vmem:[#allocation176_spill] sm:$0xff] %v10641_v30 }
0x103a   :  { %v3333_v50 = vrot.slane %v3332_v27, 4 }
0x103c   :  { %v3334_v46 = vadd.f32 %v3333_v50, %v3332_v27  ;;  %v10645_v18 = vpop.permute.xlu1 %3441  ;;  %v10647_v36 = vpop.permute.xlu0 %3436 }
0x103d   :  { %11819 = vst [vmem:[#allocation177_spill] sm:$0xff] %v10645_v18  ;;  %11820 = vst [vmem:[#allocation178_spill] sm:$0xff] %v10647_v36 }
0x103e   :  { %v3335_v16 = vrot.slane %v3334_v46, 2 }
0x1040   :  { %v3336_v40 = vadd.f32 %v3335_v16, %v3334_v46 }
0x1042   :  { %v3337_v51 = vrot.slane %v3336_v40, 1 }
0x1044   :  { %v3338_v63 = vadd.f32 %v3337_v51, %v3336_v40 }
0x1046   :  { %v3339_v42 = vmul.f32 0.015625, %v3338_v63 }
0x1048   :  { %v3340_v28 = vadd.f32 1e-05, %v3339_v42 }
0x104a   :  { %8664 = vrsqrt.f32 %v3340_v28 }
0x1054   :  { %v8665_v41 = vpop.eup %8664 }
0x1055   :  { %v3348_v27 = vmul.f32 %v8665_v41, %v3308_v48  ;;  %v3342_v50 = vmul.f32 %v8665_v41, %v3302_v24  ;;  %v3343_v46 = vmul.f32 %v8665_v41, %v3303_v29  ;;  %v3344_v16 = vmul.f32 %v8665_v41, %v3304_v23 }
0x1056   :  { %v3345_v40 = vmul.f32 %v8665_v41, %v3305_v12  ;;  %v3346_v51 = vmul.f32 %v8665_v41, %v3306_v60  ;;  %v3347_v63 = vmul.f32 %v8665_v41, %v3307_v34  ;;  %v3349_v21 = vmul.f32 %v8665_v41, %v3309_v31  ;;  %v10664_v12 = vpop.permute.xlu1 %3395  ;;  %v10666_v60 = vpop.permute.xlu0 %3390 }
0x1057   :  { %v3398_v42 = vmul.f32 %v10626_v35, %v3342_v50  ;;  %v3399_v28 = vmul.f32 %v10624_v47, %v3343_v46  ;;  %v3400_v49 = vmul.f32 %v10635_v25, %v3344_v16  ;;  %11821 = vst [vmem:[#allocation179_spill] sm:$0xff] %v10664_v12  ;;  %11822 = vst [vmem:[#allocation180_spill] sm:$0xff] %v10666_v60 }
0x1058   :  { %v3401_v14 = vmul.f32 %v10633_v32, %v3345_v40  ;;  %v3402_v44 = vmul.f32 %v10643_v39, %v3346_v51  ;;  %v3403_v24 = vmul.f32 %v10641_v30, %v3347_v63  ;;  %v3404_v31 = vmul.f32 %v10666_v60, %v3348_v27  ;;  %v3463_v51 = vld [vmem:[#allocation32 + $0x8] sm:$0xff]  ;;  %v3464_v63 = vld [vmem:[#allocation32 + $0x10] sm:$0xff] }
0x1059   :  { %v10655_v38 = vadd.f32 %v10631_v6, %v3398_v42  ;;  %v10658_v29 = vadd.f32 %v10629_v37, %v3399_v28  ;;  %v10661_v23 = vadd.f32 %v10639_v17, %v3400_v49  ;;  %v3405_v46 = vmul.f32 %v10664_v12, %v3349_v21  ;;  %v3465_v42 = vld [vmem:[#allocation32 + $0x18] sm:$0xff]  ;;  %v3466_v28 = vld [vmem:[#allocation32 + $0x20] sm:$0xff] }
0x105a   :  { %v10669_v34 = vadd.f32 %v10637_v22, %v3401_v14  ;;  %v10677_v49 = vadd.f32 %v10647_v36, %v3402_v44  ;;  %v10680_v50 = vadd.f32 %v10645_v18, %v3403_v24  ;;  %v10683_v14 = vpop.permute.xlu1 %3451  ;;  %v10685_v16 = vpop.permute.xlu0 %3446  ;;  %v3467_v24 = vld [vmem:[#allocation32 + $0x28] sm:$0xff] }
0x105b   :  { %v8299_v48 = vpack.c.bf16 %v10658_v29, %v10655_v38  ;;  %11823 = vst [vmem:[#allocation181_spill] sm:$0xff] %v10683_v14  ;;  %11824 = vst [vmem:[#allocation182_spill] sm:$0xff] %v10685_v16  ;;  %v10690_v40 = vadd.f32 %v10685_v16, %v3404_v31  ;;  %v10693_v44 = vadd.f32 %v10683_v14, %v3405_v46  ;;  %v3470_v31 = vld [vmem:[#allocation32 + $0x40] sm:$0xff]  ;;  %v3473_v46 = vld [vmem:[#allocation32 + $0x58] sm:$0xff] }
0x105c   :  { %v8303_v41 = vpack.c.bf16 %v10669_v34, %v10661_v23  ;;  %v8307_v27 = vpack.c.bf16 %v10680_v50, %v10677_v49 }
0x105d   :  { %8300 = vmatprep.subr.bf16.mxu0 %v8299_v48  ;;  %v8311_v21 = vpack.c.bf16 %v10693_v44, %v10690_v40 }
0x105e   :  { %8302 = vmatpush3.bf16.msra.mxu0 %v8299_v48  ;;  %v3468_v48 = vld [vmem:[#allocation32 + $0x30] sm:$0xff] }
0x105f   :  { %8304 = vmatprep.subr.bf16.mxu0 %v8303_v41 }
0x1062   :  { %8306 = vmatpush3.bf16.msra.mxu0 %v8303_v41  ;;  %v3472_v41 = vld [vmem:[#allocation32 + $0x50] sm:$0xff] }
0x1063   :  { %8308 = vmatprep.subr.bf16.mxu0 %v8307_v27 }
0x1066   :  { %8310 = vmatpush3.bf16.msra.mxu0 %v8307_v27  ;;  %v3475_v27 = vld [vmem:[#allocation32 + $0x68] sm:$0xff] }
0x1067   :  { %8312 = vmatprep.subr.bf16.mxu0 %v8311_v21 }
0x106a   :  { %8314 = vmatpush3.bf16.msra.mxu0 %v8311_v21  ;;  %v3476_v21 = vld [vmem:[#allocation32 + $0x70] sm:$0xff] }
0x106b   :  { %8348 = vmatprep.subr.bf16.mxu0 %v10342_v15 }
0x106d   :  { %7689 = vmatmul.mubr.msk.f32.vlgmr.msra.gmra.mrb[22].mxu0 %vm597_vm0, %v3463_v51  ;;  %v8702_v51 = vld [vmem:[#allocation8] sm:$0xff] }
0x106e   :  { %8350 = vmatpush3.bf16.msra.mxu0 %v10342_v15  ;;  %7691 = vmatprep.mubr.msk.f32.mxu0 %vm597_vm0, %v3464_v63  ;;  %v3469_v15 = vld [vmem:[#allocation32 + $0x38] sm:$0xff]  ;;  %v8703_v63 = vld [vmem:[#allocation8 + $0x8] sm:$0xff] }
0x106f   :  { %8352 = vmatprep.subr.bf16.mxu0 %v10348_v2 }
0x1071   :  { %7692 = vmatmul.mubr.msk.f32.gmra.mrb[24].mxu0 %vm597_vm0, %v3465_v42  ;;  %v8704_v42 = vld [vmem:[#allocation8 + $0x10] sm:$0xff] }
0x1072   :  { %8354 = vmatpush3.bf16.msra.mxu0 %v10348_v2  ;;  %7694 = vmatprep.mubr.msk.f32.mxu0 %vm597_vm0, %v3466_v28  ;;  %v3471_v2 = vld [vmem:[#allocation32 + $0x48] sm:$0xff]  ;;  %v8705_v28 = vld [vmem:[#allocation8 + $0x18] sm:$0xff] }
0x1073   :  { %8356 = vmatprep.subr.bf16.mxu0 %v10366_v43 }
0x1075   :  { %7695 = vmatmul.mubr.msk.f32.gmra.mrb[26].mxu0 %vm597_vm0, %v3467_v24  ;;  %v8706_v24 = vld [vmem:[#allocation8 + $0x20] sm:$0xff] }
0x1076   :  { %8358 = vmatpush3.bf16.msra.mxu0 %v10366_v43  ;;  %7697 = vmatprep.mubr.msk.f32.mxu0 %vm597_vm0, %v3468_v48  ;;  %v3474_v43 = vld [vmem:[#allocation32 + $0x60] sm:$0xff]  ;;  %v8707_v48 = vld [vmem:[#allocation8 + $0x28] sm:$0xff] }
0x1077   :  { %8360 = vmatprep.subr.bf16.mxu0 %v10378_v20 }
0x1079   :  { %7698 = vmatmul.mubr.msk.f32.gmra.mrb[28].mxu0 %vm597_vm0, %v3469_v15  ;;  %v8708_v15 = vld [vmem:[#allocation13] sm:$0xff] }
0x107a   :  { %8362 = vmatpush3.bf16.msra.mxu0 %v10378_v20  ;;  %7700 = vmatprep.mubr.msk.f32.mxu0 %vm597_vm0, %v3470_v31  ;;  %v3477_v20 = vld [vmem:[#allocation32 + $0x78] sm:$0xff]  ;;  %v3783_v31 = vld [vmem:[#allocation35] sm:$0xff] }
0x107b   :  { %7744 = vmatprep.mubr.f32.mxu1 %v3783_v31 }
0x107d   :  { %7701 = vmatmul.mubr.msk.f32.gmra.mrb[30].mxu0 %vm597_vm0, %v3471_v2  ;;  %v10727_v2 = vpop.permute.xlu1 %3501 }
0x107e   :  { %7703 = vmatprep.mubr.msk.f32.mxu0 %vm597_vm0, %v3472_v41  ;;  %11825 = vst [vmem:[#allocation183_spill] sm:$0xff] %v10727_v2  ;;  %v10729_v41 = vpop.permute.xlu0 %3496 }
0x107f   :  { %11826 = vst [vmem:[#allocation184_spill] sm:$0xff] %v10729_v41 }
0x1081   :  { %7704 = vmatmul.mubr.msk.f32.gmra.mrb[32].mxu0 %vm597_vm0, %v3473_v46  ;;  %v10731_v46 = vpop.permute.xlu1 %3511 }
0x1082   :  { %7706 = vmatprep.mubr.msk.f32.mxu0 %vm597_vm0, %v3474_v43  ;;  %11827 = vst [vmem:[#allocation185_spill] sm:$0xff] %v10731_v46  ;;  %v10733_v43 = vpop.permute.xlu0 %3506 }
0x1083   :  { %11828 = vst [vmem:[#allocation186_spill] sm:$0xff] %v10733_v43 }
0x1085   :  { %7707 = vmatmul.mubr.msk.f32.gmra.mrb[34].mxu0 %vm597_vm0, %v3475_v27  ;;  %v10735_v27 = vpop.permute.xlu1 %3521 }
0x1086   :  { %7709 = vmatprep.mubr.msk.f32.mxu0 %vm597_vm0, %v3476_v21  ;;  %11829 = vst [vmem:[#allocation187_spill] sm:$0xff] %v10735_v27  ;;  %v10737_v21 = vpop.permute.xlu0 %3516 }
0x1087   :  { %11830 = vst [vmem:[#allocation188_spill] sm:$0xff] %v10737_v21 }
0x1089   :  { %7710 = vmatmul.mubr.msk.f32.gmra.mrb[36].mxu0 %vm597_vm0, %v3477_v20 }
0x108a   :  { %7772 = vmatprep.mubr.msk.f32.mxu0 %vm597_vm0, %v8702_v51  ;;  %v10743_v31 = vpop.permute.xlu0 %3526 }
0x108b   :  { %11832 = vst [vmem:[#allocation190_spill] sm:$0xff] %v10743_v31 }
0x108d   :  { %7773 = vmatmul.mubr.msk.f32.vlgmr.msra.gmra.mrb[38].mxu0 %vm597_vm0, %v8703_v63 }
0x108e   :  { %7775 = vmatprep.mubr.msk.f32.mxu0 %vm597_vm0, %v8704_v42 }
0x1091   :  { %7776 = vmatmul.mubr.msk.f32.gmra.mrb[40].mxu0 %vm597_vm0, %v8705_v28 }
0x1092   :  { %7778 = vmatprep.mubr.msk.f32.mxu0 %vm597_vm0, %v8706_v24  ;;  %v10741_v24 = vpop.permute.xlu1 %3531 }
0x1093   :  { %11831 = vst [vmem:[#allocation189_spill] sm:$0xff] %v10741_v24 }
0x1095   :  { %7779 = vmatmul.mubr.msk.f32.gmra.mrb[42].mxu0 %vm597_vm0, %v8707_v48 }
0x1096   :  { %7827 = vmatprep.mubr.msk.f32.mxu0 %vm597_vm0, %v8708_v15 }
0x1140   :  { %v7690_v20 = vpop.f32.mrb[22].mxu0 }
0x1141   :  { %v3694_v51 = vadd.f32 %v7690_v20, %v10727_v2  ;;  %v3688_v63 = vpop.f32.mrb[23].mxu0  ;;  %v10751_v2 = vpop.permute.xlu0 %3536 }
0x1142   :  { %v3689_v42 = vadd.f32 %v3688_v63, %v10729_v41  ;;  %11834 = vst [vmem:[#allocation192_spill] sm:$0xff] %v10751_v2 }
0x1143   :  { %v3768_v28 = vmax.f32 %v3694_v51, 0.0  ;;  %v10748_v51 = vpop.permute.xlu1 %3541 }
0x1144   :  { %v3767_v48 = vmax.f32 %v3689_v42, 0.0  ;;  %v7693_v15 = vpop.f32.mrb[24].mxu0  ;;  %11833 = vst [vmem:[#allocation191_spill] sm:$0xff] %v10748_v51 }
0x1145   :  { %v3704_v14 = vadd.f32 %v7693_v15, %v10731_v46  ;;  %v3698_v16 = vpop.f32.mrb[25].mxu0 }
0x1146   :  { %v8315_v12 = vpack.c.bf16 %v3768_v28, %v3767_v48  ;;  %v3699_v18 = vadd.f32 %v3698_v16, %v10733_v43 }
0x1147   :  { %v3770_v36 = vmax.f32 %v3704_v14, 0.0 }
0x1148   :  { %v3769_v60 = vmax.f32 %v3699_v18, 0.0  ;;  %v7696_v22 = vpop.f32.mrb[26].mxu0  ;;  %8316 = vmatprep.subr.bf16.mxu1 %v8315_v12 }
0x1149   :  { %v3714_v20 = vadd.f32 %v7696_v22, %v10735_v27  ;;  %v3708_v63 = vpop.f32.mrb[27].mxu0  ;;  %8318 = vmatpush3.bf16.msra.mxu1 %v8315_v12  ;;  %v10755_v12 = vpop.permute.xlu1 %3551 }
0x114a   :  { %v8319_v42 = vpack.c.bf16 %v3770_v36, %v3769_v60  ;;  %v3709_v41 = vadd.f32 %v3708_v63, %v10737_v21  ;;  %11835 = vst [vmem:[#allocation193_spill] sm:$0xff] %v10755_v12  ;;  %v10757_v60 = vpop.permute.xlu0 %3546 }
0x114b   :  { %v3772_v15 = vmax.f32 %v3714_v20, 0.0  ;;  %11836 = vst [vmem:[#allocation194_spill] sm:$0xff] %v10757_v60 }
0x114c   :  { %v3771_v46 = vmax.f32 %v3709_v41, 0.0  ;;  %v7699_v28 = vpop.f32.mrb[28].mxu0  ;;  %8320 = vmatprep.subr.bf16.mxu1 %v8319_v42 }
0x114d   :  { %v3724_v14 = vadd.f32 %v7699_v28, %v10741_v24  ;;  %v3718_v18 = vpop.f32.mrb[29].mxu0  ;;  %8322 = vmatpush3.bf16.msra.mxu1 %v8319_v42 }
0x114e   :  { %v8323_v16 = vpack.c.bf16 %v3772_v15, %v3771_v46  ;;  %v3719_v22 = vadd.f32 %v3718_v18, %v10743_v31  ;;  %v10762_v18 = vpop.permute.xlu1 %3561  ;;  %v10765_v21 = vpop.permute.xlu0 %3556 }
0x114f   :  { %v3774_v48 = vmax.f32 %v3724_v14, 0.0  ;;  %11837 = vst [vmem:[#allocation195_spill] sm:$0xff] %v10762_v18  ;;  %11838 = vst [vmem:[#allocation196_spill] sm:$0xff] %v10765_v21 }
0x1150   :  { %v3773_v27 = vmax.f32 %v3719_v22, 0.0  ;;  %v7702_v36 = vpop.f32.mrb[30].mxu0  ;;  %8324 = vmatprep.subr.bf16.mxu1 %v8323_v16 }
0x1151   :  { %v3734_v20 = vadd.f32 %v7702_v36, %v10748_v51  ;;  %v3728_v41 = vpop.f32.mrb[31].mxu0  ;;  %8326 = vmatpush3.bf16.msra.mxu1 %v8323_v16 }
0x1152   :  { %v8327_v63 = vpack.c.bf16 %v3774_v48, %v3773_v27  ;;  %v3729_v28 = vadd.f32 %v3728_v41, %v10751_v2  ;;  %v3784_v2 = vld [vmem:[#allocation35 + $0x8] sm:$0xff] }
0x1153   :  { %v3776_v24 = vmax.f32 %v3734_v20, 0.0 }
0x1154   :  { %v3775_v42 = vmax.f32 %v3729_v28, 0.0  ;;  %v7705_v46 = vpop.f32.mrb[32].mxu0  ;;  %8328 = vmatprep.subr.bf16.mxu1 %v8327_v63 }
0x1155   :  { %v3744_v15 = vadd.f32 %v7705_v46, %v10755_v12  ;;  %v3738_v14 = vpop.f32.mrb[33].mxu0  ;;  %8330 = vmatpush3.bf16.msra.mxu1 %v8327_v63  ;;  %v10769_v63 = vpop.permute.xlu1 %3571 }
0x1156   :  { %v8331_v22 = vpack.c.bf16 %v3776_v24, %v3775_v42  ;;  %v3739_v31 = vadd.f32 %v3738_v14, %v10757_v60  ;;  %11839 = vst [vmem:[#allocation197_spill] sm:$0xff] %v10769_v63  ;;  %v10771_v42 = vpop.permute.xlu0 %3566 }
0x1157   :  { %v3778_v36 = vmax.f32 %v3744_v15, 0.0  ;;  %11840 = vst [vmem:[#allocation198_spill] sm:$0xff] %v10771_v42 }
0x1158   :  { %v3777_v16 = vmax.f32 %v3739_v31, 0.0  ;;  %v7708_v27 = vpop.f32.mrb[34].mxu0  ;;  %8332 = vmatprep.subr.bf16.mxu1 %v8331_v22 }
0x1159   :  { %v3754_v48 = vadd.f32 %v7708_v27, %v10762_v18  ;;  %v3748_v20 = vpop.f32.mrb[35].mxu0  ;;  %8334 = vmatpush3.bf16.msra.mxu1 %v8331_v22 }
0x115a   :  { %v8335_v41 = vpack.c.bf16 %v3778_v36, %v3777_v16  ;;  %v3749_v28 = vadd.f32 %v3748_v20, %v10765_v21 }
0x115b   :  { %v3780_v46 = vmax.f32 %v3754_v48, 0.0 }
0x115c   :  { %v3779_v12 = vmax.f32 %v3749_v28, 0.0  ;;  %v7711_v24 = vpop.f32.mrb[36].mxu0  ;;  %8336 = vmatprep.subr.bf16.mxu1 %v8335_v41  ;;  %v11841_v28 = vld [vmem:[#allocation85_spill] sm:$0xff] }
0x115d   :  { %v3764_v15 = vadd.f32 %v7711_v24, %v10769_v63  ;;  %v3758_v31 = vpop.f32.mrb[37].mxu0  ;;  %8338 = vmatpush3.bf16.msra.mxu1 %v8335_v41  ;;  %v11842_v24 = vld [vmem:[#allocation76_spill] sm:$0xff] }
0x115e   :  { %v8339_v14 = vpack.c.bf16 %v3780_v46, %v3779_v12  ;;  %v3759_v27 = vadd.f32 %v3758_v31, %v10771_v42  ;;  %v3785_v41 = vld [vmem:[#allocation35 + $0x10] sm:$0xff]  ;;  %v11844_v42 = vld [vmem:[#allocation94_spill] sm:$0xff] }
0x115f   :  { %v3782_v18 = vmax.f32 %v3764_v15, 0.0  ;;  %v11843_v15 = vld [vmem:[#allocation77_spill] sm:$0xff] }
0x1160   :  { %v3781_v22 = vmax.f32 %v3759_v27, 0.0  ;;  %8340 = vmatprep.subr.bf16.mxu1 %v8339_v14  ;;  %v7774_v36 = vpop.f32.mrb[38].mxu0 }
0x1161   :  { %8342 = vmatpush3.bf16.msra.mxu1 %v8339_v14  ;;  %v4200_v16 = vpop.f32.mrb[39].mxu0  ;;  %v3786_v14 = vld [vmem:[#allocation35 + $0x18] sm:$0xff] }
0x1162   :  { %v8343_v48 = vpack.c.bf16 %v3782_v18, %v3781_v22  ;;  %v3787_v22 = vld [vmem:[#allocation35 + $0x20] sm:$0xff] }
0x1164   :  { %8344 = vmatprep.subr.bf16.mxu1 %v8343_v48  ;;  %v7777_v20 = vpop.f32.mrb[40].mxu0 }
0x1165   :  { %v4216_v21 = vadd.f32 %v7777_v20, %v11841_v28  ;;  %8346 = vmatpush3.bf16.msra.mxu1 %v8343_v48  ;;  %v4210_v60 = vpop.f32.mrb[41].mxu0  ;;  %v3788_v20 = vld [vmem:[#allocation35 + $0x28] sm:$0xff] }
0x1166   :  { %v4211_v63 = vadd.f32 %v4210_v60, %v11842_v24  ;;  %v11845_v60 = vld [vmem:[#allocation87_spill] sm:$0xff] }
0x1168   :  { %v8363_v12 = vpack.c.bf16 %v4216_v21, %v4211_v63  ;;  %7745 = vmatmul.mubr.f32.vlgmr.msra.gmra.mrb[56].mxu1 %v3784_v2  ;;  %v7780_v46 = vpop.f32.mrb[42].mxu0  ;;  %v3789_v2 = vld [vmem:[#allocation35 + $0x30] sm:$0xff]  ;;  %v3790_v21 = vld [vmem:[#allocation35 + $0x38] sm:$0xff]  ;;  %v4201_v63 = vadd.f32 %v4200_v16, %v11845_v60 }
0x1169   :  { %v4226_v31 = vadd.f32 %v7780_v46, %v11843_v15  ;;  %v4220_v27 = vpop.f32.mrb[43].mxu0  ;;  %7747 = vmatprep.mubr.f32.mxu1 %v3785_v41  ;;  %v3794_v60 = vld [vmem:[#allocation37 + $0x18] sm:$0xff] }
0x116a   :  { %v4221_v18 = vadd.f32 %v4220_v27, %v11844_v42  ;;  %8365 = vmatprep.subr.msk.bf16.mxu1 %vm9888_vm2, %v8363_v12  ;;  %v11846_v42 = vld [vmem:[#allocation91_spill] sm:$0xff] }
0x116b   :  { %v4206_v28 = vadd.f32 %v7774_v36, %v11846_v42  ;;  %v3798_v42 = vld [vmem:[#allocation37 + $0x38] sm:$0xff] }
0x116c   :  { %v8369_v48 = vpack.c.bf16 %v4226_v31, %v4221_v18  ;;  %7748 = vmatmul.mubr.f32.gmra.mrb[58].mxu1 %v3786_v14 }
0x116d   :  { %7750 = vmatprep.mubr.f32.mxu1 %v3787_v22 }
0x116e   :  { %8368 = vmatpush3.bf16.xpose.msk.msra.mxu1 %vm9888_vm2, %v8363_v12 }
0x116f   :  { %8370 = vmatprep.subr.bf16.mxu1 %v8369_v48 }
0x1170   :  { %7751 = vmatmul.mubr.f32.gmra.mrb[60].mxu1 %v3788_v20 }
0x1171   :  { %7753 = vmatprep.mubr.f32.mxu1 %v3789_v2  ;;  %v3791_v2 = vld [vmem:[#allocation37] sm:$0xff] }
0x1174   :  { %7754 = vmatmul.mubr.f32.gmra.mrb[62].mxu1 %v3790_v21  ;;  %v3793_v21 = vld [vmem:[#allocation37 + $0x10] sm:$0xff] }
0x1175   :  { %7785 = vmatprep.mubr.msk.f32.mxu1 %vm711_vm1, %v4201_v63  ;;  %v3796_v63 = vld [vmem:[#allocation37 + $0x28] sm:$0xff] }
0x1178   :  { %7786 = vmatmul.mubr.msk.f32.vlgmr.msra.gmra.mrb[64].mxu1 %vm711_vm1, %v4206_v28  ;;  %v4023_v28 = vld [vmem:[%s11847_s26 + $0x8] sm:$0xff] }
0x1179   :  { %8372 = vmatpush3.bf16.msra.mxu1 %v8369_v48 }
0x123b   :  { %v10787_v24 = vpop.f32.mrb[56].mxu1 }
0x123c   :  { %v10789_v41 = vpop.f32.mrb[57].mxu1 }
0x123f   :  { %v10791_v12 = vpop.f32.mrb[58].mxu1 }
0x1240   :  { %v10793_v46 = vpop.f32.mrb[59].mxu1 }
0x1243   :  { %v10795_v15 = vpop.f32.mrb[60].mxu1 }
0x1244   :  { %v10797_v31 = vpop.f32.mrb[61].mxu1 }
0x1247   :  { %v10799_v16 = vpop.f32.mrb[62].mxu1 }
0x1248   :  { %v10801_v27 = vpop.f32.mrb[63].mxu1 }
0x124b   :  { %v7787_v36 = vpop.f32.mrb[64].mxu1 }
0x124c   :  { %v4317_v14 = vmul.f32 0.25, %v7787_v36  ;;  %v4307_v18 = vpop.f32.mrb[65].mxu1  ;;  %v4079_v36 = vld [vmem:[%s9619_s5 + $0x8] sm:$0xff] }
0x124d   :  { %v4316_v22 = vmul.f32 0.25, %v4307_v18  ;;  %v4025_v18 = vld [vmem:[%s11847_s26 + $0x18] sm:$0xff] }
0x124e   :  { %v4321_v48 = vsel %vm801_vm3, %v4317_v14, -inf }
0x124f   :  { %4322 = vmax.xlane.f32.xlu1 %v4321_v48  ;;  %v4318_v20 = vsel %vm801_vm3, %v4316_v22, -inf  ;;  %v4081_v48 = vld [vmem:[%s9619_s5 + $0x18] sm:$0xff] }
0x1250   :  { %4319 = vmax.xlane.f32.xlu0 %v4318_v20  ;;  %v4027_v20 = vld [vmem:[%s11847_s26 + $0x28] sm:$0xff] }
0x1260   :  { %3801 = vperm.xlu1 %8633, %v3791_v2   ;;  %v4083_v2 = vld [vmem:[%s9619_s5 + $0x28] sm:$0xff] }
0x1264   :  { %3811 = vperm.xlu1 %8633, %v3793_v21   ;;  %v4029_v21 = vld [vmem:[%s11847_s26 + $0x38] sm:$0xff] }
0x1268   :  { %3816 = vperm.xlu1 %8633, %v3794_v60   ;;  %v4085_v60 = vld [vmem:[%s9619_s5 + $0x38] sm:$0xff] }
0x126c   :  { %3826 = vperm.xlu1 %8633, %v3796_v63  }
0x1270   :  { %3836 = vperm.xlu1 %8633, %v3798_v42  }
0x1274   :  { %4037 = vperm.xlu1 %8633, %v4023_v28  }
0x1278   :  { %4093 = vperm.xlu1 %8633, %v4079_v36  }
0x127c   :  { %4047 = vperm.xlu1 %8633, %v4025_v18  }
0x1280   :  { %4103 = vperm.xlu1 %8633, %v4081_v48  }
0x1284   :  { %4057 = vperm.xlu1 %8633, %v4027_v20  }
0x1288   :  { %4113 = vperm.xlu1 %8633, %v4083_v2   ;;  %v4024_v2 = vld [vmem:[%s11847_s26 + $0x10] sm:$0xff] }
0x128c   :  { %4067 = vperm.xlu1 %8633, %v4029_v21   ;;  %v4080_v21 = vld [vmem:[%s9619_s5 + $0x10] sm:$0xff] }
0x1290   :  { %4123 = vperm.xlu1 %8633, %v4085_v60   ;;  %v4026_v60 = vld [vmem:[%s11847_s26 + $0x20] sm:$0xff] }
0x12dc   :  { %v4323_v63 = vpop.xlane.xlu1 %4322 }
0x12dd   :  { %v4325_v51 = vsub.f32 %v4317_v14, %v4323_v63  ;;  %v4320_v43 = vpop.xlane.xlu0 %4319  ;;  %v3792_v14 = vld [vmem:[#allocation37 + $0x8] sm:$0xff]  ;;  %v4082_v63 = vld [vmem:[%s9619_s5 + $0x20] sm:$0xff] }
0x12de   :  { %v4324_v42 = vsub.f32 %v4316_v22, %v4320_v43  ;;  %v3795_v43 = vld [vmem:[#allocation37 + $0x20] sm:$0xff]  ;;  %v4078_v22 = vld [vmem:[%s9619_s5] sm:$0xff] }
0x12df   :  { %v4328_v30 = vmul.f32 1.442695, %v4325_v51  ;;  %v3797_v51 = vld [vmem:[#allocation37 + $0x30] sm:$0xff] }
0x12e0   :  { %v4326_v28 = vmul.f32 1.442695, %v4324_v42  ;;  %v4028_v42 = vld [vmem:[%s11847_s26 + $0x30] sm:$0xff] }
0x12e2   :  { %8666 = vpow2.f32 %v4326_v28  ;;  %v4084_v28 = vld [vmem:[%s9619_s5 + $0x30] sm:$0xff]  ;;  %s9435_s5 = smov [#allocation40]  }
0x12e3   :  { %8668 = vpow2.f32 %v4328_v30  ;;  %v4022_v30 = vld [vmem:[%s11847_s26] sm:$0xff] }
0x12ec   :  { %v8667_v36 = vpop.eup %8666 }
0x12ed   :  { %v4330_v18 = vsel %vm801_vm3, %v8667_v36, 0.0  ;;  %v8669_v48 = vpop.eup %8668 }
0x12ee   :  { %4331 = vadd.xlane.f32.xlu0 %v4330_v18  ;;  %v4333_v20 = vsel %vm801_vm3, %v8669_v48, 0.0  ;;  %v10823_v18 = vpop.permute.xlu1 %3801 }
0x12ef   :  { %11848 = vst [vmem:[#allocation85_spill] sm:$0xff] %v10823_v18 }
0x12f2   :  { %4334 = vadd.xlane.f32.xlu0 %v4333_v20  ;;  %v10825_v20 = vpop.permute.xlu1 %3811 }
0x12f3   :  { %11849 = vst [vmem:[#allocation76_spill] sm:$0xff] %v10825_v20 }
0x1308   :  { %3806 = vperm.xlu0 %8632, %v3792_v14  }
0x130c   :  { %3821 = vperm.xlu0 %8632, %v3795_v43  }
0x1310   :  { %3831 = vperm.xlu0 %8632, %v3797_v51   ;;  %v10827_v51 = vpop.permute.xlu1 %3816 }
0x1311   :  { %11850 = vst [vmem:[#allocation77_spill] sm:$0xff] %v10827_v51 }
0x1314   :  { %4032 = vperm.xlu0 %8632, %v4022_v30   ;;  %v3906_v30 = vadd.f32 %v10789_v41, %v10823_v18 }
0x1318   :  { %4088 = vperm.xlu0 %8632, %v4078_v22  }
0x131c   :  { %4042 = vperm.xlu0 %8632, %v4024_v2   ;;  %v3916_v2 = vadd.f32 %v10793_v46, %v10825_v20 }
0x1320   :  { %4098 = vperm.xlu0 %8632, %v4080_v21   ;;  %v3944_v21 = vadd.f32 %v3906_v30, %v10655_v38 }
0x1322   :  { %v3952_v38 = vsel %vm801_vm3, %v3944_v21, 0.0 }
0x1324   :  { %4052 = vperm.xlu0 %8632, %v4026_v60   ;;  %v10834_v60 = vpop.permute.xlu1 %3826 }
0x1325   :  { %11851 = vst [vmem:[#allocation94_spill] sm:$0xff] %v10834_v60 }
0x1328   :  { %4108 = vperm.xlu0 %8632, %v4082_v63  }
0x132c   :  { %4062 = vperm.xlu0 %8632, %v4028_v42  }
0x1330   :  { %4118 = vperm.xlu0 %8632, %v4084_v28   ;;  %v3921_v28 = vadd.f32 %v10791_v12, %v10827_v51  ;;  %v3931_v12 = vadd.f32 %v10795_v15, %v10834_v60 }
0x137b   :  { %v4332_v14 = vpop.xlane.xlu0 %4331 }
0x137c   :  { %8670 = vrcp.f32 %v4332_v14 }
0x137f   :  { %v4335_v43 = vpop.xlane.xlu0 %4334 }
0x1380   :  { %8672 = vrcp.f32 %v4335_v43  ;;  %v3946_v43 = vadd.f32 %v3916_v2, %v10661_v23  ;;  %v8709_v2 = vld [vmem:[%s11713_s20] sm:$0xff] }
0x1386   :  { %v8671_v22 = vpop.eup %8670 }
0x1387   :  { %v10836_v63 = vpop.permute.xlu0 %3806  ;;  %v4338_v42 = vmul.f32 %v8671_v22, %v8667_v36  ;;  %v3947_v36 = vadd.f32 %v3921_v28, %v10669_v34 }
0x1388   :  { %v3911_v14 = vadd.f32 %v10787_v24, %v10836_v63 }
0x1389   :  { %7792 = vmatprep.mubr.msk.f32.mxu1 %vm801_vm3, %v4338_v42  ;;  %v10854_v42 = vpop.permute.xlu1 %3836  ;;  %v3957_v15 = vsel %vm801_vm3, %v3947_v36, 0.0 }
0x138a   :  { %v8673_v41 = vpop.eup %8672  ;;  %v3945_v46 = vadd.f32 %v3911_v14, %v10658_v29  ;;  %11853 = vst [vmem:[#allocation91_spill] sm:$0xff] %v10854_v42  ;;  %v3955_v29 = vsel %vm801_vm3, %v3946_v43, 0.0  ;;  %v3949_v14 = vadd.f32 %v3931_v12, %v10680_v50 }
0x138b   :  { %v4339_v30 = vmul.f32 %v8673_v41, %v8669_v48  ;;  %v10846_v20 = vpop.permute.xlu0 %3821 }
0x138c   :  { %11852 = vst [vmem:[#allocation87_spill] sm:$0xff] %v10846_v20  ;;  %v3953_v24 = vsel %vm801_vm3, %v3945_v46, 0.0  ;;  %v3926_v22 = vadd.f32 %v10797_v31, %v10846_v20  ;;  %v3941_v31 = vadd.f32 %v10799_v16, %v10854_v42 }
0x138d   :  { %v3954_v23 = vadd.f32 %v3953_v24, %v3952_v38  ;;  %7793 = vmatmul.mubr.msk.f32.vlgmr.msra.gmra.mrb[66].mxu1 %vm801_vm3, %v4339_v30 }
0x138e   :  { %v3948_v48 = vadd.f32 %v3926_v22, %v10677_v49  ;;  %7799 = vmatprep.mubr.msk.f32.mxu1 %vm801_vm3, %v8709_v2  ;;  %v3961_v22 = vsel %vm801_vm3, %v3949_v14, 0.0 }
0x138f   :  { %v3956_v34 = vadd.f32 %v3955_v29, %v3954_v23  ;;  %v10861_v28 = vpop.permute.xlu0 %3831  ;;  %v3951_v23 = vadd.f32 %v3941_v31, %v10693_v44 }
0x1390   :  { %11854 = vst [vmem:[#allocation199_spill] sm:$0xff] %v10861_v28  ;;  %v3936_v41 = vadd.f32 %v10801_v27, %v10861_v28  ;;  %v3959_v30 = vsel %vm801_vm3, %v3948_v48, 0.0 }
0x1391   :  { %v3958_v38 = vadd.f32 %v3957_v15, %v3956_v34  ;;  %v3965_v12 = vsel %vm801_vm3, %v3951_v23, 0.0 }
0x1392   :  { %v3950_v49 = vadd.f32 %v3936_v41, %v10690_v40 }
0x1393   :  { %v3960_v24 = vadd.f32 %v3959_v30, %v3958_v38 }
0x1394   :  { %v3963_v2 = vsel %vm801_vm3, %v3950_v49, 0.0 }
0x1395   :  { %v3962_v29 = vadd.f32 %v3961_v22, %v3960_v24 }
0x1397   :  { %v3964_v50 = vadd.f32 %v3963_v2, %v3962_v29 }
0x1399   :  { %v3966_v16 = vadd.f32 %v3965_v12, %v3964_v50 }
0x139b   :  { %v3967_v42 = vrot.slane %v3966_v16, 4 }
0x139d   :  { %v3968_v20 = vadd.f32 %v3967_v42, %v3966_v16 }
0x139f   :  { %v3969_v27 = vrot.slane %v3968_v20, 2 }
0x13a1   :  { %v3970_v34 = vadd.f32 %v3969_v27, %v3968_v20 }
0x13a3   :  { %v3971_v15 = vrot.slane %v3970_v34, 1 }
0x13a5   :  { %v3972_v28 = vadd.f32 %v3971_v15, %v3970_v34 }
0x13a7   :  { %v3973_v60 = vmul.f32 0.015625, %v3972_v28 }
0x13a9   :  { %v3976_v40 = vsub.f32 %v3946_v43, %v3973_v60  ;;  %v3978_v41 = vsub.f32 %v3948_v48, %v3973_v60  ;;  %v3980_v38 = vsub.f32 %v3950_v49, %v3973_v60  ;;  %v3974_v30 = vsub.f32 %v3944_v21, %v3973_v60 }
0x13aa   :  { %v3975_v51 = vsub.f32 %v3945_v46, %v3973_v60  ;;  %v3977_v44 = vsub.f32 %v3947_v36, %v3973_v60  ;;  %v3979_v31 = vsub.f32 %v3949_v14, %v3973_v60  ;;  %v3981_v24 = vsub.f32 %v3951_v23, %v3973_v60 }
0x13ab   :  { %v3982_v22 = vmul.f32 %v3974_v30, %v3974_v30  ;;  %v3984_v2 = vmul.f32 %v3976_v40, %v3976_v40  ;;  %v3986_v16 = vmul.f32 %v3978_v41, %v3978_v41  ;;  %v3988_v36 = vmul.f32 %v3980_v38, %v3980_v38 }
0x13ac   :  { %v3983_v29 = vmul.f32 %v3975_v51, %v3975_v51  ;;  %v3985_v12 = vmul.f32 %v3977_v44, %v3977_v44  ;;  %v3987_v48 = vmul.f32 %v3979_v31, %v3979_v31  ;;  %v3989_v49 = vmul.f32 %v3981_v24, %v3981_v24 }
0x13ad   :  { %v3990_v50 = vsel %vm801_vm3, %v3982_v22, 0.0  ;;  %v3993_v28 = vsel %vm801_vm3, %v3984_v2, 0.0  ;;  %v3997_v60 = vsel %vm801_vm3, %v3986_v16, 0.0  ;;  %v4001_v34 = vsel %vm801_vm3, %v3988_v36, 0.0 }
0x13ae   :  { %v3991_v42 = vsel %vm801_vm3, %v3983_v29, 0.0  ;;  %v3995_v21 = vsel %vm801_vm3, %v3985_v12, 0.0  ;;  %v3999_v23 = vsel %vm801_vm3, %v3987_v48, 0.0  ;;  %v4003_v22 = vsel %vm801_vm3, %v3989_v49, 0.0 }
0x13af   :  { %v3992_v20 = vadd.f32 %v3991_v42, %v3990_v50 }
0x13b1   :  { %v3994_v43 = vadd.f32 %v3993_v28, %v3992_v20 }
0x13b3   :  { %v3996_v46 = vadd.f32 %v3995_v21, %v3994_v43 }
0x13b5   :  { %v3998_v14 = vadd.f32 %v3997_v60, %v3996_v46 }
0x13b7   :  { %v4000_v27 = vadd.f32 %v3999_v23, %v3998_v14 }
0x13b9   :  { %v4002_v15 = vadd.f32 %v4001_v34, %v4000_v27 }
0x13bb   :  { %v4004_v29 = vadd.f32 %v4003_v22, %v4002_v15  ;;  %v8716_v15 = vld [vmem:[%s11713_s20 + $0x38] sm:$0xff]  ;;  %v8717_v22 = vld [vmem:[#allocation16] sm:$0xff] }
0x13bd   :  { %v4005_v2 = vrot.slane %v4004_v29, 4 }
0x13bf   :  { %v4006_v50 = vadd.f32 %v4005_v2, %v4004_v29  ;;  %v11855_v2 = vld [vmem:[#allocation95_spill] sm:$0xff] }
0x13c1   :  { %v4007_v42 = vrot.slane %v4006_v50, 2 }
0x13c3   :  { %v4008_v20 = vadd.f32 %v4007_v42, %v4006_v50 }
0x13c5   :  { %v4009_v12 = vrot.slane %v4008_v20, 1 }
0x13c7   :  { %v4010_v28 = vadd.f32 %v4009_v12, %v4008_v20  ;;  %v11856_v20 = vld [vmem:[#allocation78_spill] sm:$0xff] }
0x13c9   :  { %v4011_v43 = vmul.f32 0.015625, %v4010_v28 }
0x13cb   :  { %v4012_v21 = vadd.f32 1e-05, %v4011_v43 }
0x13cd   :  { %8674 = vrsqrt.f32 %v4012_v21 }
0x13d7   :  { %v8675_v16 = vpop.eup %8674 }
0x13d8   :  { %v10883_v48 = vmul.f32 %v8675_v16, %v3974_v30  ;;  %v10885_v46 = vmul.f32 %v8675_v16, %v3975_v51  ;;  %v10887_v36 = vmul.f32 %v8675_v16, %v3976_v40  ;;  %v10889_v60 = vmul.f32 %v8675_v16, %v3977_v44  ;;  %v8710_v40 = vld [vmem:[%s11713_s20 + $0x8] sm:$0xff]  ;;  %v8711_v44 = vld [vmem:[%s11713_s20 + $0x10] sm:$0xff] }
0x13d9   :  { %v10891_v14 = vmul.f32 %v8675_v16, %v3978_v41  ;;  %v10893_v49 = vmul.f32 %v8675_v16, %v3979_v31  ;;  %v10895_v23 = vmul.f32 %v8675_v16, %v3980_v38  ;;  %v10897_v27 = vmul.f32 %v8675_v16, %v3981_v24  ;;  %v8712_v41 = vld [vmem:[%s11713_s20 + $0x18] sm:$0xff]  ;;  %v8713_v38 = vld [vmem:[%s11713_s20 + $0x20] sm:$0xff]  ;;  %v8714_v31 = vld [vmem:[%s11713_s20 + $0x28] sm:$0xff] }
0x13da   :  { %v8715_v24 = vld [vmem:[%s11713_s20 + $0x30] sm:$0xff] }
0x1460   :  { %v7794_v30 = vpop.f32.mrb[66].mxu1 }
0x1461   :  { %v4412_v34 = vpop.f32.mrb[67].mxu1 }
0x1462   :  { %v8373_v51 = vpack.c.bf16 %v7794_v30, %v4412_v34  ;;  %v11857_v30 = vld [vmem:[#allocation96_spill] sm:$0xff] }
0x1464   :  { %8374 = vmatprep.subr.bf16.mxu1 %v8373_v51 }
0x1465   :  { %8376 = vmatpush3.bf16.msra.mxu1 %v8373_v51 }
0x1468   :  { %7800 = vmatmul.mubr.msk.f32.vlgmr.msra.gmra.mrb[68].mxu1 %vm801_vm3, %v8710_v40 }
0x1469   :  { %7802 = vmatprep.mubr.msk.f32.mxu1 %vm801_vm3, %v8711_v44  ;;  %v11858_v44 = vld [vmem:[#allocation79_spill] sm:$0xff] }
0x146c   :  { %7803 = vmatmul.mubr.msk.f32.gmra.mrb[70].mxu1 %vm801_vm3, %v8712_v41 }
0x146d   :  { %7805 = vmatprep.mubr.msk.f32.mxu1 %vm801_vm3, %v8713_v38 }
0x1470   :  { %7806 = vmatmul.mubr.msk.f32.gmra.mrb[72].mxu1 %vm801_vm3, %v8714_v31 }
0x1471   :  { %7808 = vmatprep.mubr.msk.f32.mxu1 %vm801_vm3, %v8715_v24 }
0x1474   :  { %7809 = vmatmul.mubr.msk.f32.gmra.mrb[74].mxu1 %vm801_vm3, %v8716_v15 }
0x1475   :  { %7883 = vmatprep.mubr.f32.mxu1 %v8717_v22  ;;  %v11859_v22 = vld [vmem:[#allocation97_spill] sm:$0xff] }
0x153b   :  { %v7801_v29 = vpop.f32.mrb[68].mxu1 }
0x153c   :  { %v4493_v50 = vadd.f32 %v7801_v29, %v11855_v2  ;;  %v4487_v42 = vpop.f32.mrb[69].mxu1  ;;  %v11860_v2 = vld [vmem:[#allocation80_spill] sm:$0xff] }
0x153d   :  { %v4488_v12 = vadd.f32 %v4487_v42, %v11856_v20 }
0x153e   :  { %v4527_v28 = vadd.f32 %v4493_v50, %v10328_v26 }
0x153f   :  { %v4526_v43 = vadd.f32 %v4488_v12, %v10325_v62  ;;  %v7804_v21 = vpop.f32.mrb[70].mxu1 }
0x1540   :  { %v4535_v16 = vsel %vm711_vm1, %v4527_v28, 0.0  ;;  %v4503_v34 = vadd.f32 %v7804_v21, %v11857_v30  ;;  %v4497_v51 = vpop.f32.mrb[71].mxu1 }
0x1541   :  { %v4534_v40 = vsel %vm711_vm1, %v4526_v43, 0.0  ;;  %v4498_v41 = vadd.f32 %v4497_v51, %v11858_v44 }
0x1542   :  { %v4536_v38 = vadd.f32 %v4535_v16, %v4534_v40  ;;  %v4529_v31 = vadd.f32 %v4503_v34, %v10334_v13  ;;  %v11861_v13 = vld [vmem:[#allocation98_spill] sm:$0xff]  ;;  %v11862_v40 = vld [vmem:[#allocation81_spill] sm:$0xff] }
0x1543   :  { %v4528_v24 = vadd.f32 %v4498_v41, %v10331_v61  ;;  %v7807_v15 = vpop.f32.mrb[72].mxu1 }
0x1544   :  { %v4513_v26 = vadd.f32 %v7807_v15, %v11859_v22  ;;  %v4507_v29 = vpop.f32.mrb[73].mxu1  ;;  %v4539_v20 = vsel %vm711_vm1, %v4529_v31, 0.0 }
0x1545   :  { %v4537_v62 = vsel %vm711_vm1, %v4528_v24, 0.0  ;;  %v4508_v50 = vadd.f32 %v4507_v29, %v11860_v2 }
0x1546   :  { %v4538_v42 = vadd.f32 %v4537_v62, %v4536_v38  ;;  %v4531_v12 = vadd.f32 %v4513_v26, %v10354_v0 }
0x1547   :  { %v4530_v21 = vadd.f32 %v4508_v50, %v10351_v11  ;;  %v7810_v16 = vpop.f32.mrb[74].mxu1 }
0x1548   :  { %v4540_v30 = vadd.f32 %v4539_v20, %v4538_v42  ;;  %v4523_v34 = vadd.f32 %v7810_v16, %v11861_v13  ;;  %v4517_v61 = vpop.f32.mrb[75].mxu1  ;;  %v4543_v15 = vsel %vm711_vm1, %v4531_v12, 0.0 }
0x1549   :  { %v4541_v51 = vsel %vm711_vm1, %v4530_v21, 0.0  ;;  %v4518_v44 = vadd.f32 %v4517_v61, %v11862_v40 }
0x154a   :  { %v4542_v41 = vadd.f32 %v4541_v51, %v4540_v30  ;;  %v4533_v38 = vadd.f32 %v4523_v34, %v10372_v10 }
0x154b   :  { %v4532_v22 = vadd.f32 %v4518_v44, %v10369_v33 }
0x154c   :  { %v4544_v29 = vadd.f32 %v4543_v15, %v4542_v41  ;;  %v4547_v26 = vsel %vm711_vm1, %v4533_v38, 0.0 }
0x154d   :  { %v4545_v0 = vsel %vm711_vm1, %v4532_v22, 0.0 }
0x154e   :  { %v4546_v11 = vadd.f32 %v4545_v0, %v4544_v29 }
0x1550   :  { %v4548_v62 = vadd.f32 %v4547_v26, %v4546_v11 }
0x1552   :  { %v4549_v2 = vrot.slane %v4548_v62, 4 }
0x1554   :  { %v4550_v50 = vadd.f32 %v4549_v2, %v4548_v62 }
0x1556   :  { %v4551_v42 = vrot.slane %v4550_v50, 2 }
0x1558   :  { %v4552_v20 = vadd.f32 %v4551_v42, %v4550_v50 }
0x155a   :  { %v4553_v16 = vrot.slane %v4552_v20, 1 }
0x155c   :  { %v4554_v13 = vadd.f32 %v4553_v16, %v4552_v20 }
0x155e   :  { %v4555_v30 = vmul.f32 0.015625, %v4554_v13 }
0x1560   :  { %v4556_v61 = vsub.f32 %v4526_v43, %v4555_v30  ;;  %v4557_v51 = vsub.f32 %v4527_v28, %v4555_v30  ;;  %v4558_v40 = vsub.f32 %v4528_v24, %v4555_v30  ;;  %v4559_v10 = vsub.f32 %v4529_v31, %v4555_v30 }
0x1561   :  { %v4560_v34 = vsub.f32 %v4530_v21, %v4555_v30  ;;  %v4561_v33 = vsub.f32 %v4531_v12, %v4555_v30  ;;  %v4562_v44 = vsub.f32 %v4532_v22, %v4555_v30  ;;  %v4563_v41 = vsub.f32 %v4533_v38, %v4555_v30 }
0x1562   :  { %v4564_v15 = vmul.f32 %v4556_v61, %v4556_v61  ;;  %v4565_v29 = vmul.f32 %v4557_v51, %v4557_v51  ;;  %v4566_v0 = vmul.f32 %v4558_v40, %v4558_v40  ;;  %v4567_v18 = vmul.f32 %v4559_v10, %v4559_v10 }
0x1563   :  { %v4568_v2 = vmul.f32 %v4560_v34, %v4560_v34  ;;  %v4569_v28 = vmul.f32 %v4561_v33, %v4561_v33  ;;  %v4570_v12 = vmul.f32 %v4562_v44, %v4562_v44  ;;  %v4571_v22 = vmul.f32 %v4563_v41, %v4563_v41 }
0x1564   :  { %v4572_v11 = vsel %vm711_vm1, %v4564_v15, 0.0  ;;  %v4573_v26 = vsel %vm711_vm1, %v4565_v29, 0.0  ;;  %v4575_v50 = vsel %vm711_vm1, %v4566_v0, 0.0  ;;  %v4577_v31 = vsel %vm711_vm1, %v4567_v18, 0.0 }
0x1565   :  { %v4574_v62 = vadd.f32 %v4573_v26, %v4572_v11  ;;  %v4579_v21 = vsel %vm711_vm1, %v4568_v2, 0.0  ;;  %v4581_v42 = vsel %vm711_vm1, %v4569_v28, 0.0  ;;  %v4583_v16 = vsel %vm711_vm1, %v4570_v12, 0.0  ;;  %v10947_v2 = vpop.permute.xlu0 %4032 }
0x1566   :  { %v4585_v30 = vsel %vm711_vm1, %v4571_v22, 0.0 }
0x1567   :  { %v4576_v43 = vadd.f32 %v4575_v50, %v4574_v62  ;;  %v10945_v50 = vpop.permute.xlu1 %4037 }
0x1569   :  { %v4578_v24 = vadd.f32 %v4577_v31, %v4576_v43 }
0x156b   :  { %v4580_v38 = vadd.f32 %v4579_v21, %v4578_v24  ;;  %v10949_v28 = vpop.permute.xlu1 %4093  ;;  %v10951_v24 = vpop.permute.xlu0 %4088 }
0x156d   :  { %v4582_v20 = vadd.f32 %v4581_v42, %v4580_v38 }
0x156f   :  { %v4584_v13 = vadd.f32 %v4583_v16, %v4582_v20  ;;  %v10953_v12 = vpop.permute.xlu1 %4047  ;;  %v10955_v21 = vpop.permute.xlu0 %4042 }
0x1571   :  { %v4586_v15 = vadd.f32 %v4585_v30, %v4584_v13 }
0x1573   :  { %v4587_v29 = vrot.slane %v4586_v15, 4 }
0x1575   :  { %v4588_v0 = vadd.f32 %v4587_v29, %v4586_v15 }
0x1577   :  { %v4589_v11 = vrot.slane %v4588_v0, 2 }
0x1579   :  { %v4590_v26 = vadd.f32 %v4589_v11, %v4588_v0 }
0x157b   :  { %v4591_v18 = vrot.slane %v4590_v26, 1 }
0x157d   :  { %v4592_v62 = vadd.f32 %v4591_v18, %v4590_v26  ;;  %v10960_v18 = vpop.permute.xlu1 %4103 }
0x157f   :  { %v4593_v43 = vmul.f32 0.015625, %v4592_v62  ;;  %v10962_v62 = vpop.permute.xlu0 %4098 }
0x1581   :  { %v4594_v31 = vadd.f32 1e-05, %v4593_v43 }
0x1583   :  { %8676 = vrsqrt.f32 %v4594_v31 }
0x158d   :  { %v8677_v38 = vpop.eup %8676 }
0x158e   :  { %v4602_v22 = vmul.f32 %v8677_v38, %v4562_v44  ;;  %v4596_v42 = vmul.f32 %v8677_v38, %v4556_v61  ;;  %v4597_v20 = vmul.f32 %v8677_v38, %v4557_v51  ;;  %v4598_v16 = vmul.f32 %v8677_v38, %v4558_v40 }
0x158f   :  { %v4599_v13 = vmul.f32 %v8677_v38, %v4559_v10  ;;  %v4600_v30 = vmul.f32 %v8677_v38, %v4560_v34  ;;  %v4601_v15 = vmul.f32 %v8677_v38, %v4561_v33  ;;  %v4603_v29 = vmul.f32 %v8677_v38, %v4563_v41 }
0x1590   :  { %v4604_v0 = vmul.f32 %v4596_v42, %v9852_v52  ;;  %v4605_v11 = vmul.f32 %v4597_v20, %v9962_v45  ;;  %v4606_v26 = vmul.f32 %v4598_v16, %v9856_v54  ;;  %v4071_v34 = vmul.f32 %v10945_v50, %v10885_v46 }
0x1591   :  { %v4607_v43 = vmul.f32 %v4599_v13, %v9966_v4  ;;  %v4608_v61 = vmul.f32 %v4600_v30, %v9860_v56  ;;  %v4609_v45 = vmul.f32 %v4601_v15, %v9970_v8  ;;  %v4610_v4 = vmul.f32 %v4602_v22, %v9864_v58  ;;  %v10991_v8 = vpop.permute.xlu1 %4057  ;;  %v8718_v15 = vld [vmem:[#allocation13 + $0x8] sm:$0xff] }
0x1592   :  { %v10967_v51 = vadd.f32 %v4604_v0, %v9854_v53  ;;  %v10970_v40 = vadd.f32 %v4605_v11, %v9964_v1  ;;  %v10973_v52 = vadd.f32 %v4606_v26, %v9858_v55  ;;  %v4611_v1 = vmul.f32 %v4603_v29, %v9974_v5  ;;  %v8719_v29 = vld [vmem:[#allocation13 + $0x10] sm:$0xff] }
0x1593   :  { %v10977_v54 = vadd.f32 %v4607_v43, %v9968_v7  ;;  %v10985_v56 = vadd.f32 %v4608_v61, %v9862_v57  ;;  %v10988_v55 = vadd.f32 %v4609_v45, %v9972_v3  ;;  %v10993_v7 = vpop.permute.xlu0 %4052  ;;  %v4070_v58 = vmul.f32 %v10947_v2, %v10883_v48  ;;  %v8720_v43 = vld [vmem:[#allocation13 + $0x18] sm:$0xff]  ;;  %v8721_v61 = vld [vmem:[#allocation13 + $0x20] sm:$0xff] }
0x1594   :  { %v8377_v10 = vpack.c.bf16 %v10970_v40, %v10967_v51  ;;  %v11002_v3 = vadd.f32 %v4610_v4, %v9866_v59  ;;  %v11005_v5 = vadd.f32 %v4611_v1, %v9976_v9  ;;  %v4072_v44 = vmul.f32 %v10955_v21, %v10887_v36  ;;  %v8723_v4 = vld [vmem:[#allocation13 + $0x30] sm:$0xff]  ;;  %v8725_v1 = vld [vmem:[#allocation13 + $0x40] sm:$0xff] }
0x1595   :  { %v8381_v53 = vpack.c.bf16 %v10977_v54, %v10973_v52  ;;  %v8385_v57 = vpack.c.bf16 %v10988_v55, %v10985_v56  ;;  %v11007_v33 = vpop.permute.xlu1 %4113  ;;  %v11014_v46 = vadd.f32 %v10949_v28, %v4071_v34  ;;  %v11017_v41 = vadd.f32 %v10951_v24, %v4070_v58  ;;  %v8726_v58 = vld [vmem:[#allocation13 + $0x48] sm:$0xff]  ;;  %v8727_v34 = vld [vmem:[#allocation13 + $0x50] sm:$0xff] }
0x1596   :  { %8378 = vmatprep.subr.bf16.mxu0 %v8377_v10  ;;  %11863 = vst [vmem:[#allocation95_spill] sm:$0xff] %v11007_v33  ;;  %v4073_v59 = vmul.f32 %v10953_v12, %v10889_v60  ;;  %v8389_v9 = vpack.c.bf16 %v11005_v5, %v11002_v3  ;;  %v4074_v31 = vmul.f32 %v10993_v7, %v10891_v14 }
0x1597   :  { %8380 = vmatpush3.bf16.msra.mxu0 %v8377_v10  ;;  %v11011_v48 = vpop.permute.xlu0 %4108  ;;  %v8425_v36 = vpack.c.bf16 %v11014_v46, %v11017_v41  ;;  %v11031_v22 = vadd.f32 %v10962_v62, %v4072_v44  ;;  %v4075_v60 = vmul.f32 %v10991_v8, %v10893_v49  ;;  %v8722_v10 = vld [vmem:[#allocation13 + $0x28] sm:$0xff]  ;;  %v8729_v44 = vld [vmem:[#allocation13 + $0x60] sm:$0xff] }
0x1598   :  { %8382 = vmatprep.subr.bf16.mxu0 %v8381_v53  ;;  %v11028_v38 = vadd.f32 %v10960_v18, %v4073_v59  ;;  %v11047_v30 = vadd.f32 %v11011_v48, %v4074_v31  ;;  %v8730_v59 = vld [vmem:[#allocation13 + $0x68] sm:$0xff]  ;;  %v8732_v31 = vld [vmem:[#allocation13 + $0x78] sm:$0xff] }
0x1599   :  { %v11035_v42 = vpop.permute.xlu1 %4067  ;;  %v11044_v13 = vadd.f32 %v11007_v33, %v4075_v60  ;;  %v8734_v60 = vld [vmem:[#allocation19 + $0x8] sm:$0xff] }
0x159a   :  { %v8429_v16 = vpack.c.bf16 %v11028_v38, %v11031_v22  ;;  %v4077_v49 = vmul.f32 %v11035_v42, %v10897_v27 }
0x159b   :  { %8384 = vmatpush3.bf16.msra.mxu0 %v8381_v53  ;;  %v11037_v20 = vpop.permute.xlu0 %4062  ;;  %v8433_v11 = vpack.c.bf16 %v11044_v13, %v11047_v30  ;;  %v8724_v53 = vld [vmem:[#allocation13 + $0x38] sm:$0xff] }
0x159c   :  { %8386 = vmatprep.subr.bf16.mxu0 %v8385_v57  ;;  %v4076_v14 = vmul.f32 %v11037_v20, %v10895_v23 }
0x159d   :  { %v11053_v23 = vpop.permute.xlu1 %4123 }
0x159e   :  { %11864 = vst [vmem:[#allocation78_spill] sm:$0xff] %v11053_v23  ;;  %v11060_v26 = vadd.f32 %v11053_v23, %v4077_v49  ;;  %v8737_v49 = vld [vmem:[#allocation19 + $0x20] sm:$0xff] }
0x159f   :  { %8388 = vmatpush3.bf16.msra.mxu0 %v8385_v57  ;;  %v11055_v0 = vpop.permute.xlu0 %4118  ;;  %v8728_v57 = vld [vmem:[#allocation13 + $0x58] sm:$0xff] }
0x15a0   :  { %8390 = vmatprep.subr.bf16.mxu0 %v8389_v9  ;;  %v11063_v27 = vadd.f32 %v11055_v0, %v4076_v14  ;;  %v8735_v14 = vld [vmem:[#allocation19 + $0x10] sm:$0xff] }
0x15a2   :  { %v8437_v45 = vpack.c.bf16 %v11060_v26, %v11063_v27 }
0x15a3   :  { %8392 = vmatpush3.bf16.msra.mxu0 %v8389_v9  ;;  %v8731_v9 = vld [vmem:[#allocation13 + $0x70] sm:$0xff] }
0x15a4   :  { %8426 = vmatprep.subr.bf16.mxu0 %v8425_v36 }
0x15a6   :  { %7828 = vmatmul.mubr.msk.f32.vlgmr.msra.gmra.mrb[44].mxu0 %vm597_vm0, %v8718_v15  ;;  %v8738_v15 = vld [vmem:[#allocation19 + $0x28] sm:$0xff] }
0x15a7   :  { %8428 = vmatpush3.bf16.msra.mxu0 %v8425_v36  ;;  %7830 = vmatprep.mubr.msk.f32.mxu0 %vm597_vm0, %v8719_v29  ;;  %v8733_v36 = vld [vmem:[#allocation19] sm:$0xff] }
0x15a8   :  { %8430 = vmatprep.subr.bf16.mxu0 %v8429_v16 }
0x15aa   :  { %7831 = vmatmul.mubr.msk.f32.gmra.mrb[46].mxu0 %vm597_vm0, %v8720_v43 }
0x15ab   :  { %8432 = vmatpush3.bf16.msra.mxu0 %v8429_v16  ;;  %7833 = vmatprep.mubr.msk.f32.mxu0 %vm597_vm0, %v8721_v61  ;;  %v8736_v16 = vld [vmem:[#allocation19 + $0x18] sm:$0xff] }
0x15ac   :  { %8434 = vmatprep.subr.bf16.mxu0 %v8433_v11 }
0x15ae   :  { %7834 = vmatmul.mubr.msk.f32.gmra.mrb[48].mxu0 %vm597_vm0, %v8722_v10 }
0x15af   :  { %8436 = vmatpush3.bf16.msra.mxu0 %v8433_v11  ;;  %7836 = vmatprep.mubr.msk.f32.mxu0 %vm597_vm0, %v8723_v4  ;;  %v11865_v11 = vld [vmem:[#allocation100_spill] sm:$0xff] }
0x15b0   :  { %8438 = vmatprep.subr.bf16.mxu0 %v8437_v45 }
0x15b2   :  { %7837 = vmatmul.mubr.msk.f32.gmra.mrb[50].mxu0 %vm597_vm0, %v8724_v53 }
0x15b3   :  { %8440 = vmatpush3.bf16.msra.mxu0 %v8437_v45  ;;  %7839 = vmatprep.mubr.msk.f32.mxu0 %vm597_vm0, %v8725_v1  ;;  %v11866_v45 = vld [vmem:[#allocation99_spill] sm:$0xff] }
0x15b6   :  { %7840 = vmatmul.mubr.msk.f32.gmra.mrb[52].mxu0 %vm597_vm0, %v8726_v58  ;;  %v11867_v58 = vld [vmem:[#allocation102_spill] sm:$0xff] }
0x15b7   :  { %7842 = vmatprep.mubr.msk.f32.mxu0 %vm597_vm0, %v8727_v34 }
0x15ba   :  { %7843 = vmatmul.mubr.msk.f32.gmra.mrb[54].mxu0 %vm597_vm0, %v8728_v57 }
0x15bb   :  { %7845 = vmatprep.mubr.msk.f32.mxu0 %vm597_vm0, %v8729_v44 }
0x15be   :  { %7846 = vmatmul.mubr.msk.f32.gmra.mrb[56].mxu0 %vm597_vm0, %v8730_v59  ;;  %v11868_v59 = vld [vmem:[#allocation101_spill] sm:$0xff] }
0x15bf   :  { %7848 = vmatprep.mubr.msk.f32.mxu0 %vm597_vm0, %v8731_v9 }
0x15c2   :  { %7849 = vmatmul.mubr.msk.f32.gmra.mrb[58].mxu0 %vm597_vm0, %v8732_v31 }
0x15c3   :  { %7911 = vmatprep.mubr.msk.f32.mxu0 %vm597_vm0, %v8733_v36 }
0x15c6   :  { %7912 = vmatmul.mubr.msk.f32.vlgmr.msra.gmra.mrb[60].mxu0 %vm597_vm0, %v8734_v60 }
0x15c7   :  { %7914 = vmatprep.mubr.msk.f32.mxu0 %vm597_vm0, %v8735_v14  ;;  %v11869_v14 = vld [vmem:[#allocation104_spill] sm:$0xff] }
0x15ca   :  { %7915 = vmatmul.mubr.msk.f32.gmra.mrb[62].mxu0 %vm597_vm0, %v8736_v16 }
0x15cb   :  { %7917 = vmatprep.mubr.msk.f32.mxu0 %vm597_vm0, %v8737_v49 }
0x15ce   :  { %7918 = vmatmul.mubr.msk.f32.gmra.mrb[64].mxu0 %vm597_vm0, %v8738_v15 }
0x1679   :  { %v7829_v29 = vpop.f32.mrb[44].mxu0 }
0x167a   :  { %v4692_v43 = vadd.f32 %v7829_v29, %v11865_v11  ;;  %v4686_v61 = vpop.f32.mrb[45].mxu0  ;;  %v11870_v29 = vld [vmem:[#allocation103_spill] sm:$0xff] }
0x167b   :  { %v4687_v10 = vadd.f32 %v4686_v61, %v11866_v45 }
0x167c   :  { %v4766_v4 = vmax.f32 %v4692_v43, 0.0 }
0x167d   :  { %v4765_v53 = vmax.f32 %v4687_v10, 0.0  ;;  %v7832_v1 = vpop.f32.mrb[46].mxu0  ;;  %v11871_v10 = vld [vmem:[#allocation106_spill] sm:$0xff] }
0x167e   :  { %v4702_v34 = vadd.f32 %v7832_v1, %v11867_v58  ;;  %v4696_v57 = vpop.f32.mrb[47].mxu0  ;;  %v11872_v58 = vld [vmem:[#allocation105_spill] sm:$0xff] }
0x167f   :  { %v8393_v44 = vpack.c.bf16 %v4766_v4, %v4765_v53  ;;  %v4697_v9 = vadd.f32 %v4696_v57, %v11868_v59 }
0x1680   :  { %v4768_v31 = vmax.f32 %v4702_v34, 0.0 }
0x1681   :  { %v4767_v36 = vmax.f32 %v4697_v9, 0.0  ;;  %v7835_v60 = vpop.f32.mrb[48].mxu0  ;;  %8394 = vmatprep.subr.bf16.mxu1 %v8393_v44 }
0x1682   :  { %v4712_v16 = vadd.f32 %v7835_v60, %v11869_v14  ;;  %v4706_v49 = vpop.f32.mrb[49].mxu0  ;;  %8396 = vmatpush3.bf16.msra.mxu1 %v8393_v44  ;;  %v11873_v60 = vld [vmem:[#allocation116_spill] sm:$0xff]  ;;  %v11874_v14 = vld [vmem:[#allocation107_spill] sm:$0xff] }
0x1683   :  { %v8397_v15 = vpack.c.bf16 %v4768_v31, %v4767_v36  ;;  %v4707_v11 = vadd.f32 %v4706_v49, %v11870_v29 }
0x1684   :  { %v4770_v43 = vmax.f32 %v4712_v16, 0.0 }
0x1685   :  { %v4769_v61 = vmax.f32 %v4707_v11, 0.0  ;;  %v7838_v45 = vpop.f32.mrb[50].mxu0  ;;  %8398 = vmatprep.subr.bf16.mxu1 %v8397_v15 }
0x1686   :  { %v4722_v1 = vadd.f32 %v7838_v45, %v11871_v10  ;;  %v4716_v4 = vpop.f32.mrb[51].mxu0  ;;  %8400 = vmatpush3.bf16.msra.mxu1 %v8397_v15  ;;  %v11875_v45 = vld [vmem:[#allocation109_spill] sm:$0xff]  ;;  %v11876_v10 = vld [vmem:[#allocation108_spill] sm:$0xff] }
0x1687   :  { %v8401_v53 = vpack.c.bf16 %v4770_v43, %v4769_v61  ;;  %v4717_v34 = vadd.f32 %v4716_v4, %v11872_v58 }
0x1688   :  { %v4772_v57 = vmax.f32 %v4722_v1, 0.0 }
0x1689   :  { %v4771_v59 = vmax.f32 %v4717_v34, 0.0  ;;  %v7841_v9 = vpop.f32.mrb[52].mxu0  ;;  %8402 = vmatprep.subr.bf16.mxu1 %v8401_v53 }
0x168a   :  { %v4732_v44 = vadd.f32 %v7841_v9, %v11873_v60  ;;  %v4726_v31 = vpop.f32.mrb[53].mxu0  ;;  %8404 = vmatpush3.bf16.msra.mxu1 %v8401_v53  ;;  %v11877_v9 = vld [vmem:[#allocation111_spill] sm:$0xff]  ;;  %v11878_v60 = vld [vmem:[#allocation110_spill] sm:$0xff] }
0x168b   :  { %v8405_v36 = vpack.c.bf16 %v4772_v57, %v4771_v59  ;;  %v4727_v16 = vadd.f32 %v4726_v31, %v11874_v14 }
0x168c   :  { %v4774_v49 = vmax.f32 %v4732_v44, 0.0 }
0x168d   :  { %v4773_v29 = vmax.f32 %v4727_v16, 0.0  ;;  %v7844_v11 = vpop.f32.mrb[54].mxu0  ;;  %8406 = vmatprep.subr.bf16.mxu1 %v8405_v36 }
0x168e   :  { %v4742_v15 = vadd.f32 %v7844_v11, %v11875_v45  ;;  %v4736_v43 = vpop.f32.mrb[55].mxu0  ;;  %8408 = vmatpush3.bf16.msra.mxu1 %v8405_v36  ;;  %v11879_v11 = vld [vmem:[#allocation113_spill] sm:$0xff]  ;;  %v11880_v45 = vld [vmem:[#allocation112_spill] sm:$0xff] }
0x168f   :  { %v8409_v61 = vpack.c.bf16 %v4774_v49, %v4773_v29  ;;  %v4737_v1 = vadd.f32 %v4736_v43, %v11876_v10 }
0x1690   :  { %v4776_v4 = vmax.f32 %v4742_v15, 0.0 }
0x1691   :  { %v4775_v58 = vmax.f32 %v4737_v1, 0.0  ;;  %v7847_v34 = vpop.f32.mrb[56].mxu0  ;;  %8410 = vmatprep.subr.bf16.mxu1 %v8409_v61 }
0x1692   :  { %v4752_v53 = vadd.f32 %v7847_v34, %v11877_v9  ;;  %v4746_v57 = vpop.f32.mrb[57].mxu0  ;;  %8412 = vmatpush3.bf16.msra.mxu1 %v8409_v61  ;;  %v11881_v34 = vld [vmem:[#allocation115_spill] sm:$0xff] }
0x1693   :  { %v8413_v59 = vpack.c.bf16 %v4776_v4, %v4775_v58  ;;  %v4747_v44 = vadd.f32 %v4746_v57, %v11878_v60  ;;  %v11882_v57 = vld [vmem:[#allocation114_spill] sm:$0xff] }
0x1694   :  { %v4778_v31 = vmax.f32 %v4752_v53, 0.0 }
0x1695   :  { %v4777_v14 = vmax.f32 %v4747_v44, 0.0  ;;  %v7850_v16 = vpop.f32.mrb[58].mxu0  ;;  %8414 = vmatprep.subr.bf16.mxu1 %v8413_v59 }
0x1696   :  { %v4762_v36 = vadd.f32 %v7850_v16, %v11879_v11  ;;  %v4756_v49 = vpop.f32.mrb[59].mxu0  ;;  %8416 = vmatpush3.bf16.msra.mxu1 %v8413_v59  ;;  %v8739_v59 = vld [vmem:[#allocation16 + $0x8] sm:$0xff] }
0x1697   :  { %v8417_v29 = vpack.c.bf16 %v4778_v31, %v4777_v14  ;;  %v4757_v15 = vadd.f32 %v4756_v49, %v11880_v45  ;;  %v11883_v14 = vld [vmem:[#allocation120_spill] sm:$0xff]  ;;  %v11884_v49 = vld [vmem:[#allocation121_spill] sm:$0xff] }
0x1698   :  { %v4780_v43 = vmax.f32 %v4762_v36, 0.0  ;;  %v8740_v36 = vld [vmem:[#allocation16 + $0x10] sm:$0xff] }
0x1699   :  { %v4779_v10 = vmax.f32 %v4757_v15, 0.0  ;;  %8418 = vmatprep.subr.bf16.mxu1 %v8417_v29  ;;  %v7913_v1 = vpop.f32.mrb[60].mxu0 }
0x169a   :  { %8420 = vmatpush3.bf16.msra.mxu1 %v8417_v29  ;;  %v5046_v61 = vpop.f32.mrb[61].mxu0 }
0x169b   :  { %v8421_v4 = vpack.c.bf16 %v4780_v43, %v4779_v10  ;;  %v8741_v43 = vld [vmem:[#allocation16 + $0x18] sm:$0xff]  ;;  %v8742_v10 = vld [vmem:[#allocation16 + $0x20] sm:$0xff] }
0x169d   :  { %8422 = vmatprep.subr.bf16.mxu1 %v8421_v4  ;;  %v7916_v58 = vpop.f32.mrb[62].mxu0 }
0x169e   :  { %v5062_v9 = vadd.f32 %v7916_v58, %v11881_v34  ;;  %8424 = vmatpush3.bf16.msra.mxu1 %v8421_v4  ;;  %v5056_v53 = vpop.f32.mrb[63].mxu0  ;;  %v8743_v4 = vld [vmem:[#allocation16 + $0x28] sm:$0xff]  ;;  %v8744_v58 = vld [vmem:[#allocation16 + $0x30] sm:$0xff]  ;;  %v11886_v34 = vld [vmem:[#allocation118_spill] sm:$0xff] }
0x169f   :  { %v5057_v60 = vadd.f32 %v5056_v53, %v11882_v57  ;;  %v8745_v53 = vld [vmem:[#allocation16 + $0x38] sm:$0xff]  ;;  %v11887_v57 = vld [vmem:[#allocation119_spill] sm:$0xff] }
0x16a1   :  { %v8441_v44 = vpack.c.bf16 %v5062_v9, %v5057_v60  ;;  %7884 = vmatmul.mubr.f32.vlgmr.msra.gmra.mrb[76].mxu1 %v8739_v59  ;;  %v7919_v31 = vpop.f32.mrb[64].mxu0  ;;  %v5047_v9 = vadd.f32 %v5046_v61, %v11886_v34  ;;  %v5052_v60 = vadd.f32 %v7913_v1, %v11887_v57  ;;  %v8746_v59 = vld [vmem:[#allocation22] sm:$0xff] }
0x16a2   :  { %v5072_v16 = vadd.f32 %v7919_v31, %v11883_v14  ;;  %v5066_v11 = vpop.f32.mrb[65].mxu0  ;;  %7886 = vmatprep.mubr.f32.mxu1 %v8740_v36  ;;  %v11888_v31 = vld [vmem:[#allocation123_spill] sm:$0xff] }
0x16a3   :  { %v5067_v29 = vadd.f32 %v5066_v11, %v11884_v49  ;;  %8443 = vmatprep.subr.msk.bf16.mxu1 %vm10142_vm4, %v8441_v44  ;;  %v11889_v11 = vld [vmem:[#allocation122_spill] sm:$0xff] }
0x16a5   :  { %v8447_v15 = vpack.c.bf16 %v5072_v16, %v5067_v29  ;;  %7887 = vmatmul.mubr.f32.gmra.mrb[78].mxu1 %v8741_v43 }
0x16a6   :  { %7889 = vmatprep.mubr.f32.mxu1 %v8742_v10 }
0x16a7   :  { %8446 = vmatpush3.bf16.xpose.msk.msra.mxu1 %vm10142_vm4, %v8441_v44  ;;  %8448 = vmatprep.subr.bf16.mxu0 %v8447_v15 }
0x16a8   :  { %8450 = vmatpush3.bf16.msra.mxu0 %v8447_v15  ;;  %v11890_v15 = vld [vmem:[#allocation127_spill] sm:$0xff] }
0x16a9   :  { %7890 = vmatmul.mubr.f32.gmra.mrb[80].mxu1 %v8743_v4  ;;  %v11891_v4 = vld [vmem:[#allocation125_spill] sm:$0xff] }
0x16aa   :  { %7892 = vmatprep.mubr.f32.mxu1 %v8744_v58 }
0x16ad   :  { %7893 = vmatmul.mubr.f32.gmra.mrb[82].mxu1 %v8745_v53 }
0x16ae   :  { %7924 = vmatprep.mubr.msk.f32.mxu1 %vm801_vm3, %v5047_v9 }
0x16b1   :  { %7925 = vmatmul.mubr.msk.f32.vlgmr.msra.gmra.mrb[84].mxu1 %vm801_vm3, %v5052_v60  ;;  %v11892_v60 = vld [vmem:[#allocation128_spill] sm:$0xff] }
0x16b2   :  { %7938 = vmatprep.mubr.msk.f32.mxu1 %vm801_vm3, %v8746_v59 }
0x1774   :  { %v7885_v44 = vpop.f32.mrb[76].mxu1 }
0x1775   :  { %v4853_v14 = vadd.f32 %v7885_v44, %v11888_v31  ;;  %v4847_v16 = vpop.f32.mrb[77].mxu1  ;;  %v11893_v44 = vld [vmem:[#allocation124_spill] sm:$0xff] }
0x1776   :  { %v4848_v36 = vadd.f32 %v4847_v16, %v11889_v11 }
0x1777   :  { %v4887_v49 = vadd.f32 %v4853_v14, %v10970_v40 }
0x1778   :  { %v4886_v61 = vadd.f32 %v4848_v36, %v10967_v51  ;;  %v7888_v29 = vpop.f32.mrb[78].mxu1 }
0x1779   :  { %v4895_v45 = vsel %vm711_vm1, %v4887_v49, 0.0  ;;  %v4863_v1 = vadd.f32 %v7888_v29, %v11890_v15  ;;  %v4857_v43 = vpop.f32.mrb[79].mxu1 }
0x177a   :  { %v4894_v10 = vsel %vm711_vm1, %v4886_v61, 0.0  ;;  %v4858_v58 = vadd.f32 %v4857_v43, %v11891_v4  ;;  %v11895_v43 = vld [vmem:[#allocation126_spill] sm:$0xff] }
0x177b   :  { %v4896_v34 = vadd.f32 %v4895_v45, %v4894_v10  ;;  %v4889_v9 = vadd.f32 %v4863_v1, %v10977_v54  ;;  %v11894_v54 = vld [vmem:[#allocation129_spill] sm:$0xff] }
0x177c   :  { %v4888_v53 = vadd.f32 %v4858_v58, %v10973_v52  ;;  %v7891_v57 = vpop.f32.mrb[80].mxu1 }
0x177d   :  { %v4873_v40 = vadd.f32 %v7891_v57, %v11892_v60  ;;  %v4867_v59 = vpop.f32.mrb[81].mxu1  ;;  %v4899_v16 = vsel %vm711_vm1, %v4889_v9, 0.0 }
0x177e   :  { %v4897_v51 = vsel %vm711_vm1, %v4888_v53, 0.0  ;;  %v4868_v31 = vadd.f32 %v4867_v59, %v11893_v44 }
0x177f   :  { %v4898_v14 = vadd.f32 %v4897_v51, %v4896_v34  ;;  %v4891_v11 = vadd.f32 %v4873_v40, %v10988_v55 }
0x1780   :  { %v4890_v36 = vadd.f32 %v4868_v31, %v10985_v56  ;;  %v7894_v29 = vpop.f32.mrb[82].mxu1 }
0x1781   :  { %v4900_v45 = vadd.f32 %v4899_v16, %v4898_v14  ;;  %v4883_v15 = vadd.f32 %v7894_v29, %v11894_v54  ;;  %v4877_v52 = vpop.f32.mrb[83].mxu1  ;;  %v4903_v58 = vsel %vm711_vm1, %v4891_v11, 0.0 }
0x1782   :  { %v4901_v1 = vsel %vm711_vm1, %v4890_v36, 0.0  ;;  %v4878_v10 = vadd.f32 %v4877_v52, %v11895_v43 }
0x1783   :  { %v4902_v4 = vadd.f32 %v4901_v1, %v4900_v45  ;;  %v4893_v34 = vadd.f32 %v4883_v15, %v11005_v5 }
0x1784   :  { %v4892_v57 = vadd.f32 %v4878_v10, %v11002_v3  ;;  %v7926_v60 = vpop.f32.mrb[84].mxu1 }
0x1785   :  { %v4904_v55 = vadd.f32 %v4903_v58, %v4902_v4  ;;  %v11137_v40 = vmul.f32 0.25, %v7926_v60  ;;  %v5153_v56 = vpop.f32.mrb[85].mxu1  ;;  %v4907_v14 = vsel %vm711_vm1, %v4893_v34, 0.0 }
0x1786   :  { %v4905_v59 = vsel %vm711_vm1, %v4892_v57, 0.0  ;;  %v11140_v51 = vmul.f32 0.25, %v5153_v56 }
0x1787   :  { %v4906_v44 = vadd.f32 %v4905_v59, %v4904_v55  ;;  %v5167_v31 = vsel %vm801_vm3, %v11137_v40, -inf }
0x1788   :  { %5168 = vmax.xlane.f32.xlu1 %v5167_v31  ;;  %v5164_v5 = vsel %vm801_vm3, %v11140_v51, -inf }
0x1789   :  { %v4908_v3 = vadd.f32 %v4907_v14, %v4906_v44  ;;  %5165 = vmax.xlane.f32.xlu0 %v5164_v5 }
0x178b   :  { %v4909_v16 = vrot.slane %v4908_v3, 4 }
0x178d   :  { %v4910_v29 = vadd.f32 %v4909_v16, %v4908_v3 }
0x178f   :  { %v4911_v45 = vrot.slane %v4910_v29, 2 }
0x1791   :  { %v4912_v54 = vadd.f32 %v4911_v45, %v4910_v29 }
0x1793   :  { %v4913_v15 = vrot.slane %v4912_v54, 1 }
0x1795   :  { %v4914_v52 = vadd.f32 %v4913_v15, %v4912_v54 }
0x1797   :  { %v4915_v1 = vmul.f32 0.015625, %v4914_v52 }
0x1799   :  { %v4916_v43 = vsub.f32 %v4886_v61, %v4915_v1  ;;  %v4917_v10 = vsub.f32 %v4887_v49, %v4915_v1  ;;  %v4918_v4 = vsub.f32 %v4888_v53, %v4915_v1  ;;  %v4919_v58 = vsub.f32 %v4889_v9, %v4915_v1 }
0x179a   :  { %v4920_v60 = vsub.f32 %v4890_v36, %v4915_v1  ;;  %v4921_v55 = vsub.f32 %v4891_v11, %v4915_v1  ;;  %v4922_v56 = vsub.f32 %v4892_v57, %v4915_v1  ;;  %v4923_v59 = vsub.f32 %v4893_v34, %v4915_v1 }
0x179b   :  { %v4924_v31 = vmul.f32 %v4916_v43, %v4916_v43  ;;  %v4925_v23 = vmul.f32 %v4917_v10, %v4917_v10  ;;  %v4926_v33 = vmul.f32 %v4918_v4, %v4918_v4  ;;  %v4927_v44 = vmul.f32 %v4919_v58, %v4919_v58 }
0x179c   :  { %v4928_v16 = vmul.f32 %v4920_v60, %v4920_v60  ;;  %v4929_v49 = vmul.f32 %v4921_v55, %v4921_v55  ;;  %v4930_v11 = vmul.f32 %v4922_v56, %v4922_v56  ;;  %v4931_v57 = vmul.f32 %v4923_v59, %v4923_v59 }
0x179d   :  { %v4932_v14 = vsel %vm711_vm1, %v4924_v31, 0.0  ;;  %v4933_v5 = vsel %vm711_vm1, %v4925_v23, 0.0  ;;  %v4935_v29 = vsel %vm711_vm1, %v4926_v33, 0.0  ;;  %v4937_v9 = vsel %vm711_vm1, %v4927_v44, 0.0 }
0x179e   :  { %v4934_v3 = vadd.f32 %v4933_v5, %v4932_v14  ;;  %v4939_v36 = vsel %vm711_vm1, %v4928_v16, 0.0  ;;  %v4941_v45 = vsel %vm711_vm1, %v4929_v49, 0.0  ;;  %v4943_v15 = vsel %vm711_vm1, %v4930_v11, 0.0 }
0x179f   :  { %v4945_v52 = vsel %vm711_vm1, %v4931_v57, 0.0  ;;  %v11896_v57 = vld [vmem:[#allocation130_spill] sm:$0xff] }
0x17a0   :  { %v4936_v61 = vadd.f32 %v4935_v29, %v4934_v3 }
0x17a2   :  { %v4938_v53 = vadd.f32 %v4937_v9, %v4936_v61 }
0x17a4   :  { %v4940_v34 = vadd.f32 %v4939_v36, %v4938_v53 }
0x17a6   :  { %v4942_v54 = vadd.f32 %v4941_v45, %v4940_v34 }
0x17a8   :  { %v4944_v23 = vadd.f32 %v4943_v15, %v4942_v54 }
0x17aa   :  { %v4946_v1 = vadd.f32 %v4945_v52, %v4944_v23  ;;  %v11897_v23 = vld [vmem:[#allocation131_spill] sm:$0xff] }
0x17ac   :  { %v4947_v33 = vrot.slane %v4946_v1, 4 }
0x17ae   :  { %v4948_v31 = vadd.f32 %v4947_v33, %v4946_v1  ;;  %v11898_v1 = vld [vmem:[#allocation134_spill] sm:$0xff] }
0x17b0   :  { %v4949_v14 = vrot.slane %v4948_v31, 2 }
0x17b2   :  { %v4950_v5 = vadd.f32 %v4949_v14, %v4948_v31  ;;  %v11899_v31 = vld [vmem:[#allocation142_spill] sm:$0xff] }
0x17b4   :  { %v4951_v44 = vrot.slane %v4950_v5, 1 }
0x17b6   :  { %v4952_v3 = vadd.f32 %v4951_v44, %v4950_v5  ;;  %v11900_v5 = vld [vmem:[#allocation135_spill] sm:$0xff] }
0x17b8   :  { %v4953_v29 = vmul.f32 0.015625, %v4952_v3  ;;  %v11901_v3 = vld [vmem:[#allocation138_spill] sm:$0xff] }
0x17ba   :  { %v4954_v61 = vadd.f32 1e-05, %v4953_v29 }
0x17bc   :  { %8678 = vrsqrt.f32 %v4954_v61  ;;  %v11906_v61 = vld [vmem:[#allocation136_spill] sm:$0xff] }
0x17c6   :  { %v8679_v16 = vpop.eup %8678 }
0x17c7   :  { %v4962_v9 = vmul.f32 %v8679_v16, %v4922_v56  ;;  %v4956_v53 = vmul.f32 %v8679_v16, %v4916_v43  ;;  %v4957_v49 = vmul.f32 %v8679_v16, %v4917_v10  ;;  %v4958_v36 = vmul.f32 %v8679_v16, %v4918_v4  ;;  %v11902_v56 = vld [vmem:[#allocation139_spill] sm:$0xff] }
0x17c8   :  { %v4959_v34 = vmul.f32 %v8679_v16, %v4919_v58  ;;  %v4960_v11 = vmul.f32 %v8679_v16, %v4920_v60  ;;  %v4961_v45 = vmul.f32 %v8679_v16, %v4921_v55  ;;  %v4963_v54 = vmul.f32 %v8679_v16, %v4923_v59  ;;  %v11903_v10 = vld [vmem:[#allocation143_spill] sm:$0xff]  ;;  %v11904_v58 = vld [vmem:[#allocation132_spill] sm:$0xff]  ;;  %v11905_v55 = vld [vmem:[#allocation133_spill] sm:$0xff] }
0x17c9   :  { %v4964_v15 = vmul.f32 %v4956_v53, %v11896_v57  ;;  %v4965_v52 = vmul.f32 %v4957_v49, %v11897_v23  ;;  %v4966_v33 = vmul.f32 %v4958_v36, %v11898_v1  ;;  %v4970_v14 = vmul.f32 %v4962_v9, %v11899_v31  ;;  %v11907_v53 = vld [vmem:[#allocation144_spill] sm:$0xff]  ;;  %v11908_v57 = vld [vmem:[#allocation137_spill] sm:$0xff] }
0x17ca   :  { %v4967_v44 = vmul.f32 %v4959_v34, %v11900_v5  ;;  %v4968_v29 = vmul.f32 %v4960_v11, %v11901_v3  ;;  %v4969_v43 = vmul.f32 %v4961_v45, %v11902_v56  ;;  %v4971_v4 = vmul.f32 %v4963_v54, %v11903_v10  ;;  %v11909_v23 = vld [vmem:[#allocation140_spill] sm:$0xff]  ;;  %v11910_v1 = vld [vmem:[#allocation141_spill] sm:$0xff] }
0x17cb   :  { %v4972_v60 = vadd.f32 %v4964_v15, %v11904_v58  ;;  %v4973_v59 = vadd.f32 %v4965_v52, %v11905_v55  ;;  %v4974_v16 = vadd.f32 %v4966_v33, %v11906_v61  ;;  %v4978_v49 = vadd.f32 %v4970_v14, %v11907_v53  ;;  %v11911_v31 = vld [vmem:[#allocation145_spill] sm:$0xff]  ;;  %v8749_v53 = vld [vmem:[%s11741_s25 + $0x10] sm:$0xff] }
0x17cc   :  { %v4975_v36 = vadd.f32 %v4967_v44, %v11908_v57  ;;  %v4976_v9 = vadd.f32 %v4968_v29, %v11909_v23  ;;  %v4977_v34 = vadd.f32 %v4969_v43, %v11910_v1  ;;  %v4979_v11 = vadd.f32 %v4971_v4, %v11911_v31  ;;  %v8747_v61 = vld [vmem:[%s11741_s25] sm:$0xff]  ;;  %v8752_v1 = vld [vmem:[#allocation22 + $0x10] sm:$0xff]  ;;  %v8754_v31 = vld [vmem:[#allocation22 + $0x20] sm:$0xff] }
0x17cd   :  { %v8455_v5 = vpack.c.bf16 %v4973_v59, %v4972_v60 }
0x17ce   :  { %v8459_v45 = vpack.c.bf16 %v4975_v36, %v4974_v16  ;;  %v8463_v3 = vpack.c.bf16 %v4977_v34, %v4976_v9  ;;  %v8467_v54 = vpack.c.bf16 %v4979_v11, %v4978_v49  ;;  %v8748_v16 = vld [vmem:[%s11741_s25 + $0x8] sm:$0xff]  ;;  %v8750_v49 = vld [vmem:[%s11741_s25 + $0x18] sm:$0xff]  ;;  %v8751_v9 = vld [vmem:[#allocation22 + $0x8] sm:$0xff] }
0x17cf   :  { %8456 = vmatprep.subr.bf16.mxu0 %v8455_v5  ;;  %v8753_v34 = vld [vmem:[#allocation22 + $0x18] sm:$0xff] }
0x1815   :  { %v5169_v15 = vpop.xlane.xlu1 %5168 }
0x1816   :  { %v5171_v52 = vsub.f32 %v11137_v40, %v5169_v15  ;;  %v5166_v56 = vpop.xlane.xlu0 %5165 }
0x1817   :  { %v5170_v33 = vsub.f32 %v11140_v51, %v5166_v56  ;;  %v8757_v56 = vld [vmem:[#allocation22 + $0x38] sm:$0xff] }
0x1818   :  { %v5174_v14 = vmul.f32 1.442695, %v5171_v52 }
0x1819   :  { %v5172_v10 = vmul.f32 1.442695, %v5170_v33  ;;  %v11913_v33 = vld [vmem:[#allocation148_spill] sm:$0xff] }
0x181b   :  { %8680 = vpow2.f32 %v5172_v10 }
0x181c   :  { %8682 = vpow2.f32 %v5174_v14 }
0x1825   :  { %v8681_v44 = vpop.eup %8680 }
0x1826   :  { %v5176_v29 = vsel %vm801_vm3, %v8681_v44, 0.0  ;;  %v8683_v43 = vpop.eup %8682 }
0x1827   :  { %5177 = vadd.xlane.f32.xlu0 %v5176_v29  ;;  %v5179_v4 = vsel %vm801_vm3, %v8683_v43, 0.0  ;;  %v11914_v29 = vld [vmem:[#allocation146_spill] sm:$0xff] }
0x182b   :  { %5180 = vadd.xlane.f32.xlu0 %v5179_v4 }
0x18b4   :  { %v5178_v58 = vpop.xlane.xlu0 %5177 }
0x18b5   :  { %8684 = vrcp.f32 %v5178_v58  ;;  %v11915_v58 = vld [vmem:[#allocation89_spill] sm:$0xff] }
0x18b8   :  { %v5181_v60 = vpop.xlane.xlu0 %5180 }
0x18b9   :  { %8686 = vrcp.f32 %v5181_v60 }
0x18bf   :  { %v8685_v40 = vpop.eup %8684 }
0x18c0   :  { %v5184_v51 = vmul.f32 %v8685_v40, %v8681_v44  ;;  %v8758_v44 = vld [vmem:[#allocation26] sm:$0xff] }
0x18c1   :  { %v8759_v40 = vld [vmem:[#allocation32] sm:$0xff] }
0x18c2   :  { %7931 = vmatprep.mubr.msk.f32.mxu0 %vm801_vm3, %v5184_v51 }
0x18c3   :  { %v8687_v55 = vpop.eup %8686 }
0x18c4   :  { %v5185_v59 = vmul.f32 %v8687_v55, %v8683_v43  ;;  %v11916_v55 = vld [vmem:[#allocation149_spill] sm:$0xff] }
0x18c6   :  { %7932 = vmatmul.mubr.msk.f32.vlgmr.msra.gmra.mrb[66].mxu0 %vm801_vm3, %v5185_v59 }
0x18c7   :  { %8458 = vmatpush3.bf16.msra.mxu0 %v8455_v5  ;;  %7966 = vmatprep.mubr.msk.f32.mxu0 %vm597_vm0, %v8747_v61  ;;  %v8755_v5 = vld [vmem:[#allocation22 + $0x28] sm:$0xff] }
0x18c8   :  { %8460 = vmatprep.subr.bf16.mxu0 %v8459_v45 }
0x18cb   :  { %8462 = vmatpush3.bf16.msra.mxu0 %v8459_v45 }
0x18cc   :  { %8464 = vmatprep.subr.bf16.mxu0 %v8463_v3 }
0x18cf   :  { %8466 = vmatpush3.bf16.msra.mxu0 %v8463_v3  ;;  %v8756_v3 = vld [vmem:[#allocation22 + $0x30] sm:$0xff] }
0x18d0   :  { %8468 = vmatprep.subr.bf16.mxu0 %v8467_v54 }
0x18d3   :  { %8470 = vmatpush3.bf16.msra.mxu0 %v8467_v54  ;;  %v11912_v54 = vld [vmem:[#allocation147_spill] sm:$0xff] }
0x18d6   :  { %7967 = vmatmul.mubr.msk.f32.vlgmr.msra.gmra.mrb[68].mxu0 %vm597_vm0, %v8748_v16  ;;  %v11917_v16 = vld [vmem:[#allocation150_spill] sm:$0xff] }
0x18d7   :  { %7969 = vmatprep.mubr.msk.f32.mxu0 %vm597_vm0, %v8749_v53 }
0x18da   :  { %7970 = vmatmul.mubr.msk.f32.gmra.mrb[70].mxu0 %vm597_vm0, %v8750_v49 }
0x1999   :  { %v7933_v57 = vpop.f32.mrb[66].mxu0 }
0x199a   :  { %v5258_v36 = vpop.f32.mrb[67].mxu0 }
0x199b   :  { %v8451_v23 = vpack.c.bf16 %v7933_v57, %v5258_v36 }
0x199d   :  { %8452 = vmatprep.subr.bf16.mxu1 %v8451_v23 }
0x199e   :  { %8454 = vmatpush3.bf16.msra.mxu1 %v8451_v23  ;;  %v11918_v23 = vld [vmem:[#allocation151_spill] sm:$0xff] }
0x19a1   :  { %7939 = vmatmul.mubr.msk.f32.vlgmr.msra.gmra.mrb[86].mxu1 %vm801_vm3, %v8751_v9 }
0x19a2   :  { %7941 = vmatprep.mubr.msk.f32.mxu1 %vm801_vm3, %v8752_v1 }
0x19a5   :  { %7942 = vmatmul.mubr.msk.f32.gmra.mrb[88].mxu1 %vm801_vm3, %v8753_v34 }
0x19a6   :  { %7944 = vmatprep.mubr.msk.f32.mxu1 %vm801_vm3, %v8754_v31  ;;  %v11919_v31 = vld [vmem:[#allocation152_spill] sm:$0xff] }
0x19a9   :  { %v7968_v11 = vpop.f32.mrb[68].mxu0  ;;  %7945 = vmatmul.mubr.msk.f32.gmra.mrb[90].mxu1 %vm801_vm3, %v8755_v5 }
0x19aa   :  { %v5532_v45 = vpop.f32.mrb[69].mxu0  ;;  %7947 = vmatprep.mubr.msk.f32.mxu1 %vm801_vm3, %v8756_v3  ;;  %v5538_v60 = vadd.f32 %v7968_v11, %v11915_v58 }
0x19ab   :  { %v5533_v15 = vadd.f32 %v5532_v45, %v11912_v54 }
0x19ad   :  { %v7971_v52 = vpop.f32.mrb[70].mxu0  ;;  %7995 = vmatprep.mubr.msk.f32.mxu0 %vm711_vm1, %v5533_v15  ;;  %7948 = vmatmul.mubr.msk.f32.gmra.mrb[92].mxu1 %vm801_vm3, %v8757_v56  ;;  %v11920_v15 = vld [vmem:[#allocation83_spill] sm:$0xff]  ;;  %v11921_v56 = vld [vmem:[#allocation82_spill] sm:$0xff] }
0x19ae   :  { %v5548_v14 = vadd.f32 %v7971_v52, %v11913_v33  ;;  %v5542_v10 = vpop.f32.mrb[71].mxu0  ;;  %7988 = vmatprep.mubr.msk.f32.mxu1 %vm597_vm0, %v8758_v44 }
0x19af   :  { %v5543_v43 = vadd.f32 %v5542_v10, %v11914_v29 }
0x19b1   :  { %v8487_v4 = vpack.c.bf16 %v5548_v14, %v5543_v43 }
0x19b3   :  { %8489 = vmatprep.subr.msk.bf16.mxu0 %vm9888_vm2, %v8487_v4 }
0x19b4   :  { %8492 = vmatpush3.bf16.xpose.msk.msra.mxu0 %vm9888_vm2, %v8487_v4 }
0x19bb   :  { %7996 = vmatmul.mubr.msk.f32.vlgmr.msra.gmra.mrb[72].mxu0 %vm711_vm1, %v5538_v60 }
0x19bc   :  { %8037 = vmatprep.mubr.msk.f32.mxu0 %vm597_vm0, %v8759_v40  ;;  %v11923_v40 = vld [vmem:[#allocation84_spill] sm:$0xff] }
0x1a74   :  { %v7940_v51 = vpop.f32.mrb[86].mxu1 }
0x1a75   :  { %v5339_v59 = vadd.f32 %v7940_v51, %v11916_v55  ;;  %v5333_v61 = vpop.f32.mrb[87].mxu1 }
0x1a76   :  { %v5334_v53 = vadd.f32 %v5333_v61, %v11917_v16 }
0x1a77   :  { %v5373_v49 = vadd.f32 %v5339_v59, %v11014_v46 }
0x1a78   :  { %v5372_v57 = vadd.f32 %v5334_v53, %v11017_v41  ;;  %v7943_v36 = vpop.f32.mrb[88].mxu1 }
0x1a79   :  { %v5381_v19 = vsel %vm801_vm3, %v5373_v49, 0.0  ;;  %v5349_v9 = vadd.f32 %v7943_v36, %v11918_v23  ;;  %v5343_v1 = vpop.f32.mrb[89].mxu1 }
0x1a7a   :  { %v5380_v34 = vsel %vm801_vm3, %v5372_v57, 0.0  ;;  %v5344_v11 = vadd.f32 %v5343_v1, %v11919_v31 }
0x1a7b   :  { %v5382_v5 = vadd.f32 %v5381_v19, %v5380_v34  ;;  %v5375_v45 = vadd.f32 %v5349_v9, %v11028_v38  ;;  %v11922_v38 = vld [vmem:[#allocation86_spill] sm:$0xff] }
0x1a7c   :  { %v5374_v3 = vadd.f32 %v5344_v11, %v11031_v22  ;;  %v7946_v54 = vpop.f32.mrb[90].mxu1 }
0x1a7d   :  { %v5359_v46 = vadd.f32 %v7946_v54, %v11920_v15  ;;  %v5353_v52 = vpop.f32.mrb[91].mxu1  ;;  %v5385_v10 = vsel %vm801_vm3, %v5375_v45, 0.0 }
0x1a7e   :  { %v5383_v41 = vsel %vm801_vm3, %v5374_v3, 0.0  ;;  %v5354_v33 = vadd.f32 %v5353_v52, %v11921_v56 }
0x1a7f   :  { %v5384_v14 = vadd.f32 %v5383_v41, %v5382_v5  ;;  %v5377_v44 = vadd.f32 %v5359_v46, %v11044_v13 }
0x1a80   :  { %v5376_v29 = vadd.f32 %v5354_v33, %v11047_v30  ;;  %v7949_v43 = vpop.f32.mrb[92].mxu1 }
0x1a81   :  { %v5386_v4 = vadd.f32 %v5385_v10, %v5384_v14  ;;  %v5369_v58 = vadd.f32 %v7949_v43, %v11922_v38  ;;  %v5363_v22 = vpop.f32.mrb[93].mxu1  ;;  %v5389_v59 = vsel %vm801_vm3, %v5377_v44, 0.0 }
0x1a82   :  { %v5387_v60 = vsel %vm801_vm3, %v5376_v29, 0.0  ;;  %v5364_v51 = vadd.f32 %v5363_v22, %v11923_v40 }
0x1a83   :  { %v5388_v55 = vadd.f32 %v5387_v60, %v5386_v4  ;;  %v5379_v61 = vadd.f32 %v5369_v58, %v11060_v26 }
0x1a84   :  { %v5378_v16 = vadd.f32 %v5364_v51, %v11063_v27 }
0x1a85   :  { %v5390_v53 = vadd.f32 %v5389_v59, %v5388_v55  ;;  %v5393_v36 = vsel %vm801_vm3, %v5379_v61, 0.0 }
0x1a86   :  { %v5391_v13 = vsel %vm801_vm3, %v5378_v16, 0.0 }
0x1a87   :  { %v5392_v30 = vadd.f32 %v5391_v13, %v5390_v53 }
0x1a89   :  { %v5394_v19 = vadd.f32 %v5393_v36, %v5392_v30 }
0x1a8b   :  { %v5395_v23 = vrot.slane %v5394_v19, 4 }
0x1a8d   :  { %v5396_v9 = vadd.f32 %v5395_v23, %v5394_v19 }
0x1a8e   :  { %v7997_v1 = vpop.f32.mrb[72].mxu0 }
0x1a8f   :  { %v5397_v34 = vrot.slane %v5396_v9, 2  ;;  %v11228_v31 = vmul.f32 0.25, %v7997_v1  ;;  %v5704_v11 = vpop.f32.mrb[73].mxu0 }
0x1a90   :  { %v11230_v5 = vmul.f32 0.25, %v5704_v11 }
0x1a91   :  { %v5398_v54 = vadd.f32 %v5397_v34, %v5396_v9  ;;  %v5718_v26 = vsel %vm801_vm3, %v11228_v31, -inf }
0x1a92   :  { %5719 = vmax.xlane.f32.xlu0 %v5718_v26  ;;  %v5715_v27 = vsel %vm801_vm3, %v11230_v5, -inf }
0x1a93   :  { %v5399_v15 = vrot.slane %v5398_v54, 1  ;;  %5716 = vmax.xlane.f32.xlu1 %v5715_v27 }
0x1a95   :  { %v5400_v46 = vadd.f32 %v5399_v15, %v5398_v54 }
0x1a97   :  { %v5401_v52 = vmul.f32 0.015625, %v5400_v46 }
0x1a99   :  { %v5402_v41 = vsub.f32 %v5372_v57, %v5401_v52  ;;  %v5403_v56 = vsub.f32 %v5373_v49, %v5401_v52  ;;  %v5404_v33 = vsub.f32 %v5374_v3, %v5401_v52  ;;  %v5405_v14 = vsub.f32 %v5375_v45, %v5401_v52 }
0x1a9a   :  { %v5406_v10 = vsub.f32 %v5376_v29, %v5401_v52  ;;  %v5407_v43 = vsub.f32 %v5377_v44, %v5401_v52  ;;  %v5408_v4 = vsub.f32 %v5378_v16, %v5401_v52  ;;  %v5409_v38 = vsub.f32 %v5379_v61, %v5401_v52 }
0x1a9b   :  { %v5410_v58 = vmul.f32 %v5402_v41, %v5402_v41  ;;  %v5411_v22 = vmul.f32 %v5403_v56, %v5403_v56  ;;  %v5412_v60 = vmul.f32 %v5404_v33, %v5404_v33  ;;  %v5413_v40 = vmul.f32 %v5405_v14, %v5405_v14 }
0x1a9c   :  { %v5414_v53 = vmul.f32 %v5406_v10, %v5406_v10  ;;  %v5415_v49 = vmul.f32 %v5407_v43, %v5407_v43  ;;  %v5416_v44 = vmul.f32 %v5408_v4, %v5408_v4  ;;  %v5417_v16 = vmul.f32 %v5409_v38, %v5409_v38 }
0x1a9d   :  { %v5418_v51 = vsel %vm801_vm3, %v5410_v58, 0.0  ;;  %v5419_v55 = vsel %vm801_vm3, %v5411_v22, 0.0  ;;  %v5421_v13 = vsel %vm801_vm3, %v5412_v60, 0.0  ;;  %v5423_v45 = vsel %vm801_vm3, %v5413_v40, 0.0 }
0x1a9e   :  { %v5420_v59 = vadd.f32 %v5419_v55, %v5418_v51  ;;  %v5425_v29 = vsel %vm801_vm3, %v5414_v53, 0.0  ;;  %v5427_v30 = vsel %vm801_vm3, %v5415_v49, 0.0  ;;  %v5429_v19 = vsel %vm801_vm3, %v5416_v44, 0.0  ;;  %v11926_v44 = vld [vmem:[#allocation153_spill] sm:$0xff] }
0x1a9f   :  { %v5431_v9 = vsel %vm801_vm3, %v5417_v16, 0.0 }
0x1aa0   :  { %v5422_v57 = vadd.f32 %v5421_v13, %v5420_v59 }
0x1aa2   :  { %v5424_v3 = vadd.f32 %v5423_v45, %v5422_v57  ;;  %v11924_v57 = vld [vmem:[#allocation90_spill] sm:$0xff]  ;;  %v11925_v45 = vld [vmem:[#allocation88_spill] sm:$0xff] }
0x1aa4   :  { %v5426_v61 = vadd.f32 %v5425_v29, %v5424_v3 }
0x1aa6   :  { %v5428_v36 = vadd.f32 %v5427_v30, %v5426_v61  ;;  %v11927_v61 = vld [vmem:[#allocation154_spill] sm:$0xff]  ;;  %v11928_v30 = vld [vmem:[#allocation157_spill] sm:$0xff] }
0x1aa8   :  { %v5430_v23 = vadd.f32 %v5429_v19, %v5428_v36  ;;  %v11929_v19 = vld [vmem:[#allocation93_spill] sm:$0xff] }
0x1aaa   :  { %v5432_v1 = vadd.f32 %v5431_v9, %v5430_v23 }
0x1aac   :  { %v5433_v34 = vrot.slane %v5432_v1, 4 }
0x1aae   :  { %v5434_v11 = vadd.f32 %v5433_v34, %v5432_v1  ;;  %v11934_v1 = vld [vmem:[#allocation161_spill] sm:$0xff] }
0x1ab0   :  { %v5435_v54 = vrot.slane %v5434_v11, 2 }
0x1ab2   :  { %v5436_v26 = vadd.f32 %v5435_v54, %v5434_v11  ;;  %v11935_v54 = vld [vmem:[#allocation159_spill] sm:$0xff] }
0x1ab4   :  { %v5437_v27 = vrot.slane %v5436_v26, 1 }
0x1ab6   :  { %v5438_v15 = vadd.f32 %v5437_v27, %v5436_v26  ;;  %v11936_v27 = vld [vmem:[#allocation160_spill] sm:$0xff] }
0x1ab8   :  { %v5439_v46 = vmul.f32 0.015625, %v5438_v15 }
0x1aba   :  { %v5440_v52 = vadd.f32 1e-05, %v5439_v46  ;;  %v11937_v46 = vld [vmem:[#allocation162_spill] sm:$0xff] }
0x1abc   :  { %8688 = vrsqrt.f32 %v5440_v52 }
0x1ac6   :  { %v8689_v58 = vpop.eup %8688 }
0x1ac7   :  { %v5448_v22 = vmul.f32 %v8689_v58, %v5408_v4  ;;  %v5442_v60 = vmul.f32 %v8689_v58, %v5402_v41  ;;  %v5443_v40 = vmul.f32 %v8689_v58, %v5403_v56  ;;  %v5444_v51 = vmul.f32 %v8689_v58, %v5404_v33  ;;  %v11930_v41 = vld [vmem:[#allocation92_spill] sm:$0xff]  ;;  %v11931_v33 = vld [vmem:[#allocation155_spill] sm:$0xff] }
0x1ac8   :  { %v5445_v55 = vmul.f32 %v8689_v58, %v5405_v14  ;;  %v5446_v59 = vmul.f32 %v8689_v58, %v5406_v10  ;;  %v5447_v53 = vmul.f32 %v8689_v58, %v5407_v43  ;;  %v5449_v13 = vmul.f32 %v8689_v58, %v5409_v38  ;;  %v11932_v10 = vld [vmem:[#allocation158_spill] sm:$0xff]  ;;  %v11933_v4 = vld [vmem:[#allocation156_spill] sm:$0xff] }
0x1ac9   :  { %v5450_v49 = vmul.f32 %v5442_v60, %v11924_v57  ;;  %v5451_v3 = vmul.f32 %v5443_v40, %v11925_v45  ;;  %v5452_v29 = vmul.f32 %v5444_v51, %v11926_v44  ;;  %v5456_v34 = vmul.f32 %v5448_v22, %v11934_v1  ;;  %v11938_v60 = vld [vmem:[#allocation163_spill] sm:$0xff]  ;;  %v11939_v22 = vld [vmem:[#allocation164_spill] sm:$0xff]  ;;  %v6405_v1 = vld [vmem:[%s9629_s14 + $0x60] sm:$0xff] }
0x1aca   :  { %v5453_v16 = vmul.f32 %v5445_v55, %v11927_v61  ;;  %v5454_v36 = vmul.f32 %v5446_v59, %v11928_v30  ;;  %v5455_v43 = vmul.f32 %v5447_v53, %v11932_v10  ;;  %v5457_v52 = vmul.f32 %v5449_v13, %v11937_v46  ;;  %v8760_v59 = vld [vmem:[#allocation26 + $0x8] sm:$0xff]  ;;  %v6401_v10 = vld [vmem:[%s9629_s14 + $0x40] sm:$0xff] }
0x1acb   :  { %v11250_v23 = vadd.f32 %v5450_v49, %v11929_v19  ;;  %v11253_v56 = vadd.f32 %v5451_v3, %v11930_v41  ;;  %v11256_v14 = vadd.f32 %v5452_v29, %v11931_v33  ;;  %v11277_v40 = vadd.f32 %v5456_v34, %v11938_v60  ;;  %v6395_v30 = vld [vmem:[%s9629_s14 + $0x10] sm:$0xff]  ;;  %v6396_v19 = vld [vmem:[%s9629_s14 + $0x18] sm:$0xff]  ;;  %v6398_v33 = vld [vmem:[%s9629_s14 + $0x28] sm:$0xff] }
0x1acc   :  { %v11260_v38 = vadd.f32 %v5453_v16, %v11933_v4  ;;  %v11268_v26 = vadd.f32 %v5454_v36, %v11935_v54  ;;  %v11271_v15 = vadd.f32 %v5455_v43, %v11936_v27  ;;  %v11280_v51 = vadd.f32 %v5457_v52, %v11939_v22  ;;  %v6397_v36 = vld [vmem:[%s9629_s14 + $0x20] sm:$0xff]  ;;  %v6399_v41 = vld [vmem:[%s9629_s14 + $0x30] sm:$0xff]  ;;  %v6400_v43 = vld [vmem:[%s9629_s14 + $0x38] sm:$0xff] }
0x1acd   :  { %v8471_v9 = vpack.c.bf16 %v11253_v56, %v11250_v23  ;;  %v6403_v4 = vld [vmem:[%s9629_s14 + $0x50] sm:$0xff]  ;;  %v6404_v34 = vld [vmem:[%s9629_s14 + $0x58] sm:$0xff]  ;;  %v6406_v54 = vld [vmem:[%s9629_s14 + $0x68] sm:$0xff] }
0x1ace   :  { %v8475_v11 = vpack.c.bf16 %v11260_v38, %v11256_v14  ;;  %v8479_v58 = vpack.c.bf16 %v11271_v15, %v11268_v26  ;;  %v8483_v55 = vpack.c.bf16 %v11280_v51, %v11277_v40  ;;  %v6408_v27 = vld [vmem:[%s9629_s14 + $0x78] sm:$0xff]  ;;  %v11940_v52 = vld [vmem:[#allocation166_spill] sm:$0xff]  ;;  %v11941_v22 = vld [vmem:[#allocation165_spill] sm:$0xff] }
0x1acf   :  { %8472 = vmatprep.subr.bf16.mxu1 %v8471_v9 }
0x1ad0   :  { %8474 = vmatpush3.bf16.msra.mxu1 %v8471_v9  ;;  %v6402_v9 = vld [vmem:[%s9629_s14 + $0x48] sm:$0xff] }
0x1ad1   :  { %8476 = vmatprep.subr.bf16.mxu1 %v8475_v11 }
0x1ad4   :  { %8478 = vmatpush3.bf16.msra.mxu1 %v8475_v11  ;;  %v6407_v11 = vld [vmem:[%s9629_s14 + $0x70] sm:$0xff] }
0x1ad5   :  { %8480 = vmatprep.subr.bf16.mxu1 %v8479_v58 }
0x1ad8   :  { %8482 = vmatpush3.bf16.msra.mxu1 %v8479_v58 }
0x1ad9   :  { %8484 = vmatprep.subr.bf16.mxu1 %v8483_v55 }
0x1adc   :  { %8486 = vmatpush3.bf16.msra.mxu1 %v8483_v55 }
0x1adf   :  { %7989 = vmatmul.mubr.msk.f32.vlgmr.msra.gmra.mrb[94].mxu1 %vm597_vm0, %v8760_v59 }
0x1b1f   :  { %v5720_v53 = vpop.xlane.xlu0 %5719 }
0x1b20   :  { %v5722_v13 = vsub.f32 %v11228_v31, %v5720_v53  ;;  %v5717_v57 = vpop.xlane.xlu1 %5716  ;;  %v6393_v31 = vld [vmem:[%s9629_s14] sm:$0xff] }
0x1b21   :  { %v5721_v49 = vsub.f32 %v11230_v5, %v5717_v57  ;;  %v6394_v5 = vld [vmem:[%s9629_s14 + $0x8] sm:$0xff]  ;;  %s6721_s14 = sshll.u32 %s9435_s5, 4  ;;  %s6722_s14 = int_to_ptr.vmem [resolvable:$true] %s6721_s14 }
0x1b22   :  { %v5725_v45 = vmul.f32 1.442695, %v5722_v13  ;;  %s9320_s28 = scalar_lea.vmem %s6722_s14, 256  ;;  %p9325_p11 = scmp.lt.s32.totalorder %s6722_s14, %s6722_s14 }
0x1b23   :  { %v5723_v3 = vmul.f32 1.442695, %v5721_v49  ;;  %p9321_p10 = scmp.ne.s32.totalorder %s6722_s14, %s9320_s28  ;;  %p9326_p12 = scmp.lt.s32.totalorder %s9320_s28, %s9320_s28 }
0x1b24   :  { %8690 = vpow2.f32 %v5725_v45 }
0x1b25   :  { %8692 = vpow2.f32 %v5723_v3  ;;  %p9327_p13 = por %p9326_p12, %p9325_p11 }
0x1b27   :  { %p9328_p0 = pnand %p9327_p13, %p9321_p10 }
0x1b2e   :  { %v8691_v44 = vpop.eup %8690 }
0x1b2f   :  { %v8693_v29 = vpop.eup %8692  ;;  %v5730_v61 = vsel %vm801_vm3, %v8691_v44, 0.0 }
0x1b30   :  { %5731 = vadd.xlane.f32.xlu0 %v5730_v61  ;;  %v5727_v16 = vsel %vm801_vm3, %v8693_v29, 0.0  ;;  %v8761_v61 = vld [vmem:[#allocation29] sm:$0xff] }
0x1b31   :  { %5728 = vadd.xlane.f32.xlu1 %v5727_v16 }
0x1b42   :  { %6411 = vperm.xlu1 %8633, %v6393_v31  }
0x1b46   :  { %6416 = vperm.xlu0 %8632, %v6394_v5   ;;  %6421 = vperm.xlu1 %8633, %v6395_v30   ;;  %v8762_v30 = vld [vmem:[#allocation29 + $0x8] sm:$0xff] }
0x1b4a   :  { %6431 = vperm.xlu0 %8632, %v6397_v36   ;;  %6426 = vperm.xlu1 %8633, %v6396_v19   ;;  %v8763_v36 = vld [vmem:[#allocation29 + $0x10] sm:$0xff]  ;;  %v8766_v19 = vld [vmem:[#allocation29 + $0x28] sm:$0xff] }
0x1b4e   :  { %6441 = vperm.xlu0 %8632, %v6399_v41   ;;  %6436 = vperm.xlu1 %8633, %v6398_v33   ;;  %v8767_v41 = vld [vmem:[#allocation29 + $0x30] sm:$0xff]  ;;  %v8768_v33 = vld [vmem:[#allocation29 + $0x38] sm:$0xff] }
0x1b52   :  { %6451 = vperm.xlu0 %8632, %v6401_v10   ;;  %6446 = vperm.xlu1 %8633, %v6400_v43   ;;  %v8769_v10 = vld [vmem:[#allocation35] sm:$0xff] }
0x1b56   :  { %6461 = vperm.xlu0 %8632, %v6403_v4   ;;  %6456 = vperm.xlu1 %8633, %v6402_v9   ;;  %v11942_v4 = vld [vmem:[#allocation168_spill] sm:$0xff] }
0x1b5a   :  { %6471 = vperm.xlu0 %8632, %v6405_v1   ;;  %6466 = vperm.xlu1 %8633, %v6404_v34   ;;  %v11943_v34 = vld [vmem:[#allocation167_spill] sm:$0xff] }
0x1b5e   :  { %6481 = vperm.xlu0 %8632, %v6407_v11   ;;  %6476 = vperm.xlu1 %8633, %v6406_v54  }
0x1b62   :  { %6486 = vperm.xlu1 %8633, %v6408_v27  }
0x1bb2   :  { %v7990_v46 = vpop.f32.mrb[94].mxu1 }
0x1bb3   :  { %v5623_v58 = vadd.f32 %v7990_v46, %v11940_v52  ;;  %v5617_v60 = vpop.f32.mrb[95].mxu1 }
0x1bb4   :  { %v5618_v55 = vadd.f32 %v5617_v60, %v11941_v22 }
0x1bb6   :  { %v8493_v59 = vpack.c.bf16 %v5623_v58, %v5618_v55  ;;  %v11944_v58 = vld [vmem:[#allocation169_spill] sm:$0xff] }
0x1bb8   :  { %8494 = vmatprep.subr.bf16.mxu1 %v8493_v59 }
0x1bb9   :  { %8496 = vmatpush3.bf16.msra.mxu1 %v8493_v59  ;;  %v11945_v59 = vld [vmem:[#allocation170_spill] sm:$0xff] }
0x1bbd   :  { %v5732_v53 = vpop.xlane.xlu0 %5731 }
0x1bbe   :  { %8694 = vrcp.f32 %v5732_v53  ;;  %v5729_v13 = vpop.xlane.xlu1 %5728 }
0x1bbf   :  { %8696 = vrcp.f32 %v5729_v13 }
0x1bc8   :  { %v8695_v57 = vpop.eup %8694 }
0x1bc9   :  { %v8697_v49 = vpop.eup %8696  ;;  %v5736_v3 = vmul.f32 %v8695_v57, %v8691_v44  ;;  %v8765_v44 = vld [vmem:[#allocation29 + $0x20] sm:$0xff] }
0x1bca   :  { %v5735_v45 = vmul.f32 %v8697_v49, %v8693_v29  ;;  %v8764_v29 = vld [vmem:[#allocation29 + $0x18] sm:$0xff] }
0x1bcc   :  { %8002 = vmatprep.mubr.msk.f32.mxu1 %vm801_vm3, %v5735_v45 }
0x1bcd   :  { %8003 = vmatmul.mubr.msk.f32.vlgmr.msra.gmra.mrb[96].mxu1 %vm801_vm3, %v5736_v3  ;;  %v11946_v3 = vld [vmem:[#allocation171_spill] sm:$0xff] }
0x1bce   :  { %8009 = vmatprep.mubr.msk.f32.mxu1 %vm801_vm3, %v8761_v61 }
0x1ca0   :  { %v8004_v16 = vpop.f32.mrb[96].mxu1 }
0x1ca1   :  { %v5809_v31 = vpop.f32.mrb[97].mxu1 }
0x1ca2   :  { %v8497_v5 = vpack.c.bf16 %v8004_v16, %v5809_v31  ;;  %v11947_v16 = vld [vmem:[#allocation172_spill] sm:$0xff] }
0x1ca4   :  { %8498 = vmatprep.subr.bf16.mxu1 %v8497_v5 }
0x1ca5   :  { %8500 = vmatpush3.bf16.msra.mxu1 %v8497_v5 }
0x1ca8   :  { %8010 = vmatmul.mubr.msk.f32.vlgmr.msra.gmra.mrb[98].mxu1 %vm801_vm3, %v8762_v30 }
0x1ca9   :  { %8012 = vmatprep.mubr.msk.f32.mxu1 %vm801_vm3, %v8763_v36 }
0x1cac   :  { %8013 = vmatmul.mubr.msk.f32.gmra.mrb[100].mxu1 %vm801_vm3, %v8764_v29 }
0x1cad   :  { %8015 = vmatprep.mubr.msk.f32.mxu1 %vm801_vm3, %v8765_v44 }
0x1cb0   :  { %8016 = vmatmul.mubr.msk.f32.gmra.mrb[102].mxu1 %vm801_vm3, %v8766_v19 }
0x1cb1   :  { %8018 = vmatprep.mubr.msk.f32.mxu1 %vm801_vm3, %v8767_v41 }
0x1cb4   :  { %8019 = vmatmul.mubr.msk.f32.gmra.mrb[104].mxu1 %vm801_vm3, %v8768_v33 }
0x1cb5   :  { %8093 = vmatprep.mubr.f32.mxu1 %v8769_v10  ;;  %v11949_v10 = vld [vmem:[#allocation174_spill] sm:$0xff] }
0x1d7b   :  { %v8011_v43 = vpop.f32.mrb[98].mxu1 }
0x1d7c   :  { %v5890_v9 = vadd.f32 %v8011_v43, %v11942_v4  ;;  %v5884_v1 = vpop.f32.mrb[99].mxu1 }
0x1d7d   :  { %v5885_v11 = vadd.f32 %v5884_v1, %v11943_v34 }
0x1d7e   :  { %v5924_v54 = vadd.f32 %v5890_v9, %v11253_v56 }
0x1d7f   :  { %v5923_v27 = vadd.f32 %v5885_v11, %v11250_v23  ;;  %v8014_v46 = vpop.f32.mrb[100].mxu1 }
0x1d80   :  { %v5932_v52 = vsel %vm801_vm3, %v5924_v54, 0.0  ;;  %v5900_v60 = vadd.f32 %v8014_v46, %v11944_v58  ;;  %v5894_v22 = vpop.f32.mrb[101].mxu1 }
0x1d81   :  { %v5931_v55 = vsel %vm801_vm3, %v5923_v27, 0.0  ;;  %v5895_v53 = vadd.f32 %v5894_v22, %v11945_v59 }
0x1d82   :  { %v5933_v13 = vadd.f32 %v5932_v52, %v5931_v55  ;;  %v5926_v57 = vadd.f32 %v5900_v60, %v11260_v38  ;;  %v11948_v38 = vld [vmem:[#allocation173_spill] sm:$0xff] }
0x1d83   :  { %v5925_v49 = vadd.f32 %v5895_v53, %v11256_v14  ;;  %v8017_v45 = vpop.f32.mrb[102].mxu1 }
0x1d84   :  { %v5910_v56 = vadd.f32 %v8017_v45, %v11946_v3  ;;  %v5904_v61 = vpop.f32.mrb[103].mxu1  ;;  %v5936_v30 = vsel %vm801_vm3, %v5926_v57, 0.0 }
0x1d85   :  { %v5934_v23 = vsel %vm801_vm3, %v5925_v49, 0.0  ;;  %v5905_v31 = vadd.f32 %v5904_v61, %v11947_v16 }
0x1d86   :  { %v5935_v5 = vadd.f32 %v5934_v23, %v5933_v13  ;;  %v5928_v36 = vadd.f32 %v5910_v56, %v11271_v15 }
0x1d87   :  { %v5927_v29 = vadd.f32 %v5905_v31, %v11268_v26  ;;  %v8020_v44 = vpop.f32.mrb[104].mxu1 }
0x1d88   :  { %v5937_v19 = vadd.f32 %v5936_v30, %v5935_v5  ;;  %v5920_v41 = vadd.f32 %v8020_v44, %v11948_v38  ;;  %v5914_v14 = vpop.f32.mrb[105].mxu1  ;;  %v5940_v9 = vsel %vm801_vm3, %v5928_v36, 0.0 }
0x1d89   :  { %v5938_v33 = vsel %vm801_vm3, %v5927_v29, 0.0  ;;  %v5915_v43 = vadd.f32 %v5914_v14, %v11949_v10 }
0x1d8a   :  { %v5939_v4 = vadd.f32 %v5938_v33, %v5937_v19  ;;  %v5930_v1 = vadd.f32 %v5920_v41, %v11280_v51 }
0x1d8b   :  { %v5929_v34 = vadd.f32 %v5915_v43, %v11277_v40 }
0x1d8c   :  { %v5941_v11 = vadd.f32 %v5940_v9, %v5939_v4  ;;  %v5944_v46 = vsel %vm801_vm3, %v5930_v1, 0.0 }
0x1d8d   :  { %v5942_v15 = vsel %vm801_vm3, %v5929_v34, 0.0 }
0x1d8e   :  { %v5943_v26 = vadd.f32 %v5942_v15, %v5941_v11 }
0x1d90   :  { %v5945_v52 = vadd.f32 %v5944_v46, %v5943_v26 }
0x1d92   :  { %v5946_v58 = vrot.slane %v5945_v52, 4 }
0x1d94   :  { %v5947_v60 = vadd.f32 %v5946_v58, %v5945_v52 }
0x1d96   :  { %v5948_v22 = vrot.slane %v5947_v60, 2 }
0x1d98   :  { %v5949_v55 = vadd.f32 %v5948_v22, %v5947_v60 }
0x1d9a   :  { %v5950_v59 = vrot.slane %v5949_v55, 1 }
0x1d9c   :  { %v5951_v53 = vadd.f32 %v5950_v59, %v5949_v55 }
0x1d9e   :  { %v5952_v13 = vmul.f32 0.015625, %v5951_v53 }
0x1da0   :  { %v5953_v45 = vsub.f32 %v5923_v27, %v5952_v13  ;;  %v5954_v3 = vsub.f32 %v5924_v54, %v5952_v13  ;;  %v5955_v56 = vsub.f32 %v5925_v49, %v5952_v13  ;;  %v5956_v51 = vsub.f32 %v5926_v57, %v5952_v13 }
0x1da1   :  { %v5957_v61 = vsub.f32 %v5927_v29, %v5952_v13  ;;  %v5958_v40 = vsub.f32 %v5928_v36, %v5952_v13  ;;  %v5959_v23 = vsub.f32 %v5929_v34, %v5952_v13  ;;  %v5960_v16 = vsub.f32 %v5930_v1, %v5952_v13 }
0x1da2   :  { %v5961_v31 = vmul.f32 %v5953_v45, %v5953_v45  ;;  %v5962_v5 = vmul.f32 %v5954_v3, %v5954_v3  ;;  %v5963_v30 = vmul.f32 %v5955_v56, %v5955_v56  ;;  %v5964_v44 = vmul.f32 %v5956_v51, %v5956_v51 }
0x1da3   :  { %v5965_v14 = vmul.f32 %v5957_v61, %v5957_v61  ;;  %v5966_v54 = vmul.f32 %v5958_v40, %v5958_v40  ;;  %v5967_v36 = vmul.f32 %v5959_v23, %v5959_v23  ;;  %v5968_v43 = vmul.f32 %v5960_v16, %v5960_v16 }
0x1da4   :  { %v5969_v19 = vsel %vm801_vm3, %v5961_v31, 0.0  ;;  %v5970_v38 = vsel %vm801_vm3, %v5962_v5, 0.0  ;;  %v5972_v33 = vsel %vm801_vm3, %v5963_v30, 0.0  ;;  %v5974_v57 = vsel %vm801_vm3, %v5964_v44, 0.0 }
0x1da5   :  { %v5971_v41 = vadd.f32 %v5970_v38, %v5969_v19  ;;  %v5976_v29 = vsel %vm801_vm3, %v5965_v14, 0.0  ;;  %v5978_v4 = vsel %vm801_vm3, %v5966_v54, 0.0  ;;  %v5980_v1 = vsel %vm801_vm3, %v5967_v36, 0.0 }
0x1da6   :  { %v5982_v11 = vsel %vm801_vm3, %v5968_v43, 0.0  ;;  %v11957_v43 = vld [vmem:[#allocation181_spill] sm:$0xff] }
0x1da7   :  { %v5973_v27 = vadd.f32 %v5972_v33, %v5971_v41 }
0x1da9   :  { %v5975_v49 = vadd.f32 %v5974_v57, %v5973_v27 }
0x1dab   :  { %v5977_v10 = vadd.f32 %v5976_v29, %v5975_v49  ;;  %v11956_v29 = vld [vmem:[#allocation182_spill] sm:$0xff] }
0x1dad   :  { %v5979_v9 = vadd.f32 %v5978_v4, %v5977_v10 }
0x1daf   :  { %v5981_v34 = vadd.f32 %v5980_v1, %v5979_v9  ;;  %v8770_v1 = vld [vmem:[#allocation32 + $0x8] sm:$0xff] }
0x1db1   :  { %v5983_v15 = vadd.f32 %v5982_v11, %v5981_v34  ;;  %v8771_v34 = vld [vmem:[#allocation32 + $0x10] sm:$0xff]  ;;  %v8772_v11 = vld [vmem:[#allocation32 + $0x18] sm:$0xff] }
0x1db3   :  { %v5984_v26 = vrot.slane %v5983_v15, 4 }
0x1db5   :  { %v5985_v46 = vadd.f32 %v5984_v26, %v5983_v15  ;;  %v8773_v15 = vld [vmem:[#allocation32 + $0x20] sm:$0xff]  ;;  %v8774_v26 = vld [vmem:[#allocation32 + $0x28] sm:$0xff] }
0x1db7   :  { %v5986_v52 = vrot.slane %v5985_v46, 2 }
0x1db9   :  { %v5987_v58 = vadd.f32 %v5986_v52, %v5985_v46  ;;  %v8775_v46 = vld [vmem:[#allocation32 + $0x30] sm:$0xff]  ;;  %v8776_v52 = vld [vmem:[#allocation32 + $0x38] sm:$0xff] }
0x1dbb   :  { %v5988_v60 = vrot.slane %v5987_v58, 1 }
0x1dbd   :  { %v5989_v22 = vadd.f32 %v5988_v60, %v5987_v58  ;;  %v8777_v58 = vld [vmem:[#allocation32 + $0x40] sm:$0xff]  ;;  %v8778_v60 = vld [vmem:[#allocation32 + $0x48] sm:$0xff] }
0x1dbf   :  { %v5990_v55 = vmul.f32 0.015625, %v5989_v22  ;;  %v8779_v22 = vld [vmem:[#allocation32 + $0x50] sm:$0xff] }
0x1dc1   :  { %v5991_v59 = vadd.f32 1e-05, %v5990_v55  ;;  %v8780_v55 = vld [vmem:[#allocation32 + $0x58] sm:$0xff] }
0x1dc3   :  { %8698 = vrsqrt.f32 %v5991_v59  ;;  %v8781_v59 = vld [vmem:[#allocation32 + $0x60] sm:$0xff] }
0x1dcd   :  { %v8699_v53 = vpop.eup %8698 }
0x1dce   :  { %v5999_v13 = vmul.f32 %v8699_v53, %v5959_v23  ;;  %v5993_v31 = vmul.f32 %v8699_v53, %v5953_v45  ;;  %v5994_v5 = vmul.f32 %v8699_v53, %v5954_v3  ;;  %v5995_v30 = vmul.f32 %v8699_v53, %v5955_v56  ;;  %v11950_v56 = vld [vmem:[#allocation176_spill] sm:$0xff]  ;;  %v11955_v23 = vld [vmem:[#allocation179_spill] sm:$0xff] }
0x1dcf   :  { %v5996_v44 = vmul.f32 %v8699_v53, %v5956_v51  ;;  %v5997_v19 = vmul.f32 %v8699_v53, %v5957_v61  ;;  %v5998_v38 = vmul.f32 %v8699_v53, %v5958_v40  ;;  %v6000_v41 = vmul.f32 %v8699_v53, %v5960_v16  ;;  %v11954_v40 = vld [vmem:[#allocation177_spill] sm:$0xff]  ;;  %v8782_v53 = vld [vmem:[#allocation32 + $0x68] sm:$0xff] }
0x1dd0   :  { %v6001_v14 = vmul.f32 %v5993_v31, %v10626_v35  ;;  %v6002_v33 = vmul.f32 %v5994_v5, %v10624_v47  ;;  %v6003_v27 = vmul.f32 %v5995_v30, %v10635_v25  ;;  %v11951_v35 = vld [vmem:[#allocation175_spill] sm:$0xff]  ;;  %v8784_v31 = vld [vmem:[#allocation32 + $0x78] sm:$0xff] }
0x1dd1   :  { %v6004_v54 = vmul.f32 %v5996_v44, %v10633_v32  ;;  %v6005_v57 = vmul.f32 %v5997_v19, %v10643_v39  ;;  %v6006_v51 = vmul.f32 %v5998_v38, %v11950_v56  ;;  %v11952_v32 = vld [vmem:[#allocation180_spill] sm:$0xff]  ;;  %v11953_v39 = vld [vmem:[#allocation178_spill] sm:$0xff]  ;;  %v6008_v16 = vmul.f32 %v6000_v41, %v11955_v23  ;;  %v11958_v30 = vld [vmem:[#allocation183_spill] sm:$0xff] }
0x1dd2   :  { %v11355_v49 = vadd.f32 %v6001_v14, %v10631_v6  ;;  %v11358_v45 = vadd.f32 %v6002_v33, %v10629_v37  ;;  %v11361_v3 = vadd.f32 %v6003_v27, %v10639_v17  ;;  %v6007_v25 = vmul.f32 %v5999_v13, %v11952_v32  ;;  %v8783_v13 = vld [vmem:[#allocation32 + $0x70] sm:$0xff] }
0x1dd3   :  { %v11365_v61 = vadd.f32 %v6004_v54, %v11951_v35  ;;  %v11373_v37 = vadd.f32 %v6005_v57, %v11953_v39  ;;  %v11376_v17 = vadd.f32 %v6006_v51, %v11954_v40  ;;  %v11385_v4 = vadd.f32 %v6008_v16, %v11957_v43  ;;  %v11959_v38 = vld [vmem:[#allocation184_spill] sm:$0xff]  ;;  %v11960_v54 = vld [vmem:[#allocation185_spill] sm:$0xff]  ;;  %v11961_v35 = vld [vmem:[#allocation186_spill] sm:$0xff] }
0x1dd4   :  { %v8501_v47 = vpack.c.bf16 %v11358_v45, %v11355_v49  ;;  %v11382_v10 = vadd.f32 %v6007_v25, %v11956_v29  ;;  %v11962_v39 = vld [vmem:[#allocation187_spill] sm:$0xff] }
0x1dd5   :  { %v8505_v6 = vpack.c.bf16 %v11365_v61, %v11361_v3  ;;  %v8509_v36 = vpack.c.bf16 %v11376_v17, %v11373_v37 }
0x1dd6   :  { %8502 = vmatprep.subr.bf16.mxu0 %v8501_v47  ;;  %v8513_v9 = vpack.c.bf16 %v11385_v4, %v11382_v10 }
0x1dd7   :  { %8504 = vmatpush3.bf16.msra.mxu0 %v8501_v47 }
0x1dd8   :  { %8506 = vmatprep.subr.bf16.mxu0 %v8505_v6 }
0x1ddb   :  { %8508 = vmatpush3.bf16.msra.mxu0 %v8505_v6 }
0x1ddc   :  { %8510 = vmatprep.subr.bf16.mxu0 %v8509_v36 }
0x1ddf   :  { %8512 = vmatpush3.bf16.msra.mxu0 %v8509_v36  ;;  %v11963_v36 = vld [vmem:[#allocation188_spill] sm:$0xff] }
0x1de0   :  { %8514 = vmatprep.subr.bf16.mxu0 %v8513_v9 }
0x1de3   :  { %8516 = vmatpush3.bf16.msra.mxu0 %v8513_v9 }
0x1de6   :  { %8038 = vmatmul.mubr.msk.f32.vlgmr.msra.gmra.mrb[74].mxu0 %vm597_vm0, %v8770_v1 }
0x1de7   :  { %8040 = vmatprep.mubr.msk.f32.mxu0 %vm597_vm0, %v8771_v34  ;;  %v11964_v34 = vld [vmem:[#allocation189_spill] sm:$0xff] }
0x1dea   :  { %8041 = vmatmul.mubr.msk.f32.gmra.mrb[76].mxu0 %vm597_vm0, %v8772_v11 }
0x1deb   :  { %8043 = vmatprep.mubr.msk.f32.mxu0 %vm597_vm0, %v8773_v15 }
0x1dee   :  { %8044 = vmatmul.mubr.msk.f32.gmra.mrb[78].mxu0 %vm597_vm0, %v8774_v26 }
0x1def   :  { %8046 = vmatprep.mubr.msk.f32.mxu0 %vm597_vm0, %v8775_v46  ;;  %v11965_v46 = vld [vmem:[#allocation190_spill] sm:$0xff] }
0x1df2   :  { %8047 = vmatmul.mubr.msk.f32.gmra.mrb[80].mxu0 %vm597_vm0, %v8776_v52 }
0x1df3   :  { %8049 = vmatprep.mubr.msk.f32.mxu0 %vm597_vm0, %v8777_v58 }
0x1df6   :  { %8050 = vmatmul.mubr.msk.f32.gmra.mrb[82].mxu0 %vm597_vm0, %v8778_v60 }
0x1df7   :  { %8052 = vmatprep.mubr.msk.f32.mxu0 %vm597_vm0, %v8779_v22 }
0x1dfa   :  { %8053 = vmatmul.mubr.msk.f32.gmra.mrb[84].mxu0 %vm597_vm0, %v8780_v55  ;;  %v11966_v55 = vld [vmem:[#allocation191_spill] sm:$0xff] }
0x1dfb   :  { %8055 = vmatprep.mubr.msk.f32.mxu0 %vm597_vm0, %v8781_v59 }
0x1dfe   :  { %8056 = vmatmul.mubr.msk.f32.gmra.mrb[86].mxu0 %vm597_vm0, %v8782_v53 }
0x1dff   :  { %8058 = vmatprep.mubr.msk.f32.mxu0 %vm597_vm0, %v8783_v13 }
0x1e02   :  { %8059 = vmatmul.mubr.msk.f32.gmra.mrb[88].mxu0 %vm597_vm0, %v8784_v31  ;;  %v11967_v31 = vld [vmem:[#allocation192_spill] sm:$0xff] }
0x1eb9   :  { %v8039_v5 = vpop.f32.mrb[74].mxu0 }
0x1eba   :  { %v6089_v44 = vadd.f32 %v8039_v5, %v11958_v30  ;;  %v6083_v19 = vpop.f32.mrb[75].mxu0 }
0x1ebb   :  { %v6084_v41 = vadd.f32 %v6083_v19, %v11959_v38  ;;  %v11968_v38 = vld [vmem:[#allocation193_spill] sm:$0xff] }
0x1ebc   :  { %v6163_v14 = vmax.f32 %v6089_v44, 0.0 }
0x1ebd   :  { %v6162_v33 = vmax.f32 %v6084_v41, 0.0  ;;  %v8042_v27 = vpop.f32.mrb[76].mxu0 }
0x1ebe   :  { %v6099_v57 = vadd.f32 %v8042_v27, %v11960_v54  ;;  %v6093_v56 = vpop.f32.mrb[77].mxu0  ;;  %v11969_v27 = vld [vmem:[#allocation194_spill] sm:$0xff] }
0x1ebf   :  { %v8517_v51 = vpack.c.bf16 %v6163_v14, %v6162_v33  ;;  %v6094_v47 = vadd.f32 %v6093_v56, %v11961_v35  ;;  %v11970_v35 = vld [vmem:[#allocation195_spill] sm:$0xff] }
0x1ec0   :  { %v6165_v32 = vmax.f32 %v6099_v57, 0.0 }
0x1ec1   :  { %v6164_v25 = vmax.f32 %v6094_v47, 0.0  ;;  %v8045_v6 = vpop.f32.mrb[78].mxu0  ;;  %8518 = vmatprep.subr.bf16.mxu1 %v8517_v51 }
0x1ec2   :  { %v6109_v40 = vadd.f32 %v8045_v6, %v11962_v39  ;;  %v6103_v23 = vpop.f32.mrb[79].mxu0  ;;  %8520 = vmatpush3.bf16.msra.mxu1 %v8517_v51  ;;  %v11971_v6 = vld [vmem:[#allocation196_spill] sm:$0xff] }
0x1ec3   :  { %v8521_v16 = vpack.c.bf16 %v6165_v32, %v6164_v25  ;;  %v6104_v29 = vadd.f32 %v6103_v23, %v11963_v36  ;;  %v11972_v36 = vld [vmem:[#allocation197_spill] sm:$0xff] }
0x1ec4   :  { %v6167_v43 = vmax.f32 %v6109_v40, 0.0 }
0x1ec5   :  { %v6166_v9 = vmax.f32 %v6104_v29, 0.0  ;;  %v8048_v1 = vpop.f32.mrb[80].mxu0  ;;  %8522 = vmatprep.subr.bf16.mxu1 %v8521_v16 }
0x1ec6   :  { %v6119_v11 = vadd.f32 %v8048_v1, %v11964_v34  ;;  %v6113_v15 = vpop.f32.mrb[81].mxu0  ;;  %8524 = vmatpush3.bf16.msra.mxu1 %v8521_v16  ;;  %v11973_v1 = vld [vmem:[#allocation198_spill] sm:$0xff] }
0x1ec7   :  { %v8525_v26 = vpack.c.bf16 %v6167_v43, %v6166_v9  ;;  %v6114_v52 = vadd.f32 %v6113_v15, %v11965_v46  ;;  %v8785_v46 = vld [vmem:[#allocation35 + $0x8] sm:$0xff] }
0x1ec8   :  { %v6169_v58 = vmax.f32 %v6119_v11, 0.0 }
0x1ec9   :  { %v6168_v60 = vmax.f32 %v6114_v52, 0.0  ;;  %v8051_v22 = vpop.f32.mrb[82].mxu0  ;;  %8526 = vmatprep.subr.bf16.mxu1 %v8525_v26  ;;  %v8786_v52 = vld [vmem:[#allocation35 + $0x10] sm:$0xff] }
0x1eca   :  { %v6129_v59 = vadd.f32 %v8051_v22, %v11966_v55  ;;  %v6123_v53 = vpop.f32.mrb[83].mxu0  ;;  %8528 = vmatpush3.bf16.msra.mxu1 %v8525_v26  ;;  %v8789_v22 = vld [vmem:[#allocation35 + $0x28] sm:$0xff]  ;;  %v8790_v55 = vld [vmem:[#allocation35 + $0x30] sm:$0xff] }
0x1ecb   :  { %v8529_v13 = vpack.c.bf16 %v6169_v58, %v6168_v60  ;;  %v6124_v5 = vadd.f32 %v6123_v53, %v11967_v31  ;;  %v8787_v58 = vld [vmem:[#allocation35 + $0x18] sm:$0xff]  ;;  %v8788_v60 = vld [vmem:[#allocation35 + $0x20] sm:$0xff] }
0x1ecc   :  { %v6171_v30 = vmax.f32 %v6129_v59, 0.0  ;;  %v8791_v59 = vld [vmem:[#allocation35 + $0x38] sm:$0xff]  ;;  %v6377_v53 = vld [vmem:[#allocation38] sm:$0xff] }
0x1ecd   :  { %v6170_v44 = vmax.f32 %v6124_v5, 0.0  ;;  %v8054_v19 = vpop.f32.mrb[84].mxu0  ;;  %8530 = vmatprep.subr.bf16.mxu1 %v8529_v13  ;;  %8121 = vmatprep.mubr.msk.f32.mxu0 %vm597_vm0, %v6377_v53 }
0x1ece   :  { %v6139_v41 = vadd.f32 %v8054_v19, %v11968_v38  ;;  %v6133_v14 = vpop.f32.mrb[85].mxu0  ;;  %8532 = vmatpush3.bf16.msra.mxu1 %v8529_v13 }
0x1ecf   :  { %v8533_v33 = vpack.c.bf16 %v6171_v30, %v6170_v44  ;;  %v6134_v54 = vadd.f32 %v6133_v14, %v11969_v27  ;;  %v11974_v30 = vld [vmem:[#allocation85_spill] sm:$0xff] }
0x1ed0   :  { %v6173_v57 = vmax.f32 %v6139_v41, 0.0 }
0x1ed1   :  { %v6172_v56 = vmax.f32 %v6134_v54, 0.0  ;;  %v8057_v51 = vpop.f32.mrb[86].mxu0  ;;  %8534 = vmatprep.subr.bf16.mxu1 %v8533_v33 }
0x1ed2   :  { %v6149_v47 = vadd.f32 %v8057_v51, %v11970_v35  ;;  %v6143_v32 = vpop.f32.mrb[87].mxu0  ;;  %8536 = vmatpush3.bf16.msra.mxu1 %v8533_v33  ;;  %v11975_v33 = vld [vmem:[#allocation77_spill] sm:$0xff] }
0x1ed3   :  { %v8537_v25 = vpack.c.bf16 %v6173_v57, %v6172_v56  ;;  %v6144_v39 = vadd.f32 %v6143_v32, %v11971_v6  ;;  %v11976_v56 = vld [vmem:[#allocation76_spill] sm:$0xff] }
0x1ed4   :  { %v6175_v40 = vmax.f32 %v6149_v47, 0.0 }
0x1ed5   :  { %v6174_v23 = vmax.f32 %v6144_v39, 0.0  ;;  %v8060_v16 = vpop.f32.mrb[88].mxu0  ;;  %8538 = vmatprep.subr.bf16.mxu1 %v8537_v25  ;;  %v11978_v39 = vld [vmem:[#allocation87_spill] sm:$0xff] }
0x1ed6   :  { %v6159_v29 = vadd.f32 %v8060_v16, %v11972_v36  ;;  %v6153_v43 = vpop.f32.mrb[89].mxu0  ;;  %8540 = vmatpush3.bf16.msra.mxu1 %v8537_v25  ;;  %v11977_v25 = vld [vmem:[#allocation94_spill] sm:$0xff] }
0x1ed7   :  { %v8541_v9 = vpack.c.bf16 %v6175_v40, %v6174_v23  ;;  %v6154_v34 = vadd.f32 %v6153_v43, %v11973_v1 }
0x1ed8   :  { %v6177_v11 = vmax.f32 %v6159_v29, 0.0 }
0x1ed9   :  { %v6176_v15 = vmax.f32 %v6154_v34, 0.0  ;;  %8542 = vmatprep.subr.bf16.mxu1 %v8541_v9 }
0x1eda   :  { %8544 = vmatpush3.bf16.msra.mxu1 %v8541_v9 }
0x1edb   :  { %v8545_v26 = vpack.c.bf16 %v6177_v11, %v6176_v15  ;;  %v11980_v11 = vld [vmem:[#allocation199_spill] sm:$0xff] }
0x1edd   :  { %8546 = vmatprep.subr.bf16.mxu1 %v8545_v26 }
0x1ede   :  { %8548 = vmatpush3.bf16.msra.mxu1 %v8545_v26 }
0x1ee1   :  { %8094 = vmatmul.mubr.f32.vlgmr.msra.gmra.mrb[106].mxu1 %v8785_v46 }
0x1ee2   :  { %8096 = vmatprep.mubr.f32.mxu1 %v8786_v52 }
0x1ee5   :  { %8097 = vmatmul.mubr.f32.gmra.mrb[108].mxu1 %v8787_v58 }
0x1ee6   :  { %8099 = vmatprep.mubr.f32.mxu1 %v8788_v60 }
0x1ee9   :  { %8100 = vmatmul.mubr.f32.gmra.mrb[110].mxu1 %v8789_v22 }
0x1eea   :  { %8102 = vmatprep.mubr.f32.mxu1 %v8790_v55 }
0x1eed   :  { %8103 = vmatmul.mubr.f32.gmra.mrb[112].mxu1 %v8791_v59 }
0x1fb4   :  { %v8095_v13 = vpop.f32.mrb[106].mxu1 }
0x1fb5   :  { %v6250_v31 = vadd.f32 %v8095_v13, %v10836_v63  ;;  %v6244_v5 = vpop.f32.mrb[107].mxu1 }
0x1fb6   :  { %v6245_v44 = vadd.f32 %v6244_v5, %v11974_v30 }
0x1fb7   :  { %v6284_v19 = vadd.f32 %v6250_v31, %v11358_v45 }
0x1fb8   :  { %v6283_v38 = vadd.f32 %v6245_v44, %v11355_v49  ;;  %v8098_v41 = vpop.f32.mrb[108].mxu1 }
0x1fb9   :  { %v6292_v14 = vsel %vm801_vm3, %v6284_v19, 0.0  ;;  %v6260_v27 = vadd.f32 %v8098_v41, %v11975_v33  ;;  %v6254_v54 = vpop.f32.mrb[109].mxu1 }
0x1fba   :  { %v6291_v57 = vsel %vm801_vm3, %v6283_v38, 0.0  ;;  %v6255_v51 = vadd.f32 %v6254_v54, %v11976_v56 }
0x1fbb   :  { %v6293_v35 = vadd.f32 %v6292_v14, %v6291_v57  ;;  %v6286_v63 = vadd.f32 %v6260_v27, %v11365_v61  ;;  %v11979_v61 = vld [vmem:[#allocation91_spill] sm:$0xff] }
0x1fbc   :  { %v6285_v47 = vadd.f32 %v6255_v51, %v11361_v3  ;;  %v8101_v32 = vpop.f32.mrb[110].mxu1 }
0x1fbd   :  { %v6270_v45 = vadd.f32 %v8101_v32, %v11977_v25  ;;  %v6264_v6 = vpop.f32.mrb[111].mxu1  ;;  %v6296_v16 = vsel %vm801_vm3, %v6286_v63, 0.0 }
0x1fbe   :  { %v6294_v49 = vsel %vm801_vm3, %v6285_v47, 0.0  ;;  %v6265_v40 = vadd.f32 %v6264_v6, %v11978_v39 }
0x1fbf   :  { %v6295_v23 = vadd.f32 %v6294_v49, %v6293_v35  ;;  %v6288_v36 = vadd.f32 %v6270_v45, %v11376_v17 }
0x1fc0   :  { %v6287_v29 = vadd.f32 %v6265_v40, %v11373_v37  ;;  %v8104_v43 = vpop.f32.mrb[112].mxu1 }
0x1fc1   :  { %v6297_v9 = vadd.f32 %v6296_v16, %v6295_v23  ;;  %v6280_v1 = vadd.f32 %v8104_v43, %v11979_v61  ;;  %v6274_v3 = vpop.f32.mrb[113].mxu1  ;;  %v6300_v46 = vsel %vm801_vm3, %v6288_v36, 0.0 }
0x1fc2   :  { %v6298_v34 = vsel %vm801_vm3, %v6287_v29, 0.0  ;;  %v6275_v15 = vadd.f32 %v6274_v3, %v11980_v11 }
0x1fc3   :  { %v6299_v26 = vadd.f32 %v6298_v34, %v6297_v9  ;;  %v6290_v52 = vadd.f32 %v6280_v1, %v11385_v4 }
0x1fc4   :  { %v6289_v58 = vadd.f32 %v6275_v15, %v11382_v10 }
0x1fc5   :  { %v6301_v60 = vadd.f32 %v6300_v46, %v6299_v26  ;;  %v6304_v22 = vsel %vm801_vm3, %v6290_v52, 0.0 }
0x1fc6   :  { %v6302_v17 = vsel %vm801_vm3, %v6289_v58, 0.0 }
0x1fc7   :  { %v6303_v37 = vadd.f32 %v6302_v17, %v6301_v60 }
0x1fc9   :  { %v6305_v55 = vadd.f32 %v6304_v22, %v6303_v37 }
0x1fcb   :  { %v6306_v59 = vrot.slane %v6305_v55, 4 }
0x1fcd   :  { %v6307_v53 = vadd.f32 %v6306_v59, %v6305_v55 }
0x1fcf   :  { %v6308_v13 = vrot.slane %v6307_v53, 2 }
0x1fd1   :  { %v6309_v31 = vadd.f32 %v6308_v13, %v6307_v53 }
0x1fd3   :  { %v6310_v5 = vrot.slane %v6309_v31, 1 }
0x1fd5   :  { %v6311_v30 = vadd.f32 %v6310_v5, %v6309_v31 }
0x1fd7   :  { %v6312_v44 = vmul.f32 0.015625, %v6311_v30 }
0x1fd9   :  { %v6313_v41 = vsub.f32 %v6283_v38, %v6312_v44  ;;  %v6314_v14 = vsub.f32 %v6284_v19, %v6312_v44  ;;  %v6315_v33 = vsub.f32 %v6285_v47, %v6312_v44  ;;  %v6316_v4 = vsub.f32 %v6286_v63, %v6312_v44 }
0x1fda   :  { %v6317_v27 = vsub.f32 %v6287_v29, %v6312_v44  ;;  %v6318_v10 = vsub.f32 %v6288_v36, %v6312_v44  ;;  %v6319_v54 = vsub.f32 %v6289_v58, %v6312_v44  ;;  %v6320_v57 = vsub.f32 %v6290_v52, %v6312_v44 }
0x1fdb   :  { %v6321_v56 = vmul.f32 %v6313_v41, %v6313_v41  ;;  %v6322_v51 = vmul.f32 %v6314_v14, %v6314_v14  ;;  %v6323_v35 = vmul.f32 %v6315_v33, %v6315_v33  ;;  %v6324_v32 = vmul.f32 %v6316_v4, %v6316_v4 }
0x1fdc   :  { %v6325_v49 = vmul.f32 %v6317_v27, %v6317_v27  ;;  %v6326_v19 = vmul.f32 %v6318_v10, %v6318_v10  ;;  %v6327_v40 = vmul.f32 %v6319_v54, %v6319_v54  ;;  %v6328_v36 = vmul.f32 %v6320_v57, %v6320_v57 }
0x1fdd   :  { %v6329_v25 = vsel %vm801_vm3, %v6321_v56, 0.0  ;;  %v6330_v45 = vsel %vm801_vm3, %v6322_v51, 0.0  ;;  %v6332_v39 = vsel %vm801_vm3, %v6323_v35, 0.0  ;;  %v6334_v63 = vsel %vm801_vm3, %v6324_v32, 0.0 }
0x1fde   :  { %v6331_v6 = vadd.f32 %v6330_v45, %v6329_v25  ;;  %v6336_v23 = vsel %vm801_vm3, %v6325_v49, 0.0  ;;  %v6338_v29 = vsel %vm801_vm3, %v6326_v19, 0.0  ;;  %v6340_v9 = vsel %vm801_vm3, %v6327_v40, 0.0  ;;  %v6384_v25 = vld [vmem:[#allocation38 + $0x38] sm:$0xff]  ;;  %v6385_v45 = vld [vmem:[#allocation38 + $0x40] sm:$0xff]  ;;  %v6387_v49 = vld [vmem:[#allocation38 + $0x50] sm:$0xff] }
0x1fdf   :  { %v6342_v1 = vsel %vm801_vm3, %v6328_v36, 0.0  ;;  %v6390_v19 = vld [vmem:[#allocation38 + $0x68] sm:$0xff] }
0x1fe0   :  { %v6333_v38 = vadd.f32 %v6332_v39, %v6331_v6  ;;  %v6386_v6 = vld [vmem:[#allocation38 + $0x48] sm:$0xff]  ;;  %v6388_v39 = vld [vmem:[#allocation38 + $0x58] sm:$0xff] }
0x1fe2   :  { %v6335_v47 = vadd.f32 %v6334_v63, %v6333_v38  ;;  %v6389_v38 = vld [vmem:[#allocation38 + $0x60] sm:$0xff]  ;;  %v6391_v63 = vld [vmem:[#allocation38 + $0x70] sm:$0xff] }
0x1fe4   :  { %v6337_v16 = vadd.f32 %v6336_v23, %v6335_v47  ;;  %v6392_v47 = vld [vmem:[#allocation38 + $0x78] sm:$0xff]  ;;  %v6412_v23 = vpop.permute.xlu1 %6411 }
0x1fe6   :  { %v6339_v43 = vadd.f32 %v6338_v29, %v6337_v16 }
0x1fe8   :  { %v6341_v61 = vadd.f32 %v6340_v9, %v6339_v43  ;;  %v6417_v43 = vpop.permute.xlu0 %6416 }
0x1fea   :  { %v6343_v3 = vadd.f32 %v6342_v1, %v6341_v61  ;;  %v6422_v1 = vpop.permute.xlu1 %6421 }
0x1fec   :  { %v6344_v34 = vrot.slane %v6343_v3, 4 }
0x1fee   :  { %v6345_v11 = vadd.f32 %v6344_v34, %v6343_v3 }
0x1ff0   :  { %v6346_v15 = vrot.slane %v6345_v11, 2 }
0x1ff2   :  { %v6347_v26 = vadd.f32 %v6346_v15, %v6345_v11 }
0x1ff4   :  { %v6348_v46 = vrot.slane %v6347_v26, 1 }
0x1ff6   :  { %v6349_v52 = vadd.f32 %v6348_v46, %v6347_v26  ;;  %v6427_v26 = vpop.permute.xlu1 %6426 }
0x1ff8   :  { %v6350_v58 = vmul.f32 0.015625, %v6349_v52 }
0x1ffa   :  { %v6351_v60 = vadd.f32 1e-05, %v6350_v58 }
0x1ffc   :  { %8700 = vrsqrt.f32 %v6351_v60  ;;  %v6432_v60 = vpop.permute.xlu0 %6431 }
0x2006   :  { %v8701_v17 = vpop.eup %8700 }
0x2007   :  { %v6359_v37 = vmul.f32 %v8701_v17, %v6319_v54  ;;  %v6353_v22 = vmul.f32 %v8701_v17, %v6313_v41  ;;  %v6354_v55 = vmul.f32 %v8701_v17, %v6314_v14  ;;  %v6355_v59 = vmul.f32 %v8701_v17, %v6315_v33 }
0x2008   :  { %v6356_v53 = vmul.f32 %v8701_v17, %v6316_v4  ;;  %v6357_v13 = vmul.f32 %v8701_v17, %v6317_v27  ;;  %v6358_v31 = vmul.f32 %v8701_v17, %v6318_v10  ;;  %v6360_v5 = vmul.f32 %v8701_v17, %v6320_v57  ;;  %v11981_v27 = vld [vmem:[#allocation95_spill] sm:$0xff]  ;;  %v11982_v10 = vld [vmem:[#allocation78_spill] sm:$0xff] }
0x2009   :  { %v6361_v30 = vmul.f32 %v6353_v22, %v10947_v2  ;;  %v6362_v44 = vmul.f32 %v6354_v55, %v10945_v50  ;;  %v6363_v56 = vmul.f32 %v6355_v59, %v10955_v21  ;;  %v6367_v51 = vmul.f32 %v6359_v37, %v11037_v20  ;;  %v6437_v55 = vpop.permute.xlu1 %6436 }
0x200a   :  { %v6364_v35 = vmul.f32 %v6356_v53, %v10953_v12  ;;  %v6365_v32 = vmul.f32 %v6357_v13, %v10993_v7  ;;  %v6366_v41 = vmul.f32 %v6358_v31, %v10991_v8  ;;  %v6368_v14 = vmul.f32 %v6360_v5, %v11035_v42  ;;  %v6442_v31 = vpop.permute.xlu0 %6441 }
0x200b   :  { %v6369_v33 = vadd.f32 %v6361_v30, %v10951_v24  ;;  %v6370_v4 = vadd.f32 %v6362_v44, %v10949_v28  ;;  %v6371_v2 = vadd.f32 %v6363_v56, %v10962_v62  ;;  %v6375_v50 = vadd.f32 %v6367_v51, %v11055_v0  ;;  %v6378_v28 = vld [vmem:[#allocation38 + $0x8] sm:$0xff]  ;;  %v6379_v24 = vld [vmem:[#allocation38 + $0x10] sm:$0xff]  ;;  %v6381_v62 = vld [vmem:[#allocation38 + $0x20] sm:$0xff] }
0x200c   :  { %v6372_v21 = vadd.f32 %v6364_v35, %v10960_v18  ;;  %v6373_v20 = vadd.f32 %v6365_v32, %v11011_v48  ;;  %v6374_v12 = vadd.f32 %v6366_v41, %v11981_v27  ;;  %v6376_v7 = vadd.f32 %v6368_v14, %v11982_v10  ;;  %v6380_v18 = vld [vmem:[#allocation38 + $0x18] sm:$0xff]  ;;  %v6382_v48 = vld [vmem:[#allocation38 + $0x28] sm:$0xff]  ;;  %v6383_v0 = vld [vmem:[#allocation38 + $0x30] sm:$0xff] }
0x200d   :  { %v8549_v54 = vpack.c.bf16 %v6370_v4, %v6369_v33  ;;  %v6447_v56 = vpop.permute.xlu1 %6446 }
0x200e   :  { %v8553_v8 = vpack.c.bf16 %v6372_v21, %v6371_v2  ;;  %v8557_v57 = vpack.c.bf16 %v6374_v12, %v6373_v20  ;;  %v8561_v42 = vpack.c.bf16 %v6376_v7, %v6375_v50  ;;  %v6452_v32 = vpop.permute.xlu0 %6451 }
0x200f   :  { %8550 = vmatprep.subr.bf16.mxu0 %v8549_v54 }
0x2010   :  { %8552 = vmatpush3.bf16.msra.mxu0 %v8549_v54 }
0x2011   :  { %8554 = vmatprep.subr.bf16.mxu0 %v8553_v8  ;;  %v6457_v14 = vpop.permute.xlu1 %6456 }
0x2012   :  { %v6462_v4 = vpop.permute.xlu0 %6461 }
0x2014   :  { %8556 = vmatpush3.bf16.msra.mxu0 %v8553_v8 }
0x2015   :  { %8558 = vmatprep.subr.bf16.mxu0 %v8557_v57  ;;  %v6467_v50 = vpop.permute.xlu1 %6466 }
0x2016   :  { %v6472_v20 = vpop.permute.xlu0 %6471 }
0x2018   :  { %8560 = vmatpush3.bf16.msra.mxu0 %v8557_v57 }
0x2019   :  { %8562 = vmatprep.subr.bf16.mxu0 %v8561_v42  ;;  %v6477_v12 = vpop.permute.xlu1 %6476 }
0x201a   :  { %v6482_v7 = vpop.permute.xlu0 %6481 }
0x201c   :  { %8564 = vmatpush3.bf16.msra.mxu0 %v8561_v42 }
0x201d   :  { %v6487_v8 = vpop.permute.xlu1 %6486 }
0x201f   :  { %8122 = vmatmul.mubr.msk.f32.vlgmr.msra.gmra.mrb[90].mxu0 %vm597_vm0, %v6378_v28 }
0x2020   :  { %8124 = vmatprep.mubr.msk.f32.mxu0 %vm597_vm0, %v6379_v24 }
0x2023   :  { %8125 = vmatmul.mubr.msk.f32.gmra.mrb[92].mxu0 %vm597_vm0, %v6380_v18 }
0x2024   :  { %8127 = vmatprep.mubr.msk.f32.mxu0 %vm597_vm0, %v6381_v62 }
0x2027   :  { %8128 = vmatmul.mubr.msk.f32.gmra.mrb[94].mxu0 %vm597_vm0, %v6382_v48 }
0x2028   :  { %8130 = vmatprep.mubr.msk.f32.mxu0 %vm597_vm0, %v6383_v0 }
0x202b   :  { %8131 = vmatmul.mubr.msk.f32.gmra.mrb[96].mxu0 %vm597_vm0, %v6384_v25 }
0x202c   :  { %8133 = vmatprep.mubr.msk.f32.mxu0 %vm597_vm0, %v6385_v45 }
0x202f   :  { %8134 = vmatmul.mubr.msk.f32.gmra.mrb[98].mxu0 %vm597_vm0, %v6386_v6 }
0x2030   :  { %8136 = vmatprep.mubr.msk.f32.mxu0 %vm597_vm0, %v6387_v49 }
0x2033   :  { %8137 = vmatmul.mubr.msk.f32.gmra.mrb[100].mxu0 %vm597_vm0, %v6388_v39 }
0x2034   :  { %8139 = vmatprep.mubr.msk.f32.mxu0 %vm597_vm0, %v6389_v38 }
0x2037   :  { %8140 = vmatmul.mubr.msk.f32.gmra.mrb[102].mxu0 %vm597_vm0, %v6390_v19 }
0x2038   :  { %8142 = vmatprep.mubr.msk.f32.mxu0 %vm597_vm0, %v6391_v63 }
0x203b   :  { %8143 = vmatmul.mubr.msk.f32.gmra.mrb[104].mxu0 %vm597_vm0, %v6392_v47 }
0x20f2   :  { %v8123_v40 = vpop.f32.mrb[90].mxu0 }
0x20f3   :  { %v6603_v16 = vpop.f32.mrb[91].mxu0  ;;  %v6609_v61 = vadd.f32 %v8123_v40, %v6417_v43 }
0x20f4   :  { %v6604_v36 = vadd.f32 %v6603_v16, %v6412_v23 }
0x20f6   :  { %v8126_v29 = vpop.f32.mrb[92].mxu0  ;;  %6682 = vxpose.xlu0.b32.start [1/16] (narrow) %v6604_v36, 16 }
0x20f7   :  { %v6613_v9 = vpop.f32.mrb[93].mxu0  ;;  %v6619_v52 = vadd.f32 %v8126_v29, %v6427_v26 }
0x20f8   :  { %v6614_v11 = vadd.f32 %v6613_v9, %v6422_v1 }
0x20fa   :  { %v8129_v3 = vpop.f32.mrb[94].mxu0  ;;  %6683 = vxpose.xlu0.b32.cont [2/16] (narrow) %v6609_v61, 16 }
0x20fb   :  { %v6623_v34 = vpop.f32.mrb[95].mxu0  ;;  %v6629_v53 = vadd.f32 %v8129_v3, %v6437_v55 }
0x20fc   :  { %v6624_v37 = vadd.f32 %v6623_v34, %v6432_v60 }
0x20fe   :  { %v8132_v15 = vpop.f32.mrb[96].mxu0  ;;  %6684 = vxpose.xlu0.b32.cont [3/16] (narrow) %v6614_v11, 16 }
0x20ff   :  { %v6633_v46 = vpop.f32.mrb[97].mxu0  ;;  %v6639_v35 = vadd.f32 %v8132_v15, %v6447_v56 }
0x2100   :  { %v6634_v30 = vadd.f32 %v6633_v46, %v6442_v31 }
0x2102   :  { %v8135_v58 = vpop.f32.mrb[98].mxu0  ;;  %6685 = vxpose.xlu0.b32.cont [4/16] (narrow) %v6619_v52, 16 }
0x2103   :  { %v6643_v17 = vpop.f32.mrb[99].mxu0  ;;  %v6649_v33 = vadd.f32 %v8135_v58, %v6457_v14 }
0x2104   :  { %v6644_v41 = vadd.f32 %v6643_v17, %v6452_v32 }
0x2106   :  { %v8138_v22 = vpop.f32.mrb[100].mxu0  ;;  %6686 = vxpose.xlu0.b32.cont [5/16] (narrow) %v6624_v37, 16 }
0x2107   :  { %v6653_v59 = vpop.f32.mrb[101].mxu0  ;;  %v6659_v21 = vadd.f32 %v8138_v22, %v6467_v50 }
0x2108   :  { %v6654_v2 = vadd.f32 %v6653_v59, %v6462_v4 }
0x210a   :  { %v8141_v13 = vpop.f32.mrb[102].mxu0  ;;  %6687 = vxpose.xlu0.b32.cont [6/16] (narrow) %v6629_v53, 16 }
0x210b   :  { %v6663_v5 = vpop.f32.mrb[103].mxu0  ;;  %v6669_v10 = vadd.f32 %v8141_v13, %v6477_v12 }
0x210c   :  { %v6664_v27 = vadd.f32 %v6663_v5, %v6472_v20 }
0x210e   :  { %v8144_v44 = vpop.f32.mrb[104].mxu0  ;;  %6688 = vxpose.xlu0.b32.cont [7/16] (narrow) %v6634_v30, 16 }
0x210f   :  { %v6673_v51 = vpop.f32.mrb[105].mxu0  ;;  %v6679_v57 = vadd.f32 %v8144_v44, %v6487_v8 }
0x2110   :  { %v6674_v54 = vadd.f32 %v6673_v51, %v6482_v7 }
0x2112   :  { %6689 = vxpose.xlu0.b32.cont [8/16] (narrow) %v6639_v35, 16 }
0x2116   :  { %6690 = vxpose.xlu0.b32.cont [9/16] (narrow) %v6644_v41, 16 }
0x211a   :  { %6691 = vxpose.xlu0.b32.cont [10/16] (narrow) %v6649_v33, 16 }
0x211e   :  { %6692 = vxpose.xlu0.b32.cont [11/16] (narrow) %v6654_v2, 16 }
0x2122   :  { %6693 = vxpose.xlu0.b32.cont [12/16] (narrow) %v6659_v21, 16 }
0x2126   :  { %6694 = vxpose.xlu0.b32.cont [13/16] (narrow) %v6664_v27, 16 }
0x212a   :  { %6695 = vxpose.xlu0.b32.cont [14/16] (narrow) %v6669_v10, 16 }
0x212e   :  { %6696 = vxpose.xlu0.b32.cont [15/16] (narrow) %v6674_v54, 16 }
0x2132   :  { %6697 = vxpose.xlu0.b32.end [16/16] (narrow) %v6679_v57, 16 }
0x2176   :  { %v6698_v42 = vpop.trf.xlu0 }
0x2177   :  { %6714 = vst [vmem:[#allocation40] sm:$0xff] %v6698_v42 }
0x217a   :  { %v6699_v28 = vpop.trf.xlu0 }
0x217b   :  { %6715 = vst [vmem:[#allocation40 + $0x8] sm:$0xff] %v6699_v28 }
0x217c   :  { %9331 = shalt.err (!%p9328_p0)
}
0x217d   :  { %s9332_s8 = scalar_lea.hbm %s9634_s30, 256 }
0x217e   :  { %p9333_p1 = scmp.ne.s32.totalorder %s9634_s30, %s9332_s8  ;;  %p9336_p2 = scmp.lt.u32.totalorder %s9332_s8, %s9634_s30 }
0x2180   :  { %p9338_p3 = pnand %p9336_p2, %p9333_p1 }
0x2182   :  { %9341 = shalt.err (!%p9338_p3)
}
0x2183   :  { %6727 = dma.vmem_to_hbm [thread:$0]  %s6722_s14, 256, %s9634_s30, [#allocation4], %s9411_s7, %s9411_s7, %s9412_s13  }
0x2184   :  { %9368 = dma.done.wait [#allocation4], 256  }
0x2185   :  { %9369 = vsyncadd [#allocation4], 4294967040 }
0x2186   :  { %6731 = vsyncpa [#allocation3], 1 }
0x2187   :  { %6732 = vsyncpa [#allocation6], 1 }
0x2188   :  { %6733 = vsyncpa [#allocation9], 1 }
0x2189   :  { %6734 = vsyncpa [#allocation12], 1 }
0x218a   :  { %6735 = vsyncpa [#allocation15], 1 }
0x218b   :  { %6736 = vsyncpa [#allocation18], 1 }
0x218c   :  { %6737 = vsyncpa [#allocation21], 1 }
0x218d   :  { %6738 = vsyncpa [#allocation24], 1 }
0x218e   :  { %6739 = vsyncpa [#allocation27], 1 }
0x218f   :  { %6740 = vsyncpa [#allocation30], 1 }
0x2190   :  { %6741 = vsyncpa [#allocation33], 1 }
0x2191   :  { %6742 = vsyncpa [#allocation36], 1 }
0x2192   :  { %6743 = vsyncpa [#allocation39], 1 }
0x2193   :  { %6744 = vsyncpa [#allocation4], 1 }

</bundles_post_ra>
